<compile_context>
chip_gen: v7x
topology: tpu7x:2x2x1
jax: 0.10.0
libtpu: 0.0.40
codegen_flags: <defaults>
</compile_context>

<pallas_src>
import math

import jax
import jax.numpy as jnp
from jax import lax
from jax.experimental import pallas as pl
from jax.experimental.pallas import tpu as pltpu

NEG_INF = -1e9


# ---------------------------------------------------------------------------
# Fused Pallas kernel
# ---------------------------------------------------------------------------
def _make_fused_kernel(B, S, D, H, L, C):
    """Builds the fused forward kernel (attention + 3x stacked LSTM + head)."""

    def kernel(*refs):
        (src_ref, wq_ref, wk_ref, wv_ref, aw_ref, bn1s_ref, bn1b_ref) = refs[:7]
        lstm_refs = refs[7:7 + 3 * L]
        (cw_ref, bn2s_ref, bn2b_ref, w1_ref, b1_ref, w2_ref, b2_ref,
         scale_ref, out_ref, seq_ref, flat_ref) = refs[7 + 3 * L:]

        f32 = jnp.float32
        x = src_ref[...]                                     # (B, S, D)

        # ---- causal mask + masked softmax (batched over B) -------------------
        row = lax.broadcasted_iota(jnp.int32, (S, S), 0)
        col = lax.broadcasted_iota(jnp.int32, (S, S), 1)
        causal = (row >= col)[None]                          # (1, S, S)

        def masked_softmax(s):                               # s: (B, S, S)
            s = jnp.where(causal, s, NEG_INF)
            m = jnp.max(s, axis=-1, keepdims=True)
            e = jnp.exp(s - m)
            # approx reciprocal goes to the (otherwise idle) EUP slot.
            return e * pl.reciprocal(jnp.sum(e, axis=-1, keepdims=True), approx=True)

        # ---- attention 1: softmax(x x^T) x -----------------------------------
        s1 = jnp.einsum('bid,bjd->bij', x, x, preferred_element_type=f32)
        a1 = jnp.einsum('bij,bjd->bid', masked_softmax(s1), x, preferred_element_type=f32)

        # ---- attention 2: scaled dot-product attention with Q/K/V projections -
        xf = x.reshape(B * S, D)                             # collapse (B,S) -> rows
        q = jnp.dot(xf, wq_ref[...], preferred_element_type=f32).reshape(B, S, D)
        k = jnp.dot(xf, wk_ref[...], preferred_element_type=f32).reshape(B, S, D)
        v = jnp.dot(xf, wv_ref[...], preferred_element_type=f32).reshape(B, S, D)
        scale = scale_ref[0] * (1.0 / math.sqrt(D))          # learned scalar from SMEM
        s2 = jnp.einsum('bid,bjd->bij', q, k, preferred_element_type=f32) * scale
        a2 = jnp.einsum('bij,bjd->bid', masked_softmax(s2), v, preferred_element_type=f32)

        # ---- attention 3: additive attention ----------------------------------
        # TODO(synk): at much larger S the (B,S,S,D) broadcast should be tiled over the
        # key axis to stay within VMEM (it is only ~8 KiB at these shapes).
        s3 = jnp.sum(jnp.tanh(x[:, :, None, :] + x[:, None, :, :]), axis=-1)
        a3 = jnp.einsum('bij,bjd->bid', masked_softmax(s3), x, preferred_element_type=f32)

        aw = aw_ref[...]                                     # (3, S, D), pre-normalized
        attn = a1 * aw[0] + a2 * aw[1] + a3 * aw[2]          # (B, S, D)

        # ---- the three BatchNorm'd LSTM input lines (eval-mode affine) --------
        bn1s = bn1s_ref[...]                                 # (3, 1, D)
        bn1b = bn1b_ref[...]
        lines = jnp.stack([x * bn1s[0] + bn1b[0],
                           (x + attn) * bn1s[1] + bn1b[1],
                           attn * bn1s[2] + bn1b[2]], axis=0)        # (3, B, S, D)

        # ---- L stacked LSTM layers, the 3 parallel LSTMs interleaved ----------
        # Input projection (+ bias) for all timesteps is hoisted out of the time loop;
        # only one batched (3,B,H)x(3,H,4H) matmul + gate elementwise stays per step.
        cur_flat = lines.reshape(3, B * S, D)                # (3, B*S, Din)
        for layer in range(L):
            wih = lstm_refs[3 * layer][...]                  # (3, Din, 4H)
            whh = lstm_refs[3 * layer + 1][...]              # (3, H, 4H)
            bias = lstm_refs[3 * layer + 2][...]             # (3, 1, 4H)
            gx = jnp.einsum('lnd,ldg->lng', cur_flat, wih, preferred_element_type=f32)
            gx = gx.reshape(3, B, S, 4 * H) + bias[:, :, None, :]    # (3, B, S, 4H)

            h = jnp.zeros((3, B, H), f32)
            c = jnp.zeros((3, B, H), f32)
            for t in range(S):                               # static -> fully unrolled
                gates = gx[:, :, t, :] + jnp.einsum(
                    'lbh,lhg->lbg', h, whh, preferred_element_type=f32)   # (3, B, 4H)
                # NOTE: gate slices are 32-lane sub-vreg selects; acceptable at H=32.
                # Use a gate-major weight layout if H is scaled up.
                i_g = jax.nn.sigmoid(gates[..., 0:H])
                f_g = jax.nn.sigmoid(gates[..., H:2 * H])
                g_g = jnp.tanh(gates[..., 2 * H:3 * H])
                o_g = jax.nn.sigmoid(gates[..., 3 * H:4 * H])
                c = f_g * c + i_g * g_g
                h = o_g * jnp.tanh(c)
                seq_ref[:, :, t:t + 1, :] = h[:, :, None, :]
            if layer + 1 < L:
                cur_flat = seq_ref[...].reshape(3, B * S, H)

        # ---- head: weighted merge + eval BatchNorm + fc1 + relu + fc2 ---------
        seq = seq_ref[...]                                   # (3, B, S, H)
        cw = cw_ref[...]                                     # (3, S, H), pre-normalized
        cat = seq[0] * cw[0] + seq[1] * cw[1] + seq[2] * cw[2]       # (B, S, H)
        cat = cat * bn2s_ref[...] + bn2b_ref[...]
        # Flatten (B,S,H) -> (B, S*H) through a VMEM scratch so fc1 is one K=S*H matmul.
        for s in range(S):
            flat_ref[:, s * H:(s + 1) * H] = cat[:, s, :]
        hidden = jnp.maximum(
            jnp.dot(flat_ref[...], w1_ref[...], preferred_element_type=f32) + b1_ref[...],
            0.0)                                             # relu(dropout(fc1)) in eval
        out_ref[...] = (jnp.dot(hidden, w2_ref[...], preferred_element_type=f32)
                        + b2_ref[...])

    return kernel


# ---------------------------------------------------------------------------
# Pallas wrapper (single pallas_call, no grid, everything resident in VMEM)
# ---------------------------------------------------------------------------
def fused_forward_pallas(src, params, eps=1e-5):
    B, S, D = src.shape
    H = params['cw'].shape[-1]
    C = params['w2_t'].shape[1]
    L = len(params['lstm'])

    aw_norm = params['aw'] / jnp.sum(params['aw'], axis=0)
    cw_norm = params['cw'] / jnp.sum(params['cw'], axis=0)

    def bn_affine(bn_p):                                     # eval-mode BN -> scale/shift
        g, b, rm, rv = bn_p
        inv = 1.0 / jnp.sqrt(rv + eps)
        return g * inv, b - rm * g * inv

    s11, o11 = bn_affine(params['bn11'])
    s12, o12 = bn_affine(params['bn12'])
    s13, o13 = bn_affine(params['bn13'])
    bn1_scale = jnp.stack([s11, s12, s13], axis=0).reshape(3, 1, D)
    bn1_shift = jnp.stack([o11, o12, o13], axis=0).reshape(3, 1, D)
    s2g, o2g = bn_affine(params['bn2'])
    bn2_scale = s2g.reshape(1, H)
    bn2_shift = o2g.reshape(1, H)

    lstm_arrays = []
    for lp in params['lstm']:
        lstm_arrays += [lp['wih_t'], lp['whh_t'], lp['b']]

    inputs = ([src, params['wq_t'], params['wk_t'], params['wv_t'], aw_norm,
               bn1_scale, bn1_shift]
              + lstm_arrays
              + [cw_norm, bn2_scale, bn2_shift,
                 params['w1_t'], params['b1'], params['w2_t'], params['b2'],
                 params['attn_scale']])

    vmem = pl.BlockSpec(memory_space=pltpu.MemorySpace.VMEM)
    smem = pl.BlockSpec(memory_space=pltpu.MemorySpace.SMEM)
    in_specs = [vmem] * (len(inputs) - 1) + [smem]           # attn_scale scalar -> SMEM

    return pl.pallas_call(
        _make_fused_kernel(B, S, D, H, L, C),
        out_shape=jax.ShapeDtypeStruct((B, C), jnp.float32),
        in_specs=in_specs,
        out_specs=vmem,
        scratch_shapes=[
            pltpu.VMEM((3, B, S, H), jnp.float32),           # per-layer LSTM output sequence
            pltpu.VMEM((B, S * H), jnp.float32),             # flattened head input
        ],
    )(*inputs)


@jax.jit
def forward(src, params):
    return fused_forward_pallas(src, params), 0


# ---------------------------------------------------------------------------
# Deterministic parameter init (shapes per the module's __init__)
# ---------------------------------------------------------------------------
def init_params(key, S, D, H, L, C):
    keys = iter(jax.random.split(key, 64))
    u = lambda shape, lo, hi: jax.random.uniform(next(keys), shape, jnp.float32, lo, hi)
    p = {}
    p['aw'] = u((3, S, D), 0.5, 1.5)                # attention_weights
    p['cw'] = u((3, S, H), 0.5, 1.5)                # cat_weights
    p['attn_scale'] = u((1,), 0.5, 1.5)             # attn_scale (scalar, lives in SMEM)
    kd = 1.0 / math.sqrt(D)
    p['wq_t'] = u((D, D), -kd, kd)                  # Linear weights, already transposed
    p['wk_t'] = u((D, D), -kd, kd)
    p['wv_t'] = u((D, D), -kd, kd)
    for name, feat in (('bn11', D), ('bn12', D), ('bn13', D), ('bn2', H)):
        gamma = u((feat,), 0.8, 1.2)
        beta = u((feat,), -0.1, 0.1)
        p[name] = (gamma, beta, jnp.zeros((feat,), jnp.float32), jnp.ones((feat,), jnp.float32))
    kh = 1.0 / math.sqrt(H)
    layers = []
    for layer in range(L):
        din = D if layer == 0 else H
        wih = u((3, din, 4 * H), -kh, kh)           # weight_ih_l{k}^T, stacked over 3 LSTMs
        whh = u((3, H, 4 * H), -kh, kh)             # weight_hh_l{k}^T
        b = u((3, 1, 4 * H), -kh, kh) + u((3, 1, 4 * H), -kh, kh)   # b_ih + b_hh
        layers.append({'wih_t': wih, 'whh_t': whh, 'b': b})
    p['lstm'] = layers
    kf1 = 1.0 / math.sqrt(S * H)
    p['w1_t'] = u((S * H, H), -kf1, kf1)            # fc1.weight^T
    p['b1'] = u((1, H), -kf1, kf1)
    kf2 = 1.0 / math.sqrt(H)
    p['w2_t'] = u((H, C), -kf2, kf2)                # fc2.weight^T
    p['b2'] = u((1, C), -kf2, kf2)
    return p


# ---------------------------------------------------------------------------
# Pure-JAX reference (for correctness check)
# ---------------------------------------------------------------------------
def bn_eval(x, bn_p, eps=1e-5):
    g, b, rm, rv = bn_p
    return (x - rm) / jnp.sqrt(rv + eps) * g + b


def reference_forward(src, p, eps=1e-5):
    B, S, D = src.shape
    H = p['cw'].shape[-1]
    mask = jnp.tril(jnp.ones((S, S), jnp.float32))

    def msoftmax(s):
        s = jnp.where(mask == 0, NEG_INF, s)
        return jax.nn.softmax(s, axis=-1)

    x = src
    s1 = jnp.einsum('bid,bjd->bij', x, x)
    a1 = jnp.einsum('bij,bjd->bid', msoftmax(s1), x)
    q = x @ p['wq_t']; k = x @ p['wk_t']; v = x @ p['wv_t']
    s2 = jnp.einsum('bid,bjd->bij', q, k) / math.sqrt(D) * p['attn_scale'][0]
    a2 = jnp.einsum('bij,bjd->bid', msoftmax(s2), v)
    s3 = jnp.sum(jnp.tanh(x[:, :, None, :] + x[:, None, :, :]), axis=-1)
    a3 = jnp.einsum('bij,bjd->bid', msoftmax(s3), x)
    aw = p['aw'] / jnp.sum(p['aw'], axis=0)
    attn = a1 * aw[0] + a2 * aw[1] + a3 * aw[2]

    lines = [bn_eval(src, p['bn11']), bn_eval(src + attn, p['bn12']), bn_eval(attn, p['bn13'])]

    outs = []
    for li, line in enumerate(lines):
        cur = line
        for layer_p in p['lstm']:
            wih = layer_p['wih_t'][li]; whh = layer_p['whh_t'][li]; bb = layer_p['b'][li]
            Hh = whh.shape[0]
            h = jnp.zeros((B, Hh), jnp.float32)
            c = jnp.zeros((B, Hh), jnp.float32)
            ys = []
            for t in range(S):
                gates = cur[:, t, :] @ wih + h @ whh + bb
                i_g = jax.nn.sigmoid(gates[:, :Hh])
                f_g = jax.nn.sigmoid(gates[:, Hh:2 * Hh])
                g_g = jnp.tanh(gates[:, 2 * Hh:3 * Hh])
                o_g = jax.nn.sigmoid(gates[:, 3 * Hh:4 * Hh])
                c = f_g * c + i_g * g_g
                h = o_g * jnp.tanh(c)
                ys.append(h)
            cur = jnp.stack(ys, axis=1)
        outs.append(cur)

    cw = p['cw'] / jnp.sum(p['cw'], axis=0)
    cat = outs[0] * cw[0] + outs[1] * cw[1] + outs[2] * cw[2]
    cat = bn_eval(cat, p['bn2'])
    flat = cat.reshape(B, S * H)
    hid = jax.nn.relu(flat @ p['w1_t'] + p['b1'])
    out = hid @ p['w2_t'] + p['b2']
    return out, 0


# ---------------------------------------------------------------------------
if __name__ == "__main__":
    B, S, D, H, L, C = 2, 8, 16, 32, 2, 5   # batch, seq_length, input_size, hidden, num_layers, num_classes
    key = jax.random.PRNGKey(0)
    pkey, xkey = jax.random.split(key)
    params = init_params(pkey, S, D, H, L, C)
    src = jax.random.normal(xkey, (B, S, D), dtype=jnp.float32)

    logits, _aux = forward(src, params)
    logits = jax.block_until_ready(logits)

    ref_logits, _ = reference_forward(src, params)
    assert logits.shape == (B, C), logits.shape
    assert bool(jnp.all(jnp.isfinite(logits)))
    # tolerance covers the EUP approx-reciprocal used in the in-kernel softmax (~1e-4..1e-3
    # relative) while still catching any real bug, which would be orders of magnitude larger.
    if not jnp.allclose(logits, ref_logits, atol=5e-3, rtol=5e-3):
        raise AssertionError(f"Pallas vs reference mismatch:\n{logits}\n{ref_logits}")
    print("KERNEL_OK")
</pallas_src>

<mosaic_0001>
module attributes {stable_mosaic.version = 11 : i64} {
  func.func @kernel(%arg0: memref<2x8x16xf32, #tpu.memory_space<vmem>>, %arg1: memref<16x16xf32, #tpu.memory_space<vmem>>, %arg2: memref<16x16xf32, #tpu.memory_space<vmem>>, %arg3: memref<16x16xf32, #tpu.memory_space<vmem>>, %arg4: memref<3x8x16xf32, #tpu.memory_space<vmem>>, %arg5: memref<3x1x16xf32, #tpu.memory_space<vmem>>, %arg6: memref<3x1x16xf32, #tpu.memory_space<vmem>>, %arg7: memref<3x16x128xf32, #tpu.memory_space<vmem>>, %arg8: memref<3x32x128xf32, #tpu.memory_space<vmem>>, %arg9: memref<3x1x128xf32, #tpu.memory_space<vmem>>, %arg10: memref<3x32x128xf32, #tpu.memory_space<vmem>>, %arg11: memref<3x32x128xf32, #tpu.memory_space<vmem>>, %arg12: memref<3x1x128xf32, #tpu.memory_space<vmem>>, %arg13: memref<3x8x32xf32, #tpu.memory_space<vmem>>, %arg14: memref<1x32xf32, #tpu.memory_space<vmem>>, %arg15: memref<1x32xf32, #tpu.memory_space<vmem>>, %arg16: memref<256x32xf32, #tpu.memory_space<vmem>>, %arg17: memref<1x32xf32, #tpu.memory_space<vmem>>, %arg18: memref<32x5xf32, #tpu.memory_space<vmem>>, %arg19: memref<1x5xf32, #tpu.memory_space<vmem>>, %arg20: memref<1xf32, #tpu.memory_space<smem>>, %arg21: memref<2x5xf32, #tpu.memory_space<vmem>>, %arg22: memref<3x2x8x32xf32, #tpu.memory_space<vmem>>, %arg23: memref<2x256xf32, #tpu.memory_space<vmem>>) attributes {dimension_semantics = [], scalar_prefetch = 0 : i64, scratch_operands = 2 : i64, tpu.core_type = #tpu.core_type<tc>} {
    %c0 = arith.constant 0 : index
    %c0_0 = arith.constant 0 : index
    %c0_1 = arith.constant 0 : index
    %0 = vector.load %arg0[%c0, %c0_0, %c0_1] : memref<2x8x16xf32, #tpu.memory_space<vmem>>, vector<2x8x16xf32>
    %1 = tpu.iota {dimensions = array<i32: 0>} : vector<8x8xi32>
    %2 = tpu.iota {dimensions = array<i32: 1>} : vector<8x8xi32>
    %3 = arith.cmpi sge, %1, %2 : vector<8x8xi32>
    %4 = vector.shape_cast %3 : vector<8x8xi1> to vector<1x8x8xi1>
    "tpu.trace_start"() <{level = 10 : i32, message = "bid,bjd->bij"}> : () -> ()
    %cst = arith.constant dense<0.000000e+00> : vector<2x8x8xf32>
    %5 = tpu.matmul %0, %0, %cst {dimension_numbers = #tpu.dot_dimension_numbers<[2], [2], [1], [1], [0, 0, 0, 1, 1, 1], [0], [0]>} : vector<2x8x16xf32>, vector<2x8x16xf32>, vector<2x8x8xf32> -> vector<2x8x8xf32>
    %cst_2 = arith.constant -1.000000e+09 : f32
    "tpu.trace_stop"() : () -> ()
    %6 = vector.shape_cast %4 : vector<1x8x8xi1> to vector<1x8x8xi1>
    %7 = vector.broadcast %6 : vector<1x8x8xi1> to vector<2x8x8xi1>
    %8 = vector.broadcast %cst_2 : f32 to vector<2x8x8xf32>
    %9 = arith.select %7, %5, %8 : vector<2x8x8xi1>, vector<2x8x8xf32>
    %cst_3 = arith.constant dense<0xFF800000> : vector<2x8xf32>
    %10 = vector.multi_reduction <maximumf>, %9, %cst_3 [2] : vector<2x8x8xf32> to vector<2x8xf32>
    %11 = vector.shape_cast %10 : vector<2x8xf32> to vector<2x8x1xf32>
    %12 = vector.broadcast %11 : vector<2x8x1xf32> to vector<2x8x8xf32>
    %13 = arith.subf %9, %12 : vector<2x8x8xf32>
    %14 = math.exp %13 : vector<2x8x8xf32>
    %cst_4 = arith.constant dense<0.000000e+00> : vector<2x8xf32>
    %15 = vector.multi_reduction <add>, %14, %cst_4 [2] : vector<2x8x8xf32> to vector<2x8xf32>
    %16 = vector.shape_cast %15 : vector<2x8xf32> to vector<2x8x1xf32>
    %17 = tpu.reciprocal %16 {approx = true} : vector<2x8x1xf32> -> vector<2x8x1xf32>
    %18 = vector.broadcast %17 : vector<2x8x1xf32> to vector<2x8x8xf32>
    %19 = arith.mulf %14, %18 : vector<2x8x8xf32>
    "tpu.trace_start"() <{level = 10 : i32, message = "bij,bjd->bid"}> : () -> ()
    %cst_5 = arith.constant dense<0.000000e+00> : vector<2x8x16xf32>
    %20 = tpu.matmul %19, %0, %cst_5 {dimension_numbers = #tpu.dot_dimension_numbers<[2], [1], [1], [2], [0, 0, 0, 1, 1, 2], [0], [0]>} : vector<2x8x8xf32>, vector<2x8x16xf32>, vector<2x8x16xf32> -> vector<2x8x16xf32>
    "tpu.trace_stop"() : () -> ()
    %21 = vector.shape_cast %0 : vector<2x8x16xf32> to vector<16x16xf32>
    %c0_6 = arith.constant 0 : index
    %c0_7 = arith.constant 0 : index
    %22 = vector.load %arg1[%c0_6, %c0_7] : memref<16x16xf32, #tpu.memory_space<vmem>>, vector<16x16xf32>
    %cst_8 = arith.constant dense<0.000000e+00> : vector<16x16xf32>
    %23 = tpu.matmul %21, %22, %cst_8 {dimension_numbers = #tpu.dot_dimension_numbers<[1], [0], [0], [1], [0, 0, 1, 1], [], []>} : vector<16x16xf32>, vector<16x16xf32>, vector<16x16xf32> -> vector<16x16xf32>
    %24 = vector.shape_cast %23 : vector<16x16xf32> to vector<2x8x16xf32>
    %c0_9 = arith.constant 0 : index
    %c0_10 = arith.constant 0 : index
    %25 = vector.load %arg2[%c0_9, %c0_10] : memref<16x16xf32, #tpu.memory_space<vmem>>, vector<16x16xf32>
    %cst_11 = arith.constant dense<0.000000e+00> : vector<16x16xf32>
    %26 = tpu.matmul %21, %25, %cst_11 {dimension_numbers = #tpu.dot_dimension_numbers<[1], [0], [0], [1], [0, 0, 1, 1], [], []>} : vector<16x16xf32>, vector<16x16xf32>, vector<16x16xf32> -> vector<16x16xf32>
    %27 = vector.shape_cast %26 : vector<16x16xf32> to vector<2x8x16xf32>
    %c0_12 = arith.constant 0 : index
    %c0_13 = arith.constant 0 : index
    %28 = vector.load %arg3[%c0_12, %c0_13] : memref<16x16xf32, #tpu.memory_space<vmem>>, vector<16x16xf32>
    %cst_14 = arith.constant dense<0.000000e+00> : vector<16x16xf32>
    %29 = tpu.matmul %21, %28, %cst_14 {dimension_numbers = #tpu.dot_dimension_numbers<[1], [0], [0], [1], [0, 0, 1, 1], [], []>} : vector<16x16xf32>, vector<16x16xf32>, vector<16x16xf32> -> vector<16x16xf32>
    %30 = vector.shape_cast %29 : vector<16x16xf32> to vector<2x8x16xf32>
    %c0_15 = arith.constant 0 : index
    %31 = memref.load %arg20[%c0_15] : memref<1xf32, #tpu.memory_space<smem>>
    %cst_16 = arith.constant 2.500000e-01 : f32
    %32 = arith.mulf %31, %cst_16 : f32
    "tpu.trace_start"() <{level = 10 : i32, message = "bid,bjd->bij"}> : () -> ()
    %cst_17 = arith.constant dense<0.000000e+00> : vector<2x8x8xf32>
    %33 = tpu.matmul %24, %27, %cst_17 {dimension_numbers = #tpu.dot_dimension_numbers<[2], [2], [1], [1], [0, 0, 0, 1, 1, 1], [0], [0]>} : vector<2x8x16xf32>, vector<2x8x16xf32>, vector<2x8x8xf32> -> vector<2x8x8xf32>
    "tpu.trace_stop"() : () -> ()
    %34 = vector.broadcast %32 : f32 to vector<2x8x8xf32>
    %35 = arith.mulf %33, %34 : vector<2x8x8xf32>
    %cst_18 = arith.constant -1.000000e+09 : f32
    %36 = vector.shape_cast %4 : vector<1x8x8xi1> to vector<1x8x8xi1>
    %37 = vector.broadcast %36 : vector<1x8x8xi1> to vector<2x8x8xi1>
    %38 = vector.broadcast %cst_18 : f32 to vector<2x8x8xf32>
    %39 = arith.select %37, %35, %38 : vector<2x8x8xi1>, vector<2x8x8xf32>
    %cst_19 = arith.constant dense<0xFF800000> : vector<2x8xf32>
    %40 = vector.multi_reduction <maximumf>, %39, %cst_19 [2] : vector<2x8x8xf32> to vector<2x8xf32>
    %41 = vector.shape_cast %40 : vector<2x8xf32> to vector<2x8x1xf32>
    %42 = vector.broadcast %41 : vector<2x8x1xf32> to vector<2x8x8xf32>
    %43 = arith.subf %39, %42 : vector<2x8x8xf32>
    %44 = math.exp %43 : vector<2x8x8xf32>
    %cst_20 = arith.constant dense<0.000000e+00> : vector<2x8xf32>
    %45 = vector.multi_reduction <add>, %44, %cst_20 [2] : vector<2x8x8xf32> to vector<2x8xf32>
    %46 = vector.shape_cast %45 : vector<2x8xf32> to vector<2x8x1xf32>
    %47 = tpu.reciprocal %46 {approx = true} : vector<2x8x1xf32> -> vector<2x8x1xf32>
    %48 = vector.broadcast %47 : vector<2x8x1xf32> to vector<2x8x8xf32>
    %49 = arith.mulf %44, %48 : vector<2x8x8xf32>
    "tpu.trace_start"() <{level = 10 : i32, message = "bij,bjd->bid"}> : () -> ()
    %cst_21 = arith.constant dense<0.000000e+00> : vector<2x8x16xf32>
    %50 = tpu.matmul %49, %30, %cst_21 {dimension_numbers = #tpu.dot_dimension_numbers<[2], [1], [1], [2], [0, 0, 0, 1, 1, 2], [0], [0]>} : vector<2x8x8xf32>, vector<2x8x16xf32>, vector<2x8x16xf32> -> vector<2x8x16xf32>
    "tpu.trace_stop"() : () -> ()
    %51 = vector.shape_cast %0 : vector<2x8x16xf32> to vector<2x8x1x16xf32>
    %52 = vector.shape_cast %0 : vector<2x8x16xf32> to vector<2x1x8x16xf32>
    %53 = vector.broadcast %51 : vector<2x8x1x16xf32> to vector<2x8x8x16xf32>
    %54 = vector.broadcast %52 : vector<2x1x8x16xf32> to vector<2x8x8x16xf32>
    %55 = arith.addf %53, %54 : vector<2x8x8x16xf32>
    %56 = math.tanh %55 : vector<2x8x8x16xf32>
    %cst_22 = arith.constant dense<0.000000e+00> : vector<2x8x8xf32>
    %57 = vector.multi_reduction <add>, %56, %cst_22 [3] : vector<2x8x8x16xf32> to vector<2x8x8xf32>
    %cst_23 = arith.constant -1.000000e+09 : f32
    %58 = vector.shape_cast %4 : vector<1x8x8xi1> to vector<1x8x8xi1>
    %59 = vector.broadcast %58 : vector<1x8x8xi1> to vector<2x8x8xi1>
    %60 = vector.broadcast %cst_23 : f32 to vector<2x8x8xf32>
    %61 = arith.select %59, %57, %60 : vector<2x8x8xi1>, vector<2x8x8xf32>
    %cst_24 = arith.constant dense<0xFF800000> : vector<2x8xf32>
    %62 = vector.multi_reduction <maximumf>, %61, %cst_24 [2] : vector<2x8x8xf32> to vector<2x8xf32>
    %63 = vector.shape_cast %62 : vector<2x8xf32> to vector<2x8x1xf32>
    %64 = vector.broadcast %63 : vector<2x8x1xf32> to vector<2x8x8xf32>
    %65 = arith.subf %61, %64 : vector<2x8x8xf32>
    %66 = math.exp %65 : vector<2x8x8xf32>
    %cst_25 = arith.constant dense<0.000000e+00> : vector<2x8xf32>
    %67 = vector.multi_reduction <add>, %66, %cst_25 [2] : vector<2x8x8xf32> to vector<2x8xf32>
    %68 = vector.shape_cast %67 : vector<2x8xf32> to vector<2x8x1xf32>
    %69 = tpu.reciprocal %68 {approx = true} : vector<2x8x1xf32> -> vector<2x8x1xf32>
    %70 = vector.broadcast %69 : vector<2x8x1xf32> to vector<2x8x8xf32>
    %71 = arith.mulf %66, %70 : vector<2x8x8xf32>
    "tpu.trace_start"() <{level = 10 : i32, message = "bij,bjd->bid"}> : () -> ()
    %cst_26 = arith.constant dense<0.000000e+00> : vector<2x8x16xf32>
    %72 = tpu.matmul %71, %0, %cst_26 {dimension_numbers = #tpu.dot_dimension_numbers<[2], [1], [1], [2], [0, 0, 0, 1, 1, 2], [0], [0]>} : vector<2x8x8xf32>, vector<2x8x16xf32>, vector<2x8x16xf32> -> vector<2x8x16xf32>
    "tpu.trace_stop"() : () -> ()
    %c0_27 = arith.constant 0 : index
    %c0_28 = arith.constant 0 : index
    %c0_29 = arith.constant 0 : index
    %73 = vector.load %arg4[%c0_27, %c0_28, %c0_29] : memref<3x8x16xf32, #tpu.memory_space<vmem>>, vector<3x8x16xf32>
    %74 = vector.extract_strided_slice %73 {offsets = [0, 0, 0], sizes = [1, 8, 16], strides = [1, 1, 1]} : vector<3x8x16xf32> to vector<1x8x16xf32>
    %75 = vector.shape_cast %74 : vector<1x8x16xf32> to vector<8x16xf32>
    %76 = vector.shape_cast %75 : vector<8x16xf32> to vector<1x8x16xf32>
    %77 = vector.broadcast %76 : vector<1x8x16xf32> to vector<2x8x16xf32>
    %78 = arith.mulf %20, %77 : vector<2x8x16xf32>
    %79 = vector.extract_strided_slice %73 {offsets = [1, 0, 0], sizes = [1, 8, 16], strides = [1, 1, 1]} : vector<3x8x16xf32> to vector<1x8x16xf32>
    %80 = vector.shape_cast %79 : vector<1x8x16xf32> to vector<8x16xf32>
    %81 = vector.shape_cast %80 : vector<8x16xf32> to vector<1x8x16xf32>
    %82 = vector.broadcast %81 : vector<1x8x16xf32> to vector<2x8x16xf32>
    %83 = arith.mulf %50, %82 : vector<2x8x16xf32>
    %84 = arith.addf %78, %83 : vector<2x8x16xf32>
    %85 = vector.extract_strided_slice %73 {offsets = [2, 0, 0], sizes = [1, 8, 16], strides = [1, 1, 1]} : vector<3x8x16xf32> to vector<1x8x16xf32>
    %86 = vector.shape_cast %85 : vector<1x8x16xf32> to vector<8x16xf32>
    %87 = vector.shape_cast %86 : vector<8x16xf32> to vector<1x8x16xf32>
    %88 = vector.broadcast %87 : vector<1x8x16xf32> to vector<2x8x16xf32>
    %89 = arith.mulf %72, %88 : vector<2x8x16xf32>
    %90 = arith.addf %84, %89 : vector<2x8x16xf32>
    %c0_30 = arith.constant 0 : index
    %c0_31 = arith.constant 0 : index
    %c0_32 = arith.constant 0 : index
    %91 = vector.load %arg5[%c0_30, %c0_31, %c0_32] : memref<3x1x16xf32, #tpu.memory_space<vmem>>, vector<3x1x16xf32>
    %c0_33 = arith.constant 0 : index
    %c0_34 = arith.constant 0 : index
    %c0_35 = arith.constant 0 : index
    %92 = vector.load %arg6[%c0_33, %c0_34, %c0_35] : memref<3x1x16xf32, #tpu.memory_space<vmem>>, vector<3x1x16xf32>
    %93 = vector.extract_strided_slice %91 {offsets = [0, 0, 0], sizes = [1, 1, 16], strides = [1, 1, 1]} : vector<3x1x16xf32> to vector<1x1x16xf32>
    %94 = vector.shape_cast %93 : vector<1x1x16xf32> to vector<1x16xf32>
    %95 = vector.shape_cast %94 : vector<1x16xf32> to vector<1x1x16xf32>
    %96 = vector.broadcast %95 : vector<1x1x16xf32> to vector<2x8x16xf32>
    %97 = arith.mulf %0, %96 : vector<2x8x16xf32>
    %98 = vector.extract_strided_slice %92 {offsets = [0, 0, 0], sizes = [1, 1, 16], strides = [1, 1, 1]} : vector<3x1x16xf32> to vector<1x1x16xf32>
    %99 = vector.shape_cast %98 : vector<1x1x16xf32> to vector<1x16xf32>
    %100 = vector.shape_cast %99 : vector<1x16xf32> to vector<1x1x16xf32>
    %101 = vector.broadcast %100 : vector<1x1x16xf32> to vector<2x8x16xf32>
    %102 = arith.addf %97, %101 : vector<2x8x16xf32>
    %103 = arith.addf %0, %90 : vector<2x8x16xf32>
    %104 = vector.extract_strided_slice %91 {offsets = [1, 0, 0], sizes = [1, 1, 16], strides = [1, 1, 1]} : vector<3x1x16xf32> to vector<1x1x16xf32>
    %105 = vector.shape_cast %104 : vector<1x1x16xf32> to vector<1x16xf32>
    %106 = vector.shape_cast %105 : vector<1x16xf32> to vector<1x1x16xf32>
    %107 = vector.broadcast %106 : vector<1x1x16xf32> to vector<2x8x16xf32>
    %108 = arith.mulf %103, %107 : vector<2x8x16xf32>
    %109 = vector.extract_strided_slice %92 {offsets = [1, 0, 0], sizes = [1, 1, 16], strides = [1, 1, 1]} : vector<3x1x16xf32> to vector<1x1x16xf32>
    %110 = vector.shape_cast %109 : vector<1x1x16xf32> to vector<1x16xf32>
    %111 = vector.shape_cast %110 : vector<1x16xf32> to vector<1x1x16xf32>
    %112 = vector.broadcast %111 : vector<1x1x16xf32> to vector<2x8x16xf32>
    %113 = arith.addf %108, %112 : vector<2x8x16xf32>
    %114 = vector.extract_strided_slice %91 {offsets = [2, 0, 0], sizes = [1, 1, 16], strides = [1, 1, 1]} : vector<3x1x16xf32> to vector<1x1x16xf32>
    %115 = vector.shape_cast %114 : vector<1x1x16xf32> to vector<1x16xf32>
    %116 = vector.shape_cast %115 : vector<1x16xf32> to vector<1x1x16xf32>
    %117 = vector.broadcast %116 : vector<1x1x16xf32> to vector<2x8x16xf32>
    %118 = arith.mulf %90, %117 : vector<2x8x16xf32>
    %119 = vector.extract_strided_slice %92 {offsets = [2, 0, 0], sizes = [1, 1, 16], strides = [1, 1, 1]} : vector<3x1x16xf32> to vector<1x1x16xf32>
    %120 = vector.shape_cast %119 : vector<1x1x16xf32> to vector<1x16xf32>
    %121 = vector.shape_cast %120 : vector<1x16xf32> to vector<1x1x16xf32>
    %122 = vector.broadcast %121 : vector<1x1x16xf32> to vector<2x8x16xf32>
    %123 = arith.addf %118, %122 : vector<2x8x16xf32>
    %124 = vector.shape_cast %102 : vector<2x8x16xf32> to vector<1x2x8x16xf32>
    %125 = vector.shape_cast %113 : vector<2x8x16xf32> to vector<1x2x8x16xf32>
    %126 = vector.shape_cast %123 : vector<2x8x16xf32> to vector<1x2x8x16xf32>
    %127 = tpu.concatenate %124, %125, %126 in 0 : vector<1x2x8x16xf32>, vector<1x2x8x16xf32>, vector<1x2x8x16xf32> -> vector<3x2x8x16xf32>
    %128 = vector.shape_cast %127 : vector<3x2x8x16xf32> to vector<3x16x16xf32>
    %c0_36 = arith.constant 0 : index
    %c0_37 = arith.constant 0 : index
    %c0_38 = arith.constant 0 : index
    %129 = vector.load %arg7[%c0_36, %c0_37, %c0_38] : memref<3x16x128xf32, #tpu.memory_space<vmem>>, vector<3x16x128xf32>
    %c0_39 = arith.constant 0 : index
    %c0_40 = arith.constant 0 : index
    %c0_41 = arith.constant 0 : index
    %130 = vector.load %arg8[%c0_39, %c0_40, %c0_41] : memref<3x32x128xf32, #tpu.memory_space<vmem>>, vector<3x32x128xf32>
    %c0_42 = arith.constant 0 : index
    %c0_43 = arith.constant 0 : index
    %c0_44 = arith.constant 0 : index
    %131 = vector.load %arg9[%c0_42, %c0_43, %c0_44] : memref<3x1x128xf32, #tpu.memory_space<vmem>>, vector<3x1x128xf32>
    "tpu.trace_start"() <{level = 10 : i32, message = "lnd,ldg->lng"}> : () -> ()
    %cst_45 = arith.constant dense<0.000000e+00> : vector<3x16x128xf32>
    %132 = tpu.matmul %128, %129, %cst_45 {dimension_numbers = #tpu.dot_dimension_numbers<[2], [1], [1], [2], [0, 0, 0, 1, 1, 2], [0], [0]>} : vector<3x16x16xf32>, vector<3x16x128xf32>, vector<3x16x128xf32> -> vector<3x16x128xf32>
    "tpu.trace_stop"() : () -> ()
    %133 = vector.shape_cast %132 : vector<3x16x128xf32> to vector<3x2x8x128xf32>
    %134 = vector.shape_cast %131 : vector<3x1x128xf32> to vector<3x1x1x128xf32>
    %135 = vector.broadcast %134 : vector<3x1x1x128xf32> to vector<3x2x8x128xf32>
    %136 = arith.addf %133, %135 : vector<3x2x8x128xf32>
    %cst_46 = arith.constant 0.000000e+00 : f32
    %137 = vector.broadcast %cst_46 : f32 to vector<3x2x32xf32>
    %cst_47 = arith.constant 0.000000e+00 : f32
    %138 = vector.broadcast %cst_47 : f32 to vector<3x2x32xf32>
    %139 = vector.extract_strided_slice %136 {offsets = [0, 0, 0, 0], sizes = [3, 2, 1, 128], strides = [1, 1, 1, 1]} : vector<3x2x8x128xf32> to vector<3x2x1x128xf32>
    %140 = vector.shape_cast %139 : vector<3x2x1x128xf32> to vector<3x2x128xf32>
    "tpu.trace_start"() <{level = 10 : i32, message = "lbh,lhg->lbg"}> : () -> ()
    %cst_48 = arith.constant dense<0.000000e+00> : vector<3x2x128xf32>
    %141 = tpu.matmul %137, %130, %cst_48 {dimension_numbers = #tpu.dot_dimension_numbers<[2], [1], [1], [2], [0, 0, 0, 1, 1, 2], [0], [0]>} : vector<3x2x32xf32>, vector<3x32x128xf32>, vector<3x2x128xf32> -> vector<3x2x128xf32>
    "tpu.trace_stop"() : () -> ()
    %142 = arith.addf %140, %141 : vector<3x2x128xf32>
    %143 = vector.extract_strided_slice %142 {offsets = [0, 0, 0], sizes = [3, 2, 32], strides = [1, 1, 1]} : vector<3x2x128xf32> to vector<3x2x32xf32>
    %144 = arith.negf %143 : vector<3x2x32xf32>
    %145 = math.exp %144 : vector<3x2x32xf32>
    %cst_49 = arith.constant 1.000000e+00 : f32
    %146 = vector.broadcast %cst_49 : f32 to vector<3x2x32xf32>
    %147 = arith.addf %146, %145 : vector<3x2x32xf32>
    %148 = arith.divf %146, %147 : vector<3x2x32xf32>
    %149 = vector.extract_strided_slice %142 {offsets = [0, 0, 32], sizes = [3, 2, 32], strides = [1, 1, 1]} : vector<3x2x128xf32> to vector<3x2x32xf32>
    %150 = arith.negf %149 : vector<3x2x32xf32>
    %151 = math.exp %150 : vector<3x2x32xf32>
    %cst_50 = arith.constant 1.000000e+00 : f32
    %152 = vector.broadcast %cst_50 : f32 to vector<3x2x32xf32>
    %153 = arith.addf %152, %151 : vector<3x2x32xf32>
    %154 = arith.divf %152, %153 : vector<3x2x32xf32>
    %155 = vector.extract_strided_slice %142 {offsets = [0, 0, 64], sizes = [3, 2, 32], strides = [1, 1, 1]} : vector<3x2x128xf32> to vector<3x2x32xf32>
    %156 = math.tanh %155 : vector<3x2x32xf32>
    %157 = vector.extract_strided_slice %142 {offsets = [0, 0, 96], sizes = [3, 2, 32], strides = [1, 1, 1]} : vector<3x2x128xf32> to vector<3x2x32xf32>
    %158 = arith.negf %157 : vector<3x2x32xf32>
    %159 = math.exp %158 : vector<3x2x32xf32>
    %cst_51 = arith.constant 1.000000e+00 : f32
    %160 = vector.broadcast %cst_51 : f32 to vector<3x2x32xf32>
    %161 = arith.addf %160, %159 : vector<3x2x32xf32>
    %162 = arith.divf %160, %161 : vector<3x2x32xf32>
    %163 = arith.mulf %154, %138 : vector<3x2x32xf32>
    %164 = arith.mulf %148, %156 : vector<3x2x32xf32>
    %165 = arith.addf %163, %164 : vector<3x2x32xf32>
    %166 = math.tanh %165 : vector<3x2x32xf32>
    %167 = arith.mulf %162, %166 : vector<3x2x32xf32>
    %168 = vector.shape_cast %167 : vector<3x2x32xf32> to vector<3x2x1x32xf32>
    %c0_52 = arith.constant 0 : index
    %c0_53 = arith.constant 0 : index
    %c0_54 = arith.constant 0 : index
    %c0_55 = arith.constant 0 : index
    %169 = vector.load %arg22[%c0_52, %c0_53, %c0_54, %c0_55] : memref<3x2x8x32xf32, #tpu.memory_space<vmem>>, vector<3x2x1x32xf32>
    tpu.vector_store %arg22[%c0_52, %c0_53, %c0_54, %c0_55], %168 {strides = array<i32>} : memref<3x2x8x32xf32, #tpu.memory_space<vmem>>, vector<3x2x1x32xf32>,
    %170 = vector.extract_strided_slice %136 {offsets = [0, 0, 1, 0], sizes = [3, 2, 1, 128], strides = [1, 1, 1, 1]} : vector<3x2x8x128xf32> to vector<3x2x1x128xf32>
    %171 = vector.shape_cast %170 : vector<3x2x1x128xf32> to vector<3x2x128xf32>
    "tpu.trace_start"() <{level = 10 : i32, message = "lbh,lhg->lbg"}> : () -> ()
    %cst_56 = arith.constant dense<0.000000e+00> : vector<3x2x128xf32>
    %172 = tpu.matmul %167, %130, %cst_56 {dimension_numbers = #tpu.dot_dimension_numbers<[2], [1], [1], [2], [0, 0, 0, 1, 1, 2], [0], [0]>} : vector<3x2x32xf32>, vector<3x32x128xf32>, vector<3x2x128xf32> -> vector<3x2x128xf32>
    "tpu.trace_stop"() : () -> ()
    %173 = arith.addf %171, %172 : vector<3x2x128xf32>
    %174 = vector.extract_strided_slice %173 {offsets = [0, 0, 0], sizes = [3, 2, 32], strides = [1, 1, 1]} : vector<3x2x128xf32> to vector<3x2x32xf32>
    %175 = arith.negf %174 : vector<3x2x32xf32>
    %176 = math.exp %175 : vector<3x2x32xf32>
    %cst_57 = arith.constant 1.000000e+00 : f32
    %177 = vector.broadcast %cst_57 : f32 to vector<3x2x32xf32>
    %178 = arith.addf %177, %176 : vector<3x2x32xf32>
    %179 = arith.divf %177, %178 : vector<3x2x32xf32>
    %180 = vector.extract_strided_slice %173 {offsets = [0, 0, 32], sizes = [3, 2, 32], strides = [1, 1, 1]} : vector<3x2x128xf32> to vector<3x2x32xf32>
    %181 = arith.negf %180 : vector<3x2x32xf32>
    %182 = math.exp %181 : vector<3x2x32xf32>
    %cst_58 = arith.constant 1.000000e+00 : f32
    %183 = vector.broadcast %cst_58 : f32 to vector<3x2x32xf32>
    %184 = arith.addf %183, %182 : vector<3x2x32xf32>
    %185 = arith.divf %183, %184 : vector<3x2x32xf32>
    %186 = vector.extract_strided_slice %173 {offsets = [0, 0, 64], sizes = [3, 2, 32], strides = [1, 1, 1]} : vector<3x2x128xf32> to vector<3x2x32xf32>
    %187 = math.tanh %186 : vector<3x2x32xf32>
    %188 = vector.extract_strided_slice %173 {offsets = [0, 0, 96], sizes = [3, 2, 32], strides = [1, 1, 1]} : vector<3x2x128xf32> to vector<3x2x32xf32>
    %189 = arith.negf %188 : vector<3x2x32xf32>
    %190 = math.exp %189 : vector<3x2x32xf32>
    %cst_59 = arith.constant 1.000000e+00 : f32
    %191 = vector.broadcast %cst_59 : f32 to vector<3x2x32xf32>
    %192 = arith.addf %191, %190 : vector<3x2x32xf32>
    %193 = arith.divf %191, %192 : vector<3x2x32xf32>
    %194 = arith.mulf %185, %165 : vector<3x2x32xf32>
    %195 = arith.mulf %179, %187 : vector<3x2x32xf32>
    %196 = arith.addf %194, %195 : vector<3x2x32xf32>
    %197 = math.tanh %196 : vector<3x2x32xf32>
    %198 = arith.mulf %193, %197 : vector<3x2x32xf32>
    %199 = vector.shape_cast %198 : vector<3x2x32xf32> to vector<3x2x1x32xf32>
    %c0_60 = arith.constant 0 : index
    %c0_61 = arith.constant 0 : index
    %c1 = arith.constant 1 : index
    %c0_62 = arith.constant 0 : index
    %200 = vector.load %arg22[%c0_60, %c0_61, %c1, %c0_62] : memref<3x2x8x32xf32, #tpu.memory_space<vmem>>, vector<3x2x1x32xf32>
    tpu.vector_store %arg22[%c0_60, %c0_61, %c1, %c0_62], %199 {strides = array<i32>} : memref<3x2x8x32xf32, #tpu.memory_space<vmem>>, vector<3x2x1x32xf32>,
    %201 = vector.extract_strided_slice %136 {offsets = [0, 0, 2, 0], sizes = [3, 2, 1, 128], strides = [1, 1, 1, 1]} : vector<3x2x8x128xf32> to vector<3x2x1x128xf32>
    %202 = vector.shape_cast %201 : vector<3x2x1x128xf32> to vector<3x2x128xf32>
    "tpu.trace_start"() <{level = 10 : i32, message = "lbh,lhg->lbg"}> : () -> ()
    %cst_63 = arith.constant dense<0.000000e+00> : vector<3x2x128xf32>
    %203 = tpu.matmul %198, %130, %cst_63 {dimension_numbers = #tpu.dot_dimension_numbers<[2], [1], [1], [2], [0, 0, 0, 1, 1, 2], [0], [0]>} : vector<3x2x32xf32>, vector<3x32x128xf32>, vector<3x2x128xf32> -> vector<3x2x128xf32>
    "tpu.trace_stop"() : () -> ()
    %204 = arith.addf %202, %203 : vector<3x2x128xf32>
    %205 = vector.extract_strided_slice %204 {offsets = [0, 0, 0], sizes = [3, 2, 32], strides = [1, 1, 1]} : vector<3x2x128xf32> to vector<3x2x32xf32>
    %206 = arith.negf %205 : vector<3x2x32xf32>
    %207 = math.exp %206 : vector<3x2x32xf32>
    %cst_64 = arith.constant 1.000000e+00 : f32
    %208 = vector.broadcast %cst_64 : f32 to vector<3x2x32xf32>
    %209 = arith.addf %208, %207 : vector<3x2x32xf32>
    %210 = arith.divf %208, %209 : vector<3x2x32xf32>
    %211 = vector.extract_strided_slice %204 {offsets = [0, 0, 32], sizes = [3, 2, 32], strides = [1, 1, 1]} : vector<3x2x128xf32> to vector<3x2x32xf32>
    %212 = arith.negf %211 : vector<3x2x32xf32>
    %213 = math.exp %212 : vector<3x2x32xf32>
    %cst_65 = arith.constant 1.000000e+00 : f32
    %214 = vector.broadcast %cst_65 : f32 to vector<3x2x32xf32>
    %215 = arith.addf %214, %213 : vector<3x2x32xf32>
    %216 = arith.divf %214, %215 : vector<3x2x32xf32>
    %217 = vector.extract_strided_slice %204 {offsets = [0, 0, 64], sizes = [3, 2, 32], strides = [1, 1, 1]} : vector<3x2x128xf32> to vector<3x2x32xf32>
    %218 = math.tanh %217 : vector<3x2x32xf32>
    %219 = vector.extract_strided_slice %204 {offsets = [0, 0, 96], sizes = [3, 2, 32], strides = [1, 1, 1]} : vector<3x2x128xf32> to vector<3x2x32xf32>
    %220 = arith.negf %219 : vector<3x2x32xf32>
    %221 = math.exp %220 : vector<3x2x32xf32>
    %cst_66 = arith.constant 1.000000e+00 : f32
    %222 = vector.broadcast %cst_66 : f32 to vector<3x2x32xf32>
    %223 = arith.addf %222, %221 : vector<3x2x32xf32>
    %224 = arith.divf %222, %223 : vector<3x2x32xf32>
    %225 = arith.mulf %216, %196 : vector<3x2x32xf32>
    %226 = arith.mulf %210, %218 : vector<3x2x32xf32>
    %227 = arith.addf %225, %226 : vector<3x2x32xf32>
    %228 = math.tanh %227 : vector<3x2x32xf32>
    %229 = arith.mulf %224, %228 : vector<3x2x32xf32>
    %230 = vector.shape_cast %229 : vector<3x2x32xf32> to vector<3x2x1x32xf32>
    %c0_67 = arith.constant 0 : index
    %c0_68 = arith.constant 0 : index
    %c2 = arith.constant 2 : index
    %c0_69 = arith.constant 0 : index
    %231 = vector.load %arg22[%c0_67, %c0_68, %c2, %c0_69] : memref<3x2x8x32xf32, #tpu.memory_space<vmem>>, vector<3x2x1x32xf32>
    tpu.vector_store %arg22[%c0_67, %c0_68, %c2, %c0_69], %230 {strides = array<i32>} : memref<3x2x8x32xf32, #tpu.memory_space<vmem>>, vector<3x2x1x32xf32>,
    %232 = vector.extract_strided_slice %136 {offsets = [0, 0, 3, 0], sizes = [3, 2, 1, 128], strides = [1, 1, 1, 1]} : vector<3x2x8x128xf32> to vector<3x2x1x128xf32>
    %233 = vector.shape_cast %232 : vector<3x2x1x128xf32> to vector<3x2x128xf32>
    "tpu.trace_start"() <{level = 10 : i32, message = "lbh,lhg->lbg"}> : () -> ()
    %cst_70 = arith.constant dense<0.000000e+00> : vector<3x2x128xf32>
    %234 = tpu.matmul %229, %130, %cst_70 {dimension_numbers = #tpu.dot_dimension_numbers<[2], [1], [1], [2], [0, 0, 0, 1, 1, 2], [0], [0]>} : vector<3x2x32xf32>, vector<3x32x128xf32>, vector<3x2x128xf32> -> vector<3x2x128xf32>
    "tpu.trace_stop"() : () -> ()
    %235 = arith.addf %233, %234 : vector<3x2x128xf32>
    %236 = vector.extract_strided_slice %235 {offsets = [0, 0, 0], sizes = [3, 2, 32], strides = [1, 1, 1]} : vector<3x2x128xf32> to vector<3x2x32xf32>
    %237 = arith.negf %236 : vector<3x2x32xf32>
    %238 = math.exp %237 : vector<3x2x32xf32>
    %cst_71 = arith.constant 1.000000e+00 : f32
    %239 = vector.broadcast %cst_71 : f32 to vector<3x2x32xf32>
    %240 = arith.addf %239, %238 : vector<3x2x32xf32>
    %241 = arith.divf %239, %240 : vector<3x2x32xf32>
    %242 = vector.extract_strided_slice %235 {offsets = [0, 0, 32], sizes = [3, 2, 32], strides = [1, 1, 1]} : vector<3x2x128xf32> to vector<3x2x32xf32>
    %243 = arith.negf %242 : vector<3x2x32xf32>
    %244 = math.exp %243 : vector<3x2x32xf32>
    %cst_72 = arith.constant 1.000000e+00 : f32
    %245 = vector.broadcast %cst_72 : f32 to vector<3x2x32xf32>
    %246 = arith.addf %245, %244 : vector<3x2x32xf32>
    %247 = arith.divf %245, %246 : vector<3x2x32xf32>
    %248 = vector.extract_strided_slice %235 {offsets = [0, 0, 64], sizes = [3, 2, 32], strides = [1, 1, 1]} : vector<3x2x128xf32> to vector<3x2x32xf32>
    %249 = math.tanh %248 : vector<3x2x32xf32>
    %250 = vector.extract_strided_slice %235 {offsets = [0, 0, 96], sizes = [3, 2, 32], strides = [1, 1, 1]} : vector<3x2x128xf32> to vector<3x2x32xf32>
    %251 = arith.negf %250 : vector<3x2x32xf32>
    %252 = math.exp %251 : vector<3x2x32xf32>
    %cst_73 = arith.constant 1.000000e+00 : f32
    %253 = vector.broadcast %cst_73 : f32 to vector<3x2x32xf32>
    %254 = arith.addf %253, %252 : vector<3x2x32xf32>
    %255 = arith.divf %253, %254 : vector<3x2x32xf32>
    %256 = arith.mulf %247, %227 : vector<3x2x32xf32>
    %257 = arith.mulf %241, %249 : vector<3x2x32xf32>
    %258 = arith.addf %256, %257 : vector<3x2x32xf32>
    %259 = math.tanh %258 : vector<3x2x32xf32>
    %260 = arith.mulf %255, %259 : vector<3x2x32xf32>
    %261 = vector.shape_cast %260 : vector<3x2x32xf32> to vector<3x2x1x32xf32>
    %c0_74 = arith.constant 0 : index
    %c0_75 = arith.constant 0 : index
    %c3 = arith.constant 3 : index
    %c0_76 = arith.constant 0 : index
    %262 = vector.load %arg22[%c0_74, %c0_75, %c3, %c0_76] : memref<3x2x8x32xf32, #tpu.memory_space<vmem>>, vector<3x2x1x32xf32>
    tpu.vector_store %arg22[%c0_74, %c0_75, %c3, %c0_76], %261 {strides = array<i32>} : memref<3x2x8x32xf32, #tpu.memory_space<vmem>>, vector<3x2x1x32xf32>,
    %263 = vector.extract_strided_slice %136 {offsets = [0, 0, 4, 0], sizes = [3, 2, 1, 128], strides = [1, 1, 1, 1]} : vector<3x2x8x128xf32> to vector<3x2x1x128xf32>
    %264 = vector.shape_cast %263 : vector<3x2x1x128xf32> to vector<3x2x128xf32>
    "tpu.trace_start"() <{level = 10 : i32, message = "lbh,lhg->lbg"}> : () -> ()
    %cst_77 = arith.constant dense<0.000000e+00> : vector<3x2x128xf32>
    %265 = tpu.matmul %260, %130, %cst_77 {dimension_numbers = #tpu.dot_dimension_numbers<[2], [1], [1], [2], [0, 0, 0, 1, 1, 2], [0], [0]>} : vector<3x2x32xf32>, vector<3x32x128xf32>, vector<3x2x128xf32> -> vector<3x2x128xf32>
    "tpu.trace_stop"() : () -> ()
    %266 = arith.addf %264, %265 : vector<3x2x128xf32>
    %267 = vector.extract_strided_slice %266 {offsets = [0, 0, 0], sizes = [3, 2, 32], strides = [1, 1, 1]} : vector<3x2x128xf32> to vector<3x2x32xf32>
    %268 = arith.negf %267 : vector<3x2x32xf32>
    %269 = math.exp %268 : vector<3x2x32xf32>
    %cst_78 = arith.constant 1.000000e+00 : f32
    %270 = vector.broadcast %cst_78 : f32 to vector<3x2x32xf32>
    %271 = arith.addf %270, %269 : vector<3x2x32xf32>
    %272 = arith.divf %270, %271 : vector<3x2x32xf32>
    %273 = vector.extract_strided_slice %266 {offsets = [0, 0, 32], sizes = [3, 2, 32], strides = [1, 1, 1]} : vector<3x2x128xf32> to vector<3x2x32xf32>
    %274 = arith.negf %273 : vector<3x2x32xf32>
    %275 = math.exp %274 : vector<3x2x32xf32>
    %cst_79 = arith.constant 1.000000e+00 : f32
    %276 = vector.broadcast %cst_79 : f32 to vector<3x2x32xf32>
    %277 = arith.addf %276, %275 : vector<3x2x32xf32>
    %278 = arith.divf %276, %277 : vector<3x2x32xf32>
    %279 = vector.extract_strided_slice %266 {offsets = [0, 0, 64], sizes = [3, 2, 32], strides = [1, 1, 1]} : vector<3x2x128xf32> to vector<3x2x32xf32>
    %280 = math.tanh %279 : vector<3x2x32xf32>
    %281 = vector.extract_strided_slice %266 {offsets = [0, 0, 96], sizes = [3, 2, 32], strides = [1, 1, 1]} : vector<3x2x128xf32> to vector<3x2x32xf32>
    %282 = arith.negf %281 : vector<3x2x32xf32>
    %283 = math.exp %282 : vector<3x2x32xf32>
    %cst_80 = arith.constant 1.000000e+00 : f32
    %284 = vector.broadcast %cst_80 : f32 to vector<3x2x32xf32>
    %285 = arith.addf %284, %283 : vector<3x2x32xf32>
    %286 = arith.divf %284, %285 : vector<3x2x32xf32>
    %287 = arith.mulf %278, %258 : vector<3x2x32xf32>
    %288 = arith.mulf %272, %280 : vector<3x2x32xf32>
    %289 = arith.addf %287, %288 : vector<3x2x32xf32>
    %290 = math.tanh %289 : vector<3x2x32xf32>
    %291 = arith.mulf %286, %290 : vector<3x2x32xf32>
    %292 = vector.shape_cast %291 : vector<3x2x32xf32> to vector<3x2x1x32xf32>
    %c0_81 = arith.constant 0 : index
    %c0_82 = arith.constant 0 : index
    %c4 = arith.constant 4 : index
    %c0_83 = arith.constant 0 : index
    %293 = vector.load %arg22[%c0_81, %c0_82, %c4, %c0_83] : memref<3x2x8x32xf32, #tpu.memory_space<vmem>>, vector<3x2x1x32xf32>
    tpu.vector_store %arg22[%c0_81, %c0_82, %c4, %c0_83], %292 {strides = array<i32>} : memref<3x2x8x32xf32, #tpu.memory_space<vmem>>, vector<3x2x1x32xf32>,
    %294 = vector.extract_strided_slice %136 {offsets = [0, 0, 5, 0], sizes = [3, 2, 1, 128], strides = [1, 1, 1, 1]} : vector<3x2x8x128xf32> to vector<3x2x1x128xf32>
    %295 = vector.shape_cast %294 : vector<3x2x1x128xf32> to vector<3x2x128xf32>
    "tpu.trace_start"() <{level = 10 : i32, message = "lbh,lhg->lbg"}> : () -> ()
    %cst_84 = arith.constant dense<0.000000e+00> : vector<3x2x128xf32>
    %296 = tpu.matmul %291, %130, %cst_84 {dimension_numbers = #tpu.dot_dimension_numbers<[2], [1], [1], [2], [0, 0, 0, 1, 1, 2], [0], [0]>} : vector<3x2x32xf32>, vector<3x32x128xf32>, vector<3x2x128xf32> -> vector<3x2x128xf32>
    "tpu.trace_stop"() : () -> ()
    %297 = arith.addf %295, %296 : vector<3x2x128xf32>
    %298 = vector.extract_strided_slice %297 {offsets = [0, 0, 0], sizes = [3, 2, 32], strides = [1, 1, 1]} : vector<3x2x128xf32> to vector<3x2x32xf32>
    %299 = arith.negf %298 : vector<3x2x32xf32>
    %300 = math.exp %299 : vector<3x2x32xf32>
    %cst_85 = arith.constant 1.000000e+00 : f32
    %301 = vector.broadcast %cst_85 : f32 to vector<3x2x32xf32>
    %302 = arith.addf %301, %300 : vector<3x2x32xf32>
    %303 = arith.divf %301, %302 : vector<3x2x32xf32>
    %304 = vector.extract_strided_slice %297 {offsets = [0, 0, 32], sizes = [3, 2, 32], strides = [1, 1, 1]} : vector<3x2x128xf32> to vector<3x2x32xf32>
    %305 = arith.negf %304 : vector<3x2x32xf32>
    %306 = math.exp %305 : vector<3x2x32xf32>
    %cst_86 = arith.constant 1.000000e+00 : f32
    %307 = vector.broadcast %cst_86 : f32 to vector<3x2x32xf32>
    %308 = arith.addf %307, %306 : vector<3x2x32xf32>
    %309 = arith.divf %307, %308 : vector<3x2x32xf32>
    %310 = vector.extract_strided_slice %297 {offsets = [0, 0, 64], sizes = [3, 2, 32], strides = [1, 1, 1]} : vector<3x2x128xf32> to vector<3x2x32xf32>
    %311 = math.tanh %310 : vector<3x2x32xf32>
    %312 = vector.extract_strided_slice %297 {offsets = [0, 0, 96], sizes = [3, 2, 32], strides = [1, 1, 1]} : vector<3x2x128xf32> to vector<3x2x32xf32>
    %313 = arith.negf %312 : vector<3x2x32xf32>
    %314 = math.exp %313 : vector<3x2x32xf32>
    %cst_87 = arith.constant 1.000000e+00 : f32
    %315 = vector.broadcast %cst_87 : f32 to vector<3x2x32xf32>
    %316 = arith.addf %315, %314 : vector<3x2x32xf32>
    %317 = arith.divf %315, %316 : vector<3x2x32xf32>
    %318 = arith.mulf %309, %289 : vector<3x2x32xf32>
    %319 = arith.mulf %303, %311 : vector<3x2x32xf32>
    %320 = arith.addf %318, %319 : vector<3x2x32xf32>
    %321 = math.tanh %320 : vector<3x2x32xf32>
    %322 = arith.mulf %317, %321 : vector<3x2x32xf32>
    %323 = vector.shape_cast %322 : vector<3x2x32xf32> to vector<3x2x1x32xf32>
    %c0_88 = arith.constant 0 : index
    %c0_89 = arith.constant 0 : index
    %c5 = arith.constant 5 : index
    %c0_90 = arith.constant 0 : index
    %324 = vector.load %arg22[%c0_88, %c0_89, %c5, %c0_90] : memref<3x2x8x32xf32, #tpu.memory_space<vmem>>, vector<3x2x1x32xf32>
    tpu.vector_store %arg22[%c0_88, %c0_89, %c5, %c0_90], %323 {strides = array<i32>} : memref<3x2x8x32xf32, #tpu.memory_space<vmem>>, vector<3x2x1x32xf32>,
    %325 = vector.extract_strided_slice %136 {offsets = [0, 0, 6, 0], sizes = [3, 2, 1, 128], strides = [1, 1, 1, 1]} : vector<3x2x8x128xf32> to vector<3x2x1x128xf32>
    %326 = vector.shape_cast %325 : vector<3x2x1x128xf32> to vector<3x2x128xf32>
    "tpu.trace_start"() <{level = 10 : i32, message = "lbh,lhg->lbg"}> : () -> ()
    %cst_91 = arith.constant dense<0.000000e+00> : vector<3x2x128xf32>
    %327 = tpu.matmul %322, %130, %cst_91 {dimension_numbers = #tpu.dot_dimension_numbers<[2], [1], [1], [2], [0, 0, 0, 1, 1, 2], [0], [0]>} : vector<3x2x32xf32>, vector<3x32x128xf32>, vector<3x2x128xf32> -> vector<3x2x128xf32>
    "tpu.trace_stop"() : () -> ()
    %328 = arith.addf %326, %327 : vector<3x2x128xf32>
    %329 = vector.extract_strided_slice %328 {offsets = [0, 0, 0], sizes = [3, 2, 32], strides = [1, 1, 1]} : vector<3x2x128xf32> to vector<3x2x32xf32>
    %330 = arith.negf %329 : vector<3x2x32xf32>
    %331 = math.exp %330 : vector<3x2x32xf32>
    %cst_92 = arith.constant 1.000000e+00 : f32
    %332 = vector.broadcast %cst_92 : f32 to vector<3x2x32xf32>
    %333 = arith.addf %332, %331 : vector<3x2x32xf32>
    %334 = arith.divf %332, %333 : vector<3x2x32xf32>
    %335 = vector.extract_strided_slice %328 {offsets = [0, 0, 32], sizes = [3, 2, 32], strides = [1, 1, 1]} : vector<3x2x128xf32> to vector<3x2x32xf32>
    %336 = arith.negf %335 : vector<3x2x32xf32>
    %337 = math.exp %336 : vector<3x2x32xf32>
    %cst_93 = arith.constant 1.000000e+00 : f32
    %338 = vector.broadcast %cst_93 : f32 to vector<3x2x32xf32>
    %339 = arith.addf %338, %337 : vector<3x2x32xf32>
    %340 = arith.divf %338, %339 : vector<3x2x32xf32>
    %341 = vector.extract_strided_slice %328 {offsets = [0, 0, 64], sizes = [3, 2, 32], strides = [1, 1, 1]} : vector<3x2x128xf32> to vector<3x2x32xf32>
    %342 = math.tanh %341 : vector<3x2x32xf32>
    %343 = vector.extract_strided_slice %328 {offsets = [0, 0, 96], sizes = [3, 2, 32], strides = [1, 1, 1]} : vector<3x2x128xf32> to vector<3x2x32xf32>
    %344 = arith.negf %343 : vector<3x2x32xf32>
    %345 = math.exp %344 : vector<3x2x32xf32>
    %cst_94 = arith.constant 1.000000e+00 : f32
    %346 = vector.broadcast %cst_94 : f32 to vector<3x2x32xf32>
    %347 = arith.addf %346, %345 : vector<3x2x32xf32>
    %348 = arith.divf %346, %347 : vector<3x2x32xf32>
    %349 = arith.mulf %340, %320 : vector<3x2x32xf32>
    %350 = arith.mulf %334, %342 : vector<3x2x32xf32>
    %351 = arith.addf %349, %350 : vector<3x2x32xf32>
    %352 = math.tanh %351 : vector<3x2x32xf32>
    %353 = arith.mulf %348, %352 : vector<3x2x32xf32>
    %354 = vector.shape_cast %353 : vector<3x2x32xf32> to vector<3x2x1x32xf32>
    %c0_95 = arith.constant 0 : index
    %c0_96 = arith.constant 0 : index
    %c6 = arith.constant 6 : index
    %c0_97 = arith.constant 0 : index
    %355 = vector.load %arg22[%c0_95, %c0_96, %c6, %c0_97] : memref<3x2x8x32xf32, #tpu.memory_space<vmem>>, vector<3x2x1x32xf32>
    tpu.vector_store %arg22[%c0_95, %c0_96, %c6, %c0_97], %354 {strides = array<i32>} : memref<3x2x8x32xf32, #tpu.memory_space<vmem>>, vector<3x2x1x32xf32>,
    %356 = vector.extract_strided_slice %136 {offsets = [0, 0, 7, 0], sizes = [3, 2, 1, 128], strides = [1, 1, 1, 1]} : vector<3x2x8x128xf32> to vector<3x2x1x128xf32>
    %357 = vector.shape_cast %356 : vector<3x2x1x128xf32> to vector<3x2x128xf32>
    "tpu.trace_start"() <{level = 10 : i32, message = "lbh,lhg->lbg"}> : () -> ()
    %cst_98 = arith.constant dense<0.000000e+00> : vector<3x2x128xf32>
    %358 = tpu.matmul %353, %130, %cst_98 {dimension_numbers = #tpu.dot_dimension_numbers<[2], [1], [1], [2], [0, 0, 0, 1, 1, 2], [0], [0]>} : vector<3x2x32xf32>, vector<3x32x128xf32>, vector<3x2x128xf32> -> vector<3x2x128xf32>
    "tpu.trace_stop"() : () -> ()
    %359 = arith.addf %357, %358 : vector<3x2x128xf32>
    %360 = vector.extract_strided_slice %359 {offsets = [0, 0, 0], sizes = [3, 2, 32], strides = [1, 1, 1]} : vector<3x2x128xf32> to vector<3x2x32xf32>
    %361 = arith.negf %360 : vector<3x2x32xf32>
    %362 = math.exp %361 : vector<3x2x32xf32>
    %cst_99 = arith.constant 1.000000e+00 : f32
    %363 = vector.broadcast %cst_99 : f32 to vector<3x2x32xf32>
    %364 = arith.addf %363, %362 : vector<3x2x32xf32>
    %365 = arith.divf %363, %364 : vector<3x2x32xf32>
    %366 = vector.extract_strided_slice %359 {offsets = [0, 0, 32], sizes = [3, 2, 32], strides = [1, 1, 1]} : vector<3x2x128xf32> to vector<3x2x32xf32>
    %367 = arith.negf %366 : vector<3x2x32xf32>
    %368 = math.exp %367 : vector<3x2x32xf32>
    %cst_100 = arith.constant 1.000000e+00 : f32
    %369 = vector.broadcast %cst_100 : f32 to vector<3x2x32xf32>
    %370 = arith.addf %369, %368 : vector<3x2x32xf32>
    %371 = arith.divf %369, %370 : vector<3x2x32xf32>
    %372 = vector.extract_strided_slice %359 {offsets = [0, 0, 64], sizes = [3, 2, 32], strides = [1, 1, 1]} : vector<3x2x128xf32> to vector<3x2x32xf32>
    %373 = math.tanh %372 : vector<3x2x32xf32>
    %374 = vector.extract_strided_slice %359 {offsets = [0, 0, 96], sizes = [3, 2, 32], strides = [1, 1, 1]} : vector<3x2x128xf32> to vector<3x2x32xf32>
    %375 = arith.negf %374 : vector<3x2x32xf32>
    %376 = math.exp %375 : vector<3x2x32xf32>
    %cst_101 = arith.constant 1.000000e+00 : f32
    %377 = vector.broadcast %cst_101 : f32 to vector<3x2x32xf32>
    %378 = arith.addf %377, %376 : vector<3x2x32xf32>
    %379 = arith.divf %377, %378 : vector<3x2x32xf32>
    %380 = arith.mulf %371, %351 : vector<3x2x32xf32>
    %381 = arith.mulf %365, %373 : vector<3x2x32xf32>
    %382 = arith.addf %380, %381 : vector<3x2x32xf32>
    %383 = math.tanh %382 : vector<3x2x32xf32>
    %384 = arith.mulf %379, %383 : vector<3x2x32xf32>
    %385 = vector.shape_cast %384 : vector<3x2x32xf32> to vector<3x2x1x32xf32>
    %c0_102 = arith.constant 0 : index
    %c0_103 = arith.constant 0 : index
    %c7 = arith.constant 7 : index
    %c0_104 = arith.constant 0 : index
    %386 = vector.load %arg22[%c0_102, %c0_103, %c7, %c0_104] : memref<3x2x8x32xf32, #tpu.memory_space<vmem>>, vector<3x2x1x32xf32>
    tpu.vector_store %arg22[%c0_102, %c0_103, %c7, %c0_104], %385 {strides = array<i32>} : memref<3x2x8x32xf32, #tpu.memory_space<vmem>>, vector<3x2x1x32xf32>,
    %c0_105 = arith.constant 0 : index
    %c0_106 = arith.constant 0 : index
    %c0_107 = arith.constant 0 : index
    %c0_108 = arith.constant 0 : index
    %387 = vector.load %arg22[%c0_105, %c0_106, %c0_107, %c0_108] : memref<3x2x8x32xf32, #tpu.memory_space<vmem>>, vector<3x2x8x32xf32>
    %388 = vector.shape_cast %387 : vector<3x2x8x32xf32> to vector<3x16x32xf32>
    %c0_109 = arith.constant 0 : index
    %c0_110 = arith.constant 0 : index
    %c0_111 = arith.constant 0 : index
    %389 = vector.load %arg10[%c0_109, %c0_110, %c0_111] : memref<3x32x128xf32, #tpu.memory_space<vmem>>, vector<3x32x128xf32>
    %c0_112 = arith.constant 0 : index
    %c0_113 = arith.constant 0 : index
    %c0_114 = arith.constant 0 : index
    %390 = vector.load %arg11[%c0_112, %c0_113, %c0_114] : memref<3x32x128xf32, #tpu.memory_space<vmem>>, vector<3x32x128xf32>
    %c0_115 = arith.constant 0 : index
    %c0_116 = arith.constant 0 : index
    %c0_117 = arith.constant 0 : index
    %391 = vector.load %arg12[%c0_115, %c0_116, %c0_117] : memref<3x1x128xf32, #tpu.memory_space<vmem>>, vector<3x1x128xf32>
    "tpu.trace_start"() <{level = 10 : i32, message = "lnd,ldg->lng"}> : () -> ()
    %cst_118 = arith.constant dense<0.000000e+00> : vector<3x16x128xf32>
    %392 = tpu.matmul %388, %389, %cst_118 {dimension_numbers = #tpu.dot_dimension_numbers<[2], [1], [1], [2], [0, 0, 0, 1, 1, 2], [0], [0]>} : vector<3x16x32xf32>, vector<3x32x128xf32>, vector<3x16x128xf32> -> vector<3x16x128xf32>
    "tpu.trace_stop"() : () -> ()
    %393 = vector.shape_cast %392 : vector<3x16x128xf32> to vector<3x2x8x128xf32>
    %394 = vector.shape_cast %391 : vector<3x1x128xf32> to vector<3x1x1x128xf32>
    %395 = vector.broadcast %394 : vector<3x1x1x128xf32> to vector<3x2x8x128xf32>
    %396 = arith.addf %393, %395 : vector<3x2x8x128xf32>
    %cst_119 = arith.constant 0.000000e+00 : f32
    %397 = vector.broadcast %cst_119 : f32 to vector<3x2x32xf32>
    %cst_120 = arith.constant 0.000000e+00 : f32
    %398 = vector.broadcast %cst_120 : f32 to vector<3x2x32xf32>
    %399 = vector.extract_strided_slice %396 {offsets = [0, 0, 0, 0], sizes = [3, 2, 1, 128], strides = [1, 1, 1, 1]} : vector<3x2x8x128xf32> to vector<3x2x1x128xf32>
    %400 = vector.shape_cast %399 : vector<3x2x1x128xf32> to vector<3x2x128xf32>
    "tpu.trace_start"() <{level = 10 : i32, message = "lbh,lhg->lbg"}> : () -> ()
    %cst_121 = arith.constant dense<0.000000e+00> : vector<3x2x128xf32>
    %401 = tpu.matmul %397, %390, %cst_121 {dimension_numbers = #tpu.dot_dimension_numbers<[2], [1], [1], [2], [0, 0, 0, 1, 1, 2], [0], [0]>} : vector<3x2x32xf32>, vector<3x32x128xf32>, vector<3x2x128xf32> -> vector<3x2x128xf32>
    "tpu.trace_stop"() : () -> ()
    %402 = arith.addf %400, %401 : vector<3x2x128xf32>
    %403 = vector.extract_strided_slice %402 {offsets = [0, 0, 0], sizes = [3, 2, 32], strides = [1, 1, 1]} : vector<3x2x128xf32> to vector<3x2x32xf32>
    %404 = arith.negf %403 : vector<3x2x32xf32>
    %405 = math.exp %404 : vector<3x2x32xf32>
    %cst_122 = arith.constant 1.000000e+00 : f32
    %406 = vector.broadcast %cst_122 : f32 to vector<3x2x32xf32>
    %407 = arith.addf %406, %405 : vector<3x2x32xf32>
    %408 = arith.divf %406, %407 : vector<3x2x32xf32>
    %409 = vector.extract_strided_slice %402 {offsets = [0, 0, 32], sizes = [3, 2, 32], strides = [1, 1, 1]} : vector<3x2x128xf32> to vector<3x2x32xf32>
    %410 = arith.negf %409 : vector<3x2x32xf32>
    %411 = math.exp %410 : vector<3x2x32xf32>
    %cst_123 = arith.constant 1.000000e+00 : f32
    %412 = vector.broadcast %cst_123 : f32 to vector<3x2x32xf32>
    %413 = arith.addf %412, %411 : vector<3x2x32xf32>
    %414 = arith.divf %412, %413 : vector<3x2x32xf32>
    %415 = vector.extract_strided_slice %402 {offsets = [0, 0, 64], sizes = [3, 2, 32], strides = [1, 1, 1]} : vector<3x2x128xf32> to vector<3x2x32xf32>
    %416 = math.tanh %415 : vector<3x2x32xf32>
    %417 = vector.extract_strided_slice %402 {offsets = [0, 0, 96], sizes = [3, 2, 32], strides = [1, 1, 1]} : vector<3x2x128xf32> to vector<3x2x32xf32>
    %418 = arith.negf %417 : vector<3x2x32xf32>
    %419 = math.exp %418 : vector<3x2x32xf32>
    %cst_124 = arith.constant 1.000000e+00 : f32
    %420 = vector.broadcast %cst_124 : f32 to vector<3x2x32xf32>
    %421 = arith.addf %420, %419 : vector<3x2x32xf32>
    %422 = arith.divf %420, %421 : vector<3x2x32xf32>
    %423 = arith.mulf %414, %398 : vector<3x2x32xf32>
    %424 = arith.mulf %408, %416 : vector<3x2x32xf32>
    %425 = arith.addf %423, %424 : vector<3x2x32xf32>
    %426 = math.tanh %425 : vector<3x2x32xf32>
    %427 = arith.mulf %422, %426 : vector<3x2x32xf32>
    %428 = vector.shape_cast %427 : vector<3x2x32xf32> to vector<3x2x1x32xf32>
    %c0_125 = arith.constant 0 : index
    %c0_126 = arith.constant 0 : index
    %c0_127 = arith.constant 0 : index
    %c0_128 = arith.constant 0 : index
    %429 = vector.load %arg22[%c0_125, %c0_126, %c0_127, %c0_128] : memref<3x2x8x32xf32, #tpu.memory_space<vmem>>, vector<3x2x1x32xf32>
    tpu.vector_store %arg22[%c0_125, %c0_126, %c0_127, %c0_128], %428 {strides = array<i32>} : memref<3x2x8x32xf32, #tpu.memory_space<vmem>>, vector<3x2x1x32xf32>,
    %430 = vector.extract_strided_slice %396 {offsets = [0, 0, 1, 0], sizes = [3, 2, 1, 128], strides = [1, 1, 1, 1]} : vector<3x2x8x128xf32> to vector<3x2x1x128xf32>
    %431 = vector.shape_cast %430 : vector<3x2x1x128xf32> to vector<3x2x128xf32>
    "tpu.trace_start"() <{level = 10 : i32, message = "lbh,lhg->lbg"}> : () -> ()
    %cst_129 = arith.constant dense<0.000000e+00> : vector<3x2x128xf32>
    %432 = tpu.matmul %427, %390, %cst_129 {dimension_numbers = #tpu.dot_dimension_numbers<[2], [1], [1], [2], [0, 0, 0, 1, 1, 2], [0], [0]>} : vector<3x2x32xf32>, vector<3x32x128xf32>, vector<3x2x128xf32> -> vector<3x2x128xf32>
    "tpu.trace_stop"() : () -> ()
    %433 = arith.addf %431, %432 : vector<3x2x128xf32>
    %434 = vector.extract_strided_slice %433 {offsets = [0, 0, 0], sizes = [3, 2, 32], strides = [1, 1, 1]} : vector<3x2x128xf32> to vector<3x2x32xf32>
    %435 = arith.negf %434 : vector<3x2x32xf32>
    %436 = math.exp %435 : vector<3x2x32xf32>
    %cst_130 = arith.constant 1.000000e+00 : f32
    %437 = vector.broadcast %cst_130 : f32 to vector<3x2x32xf32>
    %438 = arith.addf %437, %436 : vector<3x2x32xf32>
    %439 = arith.divf %437, %438 : vector<3x2x32xf32>
    %440 = vector.extract_strided_slice %433 {offsets = [0, 0, 32], sizes = [3, 2, 32], strides = [1, 1, 1]} : vector<3x2x128xf32> to vector<3x2x32xf32>
    %441 = arith.negf %440 : vector<3x2x32xf32>
    %442 = math.exp %441 : vector<3x2x32xf32>
    %cst_131 = arith.constant 1.000000e+00 : f32
    %443 = vector.broadcast %cst_131 : f32 to vector<3x2x32xf32>
    %444 = arith.addf %443, %442 : vector<3x2x32xf32>
    %445 = arith.divf %443, %444 : vector<3x2x32xf32>
    %446 = vector.extract_strided_slice %433 {offsets = [0, 0, 64], sizes = [3, 2, 32], strides = [1, 1, 1]} : vector<3x2x128xf32> to vector<3x2x32xf32>
    %447 = math.tanh %446 : vector<3x2x32xf32>
    %448 = vector.extract_strided_slice %433 {offsets = [0, 0, 96], sizes = [3, 2, 32], strides = [1, 1, 1]} : vector<3x2x128xf32> to vector<3x2x32xf32>
    %449 = arith.negf %448 : vector<3x2x32xf32>
    %450 = math.exp %449 : vector<3x2x32xf32>
    %cst_132 = arith.constant 1.000000e+00 : f32
    %451 = vector.broadcast %cst_132 : f32 to vector<3x2x32xf32>
    %452 = arith.addf %451, %450 : vector<3x2x32xf32>
    %453 = arith.divf %451, %452 : vector<3x2x32xf32>
    %454 = arith.mulf %445, %425 : vector<3x2x32xf32>
    %455 = arith.mulf %439, %447 : vector<3x2x32xf32>
    %456 = arith.addf %454, %455 : vector<3x2x32xf32>
    %457 = math.tanh %456 : vector<3x2x32xf32>
    %458 = arith.mulf %453, %457 : vector<3x2x32xf32>
    %459 = vector.shape_cast %458 : vector<3x2x32xf32> to vector<3x2x1x32xf32>
    %c0_133 = arith.constant 0 : index
    %c0_134 = arith.constant 0 : index
    %c1_135 = arith.constant 1 : index
    %c0_136 = arith.constant 0 : index
    %460 = vector.load %arg22[%c0_133, %c0_134, %c1_135, %c0_136] : memref<3x2x8x32xf32, #tpu.memory_space<vmem>>, vector<3x2x1x32xf32>
    tpu.vector_store %arg22[%c0_133, %c0_134, %c1_135, %c0_136], %459 {strides = array<i32>} : memref<3x2x8x32xf32, #tpu.memory_space<vmem>>, vector<3x2x1x32xf32>,
    %461 = vector.extract_strided_slice %396 {offsets = [0, 0, 2, 0], sizes = [3, 2, 1, 128], strides = [1, 1, 1, 1]} : vector<3x2x8x128xf32> to vector<3x2x1x128xf32>
    %462 = vector.shape_cast %461 : vector<3x2x1x128xf32> to vector<3x2x128xf32>
    "tpu.trace_start"() <{level = 10 : i32, message = "lbh,lhg->lbg"}> : () -> ()
    %cst_137 = arith.constant dense<0.000000e+00> : vector<3x2x128xf32>
    %463 = tpu.matmul %458, %390, %cst_137 {dimension_numbers = #tpu.dot_dimension_numbers<[2], [1], [1], [2], [0, 0, 0, 1, 1, 2], [0], [0]>} : vector<3x2x32xf32>, vector<3x32x128xf32>, vector<3x2x128xf32> -> vector<3x2x128xf32>
    "tpu.trace_stop"() : () -> ()
    %464 = arith.addf %462, %463 : vector<3x2x128xf32>
    %465 = vector.extract_strided_slice %464 {offsets = [0, 0, 0], sizes = [3, 2, 32], strides = [1, 1, 1]} : vector<3x2x128xf32> to vector<3x2x32xf32>
    %466 = arith.negf %465 : vector<3x2x32xf32>
    %467 = math.exp %466 : vector<3x2x32xf32>
    %cst_138 = arith.constant 1.000000e+00 : f32
    %468 = vector.broadcast %cst_138 : f32 to vector<3x2x32xf32>
    %469 = arith.addf %468, %467 : vector<3x2x32xf32>
    %470 = arith.divf %468, %469 : vector<3x2x32xf32>
    %471 = vector.extract_strided_slice %464 {offsets = [0, 0, 32], sizes = [3, 2, 32], strides = [1, 1, 1]} : vector<3x2x128xf32> to vector<3x2x32xf32>
    %472 = arith.negf %471 : vector<3x2x32xf32>
    %473 = math.exp %472 : vector<3x2x32xf32>
    %cst_139 = arith.constant 1.000000e+00 : f32
    %474 = vector.broadcast %cst_139 : f32 to vector<3x2x32xf32>
    %475 = arith.addf %474, %473 : vector<3x2x32xf32>
    %476 = arith.divf %474, %475 : vector<3x2x32xf32>
    %477 = vector.extract_strided_slice %464 {offsets = [0, 0, 64], sizes = [3, 2, 32], strides = [1, 1, 1]} : vector<3x2x128xf32> to vector<3x2x32xf32>
    %478 = math.tanh %477 : vector<3x2x32xf32>
    %479 = vector.extract_strided_slice %464 {offsets = [0, 0, 96], sizes = [3, 2, 32], strides = [1, 1, 1]} : vector<3x2x128xf32> to vector<3x2x32xf32>
    %480 = arith.negf %479 : vector<3x2x32xf32>
    %481 = math.exp %480 : vector<3x2x32xf32>
    %cst_140 = arith.constant 1.000000e+00 : f32
    %482 = vector.broadcast %cst_140 : f32 to vector<3x2x32xf32>
    %483 = arith.addf %482, %481 : vector<3x2x32xf32>
    %484 = arith.divf %482, %483 : vector<3x2x32xf32>
    %485 = arith.mulf %476, %456 : vector<3x2x32xf32>
    %486 = arith.mulf %470, %478 : vector<3x2x32xf32>
    %487 = arith.addf %485, %486 : vector<3x2x32xf32>
    %488 = math.tanh %487 : vector<3x2x32xf32>
    %489 = arith.mulf %484, %488 : vector<3x2x32xf32>
    %490 = vector.shape_cast %489 : vector<3x2x32xf32> to vector<3x2x1x32xf32>
    %c0_141 = arith.constant 0 : index
    %c0_142 = arith.constant 0 : index
    %c2_143 = arith.constant 2 : index
    %c0_144 = arith.constant 0 : index
    %491 = vector.load %arg22[%c0_141, %c0_142, %c2_143, %c0_144] : memref<3x2x8x32xf32, #tpu.memory_space<vmem>>, vector<3x2x1x32xf32>
    tpu.vector_store %arg22[%c0_141, %c0_142, %c2_143, %c0_144], %490 {strides = array<i32>} : memref<3x2x8x32xf32, #tpu.memory_space<vmem>>, vector<3x2x1x32xf32>,
    %492 = vector.extract_strided_slice %396 {offsets = [0, 0, 3, 0], sizes = [3, 2, 1, 128], strides = [1, 1, 1, 1]} : vector<3x2x8x128xf32> to vector<3x2x1x128xf32>
    %493 = vector.shape_cast %492 : vector<3x2x1x128xf32> to vector<3x2x128xf32>
    "tpu.trace_start"() <{level = 10 : i32, message = "lbh,lhg->lbg"}> : () -> ()
    %cst_145 = arith.constant dense<0.000000e+00> : vector<3x2x128xf32>
    %494 = tpu.matmul %489, %390, %cst_145 {dimension_numbers = #tpu.dot_dimension_numbers<[2], [1], [1], [2], [0, 0, 0, 1, 1, 2], [0], [0]>} : vector<3x2x32xf32>, vector<3x32x128xf32>, vector<3x2x128xf32> -> vector<3x2x128xf32>
    "tpu.trace_stop"() : () -> ()
    %495 = arith.addf %493, %494 : vector<3x2x128xf32>
    %496 = vector.extract_strided_slice %495 {offsets = [0, 0, 0], sizes = [3, 2, 32], strides = [1, 1, 1]} : vector<3x2x128xf32> to vector<3x2x32xf32>
    %497 = arith.negf %496 : vector<3x2x32xf32>
    %498 = math.exp %497 : vector<3x2x32xf32>
    %cst_146 = arith.constant 1.000000e+00 : f32
    %499 = vector.broadcast %cst_146 : f32 to vector<3x2x32xf32>
    %500 = arith.addf %499, %498 : vector<3x2x32xf32>
    %501 = arith.divf %499, %500 : vector<3x2x32xf32>
    %502 = vector.extract_strided_slice %495 {offsets = [0, 0, 32], sizes = [3, 2, 32], strides = [1, 1, 1]} : vector<3x2x128xf32> to vector<3x2x32xf32>
    %503 = arith.negf %502 : vector<3x2x32xf32>
    %504 = math.exp %503 : vector<3x2x32xf32>
    %cst_147 = arith.constant 1.000000e+00 : f32
    %505 = vector.broadcast %cst_147 : f32 to vector<3x2x32xf32>
    %506 = arith.addf %505, %504 : vector<3x2x32xf32>
    %507 = arith.divf %505, %506 : vector<3x2x32xf32>
    %508 = vector.extract_strided_slice %495 {offsets = [0, 0, 64], sizes = [3, 2, 32], strides = [1, 1, 1]} : vector<3x2x128xf32> to vector<3x2x32xf32>
    %509 = math.tanh %508 : vector<3x2x32xf32>
    %510 = vector.extract_strided_slice %495 {offsets = [0, 0, 96], sizes = [3, 2, 32], strides = [1, 1, 1]} : vector<3x2x128xf32> to vector<3x2x32xf32>
    %511 = arith.negf %510 : vector<3x2x32xf32>
    %512 = math.exp %511 : vector<3x2x32xf32>
    %cst_148 = arith.constant 1.000000e+00 : f32
    %513 = vector.broadcast %cst_148 : f32 to vector<3x2x32xf32>
    %514 = arith.addf %513, %512 : vector<3x2x32xf32>
    %515 = arith.divf %513, %514 : vector<3x2x32xf32>
    %516 = arith.mulf %507, %487 : vector<3x2x32xf32>
    %517 = arith.mulf %501, %509 : vector<3x2x32xf32>
    %518 = arith.addf %516, %517 : vector<3x2x32xf32>
    %519 = math.tanh %518 : vector<3x2x32xf32>
    %520 = arith.mulf %515, %519 : vector<3x2x32xf32>
    %521 = vector.shape_cast %520 : vector<3x2x32xf32> to vector<3x2x1x32xf32>
    %c0_149 = arith.constant 0 : index
    %c0_150 = arith.constant 0 : index
    %c3_151 = arith.constant 3 : index
    %c0_152 = arith.constant 0 : index
    %522 = vector.load %arg22[%c0_149, %c0_150, %c3_151, %c0_152] : memref<3x2x8x32xf32, #tpu.memory_space<vmem>>, vector<3x2x1x32xf32>
    tpu.vector_store %arg22[%c0_149, %c0_150, %c3_151, %c0_152], %521 {strides = array<i32>} : memref<3x2x8x32xf32, #tpu.memory_space<vmem>>, vector<3x2x1x32xf32>,
    %523 = vector.extract_strided_slice %396 {offsets = [0, 0, 4, 0], sizes = [3, 2, 1, 128], strides = [1, 1, 1, 1]} : vector<3x2x8x128xf32> to vector<3x2x1x128xf32>
    %524 = vector.shape_cast %523 : vector<3x2x1x128xf32> to vector<3x2x128xf32>
    "tpu.trace_start"() <{level = 10 : i32, message = "lbh,lhg->lbg"}> : () -> ()
    %cst_153 = arith.constant dense<0.000000e+00> : vector<3x2x128xf32>
    %525 = tpu.matmul %520, %390, %cst_153 {dimension_numbers = #tpu.dot_dimension_numbers<[2], [1], [1], [2], [0, 0, 0, 1, 1, 2], [0], [0]>} : vector<3x2x32xf32>, vector<3x32x128xf32>, vector<3x2x128xf32> -> vector<3x2x128xf32>
    "tpu.trace_stop"() : () -> ()
    %526 = arith.addf %524, %525 : vector<3x2x128xf32>
    %527 = vector.extract_strided_slice %526 {offsets = [0, 0, 0], sizes = [3, 2, 32], strides = [1, 1, 1]} : vector<3x2x128xf32> to vector<3x2x32xf32>
    %528 = arith.negf %527 : vector<3x2x32xf32>
    %529 = math.exp %528 : vector<3x2x32xf32>
    %cst_154 = arith.constant 1.000000e+00 : f32
    %530 = vector.broadcast %cst_154 : f32 to vector<3x2x32xf32>
    %531 = arith.addf %530, %529 : vector<3x2x32xf32>
    %532 = arith.divf %530, %531 : vector<3x2x32xf32>
    %533 = vector.extract_strided_slice %526 {offsets = [0, 0, 32], sizes = [3, 2, 32], strides = [1, 1, 1]} : vector<3x2x128xf32> to vector<3x2x32xf32>
    %534 = arith.negf %533 : vector<3x2x32xf32>
    %535 = math.exp %534 : vector<3x2x32xf32>
    %cst_155 = arith.constant 1.000000e+00 : f32
    %536 = vector.broadcast %cst_155 : f32 to vector<3x2x32xf32>
    %537 = arith.addf %536, %535 : vector<3x2x32xf32>
    %538 = arith.divf %536, %537 : vector<3x2x32xf32>
    %539 = vector.extract_strided_slice %526 {offsets = [0, 0, 64], sizes = [3, 2, 32], strides = [1, 1, 1]} : vector<3x2x128xf32> to vector<3x2x32xf32>
    %540 = math.tanh %539 : vector<3x2x32xf32>
    %541 = vector.extract_strided_slice %526 {offsets = [0, 0, 96], sizes = [3, 2, 32], strides = [1, 1, 1]} : vector<3x2x128xf32> to vector<3x2x32xf32>
    %542 = arith.negf %541 : vector<3x2x32xf32>
    %543 = math.exp %542 : vector<3x2x32xf32>
    %cst_156 = arith.constant 1.000000e+00 : f32
    %544 = vector.broadcast %cst_156 : f32 to vector<3x2x32xf32>
    %545 = arith.addf %544, %543 : vector<3x2x32xf32>
    %546 = arith.divf %544, %545 : vector<3x2x32xf32>
    %547 = arith.mulf %538, %518 : vector<3x2x32xf32>
    %548 = arith.mulf %532, %540 : vector<3x2x32xf32>
    %549 = arith.addf %547, %548 : vector<3x2x32xf32>
    %550 = math.tanh %549 : vector<3x2x32xf32>
    %551 = arith.mulf %546, %550 : vector<3x2x32xf32>
    %552 = vector.shape_cast %551 : vector<3x2x32xf32> to vector<3x2x1x32xf32>
    %c0_157 = arith.constant 0 : index
    %c0_158 = arith.constant 0 : index
    %c4_159 = arith.constant 4 : index
    %c0_160 = arith.constant 0 : index
    %553 = vector.load %arg22[%c0_157, %c0_158, %c4_159, %c0_160] : memref<3x2x8x32xf32, #tpu.memory_space<vmem>>, vector<3x2x1x32xf32>
    tpu.vector_store %arg22[%c0_157, %c0_158, %c4_159, %c0_160], %552 {strides = array<i32>} : memref<3x2x8x32xf32, #tpu.memory_space<vmem>>, vector<3x2x1x32xf32>,
    %554 = vector.extract_strided_slice %396 {offsets = [0, 0, 5, 0], sizes = [3, 2, 1, 128], strides = [1, 1, 1, 1]} : vector<3x2x8x128xf32> to vector<3x2x1x128xf32>
    %555 = vector.shape_cast %554 : vector<3x2x1x128xf32> to vector<3x2x128xf32>
    "tpu.trace_start"() <{level = 10 : i32, message = "lbh,lhg->lbg"}> : () -> ()
    %cst_161 = arith.constant dense<0.000000e+00> : vector<3x2x128xf32>
    %556 = tpu.matmul %551, %390, %cst_161 {dimension_numbers = #tpu.dot_dimension_numbers<[2], [1], [1], [2], [0, 0, 0, 1, 1, 2], [0], [0]>} : vector<3x2x32xf32>, vector<3x32x128xf32>, vector<3x2x128xf32> -> vector<3x2x128xf32>
    "tpu.trace_stop"() : () -> ()
    %557 = arith.addf %555, %556 : vector<3x2x128xf32>
    %558 = vector.extract_strided_slice %557 {offsets = [0, 0, 0], sizes = [3, 2, 32], strides = [1, 1, 1]} : vector<3x2x128xf32> to vector<3x2x32xf32>
    %559 = arith.negf %558 : vector<3x2x32xf32>
    %560 = math.exp %559 : vector<3x2x32xf32>
    %cst_162 = arith.constant 1.000000e+00 : f32
    %561 = vector.broadcast %cst_162 : f32 to vector<3x2x32xf32>
    %562 = arith.addf %561, %560 : vector<3x2x32xf32>
    %563 = arith.divf %561, %562 : vector<3x2x32xf32>
    %564 = vector.extract_strided_slice %557 {offsets = [0, 0, 32], sizes = [3, 2, 32], strides = [1, 1, 1]} : vector<3x2x128xf32> to vector<3x2x32xf32>
    %565 = arith.negf %564 : vector<3x2x32xf32>
    %566 = math.exp %565 : vector<3x2x32xf32>
    %cst_163 = arith.constant 1.000000e+00 : f32
    %567 = vector.broadcast %cst_163 : f32 to vector<3x2x32xf32>
    %568 = arith.addf %567, %566 : vector<3x2x32xf32>
    %569 = arith.divf %567, %568 : vector<3x2x32xf32>
    %570 = vector.extract_strided_slice %557 {offsets = [0, 0, 64], sizes = [3, 2, 32], strides = [1, 1, 1]} : vector<3x2x128xf32> to vector<3x2x32xf32>
    %571 = math.tanh %570 : vector<3x2x32xf32>
    %572 = vector.extract_strided_slice %557 {offsets = [0, 0, 96], sizes = [3, 2, 32], strides = [1, 1, 1]} : vector<3x2x128xf32> to vector<3x2x32xf32>
    %573 = arith.negf %572 : vector<3x2x32xf32>
    %574 = math.exp %573 : vector<3x2x32xf32>
    %cst_164 = arith.constant 1.000000e+00 : f32
    %575 = vector.broadcast %cst_164 : f32 to vector<3x2x32xf32>
    %576 = arith.addf %575, %574 : vector<3x2x32xf32>
    %577 = arith.divf %575, %576 : vector<3x2x32xf32>
    %578 = arith.mulf %569, %549 : vector<3x2x32xf32>
    %579 = arith.mulf %563, %571 : vector<3x2x32xf32>
    %580 = arith.addf %578, %579 : vector<3x2x32xf32>
    %581 = math.tanh %580 : vector<3x2x32xf32>
    %582 = arith.mulf %577, %581 : vector<3x2x32xf32>
    %583 = vector.shape_cast %582 : vector<3x2x32xf32> to vector<3x2x1x32xf32>
    %c0_165 = arith.constant 0 : index
    %c0_166 = arith.constant 0 : index
    %c5_167 = arith.constant 5 : index
    %c0_168 = arith.constant 0 : index
    %584 = vector.load %arg22[%c0_165, %c0_166, %c5_167, %c0_168] : memref<3x2x8x32xf32, #tpu.memory_space<vmem>>, vector<3x2x1x32xf32>
    tpu.vector_store %arg22[%c0_165, %c0_166, %c5_167, %c0_168], %583 {strides = array<i32>} : memref<3x2x8x32xf32, #tpu.memory_space<vmem>>, vector<3x2x1x32xf32>,
    %585 = vector.extract_strided_slice %396 {offsets = [0, 0, 6, 0], sizes = [3, 2, 1, 128], strides = [1, 1, 1, 1]} : vector<3x2x8x128xf32> to vector<3x2x1x128xf32>
    %586 = vector.shape_cast %585 : vector<3x2x1x128xf32> to vector<3x2x128xf32>
    "tpu.trace_start"() <{level = 10 : i32, message = "lbh,lhg->lbg"}> : () -> ()
    %cst_169 = arith.constant dense<0.000000e+00> : vector<3x2x128xf32>
    %587 = tpu.matmul %582, %390, %cst_169 {dimension_numbers = #tpu.dot_dimension_numbers<[2], [1], [1], [2], [0, 0, 0, 1, 1, 2], [0], [0]>} : vector<3x2x32xf32>, vector<3x32x128xf32>, vector<3x2x128xf32> -> vector<3x2x128xf32>
    "tpu.trace_stop"() : () -> ()
    %588 = arith.addf %586, %587 : vector<3x2x128xf32>
    %589 = vector.extract_strided_slice %588 {offsets = [0, 0, 0], sizes = [3, 2, 32], strides = [1, 1, 1]} : vector<3x2x128xf32> to vector<3x2x32xf32>
    %590 = arith.negf %589 : vector<3x2x32xf32>
    %591 = math.exp %590 : vector<3x2x32xf32>
    %cst_170 = arith.constant 1.000000e+00 : f32
    %592 = vector.broadcast %cst_170 : f32 to vector<3x2x32xf32>
    %593 = arith.addf %592, %591 : vector<3x2x32xf32>
    %594 = arith.divf %592, %593 : vector<3x2x32xf32>
    %595 = vector.extract_strided_slice %588 {offsets = [0, 0, 32], sizes = [3, 2, 32], strides = [1, 1, 1]} : vector<3x2x128xf32> to vector<3x2x32xf32>
    %596 = arith.negf %595 : vector<3x2x32xf32>
    %597 = math.exp %596 : vector<3x2x32xf32>
    %cst_171 = arith.constant 1.000000e+00 : f32
    %598 = vector.broadcast %cst_171 : f32 to vector<3x2x32xf32>
    %599 = arith.addf %598, %597 : vector<3x2x32xf32>
    %600 = arith.divf %598, %599 : vector<3x2x32xf32>
    %601 = vector.extract_strided_slice %588 {offsets = [0, 0, 64], sizes = [3, 2, 32], strides = [1, 1, 1]} : vector<3x2x128xf32> to vector<3x2x32xf32>
    %602 = math.tanh %601 : vector<3x2x32xf32>
    %603 = vector.extract_strided_slice %588 {offsets = [0, 0, 96], sizes = [3, 2, 32], strides = [1, 1, 1]} : vector<3x2x128xf32> to vector<3x2x32xf32>
    %604 = arith.negf %603 : vector<3x2x32xf32>
    %605 = math.exp %604 : vector<3x2x32xf32>
    %cst_172 = arith.constant 1.000000e+00 : f32
    %606 = vector.broadcast %cst_172 : f32 to vector<3x2x32xf32>
    %607 = arith.addf %606, %605 : vector<3x2x32xf32>
    %608 = arith.divf %606, %607 : vector<3x2x32xf32>
    %609 = arith.mulf %600, %580 : vector<3x2x32xf32>
    %610 = arith.mulf %594, %602 : vector<3x2x32xf32>
    %611 = arith.addf %609, %610 : vector<3x2x32xf32>
    %612 = math.tanh %611 : vector<3x2x32xf32>
    %613 = arith.mulf %608, %612 : vector<3x2x32xf32>
    %614 = vector.shape_cast %613 : vector<3x2x32xf32> to vector<3x2x1x32xf32>
    %c0_173 = arith.constant 0 : index
    %c0_174 = arith.constant 0 : index
    %c6_175 = arith.constant 6 : index
    %c0_176 = arith.constant 0 : index
    %615 = vector.load %arg22[%c0_173, %c0_174, %c6_175, %c0_176] : memref<3x2x8x32xf32, #tpu.memory_space<vmem>>, vector<3x2x1x32xf32>
    tpu.vector_store %arg22[%c0_173, %c0_174, %c6_175, %c0_176], %614 {strides = array<i32>} : memref<3x2x8x32xf32, #tpu.memory_space<vmem>>, vector<3x2x1x32xf32>,
    %616 = vector.extract_strided_slice %396 {offsets = [0, 0, 7, 0], sizes = [3, 2, 1, 128], strides = [1, 1, 1, 1]} : vector<3x2x8x128xf32> to vector<3x2x1x128xf32>
    %617 = vector.shape_cast %616 : vector<3x2x1x128xf32> to vector<3x2x128xf32>
    "tpu.trace_start"() <{level = 10 : i32, message = "lbh,lhg->lbg"}> : () -> ()
    %cst_177 = arith.constant dense<0.000000e+00> : vector<3x2x128xf32>
    %618 = tpu.matmul %613, %390, %cst_177 {dimension_numbers = #tpu.dot_dimension_numbers<[2], [1], [1], [2], [0, 0, 0, 1, 1, 2], [0], [0]>} : vector<3x2x32xf32>, vector<3x32x128xf32>, vector<3x2x128xf32> -> vector<3x2x128xf32>
    "tpu.trace_stop"() : () -> ()
    %619 = arith.addf %617, %618 : vector<3x2x128xf32>
    %620 = vector.extract_strided_slice %619 {offsets = [0, 0, 0], sizes = [3, 2, 32], strides = [1, 1, 1]} : vector<3x2x128xf32> to vector<3x2x32xf32>
    %621 = arith.negf %620 : vector<3x2x32xf32>
    %622 = math.exp %621 : vector<3x2x32xf32>
    %cst_178 = arith.constant 1.000000e+00 : f32
    %623 = vector.broadcast %cst_178 : f32 to vector<3x2x32xf32>
    %624 = arith.addf %623, %622 : vector<3x2x32xf32>
    %625 = arith.divf %623, %624 : vector<3x2x32xf32>
    %626 = vector.extract_strided_slice %619 {offsets = [0, 0, 32], sizes = [3, 2, 32], strides = [1, 1, 1]} : vector<3x2x128xf32> to vector<3x2x32xf32>
    %627 = arith.negf %626 : vector<3x2x32xf32>
    %628 = math.exp %627 : vector<3x2x32xf32>
    %cst_179 = arith.constant 1.000000e+00 : f32
    %629 = vector.broadcast %cst_179 : f32 to vector<3x2x32xf32>
    %630 = arith.addf %629, %628 : vector<3x2x32xf32>
    %631 = arith.divf %629, %630 : vector<3x2x32xf32>
    %632 = vector.extract_strided_slice %619 {offsets = [0, 0, 64], sizes = [3, 2, 32], strides = [1, 1, 1]} : vector<3x2x128xf32> to vector<3x2x32xf32>
    %633 = math.tanh %632 : vector<3x2x32xf32>
    %634 = vector.extract_strided_slice %619 {offsets = [0, 0, 96], sizes = [3, 2, 32], strides = [1, 1, 1]} : vector<3x2x128xf32> to vector<3x2x32xf32>
    %635 = arith.negf %634 : vector<3x2x32xf32>
    %636 = math.exp %635 : vector<3x2x32xf32>
    %cst_180 = arith.constant 1.000000e+00 : f32
    %637 = vector.broadcast %cst_180 : f32 to vector<3x2x32xf32>
    %638 = arith.addf %637, %636 : vector<3x2x32xf32>
    %639 = arith.divf %637, %638 : vector<3x2x32xf32>
    %640 = arith.mulf %631, %611 : vector<3x2x32xf32>
    %641 = arith.mulf %625, %633 : vector<3x2x32xf32>
    %642 = arith.addf %640, %641 : vector<3x2x32xf32>
    %643 = math.tanh %642 : vector<3x2x32xf32>
    %644 = arith.mulf %639, %643 : vector<3x2x32xf32>
    %645 = vector.shape_cast %644 : vector<3x2x32xf32> to vector<3x2x1x32xf32>
    %c0_181 = arith.constant 0 : index
    %c0_182 = arith.constant 0 : index
    %c7_183 = arith.constant 7 : index
    %c0_184 = arith.constant 0 : index
    %646 = vector.load %arg22[%c0_181, %c0_182, %c7_183, %c0_184] : memref<3x2x8x32xf32, #tpu.memory_space<vmem>>, vector<3x2x1x32xf32>
    tpu.vector_store %arg22[%c0_181, %c0_182, %c7_183, %c0_184], %645 {strides = array<i32>} : memref<3x2x8x32xf32, #tpu.memory_space<vmem>>, vector<3x2x1x32xf32>,
    %c0_185 = arith.constant 0 : index
    %c0_186 = arith.constant 0 : index
    %c0_187 = arith.constant 0 : index
    %c0_188 = arith.constant 0 : index
    %647 = vector.load %arg22[%c0_185, %c0_186, %c0_187, %c0_188] : memref<3x2x8x32xf32, #tpu.memory_space<vmem>>, vector<3x2x8x32xf32>
    %c0_189 = arith.constant 0 : index
    %c0_190 = arith.constant 0 : index
    %c0_191 = arith.constant 0 : index
    %648 = vector.load %arg13[%c0_189, %c0_190, %c0_191] : memref<3x8x32xf32, #tpu.memory_space<vmem>>, vector<3x8x32xf32>
    %649 = vector.extract_strided_slice %647 {offsets = [0, 0, 0, 0], sizes = [1, 2, 8, 32], strides = [1, 1, 1, 1]} : vector<3x2x8x32xf32> to vector<1x2x8x32xf32>
    %650 = vector.shape_cast %649 : vector<1x2x8x32xf32> to vector<2x8x32xf32>
    %651 = vector.extract_strided_slice %648 {offsets = [0, 0, 0], sizes = [1, 8, 32], strides = [1, 1, 1]} : vector<3x8x32xf32> to vector<1x8x32xf32>
    %652 = vector.shape_cast %651 : vector<1x8x32xf32> to vector<8x32xf32>
    %653 = vector.shape_cast %652 : vector<8x32xf32> to vector<1x8x32xf32>
    %654 = vector.broadcast %653 : vector<1x8x32xf32> to vector<2x8x32xf32>
    %655 = arith.mulf %650, %654 : vector<2x8x32xf32>
    %656 = vector.extract_strided_slice %647 {offsets = [1, 0, 0, 0], sizes = [1, 2, 8, 32], strides = [1, 1, 1, 1]} : vector<3x2x8x32xf32> to vector<1x2x8x32xf32>
    %657 = vector.shape_cast %656 : vector<1x2x8x32xf32> to vector<2x8x32xf32>
    %658 = vector.extract_strided_slice %648 {offsets = [1, 0, 0], sizes = [1, 8, 32], strides = [1, 1, 1]} : vector<3x8x32xf32> to vector<1x8x32xf32>
    %659 = vector.shape_cast %658 : vector<1x8x32xf32> to vector<8x32xf32>
    %660 = vector.shape_cast %659 : vector<8x32xf32> to vector<1x8x32xf32>
    %661 = vector.broadcast %660 : vector<1x8x32xf32> to vector<2x8x32xf32>
    %662 = arith.mulf %657, %661 : vector<2x8x32xf32>
    %663 = arith.addf %655, %662 : vector<2x8x32xf32>
    %664 = vector.extract_strided_slice %647 {offsets = [2, 0, 0, 0], sizes = [1, 2, 8, 32], strides = [1, 1, 1, 1]} : vector<3x2x8x32xf32> to vector<1x2x8x32xf32>
    %665 = vector.shape_cast %664 : vector<1x2x8x32xf32> to vector<2x8x32xf32>
    %666 = vector.extract_strided_slice %648 {offsets = [2, 0, 0], sizes = [1, 8, 32], strides = [1, 1, 1]} : vector<3x8x32xf32> to vector<1x8x32xf32>
    %667 = vector.shape_cast %666 : vector<1x8x32xf32> to vector<8x32xf32>
    %668 = vector.shape_cast %667 : vector<8x32xf32> to vector<1x8x32xf32>
    %669 = vector.broadcast %668 : vector<1x8x32xf32> to vector<2x8x32xf32>
    %670 = arith.mulf %665, %669 : vector<2x8x32xf32>
    %671 = arith.addf %663, %670 : vector<2x8x32xf32>
    %c0_192 = arith.constant 0 : index
    %c0_193 = arith.constant 0 : index
    %672 = vector.load %arg14[%c0_192, %c0_193] : memref<1x32xf32, #tpu.memory_space<vmem>>, vector<1x32xf32>
    %673 = vector.shape_cast %672 : vector<1x32xf32> to vector<1x1x32xf32>
    %674 = vector.broadcast %673 : vector<1x1x32xf32> to vector<2x8x32xf32>
    %675 = arith.mulf %671, %674 : vector<2x8x32xf32>
    %c0_194 = arith.constant 0 : index
    %c0_195 = arith.constant 0 : index
    %676 = vector.load %arg15[%c0_194, %c0_195] : memref<1x32xf32, #tpu.memory_space<vmem>>, vector<1x32xf32>
    %677 = vector.shape_cast %676 : vector<1x32xf32> to vector<1x1x32xf32>
    %678 = vector.broadcast %677 : vector<1x1x32xf32> to vector<2x8x32xf32>
    %679 = arith.addf %675, %678 : vector<2x8x32xf32>
    %680 = vector.extract_strided_slice %679 {offsets = [0, 0, 0], sizes = [2, 1, 32], strides = [1, 1, 1]} : vector<2x8x32xf32> to vector<2x1x32xf32>
    %681 = vector.shape_cast %680 : vector<2x1x32xf32> to vector<2x32xf32>
    %c0_196 = arith.constant 0 : index
    %c0_197 = arith.constant 0 : index
    %682 = vector.load %arg23[%c0_196, %c0_197] : memref<2x256xf32, #tpu.memory_space<vmem>>, vector<2x32xf32>
    tpu.vector_store %arg23[%c0_196, %c0_197], %681 {strides = array<i32>} : memref<2x256xf32, #tpu.memory_space<vmem>>, vector<2x32xf32>,
    %683 = vector.extract_strided_slice %679 {offsets = [0, 1, 0], sizes = [2, 1, 32], strides = [1, 1, 1]} : vector<2x8x32xf32> to vector<2x1x32xf32>
    %684 = vector.shape_cast %683 : vector<2x1x32xf32> to vector<2x32xf32>
    %c0_198 = arith.constant 0 : index
    %c32 = arith.constant 32 : index
    %685 = vector.load %arg23[%c0_198, %c32] : memref<2x256xf32, #tpu.memory_space<vmem>>, vector<2x32xf32>
    tpu.vector_store %arg23[%c0_198, %c32], %684 {strides = array<i32>} : memref<2x256xf32, #tpu.memory_space<vmem>>, vector<2x32xf32>,
    %686 = vector.extract_strided_slice %679 {offsets = [0, 2, 0], sizes = [2, 1, 32], strides = [1, 1, 1]} : vector<2x8x32xf32> to vector<2x1x32xf32>
    %687 = vector.shape_cast %686 : vector<2x1x32xf32> to vector<2x32xf32>
    %c0_199 = arith.constant 0 : index
    %c64 = arith.constant 64 : index
    %688 = vector.load %arg23[%c0_199, %c64] : memref<2x256xf32, #tpu.memory_space<vmem>>, vector<2x32xf32>
    tpu.vector_store %arg23[%c0_199, %c64], %687 {strides = array<i32>} : memref<2x256xf32, #tpu.memory_space<vmem>>, vector<2x32xf32>,
    %689 = vector.extract_strided_slice %679 {offsets = [0, 3, 0], sizes = [2, 1, 32], strides = [1, 1, 1]} : vector<2x8x32xf32> to vector<2x1x32xf32>
    %690 = vector.shape_cast %689 : vector<2x1x32xf32> to vector<2x32xf32>
    %c0_200 = arith.constant 0 : index
    %c96 = arith.constant 96 : index
    %691 = vector.load %arg23[%c0_200, %c96] : memref<2x256xf32, #tpu.memory_space<vmem>>, vector<2x32xf32>
    tpu.vector_store %arg23[%c0_200, %c96], %690 {strides = array<i32>} : memref<2x256xf32, #tpu.memory_space<vmem>>, vector<2x32xf32>,
    %692 = vector.extract_strided_slice %679 {offsets = [0, 4, 0], sizes = [2, 1, 32], strides = [1, 1, 1]} : vector<2x8x32xf32> to vector<2x1x32xf32>
    %693 = vector.shape_cast %692 : vector<2x1x32xf32> to vector<2x32xf32>
    %c0_201 = arith.constant 0 : index
    %c128 = arith.constant 128 : index
    %694 = vector.load %arg23[%c0_201, %c128] : memref<2x256xf32, #tpu.memory_space<vmem>>, vector<2x32xf32>
    tpu.vector_store %arg23[%c0_201, %c128], %693 {strides = array<i32>} : memref<2x256xf32, #tpu.memory_space<vmem>>, vector<2x32xf32>,
    %695 = vector.extract_strided_slice %679 {offsets = [0, 5, 0], sizes = [2, 1, 32], strides = [1, 1, 1]} : vector<2x8x32xf32> to vector<2x1x32xf32>
    %696 = vector.shape_cast %695 : vector<2x1x32xf32> to vector<2x32xf32>
    %c0_202 = arith.constant 0 : index
    %c160 = arith.constant 160 : index
    %697 = vector.load %arg23[%c0_202, %c160] : memref<2x256xf32, #tpu.memory_space<vmem>>, vector<2x32xf32>
    tpu.vector_store %arg23[%c0_202, %c160], %696 {strides = array<i32>} : memref<2x256xf32, #tpu.memory_space<vmem>>, vector<2x32xf32>,
    %698 = vector.extract_strided_slice %679 {offsets = [0, 6, 0], sizes = [2, 1, 32], strides = [1, 1, 1]} : vector<2x8x32xf32> to vector<2x1x32xf32>
    %699 = vector.shape_cast %698 : vector<2x1x32xf32> to vector<2x32xf32>
    %c0_203 = arith.constant 0 : index
    %c192 = arith.constant 192 : index
    %700 = vector.load %arg23[%c0_203, %c192] : memref<2x256xf32, #tpu.memory_space<vmem>>, vector<2x32xf32>
    tpu.vector_store %arg23[%c0_203, %c192], %699 {strides = array<i32>} : memref<2x256xf32, #tpu.memory_space<vmem>>, vector<2x32xf32>,
    %701 = vector.extract_strided_slice %679 {offsets = [0, 7, 0], sizes = [2, 1, 32], strides = [1, 1, 1]} : vector<2x8x32xf32> to vector<2x1x32xf32>
    %702 = vector.shape_cast %701 : vector<2x1x32xf32> to vector<2x32xf32>
    %c0_204 = arith.constant 0 : index
    %c224 = arith.constant 224 : index
    %703 = vector.load %arg23[%c0_204, %c224] : memref<2x256xf32, #tpu.memory_space<vmem>>, vector<2x32xf32>
    tpu.vector_store %arg23[%c0_204, %c224], %702 {strides = array<i32>} : memref<2x256xf32, #tpu.memory_space<vmem>>, vector<2x32xf32>,
    %c0_205 = arith.constant 0 : index
    %c0_206 = arith.constant 0 : index
    %704 = vector.load %arg23[%c0_205, %c0_206] : memref<2x256xf32, #tpu.memory_space<vmem>>, vector<2x256xf32>
    %c0_207 = arith.constant 0 : index
    %c0_208 = arith.constant 0 : index
    %705 = vector.load %arg16[%c0_207, %c0_208] : memref<256x32xf32, #tpu.memory_space<vmem>>, vector<256x32xf32>
    %cst_209 = arith.constant dense<0.000000e+00> : vector<2x32xf32>
    %706 = tpu.matmul %704, %705, %cst_209 {dimension_numbers = #tpu.dot_dimension_numbers<[1], [0], [0], [1], [0, 0, 1, 1], [], []>} : vector<2x256xf32>, vector<256x32xf32>, vector<2x32xf32> -> vector<2x32xf32>
    %c0_210 = arith.constant 0 : index
    %c0_211 = arith.constant 0 : index
    %707 = vector.load %arg17[%c0_210, %c0_211] : memref<1x32xf32, #tpu.memory_space<vmem>>, vector<1x32xf32>
    %708 = vector.broadcast %707 : vector<1x32xf32> to vector<2x32xf32>
    %709 = arith.addf %706, %708 : vector<2x32xf32>
    %cst_212 = arith.constant 0.000000e+00 : f32
    %710 = vector.broadcast %cst_212 : f32 to vector<2x32xf32>
    %711 = arith.maximumf %709, %710 : vector<2x32xf32>
    %c0_213 = arith.constant 0 : index
    %c0_214 = arith.constant 0 : index
    %712 = vector.load %arg18[%c0_213, %c0_214] : memref<32x5xf32, #tpu.memory_space<vmem>>, vector<32x5xf32>
    %cst_215 = arith.constant dense<0.000000e+00> : vector<2x5xf32>
    %713 = tpu.matmul %711, %712, %cst_215 {dimension_numbers = #tpu.dot_dimension_numbers<[1], [0], [0], [1], [0, 0, 1, 1], [], []>} : vector<2x32xf32>, vector<32x5xf32>, vector<2x5xf32> -> vector<2x5xf32>
    %c0_216 = arith.constant 0 : index
    %c0_217 = arith.constant 0 : index
    %714 = vector.load %arg19[%c0_216, %c0_217] : memref<1x5xf32, #tpu.memory_space<vmem>>, vector<1x5xf32>
    %715 = vector.broadcast %714 : vector<1x5xf32> to vector<2x5xf32>
    %716 = arith.addf %713, %715 : vector<2x5xf32>
    %c0_218 = arith.constant 0 : index
    %c0_219 = arith.constant 0 : index
    %717 = vector.load %arg21[%c0_218, %c0_219] : memref<2x5xf32, #tpu.memory_space<vmem>>, vector<2x5xf32>
    tpu.vector_store %arg21[%c0_218, %c0_219], %716 {strides = array<i32>} : memref<2x5xf32, #tpu.memory_space<vmem>>, vector<2x5xf32>,
    return
  }
}

</mosaic_0001>

<bundles_post_ra>
// kernel: forward.1
= control target key start
LH: loop header
LB: loop body
LE: loop exit
PB: predicated region body
PF: predicated region fallthrough
CT: control target
= control target key end

     0   :  { %s14845_s0 = inlined_call_operand.vmem [shape: f32[2,8,16], index: 0, kind: input, shape index: {}]   ;;  %s14846_s1 = inlined_call_operand.vmem [shape: f32[16,16], index: 1, kind: input, shape index: {}]   ;;  %s14847_s2 = inlined_call_operand.vmem [shape: f32[16,16], index: 2, kind: input, shape index: {}]   ;;  %s14848_s3 = inlined_call_operand.vmem [shape: f32[16,16], index: 3, kind: input, shape index: {}]   ;;  %s14849_s4 = inlined_call_operand.vmem [shape: f32[3,8,16], index: 4, kind: input, shape index: {}]   ;;  %s14850_s5 = inlined_call_operand.vmem [shape: f32[3,1,16], index: 5, kind: input, shape index: {}]   ;;  %s14851_s6 = inlined_call_operand.vmem [shape: f32[3,1,16], index: 6, kind: input, shape index: {}]   ;;  %s14852_s7 = inlined_call_operand.vmem [shape: f32[3,16,128], index: 7, kind: input, shape index: {}]   ;;  %s14853_s8 = inlined_call_operand.vmem [shape: f32[3,32,128], index: 8, kind: input, shape index: {}]   ;;  %s14854_s9 = inlined_call_operand.vmem [shape: f32[3,1,128], index: 9, kind: input, shape index: {}]   ;;  %s14855_s10 = inlined_call_operand.vmem [shape: f32[3,32,128], index: 10, kind: input, shape index: {}]   ;;  %s14856_s11 = inlined_call_operand.vmem [shape: f32[3,32,128], index: 11, kind: input, shape index: {}]   ;;  %s14857_s12 = inlined_call_operand.vmem [shape: f32[3,1,128], index: 12, kind: input, shape index: {}]   ;;  %s14858_s13 = inlined_call_operand.vmem [shape: f32[3,8,32], index: 13, kind: input, shape index: {}]   ;;  %s14859_s14 = inlined_call_operand.vmem [shape: f32[1,32], index: 14, kind: input, shape index: {}]   ;;  %s14860_s15 = inlined_call_operand.vmem [shape: f32[1,32], index: 15, kind: input, shape index: {}]   ;;  %s14861_s16 = inlined_call_operand.vmem [shape: f32[256,32], index: 16, kind: input, shape index: {}]   ;;  %s14862_s17 = inlined_call_operand.vmem [shape: f32[1,32], index: 17, kind: input, shape index: {}]   ;;  %s14863_s18 = inlined_call_operand.vmem [shape: f32[32,5], index: 18, kind: input, shape index: {}]   ;;  %s14864_s19 = inlined_call_operand.vmem [shape: f32[1,5], index: 19, kind: input, shape index: {}]   ;;  %s14865_s20 = inlined_call_operand.<no memory space> [shape: f32[1], index: 20, kind: input, shape index: {}]   ;;  %s14866_s21 = inlined_call_operand.hbm [shape: f32[2,5], index: 21, kind: output, shape index: {}]  }
   0x1   :  { %14890 = sst [smem:[#allocation15_spill]] %s14845_s0 }
   0x2   :  { %14891 = sst [smem:[#allocation16_spill]] %s14846_s1 }
   0x3   :  { %14892 = sst [smem:[#allocation17_spill]] %s14847_s2 }
   0x4   :  { %14893 = sst [smem:[#allocation18_spill]] %s14848_s3 }
   0x5   :  { %14894 = sst [smem:[#allocation19_spill]] %s14849_s4 }
   0x6   :  { %14895 = sst [smem:[#allocation20_spill]] %s14850_s5 }
   0x7   :  { %s14896_s26 = sld [smem:[#allocation15_spill]]  ;;  %vm77_vm0 = vcmask 130048   ;;  %v14875_v2 = vmov 0.0  }
   0x8   :  { %10075 = vmatprep.subr.mxu1 %v14875_v2  ;;  %10070 = vmatprep.subr.mxu0 %v14875_v2 }
   0xd   :  { %v12089_v0 = vld [vmem:[%s14896_s26 + $0x8] sm:$0xff]  ;;  %v12094_v1 = vld [vmem:[%s14896_s26] sm:$0xff] }
   0xe   :  { %27 = vsyncpa [#allocation6], 0  ;;  %10076 = vmatpush3.xpose.msk.msra.mxu1 %vm77_vm0, %v12089_v0  ;;  %vm11968_vm1 = vmmov 0   ;;  %10071 = vmatpush3.xpose.msk.msra.mxu0 %vm77_vm0, %v12094_v1  ;;  %v72_v3 = vlaneseq  ;;  %vm228_vm3 = vcmask 64512   ;;  %s14900_s0 = sld [smem:[#allocation17_spill]]  ;;  %s14901_s23 = sld [smem:[#allocation16_spill]]  ;;  %v955_v47 = vcombine.high %v12094_v1, %v12094_v1 }
   0xf   :  { %10077 = vmatprep.mubr.msk.f32.mxu1 %vm11968_vm1, %v14875_v2  ;;  %10072 = vmatprep.mubr.msk.f32.mxu0 %vm11968_vm1, %v14875_v2  ;;  %s14902_s26 = sld [smem:[#allocation18_spill]]  ;;  %v11969_v40 = vmov 1966171168   ;;  %v1004_v53 = vcombine.high %v12089_v0, %v12089_v0  ;;  %vm1293_vm4 = vcmask 1041409   ;;  %vm1295_vm5 = vcmask 1042434   ;;  %s14903_s1 = sld [smem:[#allocation20_spill]] }
  0x10   :  { %10085 = vmatprep.subr.mxu1 %v14875_v2  ;;  %10080 = vmatprep.subr.mxu0 %v14875_v2  ;;  %v12118_v4 = vshrl.u32 %v72_v3, 7  ;;  %v12120_v5 = vand.u32 127, %v72_v3  ;;  %v957_v41 = vunpack.c.l.s4 %v11969_v40  ;;  %vm1297_vm6 = vcmask 1043459   ;;  %s14904_s5 = sld [smem:[#allocation19_spill]]  ;;  %s11971_s25 = smov 64  }
  0x11   :  { %10078 = vmatmul.mubr.msk.f32.vlgmr.msra.gmra.mrb[0].mxu1 %vm77_vm0, %v12089_v0  ;;  %10073 = vmatmul.mubr.msk.f32.vlgmr.msra.gmra.mrb[0].mxu0 %vm77_vm0, %v12094_v1  ;;  %vm1299_vm7 = vcmask 1044484   ;;  %vm1301_vm8 = vcmask 1045509   ;;  %vm1303_vm9 = vcmask 1046534   ;;  %vm1305_vm10 = vcmask 1047559  }
  0x12   :  { %10086 = vmatpush3.msra.mxu1 %v12089_v0  ;;  %10087 = vmatprep.mubr.msk.f32.mxu1 %vm11968_vm1, %v14875_v2  ;;  %14897 = vst [vmem:[#allocation8_spill] sm:$0xff] %v12118_v4  ;;  %vm12124_vm2 = vcmp.ge.s32.totalorder %v12118_v4, %v12120_v5  ;;  %v958_v42 = vunpack.c.0.s8 %v957_v41  ;;  %v12176_v44 = vsub.s32 0, %v12118_v4  ;;  %vm1843_vm11 = vcmask 261120  }
  0x13   :  { %10081 = vmatpush3.msra.mxu0 %v12094_v1  ;;  %10082 = vmatprep.mubr.msk.f32.mxu0 %vm11968_vm1, %v14875_v2  ;;  %vm2243_vm12 = vcmask 253952   ;;  %vm2682_vm13 = vcmask 254977   ;;  %vm3124_vm14 = vcmask 256002   ;;  %vm3569_vm15 = vcmask 257027  }
  0x14   :  { %v474_v25 = vld [vmem:[%s14900_s0] sm:$0xff]  ;;  %v475_v26 = vld [vmem:[%s14900_s0 + $0x8] sm:$0xff]  ;;  %v961_v43 = vsub.s32 %v958_v42, %v12118_v4  ;;  %s629_s0 = smul.f32 0.25, %s14865_s20 }
  0x15   :  { %v10738_v27 = vpack.c.bf16 %v475_v26, %v474_v25  ;;  %v397_v28 = vld [vmem:[%s14901_s23] sm:$0xff]  ;;  %v398_v29 = vld [vmem:[%s14901_s23 + $0x8] sm:$0xff] }
  0x16   :  { %v10734_v30 = vpack.c.bf16 %v398_v29, %v397_v28  ;;  %v551_v35 = vld [vmem:[%s14902_s26] sm:$0xff]  ;;  %v552_v36 = vld [vmem:[%s14902_s26 + $0x8] sm:$0xff]  ;;  %v962_v45 = vrot.slane %v12094_v1, %v961_v43  ;;  %v1011_v46 = vrot.slane %v12089_v0, %v961_v43  ;;  %v969_v52 = vrot.slane %v955_v47, %v961_v43 }
  0x17   :  { %10739 = vmatprep.subr.bf16.mxu1 %v10738_v27  ;;  %v10742_v39 = vpack.c.bf16 %v552_v36, %v551_v35 }
  0x18   :  { %10735 = vmatprep.subr.bf16.mxu0 %v10734_v30  ;;  %v978_v48 = vrot.slane %v962_v45, %v961_v43  ;;  %v970_v49 = vcombine.high %v962_v45, %v962_v45  ;;  %v1027_v50 = vrot.slane %v1011_v46, %v961_v43  ;;  %v1019_v51 = vcombine.high %v1011_v46, %v1011_v46 }
  0x19   :  { %v985_v60 = vrot.slane %v969_v52, %v961_v43  ;;  %v971_v61 = vcombine.high %v969_v52, %v969_v52 }
  0x1a   :  { %v1056_v54 = vrot.slane %v978_v48, %v12176_v44  ;;  %v992_v55 = vrot.slane %v970_v49, %v961_v43  ;;  %v1000_v56 = vcombine.high %v978_v48, %v978_v48  ;;  %v1088_v57 = vrot.slane %v1027_v50, %v12176_v44 }
  0x1b   :  { %v1041_v58 = vrot.slane %v1019_v51, %v961_v43  ;;  %v1049_v59 = vcombine.high %v1027_v50, %v1027_v50 }
  0x1c   :  { %v1133_v62 = vadd.f32 %v1056_v54, %v12094_v1  ;;  %v1060_v63 = vrot.slane %v992_v55, %v12176_v44  ;;  %v1064_v3 = vrot.slane %v1000_v56, %v12176_v44 }
  0xe4   :  { %v220_v7 = vpop.f32.mrb[0].mxu1  ;;  %v147_v10 = vpop.f32.mrb[0].mxu0 }
  0xe5   :  { %v227_v8 = vsel %vm12124_vm2, %v220_v7, -1e+09  ;;  %v10079_v9 = vpop.f32.mrb[1].mxu1  ;;  %v226_v12 = vsel %vm12124_vm2, %v147_v10, -1e+09  ;;  %v10074_v13 = vpop.f32.mrb[1].mxu0  ;;  %v1141_v7 = vadd.f32 %v1088_v57, %v12089_v0  ;;  %v1096_v10 = vrot.slane %v1049_v59, %v12176_v44 }
  0xe6   :  { %v232_v11 = vsel %vm228_vm3, %v227_v8, -inf  ;;  %v229_v14 = vsel %vm228_vm3, %v226_v12, -inf  ;;  %v1002_v9 = vcombine.high %v992_v55, %v992_v55  ;;  %v1135_v13 = vadd.f32 %v1064_v3, %v12094_v1 }
  0xe7   :  { %233 = vmax.xlane.f32.xlu0 %v232_v11  ;;  %v1018_v11 = vrot.slane %v1004_v53, %v961_v43 }
  0xeb   :  { %230 = vmax.xlane.f32.xlu0 %v229_v14  ;;  %v1051_v14 = vcombine.high %v1041_v58, %v1041_v58 }
 0x174   :  { %v234_v15 = vpop.xlane.xlu0 %233 }
 0x175   :  { %v236_v16 = vsub.f32 %v227_v8, %v234_v15  ;;  %v1092_v8 = vrot.slane %v1041_v58, %v12176_v44 }
 0x177   :  { %v239_v17 = vmul.f32 1.442695, %v236_v16  ;;  %v1142_v15 = vadd.f32 %v1092_v8, %v12089_v0  ;;  %v1068_v16 = vrot.slane %v1002_v9, %v12176_v44 }
 0x178   :  { %v231_v18 = vpop.xlane.xlu0 %230 }
 0x179   :  { %11119 = vpow2.f32 %v239_v17  ;;  %v235_v19 = vsub.f32 %v226_v12, %v231_v18  ;;  %v1134_v12 = vadd.f32 %v1060_v63, %v12094_v1  ;;  %v1072_v17 = vrot.slane %v985_v60, %v12176_v44 }
 0x17a   :  { %v999_v18 = vrot.slane %v971_v61, %v961_v43 }
 0x17b   :  { %v237_v20 = vmul.f32 1.442695, %v235_v19  ;;  %v1136_v19 = vadd.f32 %v1068_v16, %v12094_v1  ;;  %v1137_v25 = vadd.f32 %v1072_v17, %v12094_v1 }
 0x17c   :  { %v1076_v26 = vrot.slane %v999_v18, %v12176_v44 }
 0x17d   :  { %11121 = vpow2.f32 %v237_v20  ;;  %v1143_v20 = vadd.f32 %v1096_v10, %v12089_v0 }
 0x183   :  { %v11120_v21 = vpop.eup %11119 }
 0x184   :  { %v244_v22 = vsel %vm228_vm3, %v11120_v21, 0.0 }
 0x185   :  { %245 = vadd.xlane.f32.xlu1 %v244_v22  ;;  %v1034_v22 = vrot.slane %v1018_v11, %v961_v43 }
 0x187   :  { %v11122_v23 = vpop.eup %11121  ;;  %v1104_v28 = vrot.slane %v1034_v22, %v12176_v44 }
 0x188   :  { %v241_v24 = vsel %vm228_vm3, %v11122_v23, 0.0 }
 0x189   :  { %242 = vadd.xlane.f32.xlu1 %v241_v24  ;;  %v1001_v24 = vcombine.high %v985_v60, %v985_v60 }
 0x212   :  { %v246_v31 = vpop.xlane.xlu1 %245 }
 0x213   :  { %11123 = vrcp.f32 %v246_v31 }
 0x216   :  { %v243_v32 = vpop.xlane.xlu1 %242 }
 0x217   :  { %11125 = vrcp.f32 %v243_v32  ;;  %v1138_v32 = vadd.f32 %v1076_v26, %v12094_v1 }
 0x218   :  { %11127 = vtanh.f32 %v1133_v62 }
 0x219   :  { %11129 = vtanh.f32 %v1141_v7 }
 0x21a   :  { %11131 = vtanh.f32 %v1134_v12 }
 0x21b   :  { %11133 = vtanh.f32 %v1135_v13 }
 0x21c   :  { %11135 = vtanh.f32 %v1142_v15 }
 0x21d   :  { %v11124_v33 = vpop.eup %11123  ;;  %11137 = vtanh.f32 %v1136_v19 }
 0x21e   :  { %v250_v34 = vmul.f32 %v11124_v33, %v11120_v21  ;;  %v1100_v21 = vrot.slane %v1051_v14, %v12176_v44  ;;  %11139 = vtanh.f32 %v1143_v20  ;;  %v1003_v33 = vcombine.high %v999_v18, %v999_v18 }
 0x21f   :  { %11141 = vtanh.f32 %v1137_v25 }
 0x220   :  { %10088 = vmatmul.mubr.msk.f32.vlgmr.msra.gmra.mrb[2].mxu1 %vm228_vm3, %v250_v34  ;;  %v1084_v46 = vrot.slane %v1003_v33, %v12176_v44 }
 0x221   :  { %v11126_v37 = vpop.eup %11125  ;;  %10741 = vmatpush3.bf16.msra.mxu1 %v10738_v27  ;;  %10101 = vmatprep.mubr.msk.f32.mxu1 %vm77_vm0, %v12094_v1  ;;  %v1144_v27 = vadd.f32 %v1100_v21, %v12089_v0 }
 0x222   :  { %v249_v38 = vmul.f32 %v11126_v37, %v11122_v23  ;;  %10111 = vmatprep.subr.mxu1 %v14875_v2  ;;  %v1020_v23 = vcombine.high %v1018_v11, %v1018_v11  ;;  %v11128_v31 = vpop.eup %11127  ;;  %v1145_v37 = vadd.f32 %v1104_v28, %v12089_v0  ;;  %v1140_v54 = vadd.f32 %v1084_v46, %v12094_v1 }
 0x223   :  { %v11130_v34 = vpop.eup %11129  ;;  %v1165_v35 = vsel %vm77_vm0, %v11128_v31, 0.0  ;;  %11143 = vtanh.f32 %v1144_v27 }
 0x224   :  { %10083 = vmatmul.mubr.msk.f32.vlgmr.msra.gmra.mrb[2].mxu0 %vm228_vm3, %v249_v38  ;;  %10102 = vmatmul.mubr.msk.f32.vlgmr.msra.gmra.mrb[4].mxu1 %vm77_vm0, %v12089_v0  ;;  %v1048_v29 = vrot.slane %v1020_v23, %v961_v43  ;;  %v11132_v36 = vpop.eup %11131  ;;  %11145 = vtanh.f32 %v1138_v32  ;;  %v1189_v48 = vsel %vm77_vm0, %v11130_v34, 0.0 }
 0x225   :  { %10737 = vmatpush3.bf16.msra.mxu0 %v10734_v30  ;;  %10094 = vmatprep.mubr.msk.f32.mxu0 %vm77_vm0, %v12094_v1  ;;  %v1080_v30 = vrot.slane %v1001_v24, %v12176_v44  ;;  %v11134_v40 = vpop.eup %11133  ;;  %v1168_v41 = vsel %vm77_vm0, %v11132_v36, 0.0  ;;  %11147 = vtanh.f32 %v1145_v37 }
 0x226   :  { %10743 = vmatprep.subr.bf16.mxu0 %v10742_v39  ;;  %10113 = vmatprep.mubr.msk.f32.mxu1 %vm11968_vm1, %v14875_v2  ;;  %v1108_v38 = vrot.slane %v1048_v29, %v12176_v44  ;;  %v11136_v43 = vpop.eup %11135  ;;  %v1171_v45 = vsel %vm77_vm0, %v11134_v40, 0.0  ;;  %v1052_v47 = vcombine.high %v1048_v29, %v1048_v29 }
 0x227   :  { %1166 = vadd.xlane.f32.xlu0 %v1165_v35  ;;  %v1139_v42 = vadd.f32 %v1080_v30, %v12094_v1  ;;  %1169 = vadd.xlane.f32.xlu1 %v1168_v41  ;;  %v11138_v49 = vpop.eup %11137  ;;  %v1192_v52 = vsel %vm77_vm0, %v11136_v43, 0.0 }
 0x228   :  { %10095 = vmatmul.mubr.msk.f32.vlgmr.msra.gmra.mrb[4].mxu0 %vm77_vm0, %v12089_v0  ;;  %v1146_v50 = vadd.f32 %v1108_v38, %v12089_v0  ;;  %v11140_v53 = vpop.eup %11139  ;;  %v1116_v55 = vrot.slane %v1052_v47, %v12176_v44  ;;  %v1174_v56 = vsel %vm77_vm0, %v11138_v49, 0.0  ;;  %v1231_v38 = vsub.s32 %v12120_v5, %v12118_v4 }
 0x229   :  { %10745 = vmatpush3.bf16.msra.mxu0 %v10742_v39  ;;  %10108 = vmatprep.mubr.msk.f32.mxu0 %vm77_vm0, %v12094_v1  ;;  %v1050_v39 = vcombine.high %v1034_v22, %v1034_v22  ;;  %11149 = vtanh.f32 %v1139_v42  ;;  %v11142_v57 = vpop.eup %11141  ;;  %v1195_v59 = vsel %vm77_vm0, %v11140_v53, 0.0 }
 0x22a   :  { %10116 = vmatprep.subr.mxu0 %v14875_v2  ;;  %11151 = vtanh.f32 %v1146_v50  ;;  %v1148_v61 = vadd.f32 %v1116_v55, %v12089_v0  ;;  %v1177_v62 = vsel %vm77_vm0, %v11142_v57, 0.0 }
 0x22b   :  { %1172 = vadd.xlane.f32.xlu0 %v1171_v45  ;;  %v1112_v51 = vrot.slane %v1050_v39, %v12176_v44  ;;  %1190 = vadd.xlane.f32.xlu1 %v1189_v48  ;;  %11153 = vtanh.f32 %v1140_v54 }
 0x22c   :  { %10109 = vmatmul.mubr.msk.f32.vlgmr.msra.gmra.mrb[6].mxu0 %vm77_vm0, %v12089_v0 }
 0x22d   :  { %10118 = vmatprep.mubr.msk.f32.mxu0 %vm11968_vm1, %v14875_v2  ;;  %v1147_v58 = vadd.f32 %v1112_v51, %v12089_v0  ;;  %v11144_v60 = vpop.eup %11143 }
 0x22e   :  { %v11146_v63 = vpop.eup %11145  ;;  %v1198_v44 = vsel %vm77_vm0, %v11144_v60, 0.0 }
 0x22f   :  { %1193 = vadd.xlane.f32.xlu0 %v1192_v52  ;;  %1175 = vadd.xlane.f32.xlu1 %v1174_v56  ;;  %11155 = vtanh.f32 %v1147_v58  ;;  %v11148_v3 = vpop.eup %11147  ;;  %v1180_v7 = vsel %vm77_vm0, %v11146_v63, 0.0 }
 0x230   :  { %11157 = vtanh.f32 %v1148_v61  ;;  %v1201_v9 = vsel %vm77_vm0, %v11148_v3, 0.0 }
 0x233   :  { %1196 = vadd.xlane.f32.xlu0 %v1195_v59  ;;  %1178 = vadd.xlane.f32.xlu1 %v1177_v62  ;;  %v11150_v8 = vpop.eup %11149 }
 0x234   :  { %v11152_v10 = vpop.eup %11151  ;;  %v1183_v11 = vsel %vm77_vm0, %v11150_v8, 0.0 }
 0x235   :  { %v11154_v12 = vpop.eup %11153  ;;  %v1204_v13 = vsel %vm77_vm0, %v11152_v10, 0.0 }
 0x236   :  { %v1186_v15 = vsel %vm77_vm0, %v11154_v12, 0.0  ;;  %v782_v12 = vstv %s629_s0 }
 0x237   :  { %1199 = vadd.xlane.f32.xlu0 %v1198_v44  ;;  %1181 = vadd.xlane.f32.xlu1 %v1180_v7 }
 0x239   :  { %v11156_v14 = vpop.eup %11155 }
 0x23a   :  { %v11158_v16 = vpop.eup %11157  ;;  %v1207_v17 = vsel %vm77_vm0, %v11156_v14, 0.0 }
 0x23b   :  { %1202 = vadd.xlane.f32.xlu0 %v1201_v9  ;;  %1184 = vadd.xlane.f32.xlu1 %v1183_v11  ;;  %v1210_v18 = vsel %vm77_vm0, %v11158_v16, 0.0 }
 0x23f   :  { %1205 = vadd.xlane.f32.xlu0 %v1204_v13  ;;  %1187 = vadd.xlane.f32.xlu1 %v1186_v15 }
 0x243   :  { %1208 = vadd.xlane.f32.xlu0 %v1207_v17  ;;  %1211 = vadd.xlane.f32.xlu1 %v1210_v18 }
 0x2b4   :  { %v1167_v29 = vpop.xlane.xlu0 %1166  ;;  %v1170_v30 = vpop.xlane.xlu1 %1169 }
 0x2b5   :  { %v1236_v43 = vrot.slane %v1170_v30, %v1231_v38  ;;  %v1232_v45 = vrot.slane %v1167_v29, %v1231_v38 }
 0x2b7   :  { %v1294_v50 = vsel %vm1293_vm4, %v1236_v43, %v1232_v45 }
 0x2b8   :  { %v1173_v31 = vpop.xlane.xlu0 %1172  ;;  %v1191_v32 = vpop.xlane.xlu1 %1190 }
 0x2b9   :  { %v1264_v40 = vrot.slane %v1191_v32, %v1231_v38  ;;  %v1240_v48 = vrot.slane %v1173_v31, %v1231_v38 }
 0x2bb   :  { %v1296_v5 = vsel %vm1295_vm5, %v1240_v48, %v1294_v50 }
 0x2bc   :  { %v1194_v33 = vpop.xlane.xlu0 %1193  ;;  %v1176_v34 = vpop.xlane.xlu1 %1175 }
 0x2bd   :  { %v1268_v41 = vrot.slane %v1194_v33, %v1231_v38  ;;  %v1244_v53 = vrot.slane %v1176_v34, %v1231_v38 }
 0x2bf   :  { %v1307_v49 = vsel %vm1293_vm4, %v1268_v41, %v1264_v40  ;;  %v1298_v59 = vsel %vm1297_vm6, %v1244_v53, %v1296_v5 }
 0x2c0   :  { %v1197_v35 = vpop.xlane.xlu0 %1196  ;;  %v1179_v36 = vpop.xlane.xlu1 %1178 }
 0x2c1   :  { %v1272_v46 = vrot.slane %v1197_v35, %v1231_v38  ;;  %v1248_v57 = vrot.slane %v1179_v36, %v1231_v38 }
 0x2c3   :  { %v1308_v54 = vsel %vm1295_vm5, %v1272_v46, %v1307_v49  ;;  %v1300_v44 = vsel %vm1299_vm7, %v1248_v57, %v1298_v59  ;;  %vm5349_vm5 = vcmask 261127  }
 0x2c4   :  { %v1200_v37 = vpop.xlane.xlu0 %1199  ;;  %v1182_v39 = vpop.xlane.xlu1 %1181 }
 0x2c5   :  { %v1276_v51 = vrot.slane %v1200_v37, %v1231_v38  ;;  %v1252_v62 = vrot.slane %v1182_v39, %v1231_v38 }
 0x2c7   :  { %v1309_v58 = vsel %vm1297_vm6, %v1276_v51, %v1308_v54  ;;  %v1302_v10 = vsel %vm1301_vm8, %v1252_v62, %v1300_v44 }
 0x2c8   :  { %v1203_v42 = vpop.xlane.xlu0 %1202  ;;  %v1185_v47 = vpop.xlane.xlu1 %1184 }
 0x2c9   :  { %v1280_v55 = vrot.slane %v1203_v42, %v1231_v38  ;;  %v1256_v8 = vrot.slane %v1185_v47, %v1231_v38 }
 0x2cb   :  { %v1310_v63 = vsel %vm1299_vm7, %v1280_v55, %v1309_v58  ;;  %v1304_v16 = vsel %vm1303_vm9, %v1256_v8, %v1302_v10  ;;  %vm9256_vm7 = vcmask 1042176  }
 0x2cc   :  { %v1206_v52 = vpop.xlane.xlu0 %1205  ;;  %v1188_v56 = vpop.xlane.xlu1 %1187 }
 0x2cd   :  { %v1284_v60 = vrot.slane %v1206_v52, %v1231_v38  ;;  %v1260_v13 = vrot.slane %v1188_v56, %v1231_v38 }
 0x2cf   :  { %v1311_v9 = vsel %vm1301_vm8, %v1284_v60, %v1310_v63 }
 0x2d0   :  { %v1209_v61 = vpop.xlane.xlu0 %1208  ;;  %v1212_v7 = vpop.xlane.xlu1 %1211 }
 0x2d1   :  { %v1288_v3 = vrot.slane %v1209_v61, %v1231_v38  ;;  %v1292_v11 = vrot.slane %v1212_v7, %v1231_v38  ;;  %v1556_v7 = vld [vmem:[%s14852_s7 + $0x8] sm:$0xff] }
 0x2d3   :  { %v1312_v14 = vsel %vm1303_vm9, %v1288_v3, %v1311_v9  ;;  %v1555_v3 = vld [vmem:[%s14852_s7] sm:$0xff] }
 0x2d4   :  { %v10746_v8 = vpack.c.bf16 %v1556_v7, %v1555_v3  ;;  %v9560_v9 = vld [vmem:[%s14903_s1] ss:$0 sm:$0xff] }
 0x2d5   :  { %v1511_v10 = vmul.f32 %v9560_v9, %v12094_v1  ;;  %v1569_v7 = vld [vmem:[%s14853_s8 + $0x40] sm:$0xff] }
 0x2f3   :  { %v12232_v19 = vpop.f32.mrb[2].mxu1 }
 0x2f4   :  { %v10089_v20 = vpop.f32.mrb[3].mxu1 }
 0x2f7   :  { %v12234_v21 = vpop.f32.mrb[2].mxu0  ;;  %v10103_v22 = vpop.f32.mrb[4].mxu1 }
 0x2f8   :  { %v10084_v23 = vpop.f32.mrb[3].mxu0  ;;  %v542_v24 = vpop.f32.mrb[5].mxu1  ;;  %10117 = vmatpush3.xpose.msk.msra.mxu0 %vm77_vm0, %v10103_v22 }
 0x2f9   :  { %10112 = vmatpush3.xpose.msk.msra.mxu1 %vm77_vm0, %v542_v24  ;;  %10126 = vmatprep.subr.mxu0 %v14875_v2  ;;  %v1313_v24 = vsel %vm1305_vm10, %v1292_v11, %v1312_v14  ;;  %v1512_v11 = vmul.f32 %v9560_v9, %v12089_v0 }
 0x2fa   :  { %10121 = vmatprep.subr.mxu1 %v14875_v2  ;;  %v1317_v30 = vsel %vm12124_vm2, %v1313_v24, -1e+09  ;;  %v1486_v24 = vld [vmem:[%s14904_s5] sm:$0xff] }
 0x2fb   :  { %v10096_v25 = vpop.f32.mrb[4].mxu0  ;;  %v1321_v32 = vsel %vm228_vm3, %v1317_v30, -inf }
 0x2fc   :  { %v465_v26 = vpop.f32.mrb[5].mxu0  ;;  %10119 = vmatmul.mubr.msk.f32.vlgmr.msra.gmra.mrb[8].mxu0 %vm77_vm0, %v10096_v25 }
 0x2fd   :  { %10114 = vmatmul.mubr.msk.f32.vlgmr.msra.gmra.mrb[6].mxu1 %vm77_vm0, %v465_v26  ;;  %10128 = vmatprep.mubr.msk.f32.mxu0 %vm11968_vm1, %v14875_v2  ;;  %v1306_v26 = vsel %vm1305_vm10, %v1260_v13, %v1304_v16  ;;  %v1559_v13 = vld [vmem:[%s14852_s7 + $0x20] sm:$0xff]  ;;  %v1560_v16 = vld [vmem:[%s14852_s7 + $0x28] sm:$0xff] }
 0x2fe   :  { %10123 = vmatprep.mubr.msk.f32.mxu1 %vm11968_vm1, %v14875_v2  ;;  %v1316_v31 = vsel %vm12124_vm2, %v1306_v26, -1e+09 }
 0x2ff   :  { %v10110_v27 = vpop.f32.mrb[6].mxu0  ;;  %v1318_v33 = vsel %vm228_vm3, %v1316_v31, -inf }
 0x300   :  { %v619_v28 = vpop.f32.mrb[7].mxu0  ;;  %10127 = vmatpush3.msra.mxu0 %v10110_v27 }
 0x301   :  { %10122 = vmatpush3.msra.mxu1 %v619_v28  ;;  %10136 = vmatprep.subr.mxu0 %v14875_v2 }
 0x302   :  { %10131 = vmatprep.subr.mxu1 %v14875_v2 }
 0x3cf   :  { %v778_v15 = vpop.f32.mrb[8].mxu0 }
 0x3d0   :  { %v784_v17 = vmul.f32 %v782_v12, %v778_v15  ;;  %v702_v18 = vpop.f32.mrb[6].mxu1  ;;  %v10120_v20 = vpop.f32.mrb[9].mxu0 }
 0x3d1   :  { %v783_v22 = vmul.f32 %v782_v12, %v702_v18  ;;  %v10115_v23 = vpop.f32.mrb[7].mxu1  ;;  %v9561_v12 = vld [vmem:[%s14851_s6] ss:$0 sm:$0xff]  ;;  %v1558_v18 = vld [vmem:[%s14852_s7 + $0x18] sm:$0xff]  ;;  %v10754_v20 = vpack.c.bf16 %v1560_v16, %v1559_v13 }
 0x3d2   :  { %v786_v25 = vsel %vm12124_vm2, %v784_v17, -1e+09  ;;  %v1519_v14 = vadd.f32 %v9561_v12, %v1511_v10  ;;  %v1520_v15 = vadd.f32 %v9561_v12, %v1512_v11  ;;  %v1557_v17 = vld [vmem:[%s14852_s7 + $0x10] sm:$0xff]  ;;  %v14873_v23 = vmov 0.0|0.0   ;;  %v1572_v11 = vld [vmem:[%s14853_s8 + $0x58] sm:$0xff] }
 0x3d3   :  { %v790_v27 = vsel %vm228_vm3, %v786_v25, -inf  ;;  %v785_v28 = vsel %vm12124_vm2, %v783_v22, -1e+09  ;;  %v10750_v22 = vpack.c.bf16 %v1558_v18, %v1557_v17  ;;  %v1571_v10 = vld [vmem:[%s14853_s8 + $0x50] sm:$0xff]  ;;  %vm4459_vm2 = vcmask 259077  }
 0x3d4   :  { %791 = vmax.xlane.f32.xlu1 %v790_v27  ;;  %v787_v29 = vsel %vm228_vm3, %v785_v28, -inf  ;;  %v1490_v27 = vmul.f32 %v1486_v24, %v12232_v19  ;;  %v9564_v19 = vld [vmem:[%s14903_s1 + $0x2] ss:$0 sm:$0xff]  ;;  %v12413_v12 = vpack.c.bf16 %v1572_v11, %v1571_v10 }
 0x3d5   :  { %788 = vmax.xlane.f32.xlu0 %v787_v29 }
 0x3d8   :  { %1322 = vmax.xlane.f32.xlu1 %v1321_v32 }
 0x3d9   :  { %1319 = vmax.xlane.f32.xlu0 %v1318_v33 }
 0x461   :  { %v792_v34 = vpop.xlane.xlu1 %791 }
 0x462   :  { %v794_v35 = vsub.f32 %v786_v25, %v792_v34  ;;  %v789_v36 = vpop.xlane.xlu0 %788  ;;  %v1487_v25 = vld [vmem:[%s14904_s5 + $0x8] sm:$0xff]  ;;  %v1488_v34 = vld [vmem:[%s14904_s5 + $0x10] sm:$0xff] }
 0x463   :  { %v793_v37 = vsub.f32 %v785_v28, %v789_v36 }
 0x464   :  { %v797_v38 = vmul.f32 1.442695, %v794_v35 }
 0x465   :  { %v795_v39 = vmul.f32 1.442695, %v793_v37  ;;  %v1323_v40 = vpop.xlane.xlu1 %1322 }
 0x466   :  { %11159 = vpow2.f32 %v797_v38  ;;  %v1325_v41 = vsub.f32 %v1317_v30, %v1323_v40  ;;  %v1320_v42 = vpop.xlane.xlu0 %1319 }
 0x467   :  { %11161 = vpow2.f32 %v795_v39  ;;  %v1324_v43 = vsub.f32 %v1316_v31, %v1320_v42  ;;  %v1489_v31 = vmul.f32 %v1486_v24, %v12234_v21  ;;  %v9562_v21 = vld [vmem:[%s14903_s1 + $0x1] ss:$0 sm:$0xff] }
 0x468   :  { %v1328_v6 = vmul.f32 1.442695, %v1325_v41 }
 0x469   :  { %v1326_v45 = vmul.f32 1.442695, %v1324_v43 }
 0x46a   :  { %11163 = vpow2.f32 %v1328_v6 }
 0x46b   :  { %11165 = vpow2.f32 %v1326_v45  ;;  %v9565_v45 = vld [vmem:[%s14851_s6 + $0x2] ss:$0 sm:$0xff] }
 0x470   :  { %v11160_v46 = vpop.eup %11159 }
 0x471   :  { %v11162_v47 = vpop.eup %11161  ;;  %v802_v48 = vsel %vm228_vm3, %v11160_v46, 0.0 }
 0x472   :  { %803 = vadd.xlane.f32.xlu1 %v802_v48  ;;  %v799_v49 = vsel %vm228_vm3, %v11162_v47, 0.0 }
 0x473   :  { %800 = vadd.xlane.f32.xlu0 %v799_v49 }
 0x474   :  { %v11164_v50 = vpop.eup %11163 }
 0x475   :  { %v11166_v51 = vpop.eup %11165  ;;  %v1333_v52 = vsel %vm228_vm3, %v11164_v50, 0.0 }
 0x476   :  { %1334 = vadd.xlane.f32.xlu1 %v1333_v52  ;;  %v1330_v53 = vsel %vm228_vm3, %v11166_v51, 0.0  ;;  %v1561_v52 = vld [vmem:[%s14853_s8] sm:$0xff] }
 0x477   :  { %1331 = vadd.xlane.f32.xlu0 %v1330_v53  ;;  %v1562_v53 = vld [vmem:[%s14853_s8 + $0x8] sm:$0xff] }
 0x4ff   :  { %v804_v54 = vpop.xlane.xlu1 %803 }
 0x500   :  { %11167 = vrcp.f32 %v804_v54  ;;  %v801_v5 = vpop.xlane.xlu0 %800 }
 0x501   :  { %11169 = vrcp.f32 %v801_v5 }
 0x503   :  { %v1335_v55 = vpop.xlane.xlu1 %1334 }
 0x504   :  { %11171 = vrcp.f32 %v1335_v55  ;;  %v1332_v56 = vpop.xlane.xlu0 %1331  ;;  %v12349_v55 = vpack.c.bf16 %v1562_v53, %v1561_v52 }
 0x505   :  { %11173 = vrcp.f32 %v1332_v56 }
 0x50a   :  { %v11168_v57 = vpop.eup %11167 }
 0x50b   :  { %v11170_v58 = vpop.eup %11169  ;;  %v808_v59 = vmul.f32 %v11168_v57, %v11160_v46  ;;  %v1563_v57 = vld [vmem:[%s14853_s8 + $0x10] sm:$0xff] }
 0x50c   :  { %v807_v60 = vmul.f32 %v11170_v58, %v11162_v47  ;;  %v1564_v58 = vld [vmem:[%s14853_s8 + $0x18] sm:$0xff] }
 0x50d   :  { %10129 = vmatmul.mubr.msk.f32.vlgmr.msra.gmra.mrb[10].mxu0 %vm228_vm3, %v808_v59  ;;  %v12363_v59 = vpack.c.bf16 %v1564_v58, %v1563_v57 }
 0x50e   :  { %v11172_v61 = vpop.eup %11171  ;;  %10124 = vmatmul.mubr.msk.f32.vlgmr.msra.gmra.mrb[8].mxu1 %vm228_vm3, %v807_v60  ;;  %10137 = vmatpush3.msra.mxu0 %v12089_v0  ;;  %v1565_v60 = vld [vmem:[%s14853_s8 + $0x20] sm:$0xff] }
 0x50f   :  { %v11174_v62 = vpop.eup %11173  ;;  %10132 = vmatpush3.msra.mxu1 %v12094_v1  ;;  %10138 = vmatprep.mubr.msk.f32.mxu0 %vm11968_vm1, %v14875_v2  ;;  %v1339_v63 = vmul.f32 %v11172_v61, %v11164_v50  ;;  %v9563_v50 = vld [vmem:[%s14851_s6 + $0x1] ss:$0 sm:$0xff]  ;;  %v1566_v61 = vld [vmem:[%s14853_s8 + $0x28] sm:$0xff] }
 0x510   :  { %10133 = vmatprep.mubr.msk.f32.mxu1 %vm11968_vm1, %v14875_v2  ;;  %v1338_v44 = vmul.f32 %v11174_v62, %v11166_v51  ;;  %10747 = vmatprep.subr.bf16.mxu1 %v10746_v8  ;;  %v12379_v62 = vpack.c.bf16 %v1566_v61, %v1565_v60 }
 0x511   :  { %10139 = vmatmul.mubr.msk.f32.vlgmr.msra.gmra.mrb[12].mxu0 %vm228_vm3, %v1339_v63  ;;  %10751 = vmatprep.subr.bf16.mxu0 %v10750_v22  ;;  %v1567_v63 = vld [vmem:[%s14853_s8 + $0x30] sm:$0xff] }
 0x512   :  { %10134 = vmatmul.mubr.msk.f32.vlgmr.msra.gmra.mrb[10].mxu1 %vm228_vm3, %v1338_v44  ;;  %10753 = vmatpush3.bf16.msra.mxu0 %v10750_v22  ;;  %v1568_v44 = vld [vmem:[%s14853_s8 + $0x38] sm:$0xff]  ;;  %vm4904_vm3 = vcmask 260102  }
 0x513   :  { %10749 = vmatpush3.bf16.msra.mxu1 %v10746_v8  ;;  %10145 = vmatprep.mubr.msk.f32.mxu1 %vm77_vm0, %v1519_v14  ;;  %v12390_v3 = vpack.c.bf16 %v1568_v44, %v1567_v63  ;;  %v1570_v8 = vld [vmem:[%s14853_s8 + $0x48] sm:$0xff] }
 0x514   :  { %10755 = vmatprep.subr.bf16.mxu1 %v10754_v20  ;;  %10758 = vmatprep.subr.bf16.mxu0 %v14873_v23  ;;  %v12402_v9 = vpack.c.bf16 %v1570_v8, %v1569_v7 }
 0x516   :  { %10146 = vmatmul.mubr.msk.f32.vlgmr.msra.gmra.mrb[12].mxu1 %vm77_vm0, %v1520_v15 }
 0x517   :  { %10757 = vmatpush3.bf16.msra.mxu1 %v10754_v20  ;;  %v9572_v20 = vld [vmem:[%s14854_s9] ss:$0 sm:$0xff] }
 0x518   :  { %10776 = vmatprep.subr.bf16.mxu1 %v14873_v23 }
 0x5e0   :  { %v951_v26 = vpop.f32.mrb[10].mxu0 }
 0x5e1   :  { %v1492_v28 = vmul.f32 %v1487_v25, %v951_v26  ;;  %v878_v29 = vpop.f32.mrb[8].mxu1  ;;  %v10130_v30 = vpop.f32.mrb[11].mxu0 }
 0x5e2   :  { %v1491_v32 = vmul.f32 %v1487_v25, %v878_v29  ;;  %v10125_v33 = vpop.f32.mrb[9].mxu1  ;;  %v9573_v30 = vld [vmem:[%s14854_s9 + $0x1] ss:$0 sm:$0xff] }
 0x5e3   :  { %v1494_v35 = vadd.f32 %v1492_v28, %v1490_v27 }
 0x5e4   :  { %v1493_v36 = vadd.f32 %v1491_v32, %v1489_v31  ;;  %v1482_v37 = vpop.f32.mrb[12].mxu0 }
 0x5e5   :  { %v1496_v38 = vmul.f32 %v1488_v34, %v1482_v37  ;;  %v1409_v39 = vpop.f32.mrb[10].mxu1  ;;  %v10140_v40 = vpop.f32.mrb[13].mxu0 }
 0x5e6   :  { %v1495_v41 = vmul.f32 %v1488_v34, %v1409_v39  ;;  %v10135_v42 = vpop.f32.mrb[11].mxu1 }
 0x5e7   :  { %v1498_v43 = vadd.f32 %v1496_v38, %v1494_v35 }
 0x5e8   :  { %v1497_v6 = vadd.f32 %v1495_v41, %v1493_v36  ;;  %v9574_v36 = vld [vmem:[%s14854_s9 + $0x2] ss:$0 sm:$0xff]  ;;  %s11972_s9 = smov 32  }
 0x5e9   :  { %v1522_v46 = vadd.f32 %v1498_v43, %v12089_v0  ;;  %v1546_v47 = vmul.f32 %v9564_v19, %v1498_v43  ;;  %v10147_v13 = vpop.f32.mrb[12].mxu1 }
 0x5ea   :  { %v1521_v48 = vadd.f32 %v1497_v6, %v12094_v1  ;;  %v1545_v49 = vmul.f32 %v9564_v19, %v1497_v6  ;;  %v1648_v14 = vpop.f32.mrb[13].mxu1  ;;  %v12432_v24 = vadd.f32 %v10147_v13, %v9572_v20 }
 0x5eb   :  { %v1530_v51 = vmul.f32 %v9562_v21, %v1522_v46  ;;  %v1554_v0 = vadd.f32 %v9565_v45, %v1546_v47  ;;  %v12430_v22 = vadd.f32 %v9572_v20, %v1648_v14 }
 0x5ec   :  { %v1529_v54 = vmul.f32 %v9562_v21, %v1521_v48  ;;  %v1553_v5 = vadd.f32 %v9565_v45, %v1545_v49 }
 0x5ed   :  { %v1538_v56 = vadd.f32 %v9563_v50, %v1530_v51 }
 0x5ee   :  { %10159 = vmatprep.mubr.msk.f32.mxu1 %vm77_vm0, %v1553_v5  ;;  %v1537_v1 = vadd.f32 %v9563_v50, %v1529_v54 }
 0x5ef   :  { %10160 = vmatmul.mubr.msk.f32.vlgmr.msra.gmra.mrb[14].mxu1 %vm77_vm0, %v1554_v0 }
 0x5f0   :  { %10152 = vmatprep.mubr.msk.f32.mxu0 %vm77_vm0, %v1537_v1  ;;  %10778 = vmatpush3.bf16.msra.mxu1 %v12349_v55 }
 0x5f1   :  { %10153 = vmatmul.mubr.msk.f32.vlgmr.msra.gmra.mrb[14].mxu0 %vm77_vm0, %v1538_v56  ;;  %10779 = vmatprep.subr.bf16.mxu1 %v14873_v23  ;;  %vm4014_vm0 = vcmask 258052  }
 0x5f2   :  { %10760 = vmatpush3.bf16.msra.mxu0 %v12349_v55  ;;  %10170 = vmatprep.mubr.msk.f32.mxu0 %vm11968_vm1, %v14875_v2 }
 0x5f3   :  { %10761 = vmatprep.subr.bf16.mxu0 %v14873_v23  ;;  %10203 = vmatprep.mubr.msk.f32.mxu1 %vm11968_vm1, %v14875_v2 }
 0x5f4   :  { %10781 = vmatpush3.bf16.msra.mxu1 %v12363_v59 }
 0x5f5   :  { %10788 = vmatprep.subr.bf16.mxu1 %v14873_v23 }
 0x5f6   :  { %10763 = vmatpush3.bf16.msra.mxu0 %v12363_v59 }
 0x5f7   :  { %10764 = vmatprep.subr.bf16.mxu0 %v14873_v23 }
 0x5f9   :  { %10171 = vmatmul.mubr.f32.vlgmr.msra.gmra.mrb[16].mxu0 %v14875_v2 }
 0x5fa   :  { %10766 = vmatpush3.bf16.msra.mxu0 %v12379_v62  ;;  %10181 = vmatprep.mubr.msk.f32.mxu0 %vm11968_vm1, %v14875_v2 }
 0x5fb   :  { %10767 = vmatprep.subr.bf16.mxu0 %v14873_v23 }
 0x5fe   :  { %10769 = vmatpush3.bf16.msra.mxu0 %v12390_v3 }
 0x5ff   :  { %10770 = vmatprep.subr.bf16.mxu0 %v14873_v23 }
 0x601   :  { %10182 = vmatmul.mubr.f32.vlgmr.msra.gmra.mrb[18].mxu0 %v14875_v2 }
 0x602   :  { %10772 = vmatpush3.bf16.msra.mxu0 %v12402_v9  ;;  %10192 = vmatprep.mubr.msk.f32.mxu0 %vm11968_vm1, %v14875_v2 }
 0x603   :  { %10773 = vmatprep.subr.bf16.mxu0 %v14873_v23 }
 0x606   :  { %10775 = vmatpush3.bf16.msra.mxu0 %v12413_v12 }
 0x607   :  { %10782 = vmatprep.subr.bf16.mxu0 %v14873_v23 }
 0x609   :  { %10193 = vmatmul.mubr.f32.vlgmr.msra.gmra.mrb[20].mxu0 %v14875_v2 }
 0x60a   :  { %10784 = vmatpush3.bf16.msra.mxu0 %v12379_v62  ;;  %10214 = vmatprep.mubr.msk.f32.mxu0 %vm11968_vm1, %v14875_v2 }
 0x60b   :  { %10785 = vmatprep.subr.bf16.mxu0 %v14873_v23 }
 0x60e   :  { %10787 = vmatpush3.bf16.msra.mxu0 %v12390_v3 }
 0x60f   :  { %10794 = vmatprep.subr.bf16.mxu0 %v14873_v23 }
 0x6c2   :  { %v10161_v15 = vpop.f32.mrb[14].mxu1 }
 0x6c3   :  { %v1810_v16 = vpop.f32.mrb[15].mxu1  ;;  %v12451_v42 = vadd.f32 %v10161_v15, %v9574_v36 }
 0x6c4   :  { %v10154_v17 = vpop.f32.mrb[14].mxu0  ;;  %v12449_v40 = vadd.f32 %v9574_v36, %v1810_v16 }
 0x6c5   :  { %v1729_v18 = vpop.f32.mrb[15].mxu0  ;;  %v12439_v32 = vadd.f32 %v10154_v17, %v9573_v30 }
 0x6c6   :  { %v12445_v37 = vadd.f32 %v9573_v30, %v1729_v18 }
 0x6cc   :  { %v1913_v25 = vpop.f32.mrb[16].mxu0 }
 0x6cd   :  { %v2060_v26 = vrot.slane %v1913_v25, 1  ;;  %v2069_v27 = vadd.f32 %v1913_v25, %v12430_v22  ;;  %v10172_v28 = vpop.f32.mrb[17].mxu0 }
 0x6cf   :  { %v2070_v29 = vadd.f32 %v2060_v26, %v12432_v24  ;;  %11175 = vtanh.f32 %v2069_v27  ;;  %v9575_v50 = vmul.f32 -1.442695, %v2069_v27 }
 0x6d1   :  { %11177 = vtanh.f32 %v2070_v29  ;;  %v9576_v51 = vmul.f32 -1.442695, %v2070_v29 }
 0x6d4   :  { %v1983_v31 = vpop.f32.mrb[18].mxu0 }
 0x6d5   :  { %v2061_v33 = vrot.slane %v1983_v31, 1  ;;  %v10183_v34 = vpop.f32.mrb[19].mxu0  ;;  %v2071_v39 = vadd.f32 %v1983_v31, %v12445_v37 }
 0x6d7   :  { %v2072_v35 = vadd.f32 %v2061_v33, %v12439_v32  ;;  %v9577_v54 = vmul.f32 -1.442695, %v2071_v39 }
 0x6d9   :  { %v11176_v38 = vpop.eup %11175  ;;  %11179 = vtanh.f32 %v2072_v35  ;;  %v9578_v52 = vmul.f32 -1.442695, %v2072_v35 }
 0x6da   :  { %2129 = vrot.lane.b32.xlu1 %v11176_v38, %s11971_s25  ;;  %11181 = vtanh.f32 %v2071_v39 }
 0x6db   :  { %v11178_v19 = vpop.eup %11177 }
 0x6dc   :  { %v2053_v41 = vpop.f32.mrb[20].mxu0  ;;  %2131 = vrot.lane.b32.xlu0 %v11178_v19, %s11971_s25 }
 0x6dd   :  { %v2062_v43 = vrot.slane %v2053_v41, 1  ;;  %v2073_v21 = vadd.f32 %v2053_v41, %v12449_v40  ;;  %v10194_v6 = vpop.f32.mrb[21].mxu0 }
 0x6df   :  { %v2074_v45 = vadd.f32 %v2062_v43, %v12451_v42  ;;  %11183 = vtanh.f32 %v2073_v21  ;;  %v9579_v1 = vmul.f32 -1.442695, %v2073_v21 }
 0x6e1   :  { %11185 = vtanh.f32 %v2074_v45  ;;  %v9580_v56 = vmul.f32 -1.442695, %v2074_v45 }
 0x6e2   :  { %11187 = vpow2.f32 %v9575_v50 }
 0x6e3   :  { %v11180_v46 = vpop.eup %11179  ;;  %11189 = vpow2.f32 %v9576_v51 }
 0x6e4   :  { %2135 = vrot.lane.b32.xlu1 %v11180_v46, %s11971_s25  ;;  %v11182_v47 = vpop.eup %11181  ;;  %11191 = vpow2.f32 %v9578_v52 }
 0x6e5   :  { %11193 = vpow2.f32 %v9577_v54 }
 0x6e8   :  { %2133 = vrot.lane.b32.xlu1 %v11182_v47, %s11971_s25 }
 0x6e9   :  { %v11184_v48 = vpop.eup %11183 }
 0x6eb   :  { %v11186_v49 = vpop.eup %11185 }
 0x6ec   :  { %2139 = vrot.lane.b32.xlu0 %v11186_v49, %s11971_s25  ;;  %2137 = vrot.lane.b32.xlu1 %v11184_v48, %s11971_s25  ;;  %v11188_v53 = vpop.eup %11187 }
 0x6ed   :  { %v11190_v5 = vpop.eup %11189  ;;  %v2093_v0 = vadd.f32 1.0, %v11188_v53 }
 0x6ee   :  { %v2094_v57 = vadd.f32 1.0, %v11190_v5  ;;  %v11192_v58 = vpop.eup %11191 }
 0x6ef   :  { %11195 = vrcp.f32 %v2093_v0  ;;  %v2096_v60 = vadd.f32 1.0, %v11192_v58  ;;  %v11194_v61 = vpop.eup %11193 }
 0x6f0   :  { %11197 = vpow2.f32 %v9579_v1  ;;  %v2095_v8 = vadd.f32 1.0, %v11194_v61 }
 0x6f1   :  { %11199 = vpow2.f32 %v9580_v56 }
 0x6f2   :  { %11201 = vrcp.f32 %v2094_v57 }
 0x6f3   :  { %11203 = vrcp.f32 %v2096_v60 }
 0x6f4   :  { %11205 = vrcp.f32 %v2095_v8 }
 0x6f9   :  { %v12460_v63 = vpop.eup %11195 }
 0x6fa   :  { %v11198_v7 = vpop.eup %11197  ;;  %v2117_v36 = vmul.f32 0.0, %v12460_v63 }
 0x6fb   :  { %v11200_v11 = vpop.eup %11199  ;;  %v2097_v15 = vadd.f32 1.0, %v11198_v7 }
 0x6fc   :  { %v12463_v13 = vpop.eup %11201  ;;  %v2098_v17 = vadd.f32 1.0, %v11200_v11 }
 0x6fd   :  { %11207 = vrcp.f32 %v2097_v15  ;;  %v11204_v18 = vpop.eup %11203  ;;  %v2118_v19 = vmul.f32 0.0, %v12463_v13 }
 0x6fe   :  { %11209 = vrcp.f32 %v2098_v17  ;;  %v11206_v26 = vpop.eup %11205  ;;  %v2120_v21 = vmul.f32 0.0, %v11204_v18 }
 0x6ff   :  { %v2119_v47 = vmul.f32 0.0, %v11206_v26 }
 0x707   :  { %v12469_v29 = vpop.eup %11207 }
 0x708   :  { %v11210_v30 = vpop.eup %11209  ;;  %v2121_v52 = vmul.f32 0.0, %v12469_v29 }
 0x709   :  { %v2122_v51 = vmul.f32 0.0, %v11210_v30 }
 0x74c   :  { %v2130_v44 = vpop.permute.xlu1 %2129 }
 0x74d   :  { %v2147_v10 = vmul.f32 %v12460_v63, %v2130_v44 }
 0x74e   :  { %v2132_v14 = vpop.permute.xlu0 %2131 }
 0x74f   :  { %2159 = vrot.lane.b32.xlu1 %v2147_v10, %s11972_s9  ;;  %v2148_v16 = vmul.f32 %v12463_v13, %v2132_v14 }
 0x751   :  { %2161 = vrot.lane.b32.xlu0 %v2148_v16, %s11972_s9 }
 0x756   :  { %v2136_v20 = vpop.permute.xlu1 %2135 }
 0x757   :  { %v2150_v25 = vmul.f32 %v11204_v18, %v2136_v20 }
 0x759   :  { %2165 = vrot.lane.b32.xlu0 %v2150_v25, %s11972_s9 }
 0x75a   :  { %v2134_v27 = vpop.permute.xlu1 %2133 }
 0x75b   :  { %v2149_v28 = vmul.f32 %v11206_v26, %v2134_v27 }
 0x75d   :  { %2163 = vrot.lane.b32.xlu1 %v2149_v28, %s11972_s9 }
 0x75e   :  { %v2140_v31 = vpop.permute.xlu0 %2139  ;;  %v2138_v33 = vpop.permute.xlu1 %2137 }
 0x75f   :  { %v2152_v34 = vmul.f32 %v11210_v30, %v2140_v31  ;;  %v2151_v35 = vmul.f32 %v12469_v29, %v2138_v33 }
 0x761   :  { %2169 = vrot.lane.b32.xlu0 %v2152_v34, %s11972_s9  ;;  %2167 = vrot.lane.b32.xlu1 %v2151_v35, %s11972_s9 }
 0x7c1   :  { %v2160_v38 = vpop.permute.xlu1 %2159 }
 0x7c2   :  { %v12476_v39 = vadd.f32 %v2160_v38, %v2117_v36 }
 0x7c3   :  { %v2162_v41 = vpop.permute.xlu0 %2161 }
 0x7c4   :  { %11211 = vtanh.f32 %v12476_v39  ;;  %v12480_v43 = vadd.f32 %v2162_v41, %v2118_v19 }
 0x7c6   :  { %11213 = vtanh.f32 %v12480_v43 }
 0x7cb   :  { %v2166_v6 = vpop.permute.xlu0 %2165 }
 0x7cc   :  { %v12483_v45 = vadd.f32 %v2166_v6, %v2120_v21 }
 0x7ce   :  { %v11212_v46 = vpop.eup %11211  ;;  %11215 = vtanh.f32 %v12483_v45 }
 0x7cf   :  { %2195 = vrot.lane.b32.xlu1 %v11212_v46, %s11971_s25  ;;  %v2164_v48 = vpop.permute.xlu1 %2163 }
 0x7d0   :  { %v11214_v49 = vpop.eup %11213  ;;  %v12487_v50 = vadd.f32 %v2164_v48, %v2119_v47 }
 0x7d1   :  { %2197 = vrot.lane.b32.xlu0 %v11214_v49, %s11971_s25 }
 0x7d2   :  { %11217 = vtanh.f32 %v12487_v50 }
 0x7d3   :  { %v2170_v53 = vpop.permute.xlu0 %2169  ;;  %v2168_v54 = vpop.permute.xlu1 %2167 }
 0x7d4   :  { %v12492_v5 = vadd.f32 %v2170_v53, %v2122_v51  ;;  %v12494_v0 = vadd.f32 %v2168_v54, %v2121_v52 }
 0x7d6   :  { %11219 = vtanh.f32 %v12492_v5 }
 0x7d7   :  { %11221 = vtanh.f32 %v12494_v0 }
 0x7d8   :  { %v11216_v1 = vpop.eup %11215 }
 0x7d9   :  { %2201 = vrot.lane.b32.xlu0 %v11216_v1, %s11971_s25 }
 0x7dc   :  { %v11218_v56 = vpop.eup %11217 }
 0x7dd   :  { %2199 = vrot.lane.b32.xlu1 %v11218_v56, %s11971_s25 }
 0x7e0   :  { %v11220_v57 = vpop.eup %11219 }
 0x7e1   :  { %v11222_v58 = vpop.eup %11221  ;;  %2205 = vrot.lane.b32.xlu0 %v11220_v57, %s11971_s25 }
 0x7e2   :  { %2203 = vrot.lane.b32.xlu1 %v11222_v58, %s11971_s25 }
 0x841   :  { %v2196_v60 = vpop.permute.xlu1 %2195 }
 0x842   :  { %v12506_v7 = vmul.f32 %v12460_v63, %v2196_v60 }
 0x843   :  { %v2198_v61 = vpop.permute.xlu0 %2197 }
 0x844   :  { %v12503_v44 = vmul.f32 %v12463_v13, %v2198_v61 }
 0x846   :  { %v2250_v8 = vrot.slane %v12503_v44, 7 }
 0x848   :  { %v2251_v10 = vsel %vm1293_vm4, %v2250_v8, %v12506_v7 }
 0x849   :  { %2252 = vrot.lane.b32.xlu0 %v2251_v10, %s11972_s9 }
 0x84b   :  { %v2202_v11 = vpop.permute.xlu0 %2201 }
 0x84c   :  { %v12512_v14 = vmul.f32 %v11204_v18, %v2202_v11 }
 0x84e   :  { %v2326_v16 = vrot.slane %v12512_v14, 7 }
 0x84f   :  { %v2200_v15 = vpop.permute.xlu1 %2199 }
 0x850   :  { %v12515_v17 = vmul.f32 %v11206_v26, %v2200_v15 }
 0x852   :  { %v2327_v13 = vsel %vm1293_vm4, %v2326_v16, %v12515_v17 }
 0x853   :  { %v2206_v63 = vpop.permute.xlu0 %2205  ;;  %2328 = vrot.lane.b32.xlu1 %v2327_v13, %s11972_s9 }
 0x854   :  { %v12520_v20 = vmul.f32 %v11210_v30, %v2206_v63  ;;  %v2204_v25 = vpop.permute.xlu1 %2203 }
 0x855   :  { %v12524_v28 = vmul.f32 %v12469_v29, %v2204_v25 }
 0x856   :  { %14905 = vst [vmem:[#allocation9_spill] sm:$0xff] %v12520_v20  ;;  %v2402_v27 = vrot.slane %v12520_v20, 7 }
 0x858   :  { %v2403_v18 = vsel %vm1293_vm4, %v2402_v27, %v12524_v28 }
 0x859   :  { %2404 = vrot.lane.b32.xlu0 %v2403_v18, %s11972_s9 }
 0x8bb   :  { %v2253_v26 = vpop.permute.xlu0 %2252 }
 0x8bc   :  { %10204 = vmatmul.mubr.msk.f32.vlgmr.msra.gmra.mrb[16].mxu1 %vm1843_vm11, %v2253_v26 }
 0x8bd   :  { %10790 = vmatpush3.bf16.msra.mxu1 %v12402_v9  ;;  %10225 = vmatprep.mubr.msk.f32.mxu1 %vm11968_vm1, %v14875_v2 }
 0x8be   :  { %10791 = vmatprep.subr.bf16.mxu1 %v14873_v23 }
 0x8c1   :  { %10793 = vmatpush3.bf16.msra.mxu1 %v12413_v12 }
 0x8c2   :  { %10800 = vmatprep.subr.bf16.mxu1 %v14873_v23 }
 0x8c5   :  { %v2329_v29 = vpop.permute.xlu1 %2328 }
 0x8c6   :  { %10215 = vmatmul.mubr.msk.f32.vlgmr.msra.gmra.mrb[22].mxu0 %vm1843_vm11, %v2329_v29 }
 0x8c7   :  { %10796 = vmatpush3.bf16.msra.mxu0 %v12349_v55  ;;  %10236 = vmatprep.mubr.msk.f32.mxu0 %vm11968_vm1, %v14875_v2 }
 0x8c8   :  { %10797 = vmatprep.subr.bf16.mxu0 %v14873_v23 }
 0x8cb   :  { %v2405_v30 = vpop.permute.xlu0 %2404  ;;  %10799 = vmatpush3.bf16.msra.mxu0 %v12363_v59 }
 0x8cc   :  { %10226 = vmatmul.mubr.msk.f32.vlgmr.msra.gmra.mrb[18].mxu1 %vm1843_vm11, %v2405_v30  ;;  %10806 = vmatprep.subr.bf16.mxu0 %v14873_v23 }
 0x8cd   :  { %10802 = vmatpush3.bf16.msra.mxu1 %v12379_v62  ;;  %10247 = vmatprep.mubr.msk.f32.mxu1 %vm11968_vm1, %v14875_v2 }
 0x8ce   :  { %10803 = vmatprep.subr.bf16.mxu1 %v14873_v23 }
 0x8d1   :  { %10805 = vmatpush3.bf16.msra.mxu1 %v12390_v3 }
 0x8d2   :  { %10812 = vmatprep.subr.bf16.mxu1 %v14873_v23 }
 0x98f   :  { %v2322_v31 = vpop.f32.mrb[16].mxu1 }
 0x990   :  { %v2481_v33 = vrot.slane %v2322_v31, 7  ;;  %v2491_v34 = vadd.f32 %v2322_v31, %v12432_v24  ;;  %v10205_v35 = vpop.f32.mrb[17].mxu1 }
 0x992   :  { %v2490_v36 = vadd.f32 %v2481_v33, %v12430_v22  ;;  %11223 = vtanh.f32 %v2491_v34  ;;  %v9585_v58 = vmul.f32 -1.442695, %v2491_v34 }
 0x994   :  { %11225 = vtanh.f32 %v2490_v36  ;;  %v9584_v60 = vmul.f32 -1.442695, %v2490_v36 }
 0x999   :  { %v2398_v38 = vpop.f32.mrb[22].mxu0 }
 0x99a   :  { %v2482_v19 = vrot.slane %v2398_v38, 7  ;;  %v2493_v41 = vadd.f32 %v2398_v38, %v12439_v32  ;;  %v10216_v21 = vpop.f32.mrb[23].mxu0 }
 0x99c   :  { %v11224_v6 = vpop.eup %11223  ;;  %v2492_v46 = vadd.f32 %v2482_v19, %v12445_v37  ;;  %11227 = vtanh.f32 %v2493_v41  ;;  %v9587_v61 = vmul.f32 -1.442695, %v2493_v41 }
 0x99d   :  { %2570 = vrot.lane.b32.xlu0 %v11224_v6, %s11971_s25 }
 0x99e   :  { %v11226_v47 = vpop.eup %11225  ;;  %11229 = vtanh.f32 %v2492_v46  ;;  %v9586_v8 = vmul.f32 -1.442695, %v2492_v46 }
 0x99f   :  { %v2474_v48 = vpop.f32.mrb[18].mxu1  ;;  %2568 = vrot.lane.b32.xlu1 %v11226_v47, %s11971_s25 }
 0x9a0   :  { %v2483_v49 = vrot.slane %v2474_v48, 7  ;;  %v2495_v51 = vadd.f32 %v2474_v48, %v12451_v42  ;;  %v10227_v52 = vpop.f32.mrb[19].mxu1 }
 0x9a2   :  { %v2494_v53 = vadd.f32 %v2483_v49, %v12449_v40  ;;  %11231 = vtanh.f32 %v2495_v51  ;;  %v9589_v11 = vmul.f32 -1.442695, %v2495_v51 }
 0x9a4   :  { %11233 = vtanh.f32 %v2494_v53  ;;  %v9588_v13 = vmul.f32 -1.442695, %v2494_v53 }
 0x9a5   :  { %11235 = vpow2.f32 %v9585_v58 }
 0x9a6   :  { %v11228_v54 = vpop.eup %11227  ;;  %11237 = vpow2.f32 %v9584_v60  ;;  %v2544_v60 = vrot.slane %v12476_v39, 7 }
 0x9a7   :  { %2574 = vrot.lane.b32.xlu0 %v11228_v54, %s11971_s25  ;;  %11239 = vpow2.f32 %v9587_v61 }
 0x9a8   :  { %v11230_v1 = vpop.eup %11229  ;;  %11241 = vpow2.f32 %v9586_v8 }
 0x9a9   :  { %2572 = vrot.lane.b32.xlu1 %v11230_v1, %s11971_s25  ;;  %11243 = vpow2.f32 %v9589_v11 }
 0x9ac   :  { %v11232_v56 = vpop.eup %11231 }
 0x9ad   :  { %2578 = vrot.lane.b32.xlu0 %v11232_v56, %s11971_s25 }
 0x9ae   :  { %v11234_v57 = vpop.eup %11233 }
 0x9af   :  { %2576 = vrot.lane.b32.xlu1 %v11234_v57, %s11971_s25  ;;  %v11236_v10 = vpop.eup %11235  ;;  %v2545_v57 = vrot.slane %v12480_v43, 7 }
 0x9b0   :  { %v11238_v15 = vpop.eup %11237  ;;  %v2515_v16 = vadd.f32 1.0, %v11236_v10 }
 0x9b1   :  { %v2514_v63 = vadd.f32 1.0, %v11238_v15  ;;  %v11240_v25 = vpop.eup %11239 }
 0x9b2   :  { %11245 = vrcp.f32 %v2515_v16  ;;  %v11242_v27 = vpop.eup %11241  ;;  %v2517_v18 = vadd.f32 1.0, %v11240_v25  ;;  %v2547_v16 = vrot.slane %v12483_v45, 7 }
 0x9b3   :  { %11247 = vpow2.f32 %v9588_v13  ;;  %v11244_v26 = vpop.eup %11243  ;;  %v2516_v29 = vadd.f32 1.0, %v11242_v27  ;;  %v2546_v13 = vrot.slane %v12487_v50, 7  ;;  %v2548_v50 = vrot.slane %v12494_v0, 7 }
 0x9b4   :  { %11249 = vrcp.f32 %v2514_v63  ;;  %v2519_v35 = vadd.f32 1.0, %v11244_v26 }
 0x9b5   :  { %11251 = vrcp.f32 %v2517_v18  ;;  %v2549_v18 = vrot.slane %v12492_v5, 7 }
 0x9b6   :  { %11253 = vrcp.f32 %v2516_v29 }
 0x9b7   :  { %11255 = vrcp.f32 %v2519_v35 }
 0x9bc   :  { %v12562_v30 = vpop.eup %11245 }
 0x9bd   :  { %v11248_v34 = vpop.eup %11247  ;;  %v2557_v58 = vmul.f32 %v12562_v30, %v2545_v57 }
 0x9be   :  { %v12565_v36 = vpop.eup %11249  ;;  %v2518_v41 = vadd.f32 1.0, %v11248_v34 }
 0x9bf   :  { %v12570_v21 = vpop.eup %11251  ;;  %v2556_v10 = vmul.f32 %v12565_v36, %v2544_v60 }
 0x9c0   :  { %11257 = vrcp.f32 %v2518_v41  ;;  %v12573_v47 = vpop.eup %11253  ;;  %v2559_v43 = vmul.f32 %v12570_v21, %v2547_v16 }
 0x9c1   :  { %v12577_v51 = vpop.eup %11255  ;;  %v2558_v25 = vmul.f32 %v12573_v47, %v2546_v13 }
 0x9c2   :  { %v2561_v45 = vmul.f32 %v12577_v51, %v2549_v18 }
 0x9ca   :  { %v12581_v54 = vpop.eup %11257 }
 0x9cb   :  { %v2560_v5 = vmul.f32 %v12581_v54, %v2548_v50 }
 0xa0f   :  { %v2571_v31 = vpop.permute.xlu0 %2570 }
 0xa10   :  { %v2587_v33 = vmul.f32 %v12562_v30, %v2571_v31 }
 0xa11   :  { %v2569_v38 = vpop.permute.xlu1 %2568 }
 0xa12   :  { %2600 = vrot.lane.b32.xlu0 %v2587_v33, %s11972_s9  ;;  %v2586_v19 = vmul.f32 %v12565_v36, %v2569_v38 }
 0xa14   :  { %2598 = vrot.lane.b32.xlu1 %v2586_v19, %s11972_s9 }
 0xa19   :  { %v2575_v6 = vpop.permute.xlu0 %2574 }
 0xa1a   :  { %v2589_v46 = vmul.f32 %v12570_v21, %v2575_v6 }
 0xa1b   :  { %v2573_v48 = vpop.permute.xlu1 %2572 }
 0xa1c   :  { %2604 = vrot.lane.b32.xlu0 %v2589_v46, %s11972_s9  ;;  %v2588_v49 = vmul.f32 %v12573_v47, %v2573_v48 }
 0xa1e   :  { %2602 = vrot.lane.b32.xlu1 %v2588_v49, %s11972_s9 }
 0xa1f   :  { %v2579_v52 = vpop.permute.xlu0 %2578 }
 0xa20   :  { %v2591_v53 = vmul.f32 %v12577_v51, %v2579_v52 }
 0xa21   :  { %v2577_v1 = vpop.permute.xlu1 %2576 }
 0xa22   :  { %2608 = vrot.lane.b32.xlu0 %v2591_v53, %s11972_s9  ;;  %v2590_v56 = vmul.f32 %v12581_v54, %v2577_v1 }
 0xa24   :  { %2606 = vrot.lane.b32.xlu1 %v2590_v56, %s11972_s9 }
 0xa84   :  { %v2601_v61 = vpop.permute.xlu0 %2600 }
 0xa85   :  { %v12589_v8 = vadd.f32 %v2601_v61, %v2557_v58 }
 0xa86   :  { %v2599_v11 = vpop.permute.xlu1 %2598 }
 0xa87   :  { %11259 = vtanh.f32 %v12589_v8  ;;  %v12593_v15 = vadd.f32 %v2599_v11, %v2556_v10 }
 0xa89   :  { %11261 = vtanh.f32 %v12593_v15 }
 0xa8e   :  { %v2605_v63 = vpop.permute.xlu0 %2604 }
 0xa8f   :  { %v12599_v39 = vadd.f32 %v2605_v63, %v2559_v43 }
 0xa90   :  { %v2603_v26 = vpop.permute.xlu1 %2602 }
 0xa91   :  { %v11260_v27 = vpop.eup %11259  ;;  %11263 = vtanh.f32 %v12599_v39  ;;  %v12604_v29 = vadd.f32 %v2603_v26, %v2558_v25 }
 0xa92   :  { %2636 = vrot.lane.b32.xlu0 %v11260_v27, %s11971_s25 }
 0xa93   :  { %v11262_v31 = vpop.eup %11261  ;;  %11265 = vtanh.f32 %v12604_v29 }
 0xa94   :  { %v2609_v33 = vpop.permute.xlu0 %2608  ;;  %2634 = vrot.lane.b32.xlu1 %v11262_v31, %s11971_s25 }
 0xa95   :  { %v12610_v34 = vadd.f32 %v2609_v33, %v2561_v45 }
 0xa96   :  { %v2607_v35 = vpop.permute.xlu1 %2606 }
 0xa97   :  { %11267 = vtanh.f32 %v12610_v34  ;;  %v12615_v38 = vadd.f32 %v2607_v35, %v2560_v5 }
 0xa99   :  { %11269 = vtanh.f32 %v12615_v38 }
 0xa9b   :  { %v11264_v19 = vpop.eup %11263 }
 0xa9c   :  { %2640 = vrot.lane.b32.xlu0 %v11264_v19, %s11971_s25 }
 0xa9d   :  { %v11266_v0 = vpop.eup %11265 }
 0xa9e   :  { %2638 = vrot.lane.b32.xlu1 %v11266_v0, %s11971_s25 }
 0xaa1   :  { %v11268_v41 = vpop.eup %11267 }
 0xaa2   :  { %2644 = vrot.lane.b32.xlu0 %v11268_v41, %s11971_s25 }
 0xaa3   :  { %v11270_v6 = vpop.eup %11269 }
 0xaa4   :  { %2642 = vrot.lane.b32.xlu1 %v11270_v6, %s11971_s25 }
 0xb04   :  { %v2637_v46 = vpop.permute.xlu0 %2636 }
 0xb05   :  { %v12626_v52 = vmul.f32 %v12562_v30, %v2637_v46 }
 0xb06   :  { %v2635_v48 = vpop.permute.xlu1 %2634 }
 0xb07   :  { %v12623_v49 = vmul.f32 %v12565_v36, %v2635_v48 }
 0xb09   :  { %v2689_v53 = vrot.slane %v12623_v49, 1 }
 0xb0b   :  { %v2690_v1 = vsel %vm1293_vm4, %v12626_v52, %v2689_v53 }
 0xb0c   :  { %2691 = vrot.lane.b32.xlu1 %v2690_v1, %s11972_s9 }
 0xb0e   :  { %v2641_v56 = vpop.permute.xlu0 %2640 }
 0xb0f   :  { %v12636_v60 = vmul.f32 %v12570_v21, %v2641_v56 }
 0xb10   :  { %v2639_v57 = vpop.permute.xlu1 %2638 }
 0xb11   :  { %v12633_v58 = vmul.f32 %v12573_v47, %v2639_v57 }
 0xb13   :  { %v2765_v36 = vrot.slane %v12633_v58, 1 }
 0xb14   :  { %v2645_v61 = vpop.permute.xlu0 %2644 }
 0xb15   :  { %v2766_v30 = vsel %vm1293_vm4, %v12636_v60, %v2765_v36  ;;  %v12646_v16 = vmul.f32 %v12577_v51, %v2645_v61 }
 0xb16   :  { %2767 = vrot.lane.b32.xlu0 %v2766_v30, %s11972_s9  ;;  %v2643_v10 = vpop.permute.xlu1 %2642 }
 0xb17   :  { %v12643_v11 = vmul.f32 %v12581_v54, %v2643_v10 }
 0xb19   :  { %v2841_v47 = vrot.slane %v12643_v11, 1 }
 0xb1b   :  { %v2842_v21 = vsel %vm1293_vm4, %v12646_v16, %v2841_v47 }
 0xb1c   :  { %2843 = vrot.lane.b32.xlu1 %v2842_v21, %s11972_s9 }
 0xb7e   :  { %v2692_v43 = vpop.permute.xlu1 %2691 }
 0xb7f   :  { %10237 = vmatmul.mubr.msk.f32.vlgmr.msra.gmra.mrb[24].mxu0 %vm1843_vm11, %v2692_v43 }
 0xb80   :  { %10808 = vmatpush3.bf16.msra.mxu0 %v12402_v9  ;;  %10258 = vmatprep.mubr.msk.f32.mxu0 %vm11968_vm1, %v14875_v2 }
 0xb81   :  { %10809 = vmatprep.subr.bf16.mxu0 %v14873_v23 }
 0xb84   :  { %10811 = vmatpush3.bf16.msra.mxu0 %v12413_v12 }
 0xb85   :  { %10818 = vmatprep.subr.bf16.mxu0 %v14873_v23 }
 0xb88   :  { %v2768_v51 = vpop.permute.xlu0 %2767 }
 0xb89   :  { %10248 = vmatmul.mubr.msk.f32.vlgmr.msra.gmra.mrb[20].mxu1 %vm1843_vm11, %v2768_v51 }
 0xb8a   :  { %10814 = vmatpush3.bf16.msra.mxu1 %v12349_v55  ;;  %10269 = vmatprep.mubr.msk.f32.mxu1 %vm11968_vm1, %v14875_v2 }
 0xb8b   :  { %10815 = vmatprep.subr.bf16.mxu1 %v14873_v23 }
 0xb8e   :  { %v2844_v54 = vpop.permute.xlu1 %2843  ;;  %10817 = vmatpush3.bf16.msra.mxu1 %v12363_v59 }
 0xb8f   :  { %10259 = vmatmul.mubr.msk.f32.vlgmr.msra.gmra.mrb[26].mxu0 %vm1843_vm11, %v2844_v54  ;;  %10824 = vmatprep.subr.bf16.mxu1 %v14873_v23 }
 0xb90   :  { %10820 = vmatpush3.bf16.msra.mxu0 %v12379_v62  ;;  %10280 = vmatprep.mubr.msk.f32.mxu0 %vm11968_vm1, %v14875_v2 }
 0xb91   :  { %10821 = vmatprep.subr.bf16.mxu0 %v14873_v23 }
 0xb94   :  { %10823 = vmatpush3.bf16.msra.mxu0 %v12390_v3 }
 0xb95   :  { %10830 = vmatprep.subr.bf16.mxu0 %v14873_v23 }
 0xc52   :  { %v2761_v13 = vpop.f32.mrb[24].mxu0 }
 0xc53   :  { %v2920_v63 = vrot.slane %v2761_v13, 6  ;;  %v2921_v25 = vrot.slane %v2761_v13, 7  ;;  %v10238_v27 = vpop.f32.mrb[25].mxu0 }
 0xc55   :  { %v2932_v18 = vadd.f32 %v2920_v63, %v12430_v22  ;;  %v2933_v26 = vadd.f32 %v2921_v25, %v12432_v24 }
 0xc57   :  { %11271 = vtanh.f32 %v2932_v18  ;;  %v9593_v61 = vmul.f32 -1.442695, %v2932_v18  ;;  %v9594_v10 = vmul.f32 -1.442695, %v2933_v26 }
 0xc58   :  { %11273 = vtanh.f32 %v2933_v26 }
 0xc5c   :  { %v2837_v45 = vpop.f32.mrb[20].mxu1 }
 0xc5d   :  { %v2922_v31 = vrot.slane %v2837_v45, 6  ;;  %v2923_v50 = vrot.slane %v2837_v45, 7  ;;  %v10249_v33 = vpop.f32.mrb[21].mxu1 }
 0xc5f   :  { %v2934_v5 = vadd.f32 %v2922_v31, %v12445_v37  ;;  %v2935_v35 = vadd.f32 %v2923_v50, %v12439_v32 }
 0xc61   :  { %v11272_v19 = vpop.eup %11271  ;;  %11275 = vtanh.f32 %v2934_v5  ;;  %v9595_v47 = vmul.f32 -1.442695, %v2934_v5  ;;  %v9596_v21 = vmul.f32 -1.442695, %v2935_v35 }
 0xc62   :  { %v11274_v0 = vpop.eup %11273  ;;  %11277 = vtanh.f32 %v2935_v35  ;;  %3010 = vrot.lane.b32.xlu0 %v11272_v19, %s11971_s25  ;;  %v2913_v41 = vpop.f32.mrb[26].mxu0 }
 0xc63   :  { %3012 = vrot.lane.b32.xlu1 %v11274_v0, %s11971_s25  ;;  %v2924_v6 = vrot.slane %v2913_v41, 6  ;;  %v2925_v46 = vrot.slane %v2913_v41, 7  ;;  %v10260_v48 = vpop.f32.mrb[27].mxu0 }
 0xc65   :  { %v2936_v53 = vadd.f32 %v2924_v6, %v12449_v40  ;;  %v2937_v1 = vadd.f32 %v2925_v46, %v12451_v42 }
 0xc67   :  { %11279 = vtanh.f32 %v2936_v53  ;;  %v9597_v13 = vmul.f32 -1.442695, %v2936_v53  ;;  %v9598_v25 = vmul.f32 -1.442695, %v2937_v1 }
 0xc68   :  { %11281 = vtanh.f32 %v2937_v1 }
 0xc69   :  { %11283 = vpow2.f32 %v9593_v61 }
 0xc6a   :  { %11285 = vpow2.f32 %v9594_v10 }
 0xc6b   :  { %v11276_v56 = vpop.eup %11275  ;;  %11287 = vpow2.f32 %v9595_v47 }
 0xc6c   :  { %v11278_v57 = vpop.eup %11277  ;;  %3014 = vrot.lane.b32.xlu0 %v11276_v56, %s11971_s25  ;;  %11289 = vpow2.f32 %v9596_v21 }
 0xc6d   :  { %3016 = vrot.lane.b32.xlu1 %v11278_v57, %s11971_s25 }
 0xc71   :  { %v11280_v36 = vpop.eup %11279 }
 0xc72   :  { %3018 = vrot.lane.b32.xlu0 %v11280_v36, %s11971_s25  ;;  %v11282_v30 = vpop.eup %11281 }
 0xc73   :  { %3020 = vrot.lane.b32.xlu1 %v11282_v30, %s11971_s25  ;;  %v11284_v43 = vpop.eup %11283 }
 0xc74   :  { %v11286_v51 = vpop.eup %11285  ;;  %v2956_v54 = vadd.f32 1.0, %v11284_v43 }
 0xc75   :  { %v2957_v63 = vadd.f32 1.0, %v11286_v51  ;;  %v11288_v27 = vpop.eup %11287  ;;  %v2986_v51 = vrot.slane %v12593_v15, 7  ;;  %v2989_v15 = vrot.slane %v12599_v39, 7 }
 0xc76   :  { %11291 = vrcp.f32 %v2956_v54  ;;  %v11290_v45 = vpop.eup %11289  ;;  %v2958_v18 = vadd.f32 1.0, %v11288_v27  ;;  %v2987_v54 = vrot.slane %v12589_v8, 7 }
 0xc77   :  { %11293 = vpow2.f32 %v9597_v13  ;;  %v2959_v26 = vadd.f32 1.0, %v11290_v45 }
 0xc78   :  { %11295 = vrcp.f32 %v2957_v63 }
 0xc79   :  { %11297 = vpow2.f32 %v9598_v25 }
 0xc7a   :  { %11299 = vrcp.f32 %v2958_v18 }
 0xc7b   :  { %11301 = vrcp.f32 %v2959_v26  ;;  %v2988_v26 = vrot.slane %v12604_v29, 7  ;;  %v2991_v29 = vrot.slane %v12610_v34, 7 }
 0xc80   :  { %v12685_v31 = vpop.eup %11291 }
 0xc81   :  { %v11294_v50 = vpop.eup %11293  ;;  %v2998_v13 = vmul.f32 %v12685_v31, %v2986_v51 }
 0xc82   :  { %v12687_v5 = vpop.eup %11295  ;;  %v2960_v6 = vadd.f32 1.0, %v11294_v50 }
 0xc83   :  { %v11298_v41 = vpop.eup %11297  ;;  %v2999_v25 = vmul.f32 %v12687_v5, %v2987_v54 }
 0xc84   :  { %v2961_v46 = vadd.f32 1.0, %v11298_v41  ;;  %11303 = vrcp.f32 %v2960_v6  ;;  %v12693_v48 = vpop.eup %11299 }
 0xc85   :  { %v12695_v1 = vpop.eup %11301  ;;  %v3000_v8 = vmul.f32 %v12693_v48, %v2988_v26 }
 0xc86   :  { %11305 = vrcp.f32 %v2961_v46  ;;  %v2990_v46 = vrot.slane %v12615_v38, 7 }
 0xc8e   :  { %v12701_v30 = vpop.eup %11303 }
 0xc8f   :  { %v3002_v39 = vmul.f32 %v12701_v30, %v2990_v46 }
 0xc90   :  { %v12704_v47 = vpop.eup %11305 }
 0xcd4   :  { %v3011_v33 = vpop.permute.xlu0 %3010 }
 0xcd5   :  { %v3028_v35 = vmul.f32 %v12685_v31, %v3011_v33  ;;  %v3013_v19 = vpop.permute.xlu1 %3012  ;;  %v3001_v33 = vmul.f32 %v12695_v1, %v2989_v15 }
 0xcd6   :  { %v3029_v0 = vmul.f32 %v12687_v5, %v3013_v19 }
 0xcd7   :  { %3040 = vrot.lane.b32.xlu0 %v3028_v35, %s11972_s9 }
 0xcd8   :  { %3042 = vrot.lane.b32.xlu1 %v3029_v0, %s11972_s9 }
 0xcde   :  { %v3015_v53 = vpop.permute.xlu0 %3014 }
 0xcdf   :  { %v3030_v56 = vmul.f32 %v12693_v48, %v3015_v53  ;;  %v3017_v57 = vpop.permute.xlu1 %3016 }
 0xce0   :  { %v3031_v36 = vmul.f32 %v12695_v1, %v3017_v57  ;;  %v3003_v57 = vmul.f32 %v12704_v47, %v2991_v29 }
 0xce1   :  { %3044 = vrot.lane.b32.xlu0 %v3030_v56, %s11972_s9 }
 0xce2   :  { %3046 = vrot.lane.b32.xlu1 %v3031_v36, %s11972_s9 }
 0xce4   :  { %v3019_v61 = vpop.permute.xlu0 %3018 }
 0xce5   :  { %v3032_v10 = vmul.f32 %v12701_v30, %v3019_v61  ;;  %v3021_v21 = vpop.permute.xlu1 %3020 }
 0xce6   :  { %v3033_v43 = vmul.f32 %v12704_v47, %v3021_v21 }
 0xce7   :  { %3048 = vrot.lane.b32.xlu0 %v3032_v10, %s11972_s9 }
 0xce8   :  { %3050 = vrot.lane.b32.xlu1 %v3033_v43, %s11972_s9 }
 0xd49   :  { %v3041_v63 = vpop.permute.xlu0 %3040 }
 0xd4a   :  { %v12713_v27 = vadd.f32 %v3041_v63, %v2998_v13  ;;  %v3043_v45 = vpop.permute.xlu1 %3042 }
 0xd4b   :  { %v12715_v18 = vadd.f32 %v3043_v45, %v2999_v25 }
 0xd4c   :  { %11307 = vtanh.f32 %v12713_v27 }
 0xd4d   :  { %11309 = vtanh.f32 %v12715_v18 }
 0xd53   :  { %v3045_v50 = vpop.permute.xlu0 %3044 }
 0xd54   :  { %v12723_v35 = vadd.f32 %v3045_v50, %v3000_v8  ;;  %v3047_v19 = vpop.permute.xlu1 %3046 }
 0xd55   :  { %v12725_v0 = vadd.f32 %v3047_v19, %v3001_v33 }
 0xd56   :  { %v11308_v41 = vpop.eup %11307  ;;  %11311 = vtanh.f32 %v12723_v35 }
 0xd57   :  { %v11310_v6 = vpop.eup %11309  ;;  %11313 = vtanh.f32 %v12725_v0  ;;  %3076 = vrot.lane.b32.xlu0 %v11308_v41, %s11971_s25 }
 0xd58   :  { %3078 = vrot.lane.b32.xlu1 %v11310_v6, %s11971_s25 }
 0xd59   :  { %v3049_v53 = vpop.permute.xlu0 %3048 }
 0xd5a   :  { %v12734_v56 = vadd.f32 %v3049_v53, %v3002_v39  ;;  %v3051_v36 = vpop.permute.xlu1 %3050 }
 0xd5b   :  { %v12738_v61 = vadd.f32 %v3051_v36, %v3003_v57 }
 0xd5c   :  { %11315 = vtanh.f32 %v12734_v56 }
 0xd5d   :  { %11317 = vtanh.f32 %v12738_v61 }
 0xd60   :  { %v11312_v38 = vpop.eup %11311 }
 0xd61   :  { %v11314_v10 = vpop.eup %11313  ;;  %3080 = vrot.lane.b32.xlu0 %v11312_v38, %s11971_s25 }
 0xd62   :  { %3082 = vrot.lane.b32.xlu1 %v11314_v10, %s11971_s25 }
 0xd66   :  { %v11316_v21 = vpop.eup %11315 }
 0xd67   :  { %3084 = vrot.lane.b32.xlu0 %v11316_v21, %s11971_s25  ;;  %v11318_v34 = vpop.eup %11317 }
 0xd68   :  { %3086 = vrot.lane.b32.xlu1 %v11318_v34, %s11971_s25 }
 0xdc9   :  { %v3077_v43 = vpop.permute.xlu0 %3076 }
 0xdca   :  { %v12746_v51 = vmul.f32 %v12685_v31, %v3077_v43  ;;  %v3079_v54 = vpop.permute.xlu1 %3078 }
 0xdcb   :  { %v12749_v13 = vmul.f32 %v12687_v5, %v3079_v54 }
 0xdcc   :  { %v3131_v63 = vrot.slane %v12746_v51, 2 }
 0xdcd   :  { %v3132_v25 = vrot.slane %v12749_v13, 1 }
 0xdcf   :  { %v3133_v45 = vsel %vm1293_vm4, %v3132_v25, %v3131_v63 }
 0xdd0   :  { %3134 = vrot.lane.b32.xlu0 %v3133_v45, %s11972_s9 }
 0xdd3   :  { %v3081_v26 = vpop.permute.xlu0 %3080 }
 0xdd4   :  { %v12756_v15 = vmul.f32 %v12693_v48, %v3081_v26  ;;  %v3083_v8 = vpop.permute.xlu1 %3082 }
 0xdd5   :  { %v12759_v31 = vmul.f32 %v12695_v1, %v3083_v8 }
 0xdd6   :  { %v3208_v50 = vrot.slane %v12756_v15, 2 }
 0xdd7   :  { %v3209_v5 = vrot.slane %v12759_v31, 1 }
 0xdd9   :  { %v3210_v33 = vsel %vm1293_vm4, %v3209_v5, %v3208_v50  ;;  %v3085_v19 = vpop.permute.xlu0 %3084 }
 0xdda   :  { %3211 = vrot.lane.b32.xlu1 %v3210_v33, %s11972_s9  ;;  %v12766_v41 = vmul.f32 %v12701_v30, %v3085_v19  ;;  %v3087_v6 = vpop.permute.xlu1 %3086 }
 0xddb   :  { %v12770_v46 = vmul.f32 %v12704_v47, %v3087_v6 }
 0xddc   :  { %v3285_v48 = vrot.slane %v12766_v41, 2 }
 0xddd   :  { %14906 = vst [vmem:[#allocation10_spill] sm:$0xff] %v12770_v46  ;;  %v3286_v1 = vrot.slane %v12770_v46, 1 }
 0xddf   :  { %v3287_v39 = vsel %vm1293_vm4, %v3286_v1, %v3285_v48 }
 0xde0   :  { %3288 = vrot.lane.b32.xlu0 %v3287_v39, %s11972_s9 }
 0xe42   :  { %v3135_v29 = vpop.permute.xlu0 %3134 }
 0xe43   :  { %10270 = vmatmul.mubr.msk.f32.vlgmr.msra.gmra.mrb[22].mxu1 %vm1843_vm11, %v3135_v29 }
 0xe44   :  { %10826 = vmatpush3.bf16.msra.mxu1 %v12402_v9  ;;  %10291 = vmatprep.mubr.msk.f32.mxu1 %vm11968_vm1, %v14875_v2 }
 0xe45   :  { %10827 = vmatprep.subr.bf16.mxu1 %v14873_v23 }
 0xe48   :  { %10829 = vmatpush3.bf16.msra.mxu1 %v12413_v12 }
 0xe49   :  { %10836 = vmatprep.subr.bf16.mxu1 %v14873_v23 }
 0xe4c   :  { %v3212_v30 = vpop.permute.xlu1 %3211 }
 0xe4d   :  { %10281 = vmatmul.mubr.msk.f32.vlgmr.msra.gmra.mrb[28].mxu0 %vm1843_vm11, %v3212_v30 }
 0xe4e   :  { %10832 = vmatpush3.bf16.msra.mxu0 %v12349_v55  ;;  %10302 = vmatprep.mubr.msk.f32.mxu0 %vm11968_vm1, %v14875_v2 }
 0xe4f   :  { %10833 = vmatprep.subr.bf16.mxu0 %v14873_v23 }
 0xe52   :  { %10835 = vmatpush3.bf16.msra.mxu0 %v12363_v59  ;;  %v3289_v47 = vpop.permute.xlu0 %3288 }
 0xe53   :  { %10842 = vmatprep.subr.bf16.mxu0 %v14873_v23  ;;  %10292 = vmatmul.mubr.msk.f32.vlgmr.msra.gmra.mrb[24].mxu1 %vm1843_vm11, %v3289_v47 }
 0xe54   :  { %10838 = vmatpush3.bf16.msra.mxu1 %v12379_v62  ;;  %10313 = vmatprep.mubr.msk.f32.mxu1 %vm11968_vm1, %v14875_v2 }
 0xe55   :  { %10839 = vmatprep.subr.bf16.mxu1 %v14873_v23 }
 0xe58   :  { %10841 = vmatpush3.bf16.msra.mxu1 %v12390_v3 }
 0xe59   :  { %10848 = vmatprep.subr.bf16.mxu1 %v14873_v23 }
 0xf16   :  { %v3204_v53 = vpop.f32.mrb[22].mxu1 }
 0xf17   :  { %v3365_v57 = vrot.slane %v3204_v53, 5  ;;  %v3366_v36 = vrot.slane %v3204_v53, 6  ;;  %v10271_v38 = vpop.f32.mrb[23].mxu1 }
 0xf19   :  { %v3377_v10 = vadd.f32 %v3365_v57, %v12430_v22  ;;  %v3378_v21 = vadd.f32 %v3366_v36, %v12432_v24 }
 0xf1b   :  { %11319 = vtanh.f32 %v3377_v10  ;;  %v9602_v47 = vmul.f32 -1.442695, %v3377_v10  ;;  %v9603_v53 = vmul.f32 -1.442695, %v3378_v21 }
 0xf1c   :  { %11321 = vtanh.f32 %v3378_v21 }
 0xf20   :  { %v3281_v34 = vpop.f32.mrb[28].mxu0 }
 0xf21   :  { %v3367_v43 = vrot.slane %v3281_v34, 5  ;;  %v3368_v54 = vrot.slane %v3281_v34, 6  ;;  %v10282_v63 = vpop.f32.mrb[29].mxu0 }
 0xf23   :  { %v3379_v25 = vadd.f32 %v3367_v43, %v12445_v37  ;;  %v3380_v45 = vadd.f32 %v3368_v54, %v12439_v32 }
 0xf25   :  { %v11320_v26 = vpop.eup %11319  ;;  %11323 = vtanh.f32 %v3379_v25  ;;  %v9604_v57 = vmul.f32 -1.442695, %v3379_v25  ;;  %v9605_v36 = vmul.f32 -1.442695, %v3380_v45 }
 0xf26   :  { %v11322_v8 = vpop.eup %11321  ;;  %11325 = vtanh.f32 %v3380_v45  ;;  %3455 = vrot.lane.b32.xlu1 %v11320_v26, %s11971_s25  ;;  %v3358_v50 = vpop.f32.mrb[24].mxu1 }
 0xf27   :  { %3457 = vrot.lane.b32.xlu0 %v11322_v8, %s11971_s25  ;;  %v3369_v5 = vrot.slane %v3358_v50, 5  ;;  %v3370_v33 = vrot.slane %v3358_v50, 6  ;;  %v10293_v19 = vpop.f32.mrb[25].mxu1 }
 0xf29   :  { %v3381_v6 = vadd.f32 %v3369_v5, %v12449_v40  ;;  %v3382_v48 = vadd.f32 %v3370_v33, %v12451_v42 }
 0xf2b   :  { %11327 = vtanh.f32 %v3381_v6  ;;  %v9606_v63 = vmul.f32 -1.442695, %v3381_v6  ;;  %v9607_v26 = vmul.f32 -1.442695, %v3382_v48 }
 0xf2c   :  { %11329 = vtanh.f32 %v3382_v48 }
 0xf2d   :  { %11331 = vpow2.f32 %v9602_v47 }
 0xf2e   :  { %11333 = vpow2.f32 %v9603_v53 }
 0xf2f   :  { %v11324_v1 = vpop.eup %11323  ;;  %11335 = vpow2.f32 %v9604_v57 }
 0xf30   :  { %v11326_v39 = vpop.eup %11325  ;;  %3459 = vrot.lane.b32.xlu1 %v11324_v1, %s11971_s25  ;;  %11337 = vpow2.f32 %v9605_v36 }
 0xf31   :  { %3461 = vrot.lane.b32.xlu0 %v11326_v39, %s11971_s25 }
 0xf35   :  { %v11328_v29 = vpop.eup %11327 }
 0xf36   :  { %v11330_v30 = vpop.eup %11329  ;;  %3463 = vrot.lane.b32.xlu1 %v11328_v29, %s11971_s25 }
 0xf37   :  { %3465 = vrot.lane.b32.xlu0 %v11330_v30, %s11971_s25  ;;  %v11332_v38 = vpop.eup %11331 }
 0xf38   :  { %v11334_v34 = vpop.eup %11333  ;;  %v3401_v43 = vadd.f32 1.0, %v11332_v38 }
 0xf39   :  { %v3402_v54 = vadd.f32 1.0, %v11334_v34  ;;  %v11336_v8 = vpop.eup %11335 }
 0xf3a   :  { %11339 = vrcp.f32 %v3401_v43  ;;  %v11338_v50 = vpop.eup %11337  ;;  %v3403_v10 = vadd.f32 1.0, %v11336_v8 }
 0xf3b   :  { %11341 = vrcp.f32 %v3402_v54  ;;  %v3404_v21 = vadd.f32 1.0, %v11338_v50  ;;  %v3431_v50 = vrot.slane %v12713_v27, 7  ;;  %v3434_v27 = vrot.slane %v12725_v0, 7 }
 0xf3c   :  { %11343 = vpow2.f32 %v9606_v63  ;;  %v3436_v0 = vrot.slane %v12738_v61, 7 }
 0xf3d   :  { %11345 = vpow2.f32 %v9607_v26 }
 0xf3e   :  { %11347 = vrcp.f32 %v3403_v10  ;;  %v3432_v10 = vrot.slane %v12715_v18, 7 }
 0xf3f   :  { %11349 = vrcp.f32 %v3404_v21 }
 0xf44   :  { %v12808_v5 = vpop.eup %11339 }
 0xf45   :  { %v12810_v45 = vpop.eup %11341  ;;  %v3443_v21 = vmul.f32 %v12808_v5, %v3431_v50 }
 0xf46   :  { %v11344_v6 = vpop.eup %11343 }
 0xf47   :  { %v11346_v1 = vpop.eup %11345  ;;  %v3405_v39 = vadd.f32 1.0, %v11344_v6 }
 0xf48   :  { %v3406_v29 = vadd.f32 1.0, %v11346_v1  ;;  %v12816_v30 = vpop.eup %11347  ;;  %v3433_v1 = vrot.slane %v12723_v35, 7  ;;  %v3435_v35 = vrot.slane %v12734_v56, 7 }
 0xf49   :  { %11351 = vrcp.f32 %v3405_v39  ;;  %v12818_v53 = vpop.eup %11349 }
 0xf4a   :  { %11353 = vrcp.f32 %v3406_v29  ;;  %v3445_v18 = vmul.f32 %v12816_v30, %v3433_v1  ;;  %v3446_v39 = vmul.f32 %v12818_v53, %v3434_v27 }
 0xf53   :  { %v12824_v34 = vpop.eup %11351 }
 0xf54   :  { %v12826_v54 = vpop.eup %11353 }
 0xf98   :  { %v3456_v25 = vpop.permute.xlu1 %3455 }
 0xf99   :  { %v3458_v33 = vpop.permute.xlu0 %3457  ;;  %v3473_v19 = vmul.f32 %v12808_v5, %v3456_v25  ;;  %v3444_v25 = vmul.f32 %v12810_v45, %v3432_v10 }
 0xf9a   :  { %v3474_v48 = vmul.f32 %v12810_v45, %v3458_v33 }
 0xf9b   :  { %3485 = vrot.lane.b32.xlu1 %v3473_v19, %s11972_s9 }
 0xf9c   :  { %3487 = vrot.lane.b32.xlu0 %v3474_v48, %s11972_s9 }
 0xfa2   :  { %v3460_v47 = vpop.permute.xlu1 %3459 }
 0xfa3   :  { %v3462_v57 = vpop.permute.xlu0 %3461  ;;  %v3475_v36 = vmul.f32 %v12816_v30, %v3460_v47 }
 0xfa4   :  { %v3476_v38 = vmul.f32 %v12818_v53, %v3462_v57 }
 0xfa5   :  { %3489 = vrot.lane.b32.xlu1 %v3475_v36, %s11972_s9 }
 0xfa6   :  { %3491 = vrot.lane.b32.xlu0 %v3476_v38, %s11972_s9 }
 0xfa8   :  { %v3464_v43 = vpop.permute.xlu1 %3463 }
 0xfa9   :  { %v3466_v63 = vpop.permute.xlu0 %3465  ;;  %v3477_v26 = vmul.f32 %v12824_v34, %v3464_v43 }
 0xfaa   :  { %v3478_v8 = vmul.f32 %v12826_v54, %v3466_v63  ;;  %v3447_v63 = vmul.f32 %v12824_v34, %v3435_v35 }
 0xfab   :  { %3493 = vrot.lane.b32.xlu1 %v3477_v26, %s11972_s9  ;;  %v3448_v26 = vmul.f32 %v12826_v54, %v3436_v0 }
 0xfac   :  { %3495 = vrot.lane.b32.xlu0 %v3478_v8, %s11972_s9 }
0x100d   :  { %v3486_v33 = vpop.permute.xlu1 %3485 }
0x100e   :  { %v3488_v19 = vpop.permute.xlu0 %3487  ;;  %v12836_v6 = vadd.f32 %v3486_v33, %v3443_v21 }
0x100f   :  { %v12838_v48 = vadd.f32 %v3488_v19, %v3444_v25 }
0x1010   :  { %11355 = vtanh.f32 %v12836_v6 }
0x1011   :  { %11357 = vtanh.f32 %v12838_v48 }
0x1017   :  { %v3490_v29 = vpop.permute.xlu1 %3489 }
0x1018   :  { %v3492_v47 = vpop.permute.xlu0 %3491  ;;  %v12846_v57 = vadd.f32 %v3490_v29, %v3445_v18 }
0x1019   :  { %v12848_v36 = vadd.f32 %v3492_v47, %v3446_v39 }
0x101a   :  { %v11356_v38 = vpop.eup %11355  ;;  %11359 = vtanh.f32 %v12846_v57 }
0x101b   :  { %v11358_v43 = vpop.eup %11357  ;;  %11361 = vtanh.f32 %v12848_v36  ;;  %3521 = vrot.lane.b32.xlu1 %v11356_v38, %s11971_s25 }
0x101c   :  { %3523 = vrot.lane.b32.xlu0 %v11358_v43, %s11971_s25 }
0x101d   :  { %v3494_v8 = vpop.permute.xlu1 %3493 }
0x101e   :  { %v3496_v50 = vpop.permute.xlu0 %3495  ;;  %v12858_v10 = vadd.f32 %v3494_v8, %v3447_v63 }
0x101f   :  { %v12860_v21 = vadd.f32 %v3496_v50, %v3448_v26 }
0x1020   :  { %11363 = vtanh.f32 %v12858_v10 }
0x1021   :  { %11365 = vtanh.f32 %v12860_v21 }
0x1024   :  { %v11360_v25 = vpop.eup %11359 }
0x1025   :  { %v11362_v33 = vpop.eup %11361  ;;  %3525 = vrot.lane.b32.xlu1 %v11360_v25, %s11971_s25 }
0x1026   :  { %3527 = vrot.lane.b32.xlu0 %v11362_v33, %s11971_s25 }
0x102a   :  { %v11364_v56 = vpop.eup %11363 }
0x102b   :  { %v11366_v61 = vpop.eup %11365  ;;  %3529 = vrot.lane.b32.xlu1 %v11364_v56, %s11971_s25 }
0x102c   :  { %3531 = vrot.lane.b32.xlu0 %v11366_v61, %s11971_s25 }
0x108d   :  { %v3522_v19 = vpop.permute.xlu1 %3521 }
0x108e   :  { %v3524_v1 = vpop.permute.xlu0 %3523  ;;  %v12869_v27 = vmul.f32 %v12808_v5, %v3522_v19 }
0x108f   :  { %v12872_v18 = vmul.f32 %v12810_v45, %v3524_v1 }
0x1090   :  { %v3576_v39 = vrot.slane %v12869_v27, 3 }
0x1091   :  { %v3577_v29 = vrot.slane %v12872_v18, 2 }
0x1093   :  { %v3578_v47 = vsel %vm1293_vm4, %v3577_v29, %v3576_v39 }
0x1094   :  { %3579 = vrot.lane.b32.xlu1 %v3578_v47, %s11972_s9 }
0x1097   :  { %v3526_v38 = vpop.permute.xlu1 %3525 }
0x1098   :  { %v3528_v43 = vpop.permute.xlu0 %3527  ;;  %v12879_v35 = vmul.f32 %v12816_v30, %v3526_v38 }
0x1099   :  { %v12882_v0 = vmul.f32 %v12818_v53, %v3528_v43 }
0x109a   :  { %v3653_v5 = vrot.slane %v12879_v35, 3 }
0x109b   :  { %v3654_v45 = vrot.slane %v12882_v0, 2 }
0x109d   :  { %v3655_v63 = vsel %vm1293_vm4, %v3654_v45, %v3653_v5  ;;  %v3530_v26 = vpop.permute.xlu1 %3529 }
0x109e   :  { %3656 = vrot.lane.b32.xlu0 %v3655_v63, %s11972_s9  ;;  %v3532_v8 = vpop.permute.xlu0 %3531  ;;  %v12889_v50 = vmul.f32 %v12824_v34, %v3530_v26 }
0x109f   :  { %v12892_v25 = vmul.f32 %v12826_v54, %v3532_v8 }
0x10a0   :  { %v3730_v30 = vrot.slane %v12889_v50, 3 }
0x10a1   :  { %14907 = vst [vmem:[#allocation11_spill] sm:$0xff] %v12892_v25  ;;  %v3731_v53 = vrot.slane %v12892_v25, 2 }
0x10a3   :  { %v3732_v33 = vsel %vm1293_vm4, %v3731_v53, %v3730_v30 }
0x10a4   :  { %3733 = vrot.lane.b32.xlu1 %v3732_v33, %s11972_s9 }
0x1106   :  { %v3580_v56 = vpop.permute.xlu1 %3579 }
0x1107   :  { %10303 = vmatmul.mubr.msk.f32.vlgmr.msra.gmra.mrb[30].mxu0 %vm1843_vm11, %v3580_v56 }
0x1108   :  { %10844 = vmatpush3.bf16.msra.mxu0 %v12402_v9  ;;  %10324 = vmatprep.mubr.msk.f32.mxu0 %vm11968_vm1, %v14875_v2 }
0x1109   :  { %10845 = vmatprep.subr.bf16.mxu0 %v14873_v23 }
0x110c   :  { %10847 = vmatpush3.bf16.msra.mxu0 %v12413_v12 }
0x110d   :  { %10854 = vmatprep.subr.bf16.mxu0 %v14873_v23 }
0x1110   :  { %v3657_v34 = vpop.permute.xlu0 %3656 }
0x1111   :  { %10314 = vmatmul.mubr.msk.f32.vlgmr.msra.gmra.mrb[26].mxu1 %vm1843_vm11, %v3657_v34 }
0x1112   :  { %10850 = vmatpush3.bf16.msra.mxu1 %v12349_v55  ;;  %10335 = vmatprep.mubr.msk.f32.mxu1 %vm11968_vm1, %v14875_v2 }
0x1113   :  { %10851 = vmatprep.subr.bf16.mxu1 %v14873_v23 }
0x1116   :  { %10853 = vmatpush3.bf16.msra.mxu1 %v12363_v59  ;;  %v3734_v54 = vpop.permute.xlu1 %3733 }
0x1117   :  { %10860 = vmatprep.subr.bf16.mxu1 %v14873_v23  ;;  %10325 = vmatmul.mubr.msk.f32.vlgmr.msra.gmra.mrb[32].mxu0 %vm1843_vm11, %v3734_v54 }
0x1118   :  { %10856 = vmatpush3.bf16.msra.mxu0 %v12379_v62  ;;  %10346 = vmatprep.mubr.msk.f32.mxu0 %vm11968_vm1, %v14875_v2 }
0x1119   :  { %10857 = vmatprep.subr.bf16.mxu0 %v14873_v23 }
0x111c   :  { %10859 = vmatpush3.bf16.msra.mxu0 %v12390_v3 }
0x111d   :  { %10866 = vmatprep.subr.bf16.mxu0 %v14873_v23 }
0x11da   :  { %v3649_v61 = vpop.f32.mrb[30].mxu0 }
0x11db   :  { %v3810_v19 = vrot.slane %v3649_v61, 4  ;;  %v3811_v1 = vrot.slane %v3649_v61, 5  ;;  %v10304_v39 = vpop.f32.mrb[31].mxu0 }
0x11dd   :  { %v3822_v29 = vadd.f32 %v3810_v19, %v12430_v22  ;;  %v3823_v47 = vadd.f32 %v3811_v1, %v12432_v24 }
0x11df   :  { %11367 = vtanh.f32 %v3822_v29 }
0x11e0   :  { %11369 = vtanh.f32 %v3823_v47 }
0x11e4   :  { %v3726_v38 = vpop.f32.mrb[26].mxu1 }
0x11e5   :  { %v3812_v43 = vrot.slane %v3726_v38, 4  ;;  %v3813_v5 = vrot.slane %v3726_v38, 5  ;;  %v10315_v45 = vpop.f32.mrb[27].mxu1 }
0x11e7   :  { %v3824_v63 = vadd.f32 %v3812_v43, %v12445_v37  ;;  %v3825_v26 = vadd.f32 %v3813_v5, %v12439_v32  ;;  %v9611_v43 = vmul.f32 -1.442695, %v3822_v29  ;;  %v9612_v5 = vmul.f32 -1.442695, %v3823_v47 }
0x11e9   :  { %v11368_v8 = vpop.eup %11367  ;;  %11371 = vtanh.f32 %v3824_v63  ;;  %v9613_v45 = vmul.f32 -1.442695, %v3824_v63 }
0x11ea   :  { %v11370_v30 = vpop.eup %11369  ;;  %11373 = vtanh.f32 %v3825_v26  ;;  %3900 = vrot.lane.b32.xlu0 %v11368_v8, %s11971_s25  ;;  %v3803_v53 = vpop.f32.mrb[32].mxu0  ;;  %v9614_v8 = vmul.f32 -1.442695, %v3825_v26 }
0x11eb   :  { %3902 = vrot.lane.b32.xlu1 %v11370_v30, %s11971_s25  ;;  %v3814_v33 = vrot.slane %v3803_v53, 4  ;;  %v3815_v56 = vrot.slane %v3803_v53, 5  ;;  %v10326_v34 = vpop.f32.mrb[33].mxu0 }
0x11ed   :  { %v3826_v54 = vadd.f32 %v3814_v33, %v12449_v40  ;;  %v3827_v61 = vadd.f32 %v3815_v56, %v12451_v42 }
0x11ef   :  { %11375 = vtanh.f32 %v3826_v54  ;;  %v9615_v34 = vmul.f32 -1.442695, %v3826_v54 }
0x11f0   :  { %11377 = vtanh.f32 %v3827_v61 }
0x11f1   :  { %11379 = vpow2.f32 %v9611_v43 }
0x11f2   :  { %11381 = vpow2.f32 %v9612_v5 }
0x11f3   :  { %v11372_v19 = vpop.eup %11371  ;;  %11383 = vpow2.f32 %v9613_v45 }
0x11f4   :  { %v11374_v1 = vpop.eup %11373  ;;  %3904 = vrot.lane.b32.xlu0 %v11372_v19, %s11971_s25  ;;  %11385 = vpow2.f32 %v9614_v8  ;;  %v9616_v19 = vmul.f32 -1.442695, %v3827_v61 }
0x11f5   :  { %3906 = vrot.lane.b32.xlu1 %v11374_v1, %s11971_s25 }
0x11f9   :  { %v11376_v39 = vpop.eup %11375 }
0x11fa   :  { %v11378_v38 = vpop.eup %11377  ;;  %3908 = vrot.lane.b32.xlu0 %v11376_v39, %s11971_s25 }
0x11fb   :  { %3910 = vrot.lane.b32.xlu1 %v11378_v38, %s11971_s25  ;;  %v11380_v30 = vpop.eup %11379 }
0x11fc   :  { %v11382_v53 = vpop.eup %11381  ;;  %v3846_v33 = vadd.f32 1.0, %v11380_v30 }
0x11fd   :  { %v3847_v56 = vadd.f32 1.0, %v11382_v53  ;;  %v11384_v1 = vpop.eup %11383 }
0x11fe   :  { %11387 = vrcp.f32 %v3846_v33  ;;  %v11386_v39 = vpop.eup %11385  ;;  %v3848_v29 = vadd.f32 1.0, %v11384_v1 }
0x11ff   :  { %11389 = vrcp.f32 %v3847_v56  ;;  %v3849_v47 = vadd.f32 1.0, %v11386_v39 }
0x1200   :  { %11391 = vpow2.f32 %v9615_v34 }
0x1201   :  { %11393 = vpow2.f32 %v9616_v19 }
0x1202   :  { %11395 = vrcp.f32 %v3848_v29 }
0x1203   :  { %11397 = vrcp.f32 %v3849_v47 }
0x1208   :  { %v12931_v38 = vpop.eup %11387 }
0x1209   :  { %v12933_v26 = vpop.eup %11389 }
0x120a   :  { %v11392_v54 = vpop.eup %11391 }
0x120b   :  { %v11394_v45 = vpop.eup %11393  ;;  %v3850_v8 = vadd.f32 1.0, %v11392_v54  ;;  %v3876_v54 = vrot.slane %v12836_v6, 7  ;;  %v3879_v6 = vrot.slane %v12848_v36, 7  ;;  %v3881_v36 = vrot.slane %v12860_v21, 7 }
0x120c   :  { %v3851_v30 = vadd.f32 1.0, %v11394_v45  ;;  %v12939_v53 = vpop.eup %11395 }
0x120d   :  { %11399 = vrcp.f32 %v3850_v8  ;;  %v12941_v56 = vpop.eup %11397  ;;  %v3888_v45 = vmul.f32 %v12931_v38, %v3876_v54 }
0x120e   :  { %11401 = vrcp.f32 %v3851_v30 }
0x1217   :  { %v12947_v39 = vpop.eup %11399 }
0x1218   :  { %v12949_v47 = vpop.eup %11401 }
0x125c   :  { %v3901_v63 = vpop.permute.xlu0 %3900 }
0x125d   :  { %v3918_v43 = vmul.f32 %v12931_v38, %v3901_v63  ;;  %v3903_v5 = vpop.permute.xlu1 %3902 }
0x125e   :  { %v3919_v61 = vmul.f32 %v12933_v26, %v3903_v5 }
0x125f   :  { %3930 = vrot.lane.b32.xlu0 %v3918_v43, %s11972_s9 }
0x1260   :  { %3932 = vrot.lane.b32.xlu1 %v3919_v61, %s11972_s9  ;;  %v3877_v61 = vrot.slane %v12838_v48, 7 }
0x1262   :  { %v3889_v30 = vmul.f32 %v12933_v26, %v3877_v61 }
0x1266   :  { %v3905_v33 = vpop.permute.xlu0 %3904 }
0x1267   :  { %v3920_v34 = vmul.f32 %v12939_v53, %v3905_v33  ;;  %v3907_v19 = vpop.permute.xlu1 %3906 }
0x1268   :  { %v3921_v1 = vmul.f32 %v12941_v56, %v3907_v19 }
0x1269   :  { %3934 = vrot.lane.b32.xlu0 %v3920_v34, %s11972_s9 }
0x126a   :  { %3936 = vrot.lane.b32.xlu1 %v3921_v1, %s11972_s9  ;;  %v3878_v1 = vrot.slane %v12846_v57, 7  ;;  %v3880_v57 = vrot.slane %v12858_v10, 7 }
0x126c   :  { %v3909_v29 = vpop.permute.xlu0 %3908  ;;  %v3890_v48 = vmul.f32 %v12939_v53, %v3878_v1 }
0x126d   :  { %v3922_v63 = vmul.f32 %v12947_v39, %v3909_v29  ;;  %v3911_v43 = vpop.permute.xlu1 %3910 }
0x126e   :  { %v3923_v5 = vmul.f32 %v12949_v47, %v3911_v43 }
0x126f   :  { %3938 = vrot.lane.b32.xlu0 %v3922_v63, %s11972_s9  ;;  %v3891_v63 = vmul.f32 %v12941_v56, %v3879_v6 }
0x1270   :  { %3940 = vrot.lane.b32.xlu1 %v3923_v5, %s11972_s9 }
0x12d1   :  { %v3931_v8 = vpop.permute.xlu0 %3930 }
0x12d2   :  { %v12959_v33 = vadd.f32 %v3931_v8, %v3888_v45  ;;  %v3933_v34 = vpop.permute.xlu1 %3932  ;;  %v3892_v8 = vmul.f32 %v12947_v39, %v3880_v57 }
0x12d3   :  { %v12961_v19 = vadd.f32 %v3933_v34, %v3889_v30  ;;  %v3893_v34 = vmul.f32 %v12949_v47, %v3881_v36 }
0x12d4   :  { %11403 = vtanh.f32 %v12959_v33 }
0x12d5   :  { %11405 = vtanh.f32 %v12961_v19 }
0x12db   :  { %v3935_v29 = vpop.permute.xlu0 %3934 }
0x12dc   :  { %v12969_v43 = vadd.f32 %v3935_v29, %v3890_v48  ;;  %v3937_v5 = vpop.permute.xlu1 %3936 }
0x12dd   :  { %v12971_v54 = vadd.f32 %v3937_v5, %v3891_v63 }
0x12de   :  { %v11404_v61 = vpop.eup %11403  ;;  %11407 = vtanh.f32 %v12969_v43 }
0x12df   :  { %v11406_v45 = vpop.eup %11405  ;;  %11409 = vtanh.f32 %v12971_v54  ;;  %3966 = vrot.lane.b32.xlu0 %v11404_v61, %s11971_s25 }
0x12e0   :  { %3968 = vrot.lane.b32.xlu1 %v11406_v45, %s11971_s25 }
0x12e1   :  { %v3939_v30 = vpop.permute.xlu0 %3938 }
0x12e2   :  { %v12981_v1 = vadd.f32 %v3939_v30, %v3892_v8  ;;  %v3941_v6 = vpop.permute.xlu1 %3940 }
0x12e3   :  { %v12983_v48 = vadd.f32 %v3941_v6, %v3893_v34 }
0x12e4   :  { %11411 = vtanh.f32 %v12981_v1 }
0x12e5   :  { %11413 = vtanh.f32 %v12983_v48 }
0x12e8   :  { %v11408_v29 = vpop.eup %11407 }
0x12e9   :  { %v11410_v63 = vpop.eup %11409  ;;  %3970 = vrot.lane.b32.xlu0 %v11408_v29, %s11971_s25 }
0x12ea   :  { %3972 = vrot.lane.b32.xlu1 %v11410_v63, %s11971_s25 }
0x12ee   :  { %v11412_v10 = vpop.eup %11411 }
0x12ef   :  { %v11414_v21 = vpop.eup %11413  ;;  %3974 = vrot.lane.b32.xlu0 %v11412_v10, %s11971_s25 }
0x12f0   :  { %3976 = vrot.lane.b32.xlu1 %v11414_v21, %s11971_s25 }
0x1351   :  { %v3967_v5 = vpop.permute.xlu0 %3966 }
0x1352   :  { %v12992_v61 = vmul.f32 %v12931_v38, %v3967_v5  ;;  %v3969_v45 = vpop.permute.xlu1 %3968 }
0x1353   :  { %v12995_v57 = vmul.f32 %v12933_v26, %v3969_v45 }
0x1354   :  { %v4021_v36 = vrot.slane %v12992_v61, 4 }
0x1355   :  { %v4022_v8 = vrot.slane %v12995_v57, 3 }
0x1357   :  { %v4023_v30 = vsel %vm1293_vm4, %v4022_v8, %v4021_v36 }
0x1358   :  { %4024 = vrot.lane.b32.xlu0 %v4023_v30, %s11972_s9 }
0x135b   :  { %v3971_v34 = vpop.permute.xlu0 %3970 }
0x135c   :  { %v13002_v6 = vmul.f32 %v12939_v53, %v3971_v34  ;;  %v3973_v29 = vpop.permute.xlu1 %3972 }
0x135d   :  { %v13005_v38 = vmul.f32 %v12941_v56, %v3973_v29 }
0x135e   :  { %v4098_v63 = vrot.slane %v13002_v6, 4 }
0x135f   :  { %v4099_v26 = vrot.slane %v13005_v38, 3 }
0x1361   :  { %v4100_v10 = vsel %vm1293_vm4, %v4099_v26, %v4098_v63  ;;  %v3975_v21 = vpop.permute.xlu0 %3974 }
0x1362   :  { %4101 = vrot.lane.b32.xlu1 %v4100_v10, %s11972_s9  ;;  %v13012_v5 = vmul.f32 %v12947_v39, %v3975_v21  ;;  %v3977_v45 = vpop.permute.xlu1 %3976 }
0x1363   :  { %v13015_v53 = vmul.f32 %v12949_v47, %v3977_v45 }
0x1364   :  { %14908 = vst [vmem:[#allocation12_spill] sm:$0xff] %v13012_v5  ;;  %v4175_v36 = vrot.slane %v13012_v5, 4 }
0x1365   :  { %14909 = vst [vmem:[#allocation13_spill] sm:$0xff] %v13015_v53  ;;  %v4176_v56 = vrot.slane %v13015_v53, 3 }
0x1367   :  { %v4177_v8 = vsel %vm1293_vm4, %v4176_v56, %v4175_v36 }
0x1368   :  { %4178 = vrot.lane.b32.xlu0 %v4177_v8, %s11972_s9 }
0x13ca   :  { %v4025_v30 = vpop.permute.xlu0 %4024 }
0x13cb   :  { %10336 = vmatmul.mubr.msk.f32.vlgmr.msra.gmra.mrb[28].mxu1 %vm1843_vm11, %v4025_v30 }
0x13cc   :  { %10862 = vmatpush3.bf16.msra.mxu1 %v12402_v9  ;;  %10357 = vmatprep.mubr.msk.f32.mxu1 %vm11968_vm1, %v14875_v2 }
0x13cd   :  { %10863 = vmatprep.subr.bf16.mxu1 %v14873_v23 }
0x13d0   :  { %10865 = vmatpush3.bf16.msra.mxu1 %v12413_v12 }
0x13d1   :  { %10872 = vmatprep.subr.bf16.mxu1 %v14873_v23 }
0x13d4   :  { %v4102_v39 = vpop.permute.xlu1 %4101 }
0x13d5   :  { %10347 = vmatmul.mubr.msk.f32.vlgmr.msra.gmra.mrb[34].mxu0 %vm1843_vm11, %v4102_v39 }
0x13d6   :  { %10868 = vmatpush3.bf16.msra.mxu0 %v12349_v55  ;;  %10368 = vmatprep.mubr.msk.f32.mxu0 %vm11968_vm1, %v14875_v2 }
0x13d7   :  { %10869 = vmatprep.subr.bf16.mxu0 %v14873_v23 }
0x13da   :  { %10871 = vmatpush3.bf16.msra.mxu0 %v12363_v59  ;;  %v4179_v47 = vpop.permute.xlu0 %4178 }
0x13db   :  { %10878 = vmatprep.subr.bf16.mxu0 %v14873_v23  ;;  %10358 = vmatmul.mubr.msk.f32.vlgmr.msra.gmra.mrb[30].mxu1 %vm1843_vm11, %v4179_v47 }
0x13dc   :  { %10874 = vmatpush3.bf16.msra.mxu1 %v12379_v62  ;;  %10379 = vmatprep.mubr.msk.f32.mxu1 %vm11968_vm1, %v14875_v2 }
0x13dd   :  { %10875 = vmatprep.subr.bf16.mxu1 %v14873_v23 }
0x13e0   :  { %10877 = vmatpush3.bf16.msra.mxu1 %v12390_v3 }
0x13e1   :  { %10884 = vmatprep.subr.bf16.mxu1 %v14873_v23 }
0x149e   :  { %v4094_v34 = vpop.f32.mrb[28].mxu1 }
0x149f   :  { %v4255_v29 = vrot.slane %v4094_v34, 3  ;;  %v4256_v63 = vrot.slane %v4094_v34, 4  ;;  %v10337_v26 = vpop.f32.mrb[29].mxu1 }
0x14a1   :  { %v4267_v10 = vadd.f32 %v4255_v29, %v12430_v22  ;;  %v4268_v21 = vadd.f32 %v4256_v63, %v12432_v24 }
0x14a3   :  { %11415 = vtanh.f32 %v4267_v10 }
0x14a4   :  { %11417 = vtanh.f32 %v4268_v21 }
0x14a8   :  { %v4171_v45 = vpop.f32.mrb[34].mxu0 }
0x14a9   :  { %v4257_v36 = vrot.slane %v4171_v45, 3  ;;  %v4258_v56 = vrot.slane %v4171_v45, 4  ;;  %v10348_v8 = vpop.f32.mrb[35].mxu0 }
0x14ab   :  { %v4269_v30 = vadd.f32 %v4257_v36, %v12445_v37  ;;  %v4270_v39 = vadd.f32 %v4258_v56, %v12439_v32 }
0x14ad   :  { %v11416_v47 = vpop.eup %11415  ;;  %11419 = vtanh.f32 %v4269_v30 }
0x14ae   :  { %v11418_v23 = vpop.eup %11417  ;;  %11421 = vtanh.f32 %v4270_v39  ;;  %4345 = vrot.lane.b32.xlu1 %v11416_v47, %s11971_s25  ;;  %v4248_v34 = vpop.f32.mrb[30].mxu1 }
0x14af   :  { %4347 = vrot.lane.b32.xlu0 %v11418_v23, %s11971_s25  ;;  %v4259_v29 = vrot.slane %v4248_v34, 3  ;;  %v4260_v63 = vrot.slane %v4248_v34, 4  ;;  %v10359_v26 = vpop.f32.mrb[31].mxu1  ;;  %v9620_v23 = vmul.f32 -1.442695, %v4267_v10 }
0x14b0   :  { %v9621_v34 = vmul.f32 -1.442695, %v4268_v21 }
0x14b1   :  { %v4271_v2 = vadd.f32 %v4259_v29, %v12449_v40  ;;  %v4272_v45 = vadd.f32 %v4260_v63, %v12451_v42  ;;  %v9622_v29 = vmul.f32 -1.442695, %v4269_v30  ;;  %v9623_v63 = vmul.f32 -1.442695, %v4270_v39 }
0x14b3   :  { %11423 = vtanh.f32 %v4271_v2  ;;  %v9624_v46 = vmul.f32 -1.442695, %v4271_v2 }
0x14b4   :  { %11425 = vtanh.f32 %v4272_v45 }
0x14b5   :  { %11427 = vpow2.f32 %v9620_v23 }
0x14b6   :  { %11429 = vpow2.f32 %v9621_v34 }
0x14b7   :  { %v11420_v36 = vpop.eup %11419  ;;  %11431 = vpow2.f32 %v9622_v29 }
0x14b8   :  { %v11422_v56 = vpop.eup %11421  ;;  %4349 = vrot.lane.b32.xlu1 %v11420_v36, %s11971_s25  ;;  %11433 = vpow2.f32 %v9623_v63 }
0x14b9   :  { %4351 = vrot.lane.b32.xlu0 %v11422_v56, %s11971_s25  ;;  %v9625_v56 = vmul.f32 -1.442695, %v4272_v45 }
0x14bd   :  { %v11424_v8 = vpop.eup %11423 }
0x14be   :  { %v11426_v47 = vpop.eup %11425  ;;  %4353 = vrot.lane.b32.xlu1 %v11424_v8, %s11971_s25 }
0x14bf   :  { %4355 = vrot.lane.b32.xlu0 %v11426_v47, %s11971_s25  ;;  %v11428_v26 = vpop.eup %11427 }
0x14c0   :  { %v11430_v4 = vpop.eup %11429  ;;  %v4291_v53 = vadd.f32 1.0, %v11428_v26 }
0x14c1   :  { %v4292_v36 = vadd.f32 1.0, %v11430_v4  ;;  %v11432_v8 = vpop.eup %11431 }
0x14c2   :  { %11435 = vrcp.f32 %v4291_v53  ;;  %v11434_v47 = vpop.eup %11433  ;;  %v4293_v10 = vadd.f32 1.0, %v11432_v8 }
0x14c3   :  { %11437 = vrcp.f32 %v4292_v36  ;;  %v4294_v21 = vadd.f32 1.0, %v11434_v47 }
0x14c4   :  { %11439 = vpow2.f32 %v9624_v46 }
0x14c5   :  { %11441 = vpow2.f32 %v9625_v56 }
0x14c6   :  { %11443 = vrcp.f32 %v4293_v10 }
0x14c7   :  { %11445 = vrcp.f32 %v4294_v21 }
0x14cc   :  { %v13054_v23 = vpop.eup %11435 }
0x14cd   :  { %v13056_v39 = vpop.eup %11437 }
0x14ce   :  { %v11440_v2 = vpop.eup %11439 }
0x14cf   :  { %v11442_v45 = vpop.eup %11441  ;;  %v4295_v46 = vadd.f32 1.0, %v11440_v2 }
0x14d0   :  { %v4296_v29 = vadd.f32 1.0, %v11442_v45  ;;  %v13062_v63 = vpop.eup %11443  ;;  %v4322_v45 = vrot.slane %v12961_v19, 7 }
0x14d1   :  { %11447 = vrcp.f32 %v4295_v46  ;;  %v13064_v36 = vpop.eup %11445 }
0x14d2   :  { %11449 = vrcp.f32 %v4296_v29  ;;  %v4334_v29 = vmul.f32 %v13056_v39, %v4322_v45 }
0x14db   :  { %v13070_v10 = vpop.eup %11447 }
0x1520   :  { %v4346_v30 = vpop.permute.xlu1 %4345 }
0x1521   :  { %v4348_v34 = vpop.permute.xlu0 %4347  ;;  %v4363_v4 = vmul.f32 %v13054_v23, %v4346_v30  ;;  %v13072_v30 = vpop.eup %11449 }
0x1522   :  { %v4364_v53 = vmul.f32 %v13056_v39, %v4348_v34 }
0x1523   :  { %4375 = vrot.lane.b32.xlu1 %v4363_v4, %s11972_s9 }
0x1524   :  { %4377 = vrot.lane.b32.xlu0 %v4364_v53, %s11972_s9  ;;  %v4321_v53 = vrot.slane %v12959_v33, 7  ;;  %v4324_v33 = vrot.slane %v12971_v54, 7  ;;  %v4326_v54 = vrot.slane %v12983_v48, 7 }
0x1526   :  { %v4333_v46 = vmul.f32 %v13054_v23, %v4321_v53 }
0x152a   :  { %v4350_v26 = vpop.permute.xlu1 %4349 }
0x152b   :  { %v4352_v56 = vpop.permute.xlu0 %4351  ;;  %v4365_v8 = vmul.f32 %v13062_v63, %v4350_v26 }
0x152c   :  { %v4366_v47 = vmul.f32 %v13064_v36, %v4352_v56 }
0x152d   :  { %4379 = vrot.lane.b32.xlu1 %v4365_v8, %s11972_s9 }
0x152e   :  { %4381 = vrot.lane.b32.xlu0 %v4366_v47, %s11972_s9 }
0x1530   :  { %v4354_v21 = vpop.permute.xlu1 %4353 }
0x1531   :  { %v4356_v34 = vpop.permute.xlu0 %4355  ;;  %v4367_v4 = vmul.f32 %v13070_v10, %v4354_v21  ;;  %v4323_v21 = vrot.slane %v12969_v43, 7  ;;  %v4325_v43 = vrot.slane %v12981_v1, 7 }
0x1532   :  { %v4368_v2 = vmul.f32 %v13072_v30, %v4356_v34  ;;  %v4336_v34 = vmul.f32 %v13064_v36, %v4324_v33 }
0x1533   :  { %4383 = vrot.lane.b32.xlu1 %v4367_v4, %s11972_s9  ;;  %v4335_v19 = vmul.f32 %v13062_v63, %v4323_v21 }
0x1534   :  { %4385 = vrot.lane.b32.xlu0 %v4368_v2, %s11972_s9 }
0x1595   :  { %v4376_v26 = vpop.permute.xlu1 %4375 }
0x1596   :  { %v4378_v56 = vpop.permute.xlu0 %4377  ;;  %v13082_v8 = vadd.f32 %v4376_v26, %v4333_v46  ;;  %v4337_v26 = vmul.f32 %v13070_v10, %v4325_v43 }
0x1597   :  { %v13084_v47 = vadd.f32 %v4378_v56, %v4334_v29  ;;  %v4338_v56 = vmul.f32 %v13072_v30, %v4326_v54 }
0x1598   :  { %11451 = vtanh.f32 %v13082_v8 }
0x1599   :  { %11453 = vtanh.f32 %v13084_v47 }
0x159f   :  { %v4380_v4 = vpop.permute.xlu1 %4379 }
0x15a0   :  { %v4382_v2 = vpop.permute.xlu0 %4381  ;;  %v13092_v53 = vadd.f32 %v4380_v4, %v4335_v19 }
0x15a1   :  { %v13094_v45 = vadd.f32 %v4382_v2, %v4336_v34 }
0x15a2   :  { %v11452_v46 = vpop.eup %11451  ;;  %11455 = vtanh.f32 %v13092_v53 }
0x15a3   :  { %v11454_v29 = vpop.eup %11453  ;;  %11457 = vtanh.f32 %v13094_v45  ;;  %4411 = vrot.lane.b32.xlu1 %v11452_v46, %s11971_s25 }
0x15a4   :  { %4413 = vrot.lane.b32.xlu0 %v11454_v29, %s11971_s25 }
0x15a5   :  { %v4384_v21 = vpop.permute.xlu1 %4383 }
0x15a6   :  { %v4386_v33 = vpop.permute.xlu0 %4385  ;;  %v13104_v19 = vadd.f32 %v4384_v21, %v4337_v26 }
0x15a7   :  { %v13106_v34 = vadd.f32 %v4386_v33, %v4338_v56 }
0x15a8   :  { %11459 = vtanh.f32 %v13104_v19 }
0x15a9   :  { %11461 = vtanh.f32 %v13106_v34 }
0x15ac   :  { %v11456_v4 = vpop.eup %11455 }
0x15ad   :  { %v11458_v2 = vpop.eup %11457  ;;  %4415 = vrot.lane.b32.xlu1 %v11456_v4, %s11971_s25 }
0x15ae   :  { %4417 = vrot.lane.b32.xlu0 %v11458_v2, %s11971_s25 }
0x15b2   :  { %v11460_v1 = vpop.eup %11459 }
0x15b3   :  { %v11462_v48 = vpop.eup %11461  ;;  %4419 = vrot.lane.b32.xlu1 %v11460_v1, %s11971_s25 }
0x15b4   :  { %4421 = vrot.lane.b32.xlu0 %v11462_v48, %s11971_s25 }
0x1615   :  { %v4412_v46 = vpop.permute.xlu1 %4411 }
0x1616   :  { %v4414_v29 = vpop.permute.xlu0 %4413  ;;  %v13115_v43 = vmul.f32 %v13054_v23, %v4412_v46 }
0x1617   :  { %v13118_v54 = vmul.f32 %v13056_v39, %v4414_v29 }
0x1618   :  { %v4466_v26 = vrot.slane %v13115_v43, 5 }
0x1619   :  { %v4467_v56 = vrot.slane %v13118_v54, 4 }
0x161b   :  { %v4468_v21 = vsel %vm1293_vm4, %v4467_v56, %v4466_v26 }
0x161c   :  { %4469 = vrot.lane.b32.xlu1 %v4468_v21, %s11972_s9 }
0x161f   :  { %v4416_v33 = vpop.permute.xlu1 %4415 }
0x1620   :  { %v4418_v4 = vpop.permute.xlu0 %4417  ;;  %v13125_v2 = vmul.f32 %v13062_v63, %v4416_v33 }
0x1621   :  { %v13128_v1 = vmul.f32 %v13064_v36, %v4418_v4  ;;  %v14911_v4 = vmov 0.0  }
0x1622   :  { %v4543_v23 = vrot.slane %v13125_v2, 5 }
0x1623   :  { %v4544_v39 = vrot.slane %v13128_v1, 4 }
0x1625   :  { %v4545_v48 = vsel %vm1293_vm4, %v4544_v39, %v4543_v23  ;;  %v4420_v46 = vpop.permute.xlu1 %4419 }
0x1626   :  { %4546 = vrot.lane.b32.xlu0 %v4545_v48, %s11972_s9  ;;  %v4422_v29 = vpop.permute.xlu0 %4421  ;;  %v13135_v26 = vmul.f32 %v13070_v10, %v4420_v46  ;;  %v14912_v10 = vmov 0.0|0.0  }
0x1627   :  { %v13138_v56 = vmul.f32 %v13072_v30, %v4422_v29 }
0x1628   :  { %v4620_v63 = vrot.slane %v13135_v26, 5 }
0x1629   :  { %14910 = vst [vmem:[#allocation14_spill] sm:$0xff] %v13138_v56  ;;  %v4621_v36 = vrot.slane %v13138_v56, 4 }
0x162b   :  { %v4622_v21 = vsel %vm1293_vm4, %v4621_v36, %v4620_v63 }
0x162c   :  { %4623 = vrot.lane.b32.xlu1 %v4622_v21, %s11972_s9 }
0x168e   :  { %v4470_v33 = vpop.permute.xlu1 %4469 }
0x168f   :  { %10369 = vmatmul.mubr.msk.f32.vlgmr.msra.gmra.mrb[36].mxu0 %vm1843_vm11, %v4470_v33 }
0x1690   :  { %10880 = vmatpush3.bf16.msra.mxu0 %v12402_v9  ;;  %10390 = vmatprep.mubr.msk.f32.mxu0 %vm11968_vm1, %v14911_v4 }
0x1691   :  { %10881 = vmatprep.subr.bf16.mxu0 %v14912_v10 }
0x1694   :  { %10883 = vmatpush3.bf16.msra.mxu0 %v12413_v12 }
0x1695   :  { %10890 = vmatprep.subr.bf16.mxu0 %v14912_v10 }
0x1698   :  { %v4547_v30 = vpop.permute.xlu0 %4546 }
0x1699   :  { %10380 = vmatmul.mubr.msk.f32.vlgmr.msra.gmra.mrb[32].mxu1 %vm1843_vm11, %v4547_v30 }
0x169a   :  { %10886 = vmatpush3.bf16.msra.mxu1 %v12349_v55  ;;  %10401 = vmatprep.mubr.msk.f32.mxu1 %vm11968_vm1, %v14911_v4 }
0x169b   :  { %10887 = vmatprep.subr.bf16.mxu1 %v14912_v10 }
0x169e   :  { %10889 = vmatpush3.bf16.msra.mxu1 %v12363_v59  ;;  %v4624_v23 = vpop.permute.xlu1 %4623 }
0x169f   :  { %10896 = vmatprep.subr.bf16.mxu1 %v14912_v10  ;;  %10391 = vmatmul.mubr.msk.f32.vlgmr.msra.gmra.mrb[38].mxu0 %vm1843_vm11, %v4624_v23 }
0x16a0   :  { %10892 = vmatpush3.bf16.msra.mxu0 %v12379_v62  ;;  %10412 = vmatprep.mubr.msk.f32.mxu0 %vm11968_vm1, %v14911_v4 }
0x16a1   :  { %10893 = vmatprep.subr.bf16.mxu0 %v14912_v10 }
0x16a4   :  { %10895 = vmatpush3.bf16.msra.mxu0 %v12390_v3 }
0x1762   :  { %v4539_v55 = vpop.f32.mrb[36].mxu0 }
0x1763   :  { %v4700_v39 = vrot.slane %v4539_v55, 2  ;;  %v4701_v48 = vrot.slane %v4539_v55, 3  ;;  %v10370_v46 = vpop.f32.mrb[37].mxu0 }
0x1765   :  { %v4712_v59 = vadd.f32 %v4700_v39, %v12430_v22  ;;  %v4713_v29 = vadd.f32 %v4701_v48, %v12432_v24 }
0x1767   :  { %11463 = vtanh.f32 %v4712_v59 }
0x1768   :  { %11465 = vtanh.f32 %v4713_v29 }
0x176c   :  { %v4616_v63 = vpop.f32.mrb[32].mxu1 }
0x176d   :  { %v4702_v36 = vrot.slane %v4616_v63, 2  ;;  %v4703_v62 = vrot.slane %v4616_v63, 3  ;;  %v10381_v21 = vpop.f32.mrb[33].mxu1 }
0x176f   :  { %v4714_v33 = vadd.f32 %v4702_v36, %v12445_v37  ;;  %v4715_v30 = vadd.f32 %v4703_v62, %v12439_v32 }
0x1771   :  { %v11464_v23 = vpop.eup %11463  ;;  %11467 = vtanh.f32 %v4714_v33 }
0x1772   :  { %v11466_v3 = vpop.eup %11465  ;;  %11469 = vtanh.f32 %v4715_v30  ;;  %4790 = vrot.lane.b32.xlu0 %v11464_v23, %s11971_s25  ;;  %v4693_v55 = vpop.f32.mrb[38].mxu0 }
0x1773   :  { %4792 = vrot.lane.b32.xlu1 %v11466_v3, %s11971_s25  ;;  %v4704_v39 = vrot.slane %v4693_v55, 2  ;;  %v4705_v48 = vrot.slane %v4693_v55, 3  ;;  %v10392_v46 = vpop.f32.mrb[39].mxu0  ;;  %v9629_v3 = vmul.f32 -1.442695, %v4712_v59 }
0x1774   :  { %v9630_v55 = vmul.f32 -1.442695, %v4713_v29 }
0x1775   :  { %v4716_v20 = vadd.f32 %v4704_v39, %v12449_v40  ;;  %v4717_v63 = vadd.f32 %v4705_v48, %v12451_v42  ;;  %v9631_v39 = vmul.f32 -1.442695, %v4714_v33  ;;  %v9632_v48 = vmul.f32 -1.442695, %v4715_v30 }
0x1777   :  { %11471 = vtanh.f32 %v4716_v20  ;;  %v9633_v25 = vmul.f32 -1.442695, %v4716_v20 }
0x1778   :  { %11473 = vtanh.f32 %v4717_v63 }
0x1779   :  { %11475 = vpow2.f32 %v9629_v3 }
0x177a   :  { %11477 = vpow2.f32 %v9630_v55 }
0x177b   :  { %v11468_v36 = vpop.eup %11467  ;;  %11479 = vpow2.f32 %v9631_v39 }
0x177c   :  { %v11470_v62 = vpop.eup %11469  ;;  %4794 = vrot.lane.b32.xlu0 %v11468_v36, %s11971_s25  ;;  %11481 = vpow2.f32 %v9632_v48 }
0x177d   :  { %4796 = vrot.lane.b32.xlu1 %v11470_v62, %s11971_s25  ;;  %v9634_v62 = vmul.f32 -1.442695, %v4717_v63 }
0x1781   :  { %v11472_v21 = vpop.eup %11471 }
0x1782   :  { %v11474_v23 = vpop.eup %11473  ;;  %4798 = vrot.lane.b32.xlu0 %v11472_v21, %s11971_s25 }
0x1783   :  { %4800 = vrot.lane.b32.xlu1 %v11474_v23, %s11971_s25  ;;  %v11476_v46 = vpop.eup %11475 }
0x1784   :  { %v11478_v56 = vpop.eup %11477  ;;  %v4736_v5 = vadd.f32 1.0, %v11476_v46 }
0x1785   :  { %v4737_v36 = vadd.f32 1.0, %v11478_v56  ;;  %v11480_v21 = vpop.eup %11479 }
0x1786   :  { %11483 = vrcp.f32 %v4736_v5  ;;  %v11482_v23 = vpop.eup %11481  ;;  %v4738_v59 = vadd.f32 1.0, %v11480_v21 }
0x1787   :  { %11485 = vrcp.f32 %v4737_v36  ;;  %v4739_v29 = vadd.f32 1.0, %v11482_v23 }
0x1788   :  { %11487 = vpow2.f32 %v9633_v25 }
0x1789   :  { %11489 = vpow2.f32 %v9634_v62 }
0x178a   :  { %11491 = vrcp.f32 %v4738_v59 }
0x178b   :  { %11493 = vrcp.f32 %v4739_v29 }
0x1790   :  { %v13176_v3 = vpop.eup %11483 }
0x1791   :  { %v13178_v30 = vpop.eup %11485 }
0x1792   :  { %v11488_v20 = vpop.eup %11487 }
0x1793   :  { %v11490_v63 = vpop.eup %11489  ;;  %v4740_v25 = vadd.f32 1.0, %v11488_v20 }
0x1794   :  { %v4741_v39 = vadd.f32 1.0, %v11490_v63  ;;  %v13184_v48 = vpop.eup %11491  ;;  %v4767_v63 = vrot.slane %v13084_v47, 7 }
0x1795   :  { %11495 = vrcp.f32 %v4740_v25  ;;  %v13186_v36 = vpop.eup %11493 }
0x1796   :  { %11497 = vrcp.f32 %v4741_v39 }
0x179f   :  { %v13192_v59 = vpop.eup %11495 }
0x17e4   :  { %v4791_v33 = vpop.permute.xlu0 %4790 }
0x17e5   :  { %v4808_v55 = vmul.f32 %v13176_v3, %v4791_v33  ;;  %v4793_v56 = vpop.permute.xlu1 %4792  ;;  %v13194_v33 = vpop.eup %11497 }
0x17e6   :  { %v4809_v5 = vmul.f32 %v13178_v30, %v4793_v56 }
0x17e7   :  { %4820 = vrot.lane.b32.xlu0 %v4808_v55, %s11972_s9 }
0x17e8   :  { %4822 = vrot.lane.b32.xlu1 %v4809_v5, %s11972_s9  ;;  %v4766_v5 = vrot.slane %v13082_v8, 7  ;;  %v4769_v8 = vrot.slane %v13094_v45, 7  ;;  %v4771_v45 = vrot.slane %v13106_v34, 7 }
0x17ea   :  { %v4778_v25 = vmul.f32 %v13176_v3, %v4766_v5 }
0x17ee   :  { %v4795_v46 = vpop.permute.xlu0 %4794 }
0x17ef   :  { %v4810_v62 = vmul.f32 %v13184_v48, %v4795_v46  ;;  %v4797_v21 = vpop.permute.xlu1 %4796  ;;  %v4779_v46 = vmul.f32 %v13178_v30, %v4767_v63 }
0x17f0   :  { %v4811_v23 = vmul.f32 %v13186_v36, %v4797_v21 }
0x17f1   :  { %4824 = vrot.lane.b32.xlu0 %v4810_v62, %s11972_s9 }
0x17f2   :  { %4826 = vrot.lane.b32.xlu1 %v4811_v23, %s11972_s9 }
0x17f4   :  { %v4799_v29 = vpop.permute.xlu0 %4798 }
0x17f5   :  { %v4812_v55 = vmul.f32 %v13192_v59, %v4799_v29  ;;  %v4801_v56 = vpop.permute.xlu1 %4800  ;;  %v4768_v29 = vrot.slane %v13092_v53, 7  ;;  %v4770_v53 = vrot.slane %v13104_v19, 7 }
0x17f6   :  { %v4813_v20 = vmul.f32 %v13194_v33, %v4801_v56  ;;  %v4781_v56 = vmul.f32 %v13186_v36, %v4769_v8 }
0x17f7   :  { %4828 = vrot.lane.b32.xlu0 %v4812_v55, %s11972_s9  ;;  %v4780_v47 = vmul.f32 %v13184_v48, %v4768_v29  ;;  %v4783_v29 = vmul.f32 %v13194_v33, %v4771_v45 }
0x17f8   :  { %4830 = vrot.lane.b32.xlu1 %v4813_v20, %s11972_s9 }
0x1859   :  { %v4821_v39 = vpop.permute.xlu0 %4820 }
0x185a   :  { %v13204_v62 = vadd.f32 %v4821_v39, %v4778_v25  ;;  %v4823_v21 = vpop.permute.xlu1 %4822 }
0x185b   :  { %v13206_v23 = vadd.f32 %v4823_v21, %v4779_v46  ;;  %v4782_v46 = vmul.f32 %v13192_v59, %v4770_v53 }
0x185c   :  { %11499 = vtanh.f32 %v13204_v62 }
0x185d   :  { %11501 = vtanh.f32 %v13206_v23 }
0x1863   :  { %v4825_v55 = vpop.permute.xlu0 %4824 }
0x1864   :  { %v13214_v20 = vadd.f32 %v4825_v55, %v4780_v47  ;;  %v4827_v5 = vpop.permute.xlu1 %4826 }
0x1865   :  { %v13216_v63 = vadd.f32 %v4827_v5, %v4781_v56 }
0x1866   :  { %v11500_v25 = vpop.eup %11499  ;;  %11503 = vtanh.f32 %v13214_v20 }
0x1867   :  { %v11502_v39 = vpop.eup %11501  ;;  %11505 = vtanh.f32 %v13216_v63  ;;  %4856 = vrot.lane.b32.xlu0 %v11500_v25, %s11971_s25 }
0x1868   :  { %4858 = vrot.lane.b32.xlu1 %v11502_v39, %s11971_s25 }
0x1869   :  { %v4829_v21 = vpop.permute.xlu0 %4828 }
0x186a   :  { %v13226_v8 = vadd.f32 %v4829_v21, %v4782_v46  ;;  %v4831_v47 = vpop.permute.xlu1 %4830 }
0x186b   :  { %v13228_v55 = vadd.f32 %v4831_v47, %v4783_v29 }
0x186c   :  { %11507 = vtanh.f32 %v13226_v8 }
0x186d   :  { %11509 = vtanh.f32 %v13228_v55 }
0x1870   :  { %v11504_v56 = vpop.eup %11503 }
0x1871   :  { %v11506_v5 = vpop.eup %11505  ;;  %4860 = vrot.lane.b32.xlu0 %v11504_v56, %s11971_s25 }
0x1872   :  { %4862 = vrot.lane.b32.xlu1 %v11506_v5, %s11971_s25 }
0x1876   :  { %v11508_v19 = vpop.eup %11507 }
0x1877   :  { %v11510_v34 = vpop.eup %11509  ;;  %4864 = vrot.lane.b32.xlu0 %v11508_v19, %s11971_s25 }
0x1878   :  { %4866 = vrot.lane.b32.xlu1 %v11510_v34, %s11971_s25 }
0x18d9   :  { %v4857_v25 = vpop.permute.xlu0 %4856 }
0x18da   :  { %v13237_v39 = vmul.f32 %v13176_v3, %v4857_v25  ;;  %v4859_v53 = vpop.permute.xlu1 %4858 }
0x18db   :  { %v13240_v45 = vmul.f32 %v13178_v30, %v4859_v53 }
0x18dc   :  { %v4911_v46 = vrot.slane %v13237_v39, 6 }
0x18dd   :  { %v4912_v21 = vrot.slane %v13240_v45, 5 }
0x18df   :  { %v4913_v29 = vsel %vm1293_vm4, %v4912_v21, %v4911_v46 }
0x18e0   :  { %4914 = vrot.lane.b32.xlu0 %v4913_v29, %s11972_s9 }
0x18e3   :  { %v4861_v47 = vpop.permute.xlu0 %4860 }
0x18e4   :  { %v13247_v56 = vmul.f32 %v13184_v48, %v4861_v47  ;;  %v4863_v5 = vpop.permute.xlu1 %4862 }
0x18e5   :  { %v13250_v3 = vmul.f32 %v13186_v36, %v4863_v5 }
0x18e6   :  { %v4988_v19 = vrot.slane %v13247_v56, 6 }
0x18e7   :  { %v4989_v30 = vrot.slane %v13250_v3, 5 }
0x18e9   :  { %v4990_v34 = vsel %vm1293_vm4, %v4989_v30, %v4988_v19  ;;  %v4865_v25 = vpop.permute.xlu0 %4864 }
0x18ea   :  { %4991 = vrot.lane.b32.xlu1 %v4990_v34, %s11972_s9  ;;  %v13257_v53 = vmul.f32 %v13192_v59, %v4865_v25  ;;  %v4867_v46 = vpop.permute.xlu1 %4866 }
0x18eb   :  { %v13260_v48 = vmul.f32 %v13194_v33, %v4867_v46 }
0x18ec   :  { %v5065_v21 = vrot.slane %v13257_v53, 6 }
0x18ed   :  { %v5066_v36 = vrot.slane %v13260_v48, 5 }
0x18ef   :  { %v5067_v29 = vsel %vm1293_vm4, %v5066_v36, %v5065_v21 }
0x18f0   :  { %5068 = vrot.lane.b32.xlu0 %v5067_v29, %s11972_s9 }
0x1952   :  { %v4915_v47 = vpop.permute.xlu0 %4914 }
0x1953   :  { %10402 = vmatmul.mubr.msk.f32.vlgmr.msra.gmra.mrb[34].mxu1 %vm1843_vm11, %v4915_v47 }
0x1954   :  { %10898 = vmatpush3.bf16.msra.mxu1 %v12402_v9  ;;  %10423 = vmatprep.mubr.msk.f32.mxu1 %vm11968_vm1, %v14911_v4 }
0x1955   :  { %10899 = vmatprep.subr.bf16.mxu1 %v14912_v10 }
0x1958   :  { %10901 = vmatpush3.bf16.msra.mxu1 %v12413_v12 }
0x195c   :  { %v4992_v59 = vpop.permute.xlu1 %4991 }
0x195d   :  { %10413 = vmatmul.mubr.msk.f32.vlgmr.msra.gmra.mrb[40].mxu0 %vm1843_vm11, %v4992_v59 }
0x1962   :  { %v5069_v33 = vpop.permute.xlu0 %5068 }
0x1963   :  { %10424 = vmatmul.mubr.msk.f32.vlgmr.msra.gmra.mrb[36].mxu1 %vm1843_vm11, %v5069_v33 }
0x1a26   :  { %v4984_v5 = vpop.f32.mrb[34].mxu1 }
0x1a27   :  { %v5145_v19 = vrot.slane %v4984_v5, 1  ;;  %v5146_v30 = vrot.slane %v4984_v5, 2  ;;  %v10403_v34 = vpop.f32.mrb[35].mxu1 }
0x1a29   :  { %v5157_v25 = vadd.f32 %v5145_v19, %v12430_v22  ;;  %v5158_v9 = vadd.f32 %v5146_v30, %v12432_v24 }
0x1a2b   :  { %11511 = vtanh.f32 %v5157_v25 }
0x1a2c   :  { %11513 = vtanh.f32 %v5158_v9 }
0x1a30   :  { %v5061_v46 = vpop.f32.mrb[40].mxu0 }
0x1a31   :  { %v5147_v21 = vrot.slane %v5061_v46, 1  ;;  %v5148_v36 = vrot.slane %v5061_v46, 2  ;;  %v10414_v12 = vpop.f32.mrb[41].mxu0 }
0x1a32   :  { %v9639_v12 = vmul.f32 -1.442695, %v5158_v9 }
0x1a33   :  { %v5159_v29 = vadd.f32 %v5147_v21, %v12445_v37  ;;  %v5160_v47 = vadd.f32 %v5148_v36, %v12439_v32  ;;  %v9638_v36 = vmul.f32 -1.442695, %v5157_v25 }
0x1a35   :  { %v11512_v59 = vpop.eup %11511  ;;  %11515 = vtanh.f32 %v5159_v29 }
0x1a36   :  { %v11514_v33 = vpop.eup %11513  ;;  %11517 = vtanh.f32 %v5160_v47  ;;  %5235 = vrot.lane.b32.xlu1 %v11512_v59, %s11971_s25  ;;  %v5138_v22 = vpop.f32.mrb[36].mxu1 }
0x1a37   :  { %5237 = vrot.lane.b32.xlu0 %v11514_v33, %s11971_s25  ;;  %v5149_v24 = vrot.slane %v5138_v22, 1  ;;  %v5150_v5 = vrot.slane %v5138_v22, 2  ;;  %v10425_v19 = vpop.f32.mrb[37].mxu1 }
0x1a39   :  { %v5161_v30 = vadd.f32 %v5149_v24, %v12449_v40  ;;  %v5162_v34 = vadd.f32 %v5150_v5, %v12451_v42  ;;  %v9640_v40 = vmul.f32 -1.442695, %v5159_v29  ;;  %v9641_v42 = vmul.f32 -1.442695, %v5160_v47 }
0x1a3b   :  { %11519 = vtanh.f32 %v5161_v30  ;;  %v9642_v5 = vmul.f32 -1.442695, %v5161_v30  ;;  %v9643_v19 = vmul.f32 -1.442695, %v5162_v34 }
0x1a3c   :  { %11521 = vtanh.f32 %v5162_v34 }
0x1a3d   :  { %11523 = vpow2.f32 %v9638_v36 }
0x1a3e   :  { %11525 = vpow2.f32 %v9639_v12 }
0x1a3f   :  { %v11516_v37 = vpop.eup %11515  ;;  %11527 = vpow2.f32 %v9640_v40 }
0x1a40   :  { %v11518_v32 = vpop.eup %11517  ;;  %5239 = vrot.lane.b32.xlu1 %v11516_v37, %s11971_s25  ;;  %11529 = vpow2.f32 %v9641_v42 }
0x1a41   :  { %5241 = vrot.lane.b32.xlu0 %v11518_v32, %s11971_s25 }
0x1a45   :  { %v11520_v46 = vpop.eup %11519 }
0x1a46   :  { %v11522_v21 = vpop.eup %11521  ;;  %5243 = vrot.lane.b32.xlu1 %v11520_v46, %s11971_s25 }
0x1a47   :  { %5245 = vrot.lane.b32.xlu0 %v11522_v21, %s11971_s25  ;;  %v11524_v59 = vpop.eup %11523 }
0x1a48   :  { %v11526_v33 = vpop.eup %11525  ;;  %v5181_v22 = vadd.f32 1.0, %v11524_v59 }
0x1a49   :  { %v5182_v24 = vadd.f32 1.0, %v11526_v33  ;;  %v11528_v37 = vpop.eup %11527 }
0x1a4a   :  { %11531 = vrcp.f32 %v5181_v22  ;;  %v11530_v32 = vpop.eup %11529  ;;  %v5183_v25 = vadd.f32 1.0, %v11528_v37 }
0x1a4b   :  { %11533 = vrcp.f32 %v5182_v24  ;;  %v5184_v9 = vadd.f32 1.0, %v11530_v32 }
0x1a4c   :  { %11535 = vpow2.f32 %v9642_v5 }
0x1a4d   :  { %11537 = vpow2.f32 %v9643_v19 }
0x1a4e   :  { %11539 = vrcp.f32 %v5183_v25 }
0x1a4f   :  { %11541 = vrcp.f32 %v5184_v9 }
0x1a54   :  { %v13286_v46 = vpop.eup %11531 }
0x1a55   :  { %v13288_v47 = vpop.eup %11533 }
0x1a56   :  { %v11536_v30 = vpop.eup %11535 }
0x1a57   :  { %v11538_v12 = vpop.eup %11537  ;;  %v5185_v40 = vadd.f32 1.0, %v11536_v30 }
0x1a58   :  { %v5186_v42 = vadd.f32 1.0, %v11538_v12  ;;  %v13294_v59 = vpop.eup %11539 }
0x1a59   :  { %11543 = vrcp.f32 %v5185_v40  ;;  %v13296_v22 = vpop.eup %11541 }
0x1a5a   :  { %11545 = vrcp.f32 %v5186_v42  ;;  %v5216_v42 = vrot.slane %v13228_v55, 7 }
0x1a63   :  { %v13302_v37 = vpop.eup %11543 }
0x1a64   :  { %v13304_v25 = vpop.eup %11545 }
0x1aa8   :  { %v5236_v29 = vpop.permute.xlu1 %5235 }
0x1aa9   :  { %v5238_v21 = vpop.permute.xlu0 %5237  ;;  %v5253_v36 = vmul.f32 %v13286_v46, %v5236_v29 }
0x1aaa   :  { %v5254_v34 = vmul.f32 %v13288_v47, %v5238_v21 }
0x1aab   :  { %5265 = vrot.lane.b32.xlu1 %v5253_v36, %s11972_s9 }
0x1aac   :  { %5267 = vrot.lane.b32.xlu0 %v5254_v34, %s11972_s9 }
0x1ab2   :  { %v5240_v33 = vpop.permute.xlu1 %5239 }
0x1ab3   :  { %v5242_v24 = vpop.permute.xlu0 %5241  ;;  %v5255_v5 = vmul.f32 %v13294_v59, %v5240_v33 }
0x1ab4   :  { %v5256_v19 = vmul.f32 %v13296_v22, %v5242_v24 }
0x1ab5   :  { %5269 = vrot.lane.b32.xlu1 %v5255_v5, %s11972_s9 }
0x1ab6   :  { %5271 = vrot.lane.b32.xlu0 %v5256_v19, %s11972_s9  ;;  %v5228_v19 = vmul.f32 %v13304_v25, %v5216_v42 }
0x1ab8   :  { %v5244_v32 = vpop.permute.xlu1 %5243 }
0x1ab9   :  { %v5246_v9 = vpop.permute.xlu0 %5245  ;;  %v5257_v29 = vmul.f32 %v13302_v37, %v5244_v32 }
0x1aba   :  { %v5258_v21 = vmul.f32 %v13304_v25, %v5246_v9 }
0x1abb   :  { %5273 = vrot.lane.b32.xlu1 %v5257_v29, %s11972_s9 }
0x1abc   :  { %5275 = vrot.lane.b32.xlu0 %v5258_v21, %s11972_s9 }
0x1abf   :  { %2225 = vrot.lane.b32.xlu1 %v12506_v7, %s11972_s9  ;;  %v5211_v7 = vrot.slane %v13204_v62, 7 }
0x1ac0   :  { %2664 = vrot.lane.b32.xlu0 %v12623_v49, %s11972_s9  ;;  %v5212_v49 = vrot.slane %v13206_v23, 7 }
0x1ac3   :  { %3106 = vrot.lane.b32.xlu1 %v12746_v51, %s11972_s9 }
0x1ac4   :  { %3551 = vrot.lane.b32.xlu0 %v12869_v27, %s11972_s9 }
0x1ac7   :  { %3996 = vrot.lane.b32.xlu1 %v12992_v61, %s11972_s9  ;;  %v5213_v61 = vrot.slane %v13214_v20, 7  ;;  %v5215_v20 = vrot.slane %v13226_v8, 7 }
0x1ac8   :  { %4441 = vrot.lane.b32.xlu0 %v13115_v43, %s11972_s9 }
0x1ac9   :  { %v5225_v43 = vmul.f32 %v13294_v59, %v5213_v61 }
0x1acb   :  { %4886 = vrot.lane.b32.xlu1 %v13237_v39, %s11972_s9 }
0x1acc   :  { %2666 = vrot.lane.b32.xlu0 %v12626_v52, %s11972_s9  ;;  %v5224_v52 = vmul.f32 %v13288_v47, %v5212_v49 }
0x1acf   :  { %2227 = vrot.lane.b32.xlu1 %v12503_v44, %s11972_s9  ;;  %v5223_v44 = vmul.f32 %v13286_v46, %v5211_v7 }
0x1ad0   :  { %3553 = vrot.lane.b32.xlu0 %v12872_v18, %s11972_s9 }
0x1ad3   :  { %3108 = vrot.lane.b32.xlu1 %v12749_v13, %s11972_s9 }
0x1ad4   :  { %4443 = vrot.lane.b32.xlu0 %v13118_v54, %s11972_s9 }
0x1ad7   :  { %3998 = vrot.lane.b32.xlu1 %v12995_v57, %s11972_s9  ;;  %v5214_v57 = vrot.slane %v13216_v63, 7  ;;  %v5227_v63 = vmul.f32 %v13302_v37, %v5215_v20 }
0x1ad9   :  { %v5226_v54 = vmul.f32 %v13296_v22, %v5214_v57 }
0x1adb   :  { %4888 = vrot.lane.b32.xlu1 %v13240_v45, %s11972_s9 }
0x1b1d   :  { %v5266_v51 = vpop.permute.xlu1 %5265 }
0x1b1e   :  { %v5268_v27 = vpop.permute.xlu0 %5267  ;;  %v5283_v13 = vadd.f32 %v5266_v51, %v5223_v44 }
0x1b1f   :  { %v5284_v18 = vadd.f32 %v5268_v27, %v5224_v52 }
0x1b20   :  { %11547 = vtanh.f32 %v5283_v13  ;;  %v5368_v13 = vld [vmem:[%s14855_s10 + $0x30] sm:$0xff] }
0x1b21   :  { %11549 = vtanh.f32 %v5284_v18 }
0x1b27   :  { %v5270_v62 = vpop.permute.xlu1 %5269 }
0x1b28   :  { %v5272_v23 = vpop.permute.xlu0 %5271  ;;  %v5285_v39 = vadd.f32 %v5270_v62, %v5225_v43  ;;  %v5370_v62 = vld [vmem:[%s14855_s10 + $0x40] sm:$0xff] }
0x1b29   :  { %v5286_v45 = vadd.f32 %v5272_v23, %v5226_v54 }
0x1b2a   :  { %v11548_v36 = vpop.eup %11547  ;;  %11551 = vtanh.f32 %v5285_v39 }
0x1b2b   :  { %v11550_v30 = vpop.eup %11549  ;;  %11553 = vtanh.f32 %v5286_v45  ;;  %5301 = vrot.lane.b32.xlu1 %v11548_v36, %s11971_s25 }
0x1b2c   :  { %5303 = vrot.lane.b32.xlu0 %v11550_v30, %s11971_s25 }
0x1b2d   :  { %v5274_v34 = vpop.permute.xlu1 %5273 }
0x1b2e   :  { %v5276_v12 = vpop.permute.xlu0 %5275  ;;  %v5287_v40 = vadd.f32 %v5274_v34, %v5227_v63 }
0x1b2f   :  { %v5288_v8 = vadd.f32 %v5276_v12, %v5228_v19 }
0x1b30   :  { %11555 = vtanh.f32 %v5287_v40 }
0x1b31   :  { %v2226_v24 = vpop.permute.xlu1 %2225  ;;  %11557 = vtanh.f32 %v5288_v8 }
0x1b32   :  { %v2665_v32 = vpop.permute.xlu0 %2664  ;;  %2244 = vst.msk [vmem:[#allocation2] sm:$0x1] %vm2243_vm12, %v2226_v24 }
0x1b33   :  { %2683 = vst.msk [vmem:[#allocation2] sm:$0x2] %vm2682_vm13, %v2665_v32 }
0x1b34   :  { %v11552_v33 = vpop.eup %11551 }
0x1b35   :  { %v11554_v5 = vpop.eup %11553  ;;  %5305 = vrot.lane.b32.xlu1 %v11552_v33, %s11971_s25  ;;  %v3107_v55 = vpop.permute.xlu1 %3106 }
0x1b36   :  { %5307 = vrot.lane.b32.xlu0 %v11554_v5, %s11971_s25  ;;  %v3552_v9 = vpop.permute.xlu0 %3551  ;;  %3125 = vst.msk [vmem:[#allocation2] sm:$0x4] %vm3124_vm14, %v3107_v55 }
0x1b37   :  { %3570 = vst.msk [vmem:[#allocation2] sm:$0x8] %vm3569_vm15, %v3552_v9 }
0x1b39   :  { %v3997_v29 = vpop.permute.xlu1 %3996 }
0x1b3a   :  { %2668 = vrot.lane.b32.xlu0 %v12633_v58, %s11972_s9  ;;  %v11556_v21 = vpop.eup %11555  ;;  %v4442_v7 = vpop.permute.xlu0 %4441  ;;  %4015 = vst.msk [vmem:[#allocation2] sm:$0x10] %vm4014_vm0, %v3997_v29 }
0x1b3b   :  { %4460 = vst.msk [vmem:[#allocation2] sm:$0x20] %vm4459_vm2, %v4442_v7  ;;  %5309 = vrot.lane.b32.xlu1 %v11556_v21, %s11971_s25  ;;  %v11558_v52 = vpop.eup %11557 }
0x1b3d   :  { %v4887_v49 = vpop.permute.xlu1 %4886 }
0x1b3e   :  { %3555 = vrot.lane.b32.xlu0 %v12879_v35, %s11972_s9  ;;  %v2667_v44 = vpop.permute.xlu0 %2666  ;;  %4905 = vst.msk [vmem:[#allocation2] sm:$0x40] %vm4904_vm3, %v4887_v49 }
0x1b3f   :  { %2684 = vst.msk [vmem:[#allocation2 + $0x8] sm:$0x2] %vm2682_vm13, %v2667_v44  ;;  %2229 = vrot.lane.b32.xlu1 %v12515_v17, %s11972_s9 }
0x1b41   :  { %v2228_v58 = vpop.permute.xlu1 %2227 }
0x1b42   :  { %4445 = vrot.lane.b32.xlu0 %v13125_v2, %s11972_s9  ;;  %v3554_v51 = vpop.permute.xlu0 %3553  ;;  %2245 = vst.msk [vmem:[#allocation2 + $0x8] sm:$0x1] %vm2243_vm12, %v2228_v58 }
0x1b43   :  { %3571 = vst.msk [vmem:[#allocation2 + $0x8] sm:$0x8] %vm3569_vm15, %v3554_v51  ;;  %3110 = vrot.lane.b32.xlu1 %v12756_v15, %s11972_s9 }
0x1b45   :  { %v3109_v35 = vpop.permute.xlu1 %3108 }
0x1b46   :  { %5311 = vrot.lane.b32.xlu0 %v11558_v52, %s11971_s25  ;;  %v4444_v27 = vpop.permute.xlu0 %4443  ;;  %3126 = vst.msk [vmem:[#allocation2 + $0x8] sm:$0x4] %vm3124_vm14, %v3109_v35 }
0x1b47   :  { %4461 = vst.msk [vmem:[#allocation2 + $0x8] sm:$0x20] %vm4459_vm2, %v4444_v27  ;;  %4000 = vrot.lane.b32.xlu1 %v13002_v6, %s11972_s9 }
0x1b49   :  { %v3999_v17 = vpop.permute.xlu1 %3998 }
0x1b4a   :  { %2670 = vrot.lane.b32.xlu0 %v12636_v60, %s11972_s9  ;;  %4016 = vst.msk [vmem:[#allocation2 + $0x8] sm:$0x10] %vm4014_vm0, %v3999_v17  ;;  %v14914_v60 = vld [vmem:[#allocation12_spill] sm:$0xff] }
0x1b4b   :  { %4890 = vrot.lane.b32.xlu1 %v13247_v56, %s11972_s9 }
0x1b4d   :  { %v4889_v15 = vpop.permute.xlu1 %4888 }
0x1b4e   :  { %3557 = vrot.lane.b32.xlu0 %v12882_v0, %s11972_s9  ;;  %4906 = vst.msk [vmem:[#allocation2 + $0x8] sm:$0x40] %vm4904_vm3, %v4889_v15  ;;  %v5363_v0 = vld [vmem:[%s14855_s10 + $0x8] sm:$0xff] }
0x1b4f   :  { %2231 = vrot.lane.b32.xlu1 %v12512_v14, %s11972_s9  ;;  %v14913_v14 = vld [vmem:[#allocation11_spill] sm:$0xff] }
0x1b52   :  { %4447 = vrot.lane.b32.xlu0 %v13128_v1, %s11972_s9 }
0x1b53   :  { %3112 = vrot.lane.b32.xlu1 %v12759_v31, %s11972_s9  ;;  %v14918_v31 = vld [vmem:[#allocation13_spill] sm:$0xff] }
0x1b56   :  { %2672 = vrot.lane.b32.xlu0 %v12643_v11, %s11972_s9  ;;  %v14915_v11 = vld [vmem:[#allocation14_spill] sm:$0xff] }
0x1b57   :  { %4002 = vrot.lane.b32.xlu1 %v13005_v38, %s11972_s9  ;;  %v5365_v38 = vld [vmem:[%s14855_s10 + $0x18] sm:$0xff] }
0x1b5a   :  { %3559 = vrot.lane.b32.xlu0 %v12889_v50, %s11972_s9  ;;  %v5364_v50 = vld [vmem:[%s14855_s10 + $0x10] sm:$0xff] }
0x1b5b   :  { %4892 = vrot.lane.b32.xlu1 %v13250_v3, %s11972_s9  ;;  %v10906_v2 = vpack.c.bf16 %v5365_v38, %v5364_v50  ;;  %v5366_v3 = vld [vmem:[%s14855_s10 + $0x20] sm:$0xff] }
0x1b5c   :  { %v5374_v50 = vld [vmem:[%s14856_s11] sm:$0xff] }
0x1b5e   :  { %4449 = vrot.lane.b32.xlu0 %v13135_v26, %s11972_s9 }
0x1b5f   :  { %2233 = vrot.lane.b32.xlu1 %v12524_v28, %s11972_s9  ;;  %v14916_v28 = vld [vmem:[#allocation9_spill] sm:$0xff] }
0x1b62   :  { %2674 = vrot.lane.b32.xlu0 %v12646_v16, %s11972_s9  ;;  %v14917_v16 = vld [vmem:[#allocation10_spill] sm:$0xff] }
0x1b63   :  { %3114 = vrot.lane.b32.xlu1 %v12766_v41, %s11972_s9  ;;  %v5362_v41 = vld [vmem:[%s14855_s10] sm:$0xff] }
0x1b64   :  { %v10902_v6 = vpack.c.bf16 %v5363_v0, %v5362_v41 }
0x1b66   :  { %3561 = vrot.lane.b32.xlu0 %v14913_v14, %s11972_s9  ;;  %10903 = vmatprep.subr.bf16.mxu0 %v10902_v6 }
0x1b67   :  { %4004 = vrot.lane.b32.xlu1 %v14914_v60, %s11972_s9  ;;  %10905 = vmatpush3.bf16.msra.mxu0 %v10902_v6  ;;  %v5375_v6 = vld [vmem:[%s14856_s11 + $0x8] sm:$0xff] }
0x1b68   :  { %10907 = vmatprep.subr.bf16.mxu0 %v10906_v2 }
0x1b6a   :  { %4451 = vrot.lane.b32.xlu0 %v14915_v11, %s11972_s9  ;;  %v5372_v11 = vld [vmem:[%s14855_s10 + $0x50] sm:$0xff] }
0x1b6b   :  { %4894 = vrot.lane.b32.xlu1 %v13257_v53, %s11972_s9  ;;  %10909 = vmatpush3.bf16.msra.mxu0 %v10906_v2  ;;  %v5367_v53 = vld [vmem:[%s14855_s10 + $0x28] sm:$0xff] }
0x1b6f   :  { %2235 = vrot.lane.b32.xlu1 %v14916_v28, %s11972_s9  ;;  %v5373_v28 = vld [vmem:[%s14855_s10 + $0x58] sm:$0xff] }
0x1b73   :  { %3116 = vrot.lane.b32.xlu1 %v14917_v16, %s11972_s9 }
0x1b77   :  { %4006 = vrot.lane.b32.xlu1 %v14918_v31, %s11972_s9  ;;  %v10922_v31 = vpack.c.bf16 %v5373_v28, %v5372_v11 }
0x1b7b   :  { %4896 = vrot.lane.b32.xlu1 %v13260_v48, %s11972_s9  ;;  %v10910_v48 = vpack.c.bf16 %v5367_v53, %v5366_v3 }
0x1b7d   :  { %10911 = vmatprep.subr.bf16.mxu1 %v10910_v48 }
0x1b7e   :  { %10913 = vmatpush3.bf16.msra.mxu1 %v10910_v48  ;;  %v5382_v48 = vld [vmem:[%s14856_s11 + $0x40] sm:$0xff] }
0x1b9d   :  { %v5302_v1 = vpop.permute.xlu1 %5301 }
0x1b9e   :  { %v5319_v26 = vmul.f32 %v13286_v46, %v5302_v1  ;;  %v5304_v56 = vpop.permute.xlu0 %5303  ;;  %v5369_v46 = vld [vmem:[%s14855_s10 + $0x38] sm:$0xff]  ;;  %v13522_v1 = vpack.c.bf16 %v5375_v6, %v5374_v50 }
0x1b9f   :  { %v5320_v18 = vmul.f32 %v13288_v47, %v5304_v56  ;;  %v10914_v61 = vpack.c.bf16 %v5369_v46, %v5368_v13  ;;  %v5371_v47 = vld [vmem:[%s14855_s10 + $0x48] sm:$0xff]  ;;  %v5377_v56 = vld [vmem:[%s14856_s11 + $0x18] sm:$0xff] }
0x1ba0   :  { %5331 = vrot.lane.b32.xlu0 %v5319_v26, %s11972_s9  ;;  %v13463_v23 = vpack.c.bf16 %v5371_v47, %v5370_v62  ;;  %v5376_v26 = vld [vmem:[%s14856_s11 + $0x10] sm:$0xff]  ;;  %v5383_v13 = vld [vmem:[%s14856_s11 + $0x48] sm:$0xff] }
0x1ba1   :  { %10915 = vmatprep.subr.bf16.mxu1 %v10914_v61  ;;  %v13532_v53 = vpack.c.bf16 %v5377_v56, %v5376_v26  ;;  %v5379_v62 = vld [vmem:[%s14856_s11 + $0x28] sm:$0xff] }
0x1ba2   :  { %10917 = vmatpush3.bf16.msra.mxu1 %v10914_v61  ;;  %10919 = vmatprep.subr.bf16.mxu0 %v13463_v23  ;;  %v13546_v61 = vpack.c.bf16 %v5383_v13, %v5382_v48 }
0x1ba3   :  { %10926 = vmatprep.subr.bf16.mxu1 %v14912_v10 }
0x1ba4   :  { %5333 = vrot.lane.b32.xlu0 %v5320_v18, %s11972_s9 }
0x1ba7   :  { %v5306_v57 = vpop.permute.xlu1 %5305 }
0x1ba8   :  { %v5308_v43 = vpop.permute.xlu0 %5307  ;;  %v5321_v54 = vmul.f32 %v13294_v59, %v5306_v57  ;;  %v5384_v57 = vld [vmem:[%s14856_s11 + $0x50] sm:$0xff] }
0x1ba9   :  { %v5322_v39 = vmul.f32 %v13296_v22, %v5308_v43  ;;  %v5385_v43 = vld [vmem:[%s14856_s11 + $0x58] sm:$0xff] }
0x1baa   :  { %5335 = vrot.lane.b32.xlu0 %v5321_v54, %s11972_s9  ;;  %v5378_v54 = vld [vmem:[%s14856_s11 + $0x20] sm:$0xff]  ;;  %v13563_v47 = vpack.c.bf16 %v5385_v43, %v5384_v57 }
0x1bac   :  { %v2669_v45 = vpop.permute.xlu0 %2668 }
0x1bad   :  { %2685 = vst.msk [vmem:[#allocation2 + $0x10] sm:$0x2] %vm2682_vm13, %v2669_v45  ;;  %v5310_v59 = vpop.permute.xlu1 %5309  ;;  %v5381_v45 = vld [vmem:[%s14856_s11 + $0x38] sm:$0xff] }
0x1bae   :  { %5337 = vrot.lane.b32.xlu0 %v5322_v39, %s11972_s9  ;;  %v5323_v30 = vmul.f32 %v13302_v37, %v5310_v59  ;;  %v5380_v39 = vld [vmem:[%s14856_s11 + $0x30] sm:$0xff] }
0x1bb0   :  { %v3556_v36 = vpop.permute.xlu0 %3555 }
0x1bb1   :  { %3572 = vst.msk [vmem:[#allocation2 + $0x10] sm:$0x8] %vm3569_vm15, %v3556_v36  ;;  %v2230_v20 = vpop.permute.xlu1 %2229  ;;  %v13579_v36 = vpack.c.bf16 %v5381_v45, %v5380_v39 }
0x1bb2   :  { %5339 = vrot.lane.b32.xlu0 %v5323_v30, %s11972_s9  ;;  %2246 = vst.msk [vmem:[#allocation2 + $0x10] sm:$0x1] %vm2243_vm12, %v2230_v20 }
0x1bb4   :  { %v4446_v63 = vpop.permute.xlu0 %4445 }
0x1bb5   :  { %4462 = vst.msk [vmem:[#allocation2 + $0x10] sm:$0x20] %vm4459_vm2, %v4446_v63  ;;  %v3111_v22 = vpop.permute.xlu1 %3110 }
0x1bb6   :  { %3127 = vst.msk [vmem:[#allocation2 + $0x10] sm:$0x4] %vm3124_vm14, %v3111_v22 }
0x1bb8   :  { %v5312_v34 = vpop.permute.xlu0 %5311 }
0x1bb9   :  { %v5324_v12 = vmul.f32 %v13304_v25, %v5312_v34  ;;  %v4001_v40 = vpop.permute.xlu1 %4000  ;;  %v9650_v34 = vld [vmem:[%s14857_s12] ss:$0 sm:$0xff] }
0x1bba   :  { %4017 = vst.msk [vmem:[#allocation2 + $0x10] sm:$0x10] %vm4014_vm0, %v4001_v40 }
0x1bbb   :  { %5341 = vrot.lane.b32.xlu0 %v5324_v12, %s11972_s9 }
0x1bbc   :  { %v2671_v37 = vpop.permute.xlu0 %2670 }
0x1bbd   :  { %2686 = vst.msk [vmem:[#allocation2 + $0x18] sm:$0x2] %vm2682_vm13, %v2671_v37  ;;  %v4891_v42 = vpop.permute.xlu1 %4890 }
0x1bbe   :  { %4907 = vst.msk [vmem:[#allocation2 + $0x10] sm:$0x40] %vm4904_vm3, %v4891_v42 }
0x1bc0   :  { %v3558_v33 = vpop.permute.xlu0 %3557 }
0x1bc1   :  { %3573 = vst.msk [vmem:[#allocation2 + $0x18] sm:$0x8] %vm3569_vm15, %v3558_v33  ;;  %v2232_v24 = vpop.permute.xlu1 %2231 }
0x1bc2   :  { %2247 = vst.msk [vmem:[#allocation2 + $0x18] sm:$0x1] %vm2243_vm12, %v2232_v24 }
0x1bc4   :  { %v4448_v5 = vpop.permute.xlu0 %4447 }
0x1bc5   :  { %4463 = vst.msk [vmem:[#allocation2 + $0x18] sm:$0x20] %vm4459_vm2, %v4448_v5  ;;  %v3113_v25 = vpop.permute.xlu1 %3112 }
0x1bc6   :  { %3128 = vst.msk [vmem:[#allocation2 + $0x18] sm:$0x4] %vm3124_vm14, %v3113_v25 }
0x1bc8   :  { %v2673_v19 = vpop.permute.xlu0 %2672 }
0x1bc9   :  { %2687 = vst.msk [vmem:[#allocation2 + $0x20] sm:$0x2] %vm2682_vm13, %v2673_v19  ;;  %v4003_v32 = vpop.permute.xlu1 %4002 }
0x1bca   :  { %4018 = vst.msk [vmem:[#allocation2 + $0x18] sm:$0x10] %vm4014_vm0, %v4003_v32 }
0x1bcc   :  { %v3560_v8 = vpop.permute.xlu0 %3559 }
0x1bcd   :  { %3574 = vst.msk [vmem:[#allocation2 + $0x20] sm:$0x8] %vm3569_vm15, %v3560_v8  ;;  %v4893_v55 = vpop.permute.xlu1 %4892  ;;  %v9651_v8 = vld [vmem:[%s14857_s12 + $0x1] ss:$0 sm:$0xff] }
0x1bce   :  { %4908 = vst.msk [vmem:[#allocation2 + $0x18] sm:$0x40] %vm4904_vm3, %v4893_v55  ;;  %v9652_v55 = vld [vmem:[%s14857_s12 + $0x2] ss:$0 sm:$0xff] }
0x1bd0   :  { %v4450_v9 = vpop.permute.xlu0 %4449 }
0x1bd1   :  { %4464 = vst.msk [vmem:[#allocation2 + $0x20] sm:$0x20] %vm4459_vm2, %v4450_v9  ;;  %v2234_v29 = vpop.permute.xlu1 %2233 }
0x1bd2   :  { %2248 = vst.msk [vmem:[#allocation2 + $0x20] sm:$0x1] %vm2243_vm12, %v2234_v29 }
0x1bd4   :  { %v2675_v21 = vpop.permute.xlu0 %2674 }
0x1bd5   :  { %2688 = vst.msk [vmem:[#allocation2 + $0x28] sm:$0x2] %vm2682_vm13, %v2675_v21  ;;  %v3115_v7 = vpop.permute.xlu1 %3114 }
0x1bd6   :  { %3129 = vst.msk [vmem:[#allocation2 + $0x20] sm:$0x4] %vm3124_vm14, %v3115_v7 }
0x1bd8   :  { %v3562_v49 = vpop.permute.xlu0 %3561 }
0x1bd9   :  { %3575 = vst.msk [vmem:[#allocation2 + $0x28] sm:$0x8] %vm3569_vm15, %v3562_v49  ;;  %v4005_v44 = vpop.permute.xlu1 %4004 }
0x1bda   :  { %4019 = vst.msk [vmem:[#allocation2 + $0x20] sm:$0x10] %vm4014_vm0, %v4005_v44 }
0x1bdc   :  { %v4452_v58 = vpop.permute.xlu0 %4451 }
0x1bdd   :  { %4465 = vst.msk [vmem:[#allocation2 + $0x28] sm:$0x20] %vm4459_vm2, %v4452_v58  ;;  %v4895_v52 = vpop.permute.xlu1 %4894 }
0x1bde   :  { %4909 = vst.msk [vmem:[#allocation2 + $0x20] sm:$0x40] %vm4904_vm3, %v4895_v52 }
0x1be1   :  { %v2236_v51 = vpop.permute.xlu1 %2235 }
0x1be2   :  { %2249 = vst.msk [vmem:[#allocation2 + $0x28] sm:$0x1] %vm2243_vm12, %v2236_v51 }
0x1be5   :  { %v3117_v35 = vpop.permute.xlu1 %3116 }
0x1be6   :  { %3130 = vst.msk [vmem:[#allocation2 + $0x28] sm:$0x4] %vm3124_vm14, %v3117_v35 }
0x1be9   :  { %v4007_v27 = vpop.permute.xlu1 %4006 }
0x1bea   :  { %4020 = vst.msk [vmem:[#allocation2 + $0x28] sm:$0x10] %vm4014_vm0, %v4007_v27 }
0x1bed   :  { %v4897_v17 = vpop.permute.xlu1 %4896 }
0x1bee   :  { %4910 = vst.msk [vmem:[#allocation2 + $0x28] sm:$0x40] %vm4904_vm3, %v4897_v17 }
0x1c12   :  { %v5332_v15 = vpop.permute.xlu0 %5331 }
0x1c13   :  { %5350 = vst.msk [vmem:[#allocation2] sm:$0x80] %vm5349_vm5, %v5332_v15 }
0x1c16   :  { %v5334_v14 = vpop.permute.xlu0 %5333 }
0x1c17   :  { %5351 = vst.msk [vmem:[#allocation2 + $0x8] sm:$0x80] %vm5349_vm5, %v5334_v14 }
0x1c1a   :  { %v5356_v60 = vld [vmem:[#allocation2] sm:$0xff] }
0x1c1b   :  { %10434 = vmatprep.mubr.msk.f32.mxu0 %vm1843_vm11, %v5356_v60 }
0x1c1c   :  { %v5336_v16 = vpop.permute.xlu0 %5335 }
0x1c1d   :  { %5352 = vst.msk [vmem:[#allocation2 + $0x10] sm:$0x80] %vm5349_vm5, %v5336_v16 }
0x1c1e   :  { %v5357_v41 = vld [vmem:[#allocation2 + $0x8] sm:$0xff] }
0x1c1f   :  { %10435 = vmatmul.mubr.msk.f32.vlgmr.msra.gmra.mrb[42].mxu0 %vm1843_vm11, %v5357_v41 }
0x1c20   :  { %v5338_v0 = vpop.permute.xlu0 %5337  ;;  %10921 = vmatpush3.bf16.msra.mxu0 %v13463_v23  ;;  %v13568_v23 = vpack.c.bf16 %v5379_v62, %v5378_v54 }
0x1c21   :  { %5353 = vst.msk [vmem:[#allocation2 + $0x18] sm:$0x80] %vm5349_vm5, %v5338_v0  ;;  %10923 = vmatprep.subr.bf16.mxu0 %v10922_v31 }
0x1c24   :  { %v5358_v38 = vld [vmem:[#allocation2 + $0x10] sm:$0xff]  ;;  %10925 = vmatpush3.bf16.msra.mxu0 %v10922_v31  ;;  %v5340_v2 = vpop.permute.xlu0 %5339 }
0x1c25   :  { %10445 = vmatprep.mubr.msk.f32.mxu1 %vm1843_vm11, %v5358_v38  ;;  %10932 = vmatprep.subr.bf16.mxu0 %v14912_v10  ;;  %5354 = vst.msk [vmem:[#allocation2 + $0x20] sm:$0x80] %vm5349_vm5, %v5340_v2 }
0x1c28   :  { %v5359_v3 = vld [vmem:[#allocation2 + $0x18] sm:$0xff] }
0x1c29   :  { %10446 = vmatmul.mubr.msk.f32.vlgmr.msra.gmra.mrb[38].mxu1 %vm1843_vm11, %v5359_v3 }
0x1c2a   :  { %10928 = vmatpush3.bf16.msra.mxu1 %v13522_v1  ;;  %10467 = vmatprep.mubr.msk.f32.mxu1 %vm11968_vm1, %v14911_v4 }
0x1c2b   :  { %10929 = vmatprep.subr.bf16.mxu1 %v14912_v10 }
0x1c2c   :  { %v5360_v18 = vld [vmem:[#allocation2 + $0x20] sm:$0xff] }
0x1c2d   :  { %v5342_v46 = vpop.permute.xlu0 %5341  ;;  %10456 = vmatprep.mubr.msk.f32.mxu0 %vm1843_vm11, %v5360_v18 }
0x1c2e   :  { %5355 = vst.msk [vmem:[#allocation2 + $0x28] sm:$0x80] %vm5349_vm5, %v5342_v46  ;;  %10931 = vmatpush3.bf16.msra.mxu1 %v13532_v53 }
0x1c2f   :  { %10938 = vmatprep.subr.bf16.mxu1 %v14912_v10 }
0x1c31   :  { %10468 = vmatmul.mubr.f32.vlgmr.msra.gmra.mrb[40].mxu1 %v14911_v4 }
0x1c32   :  { %10940 = vmatpush3.bf16.msra.mxu1 %v13546_v61  ;;  %10489 = vmatprep.mubr.msk.f32.mxu1 %vm11968_vm1, %v14911_v4 }
0x1c33   :  { %10941 = vmatprep.subr.bf16.mxu1 %v14912_v10 }
0x1c35   :  { %v5361_v59 = vld [vmem:[#allocation2 + $0x28] sm:$0xff] }
0x1c36   :  { %10457 = vmatmul.mubr.msk.f32.vlgmr.msra.gmra.mrb[44].mxu0 %vm1843_vm11, %v5361_v59  ;;  %10943 = vmatpush3.bf16.msra.mxu1 %v13563_v47 }
0x1c37   :  { %10934 = vmatpush3.bf16.msra.mxu0 %v13568_v23  ;;  %10478 = vmatprep.mubr.msk.f32.mxu0 %vm11968_vm1, %v14911_v4 }
0x1c38   :  { %10935 = vmatprep.subr.bf16.mxu0 %v14912_v10  ;;  %10950 = vmatprep.subr.bf16.mxu1 %v14912_v10 }
0x1c39   :  { %10490 = vmatmul.mubr.f32.vlgmr.msra.gmra.mrb[42].mxu1 %v14911_v4 }
0x1c3a   :  { %10952 = vmatpush3.bf16.msra.mxu1 %v13568_v23  ;;  %10511 = vmatprep.mubr.msk.f32.mxu1 %vm11968_vm1, %v14911_v4 }
0x1c3b   :  { %10937 = vmatpush3.bf16.msra.mxu0 %v13579_v36  ;;  %10953 = vmatprep.subr.bf16.mxu1 %v14912_v10 }
0x1c3c   :  { %10944 = vmatprep.subr.bf16.mxu0 %v14912_v10 }
0x1c3e   :  { %10479 = vmatmul.mubr.f32.vlgmr.msra.gmra.mrb[46].mxu0 %v14911_v4  ;;  %10955 = vmatpush3.bf16.msra.mxu1 %v13579_v36 }
0x1c3f   :  { %10946 = vmatpush3.bf16.msra.mxu0 %v13522_v1  ;;  %10500 = vmatprep.mubr.msk.f32.mxu0 %vm11968_vm1, %v14911_v4 }
0x1c40   :  { %10947 = vmatprep.subr.bf16.mxu0 %v14912_v10  ;;  %10962 = vmatprep.subr.bf16.mxu1 %v14912_v10 }
0x1c43   :  { %10949 = vmatpush3.bf16.msra.mxu0 %v13532_v53 }
0x1c44   :  { %10956 = vmatprep.subr.bf16.mxu0 %v14912_v10 }
0x1cf2   :  { %v10436_v30 = vpop.f32.mrb[42].mxu0 }
0x1cf3   :  { %v5461_v20 = vpop.f32.mrb[43].mxu0  ;;  %v13606_v37 = vadd.f32 %v10436_v30, %v9650_v34 }
0x1cf4   :  { %v13604_v12 = vadd.f32 %v9650_v34, %v5461_v20 }
0x1cfc   :  { %v10447_v63 = vpop.f32.mrb[38].mxu1 }
0x1cfd   :  { %v5542_v22 = vpop.f32.mrb[39].mxu1  ;;  %v13622_v35 = vadd.f32 %v10447_v63, %v9651_v8 }
0x1cfe   :  { %v13616_v29 = vadd.f32 %v9651_v8, %v5542_v22 }
0x1d04   :  { %v5722_v40 = vpop.f32.mrb[40].mxu1 }
0x1d05   :  { %v5869_v42 = vrot.slane %v5722_v40, 1  ;;  %v5878_v33 = vadd.f32 %v5722_v40, %v13604_v12  ;;  %v10469_v24 = vpop.f32.mrb[41].mxu1 }
0x1d07   :  { %v5879_v5 = vadd.f32 %v5869_v42, %v13606_v37  ;;  %11559 = vtanh.f32 %v5878_v33  ;;  %v9653_v41 = vmul.f32 -1.442695, %v5878_v33 }
0x1d09   :  { %v10458_v25 = vpop.f32.mrb[44].mxu0  ;;  %11561 = vtanh.f32 %v5879_v5  ;;  %v9654_v0 = vmul.f32 -1.442695, %v5879_v5 }
0x1d0a   :  { %v5623_v19 = vpop.f32.mrb[45].mxu0  ;;  %v13627_v14 = vadd.f32 %v10458_v25, %v9652_v55 }
0x1d0b   :  { %v13618_v21 = vadd.f32 %v9652_v55, %v5623_v19 }
0x1d0c   :  { %v5862_v32 = vpop.f32.mrb[42].mxu1 }
0x1d0d   :  { %v10491_v9 = vpop.f32.mrb[43].mxu1  ;;  %v5882_v27 = vadd.f32 %v5862_v32, %v13618_v21  ;;  %v5871_v17 = vrot.slane %v5862_v32, 1 }
0x1d0f   :  { %v5883_v60 = vadd.f32 %v5871_v17, %v13627_v14  ;;  %v9657_v38 = vmul.f32 -1.442695, %v5882_v27 }
0x1d11   :  { %v11560_v7 = vpop.eup %11559  ;;  %v5792_v49 = vpop.f32.mrb[46].mxu0  ;;  %v9658_v48 = vmul.f32 -1.442695, %v5883_v60 }
0x1d12   :  { %v5870_v44 = vrot.slane %v5792_v49, 1  ;;  %v5880_v58 = vadd.f32 %v5792_v49, %v13616_v29  ;;  %v10480_v52 = vpop.f32.mrb[47].mxu0  ;;  %5938 = vrot.lane.b32.xlu0 %v11560_v7, %s11971_s25 }
0x1d13   :  { %v11562_v51 = vpop.eup %11561 }
0x1d14   :  { %11563 = vtanh.f32 %v5880_v58  ;;  %5940 = vrot.lane.b32.xlu1 %v11562_v51, %s11971_s25  ;;  %v5881_v15 = vadd.f32 %v5870_v44, %v13622_v35  ;;  %v9655_v50 = vmul.f32 -1.442695, %v5880_v58 }
0x1d15   :  { %11565 = vtanh.f32 %v5882_v27 }
0x1d16   :  { %11567 = vtanh.f32 %v5881_v15  ;;  %v9656_v56 = vmul.f32 -1.442695, %v5881_v15 }
0x1d17   :  { %11569 = vtanh.f32 %v5883_v60 }
0x1d18   :  { %11571 = vpow2.f32 %v9653_v41 }
0x1d19   :  { %11573 = vpow2.f32 %v9654_v0 }
0x1d1a   :  { %11575 = vpow2.f32 %v9655_v50 }
0x1d1b   :  { %11577 = vpow2.f32 %v9657_v38 }
0x1d1e   :  { %v11564_v11 = vpop.eup %11563 }
0x1d1f   :  { %5942 = vrot.lane.b32.xlu0 %v11564_v11, %s11971_s25  ;;  %v11566_v28 = vpop.eup %11565 }
0x1d20   :  { %v11568_v16 = vpop.eup %11567 }
0x1d21   :  { %5944 = vrot.lane.b32.xlu1 %v11568_v16, %s11971_s25  ;;  %v11570_v31 = vpop.eup %11569 }
0x1d22   :  { %v11572_v6 = vpop.eup %11571 }
0x1d23   :  { %5946 = vrot.lane.b32.xlu0 %v11566_v28, %s11971_s25  ;;  %v11574_v2 = vpop.eup %11573  ;;  %v5902_v26 = vadd.f32 1.0, %v11572_v6 }
0x1d24   :  { %v5903_v3 = vadd.f32 1.0, %v11574_v2  ;;  %v11576_v13 = vpop.eup %11575 }
0x1d25   :  { %5948 = vrot.lane.b32.xlu1 %v11570_v31, %s11971_s25  ;;  %11579 = vrcp.f32 %v5902_v26  ;;  %v11578_v46 = vpop.eup %11577  ;;  %v5904_v18 = vadd.f32 1.0, %v11576_v13 }
0x1d26   :  { %11581 = vpow2.f32 %v9656_v56  ;;  %v5906_v45 = vadd.f32 1.0, %v11578_v46 }
0x1d27   :  { %11583 = vrcp.f32 %v5903_v3 }
0x1d28   :  { %11585 = vpow2.f32 %v9658_v48 }
0x1d29   :  { %11587 = vrcp.f32 %v5904_v18 }
0x1d2a   :  { %11589 = vrcp.f32 %v5906_v45 }
0x1d2f   :  { %v13634_v57 = vpop.eup %11579 }
0x1d30   :  { %v11582_v62 = vpop.eup %11581  ;;  %v5926_v7 = vmul.f32 0.0, %v13634_v57 }
0x1d31   :  { %v13637_v39 = vpop.eup %11583  ;;  %v5905_v20 = vadd.f32 1.0, %v11582_v62 }
0x1d32   :  { %v11586_v63 = vpop.eup %11585  ;;  %v5927_v58 = vmul.f32 0.0, %v13637_v39 }
0x1d33   :  { %v5907_v22 = vadd.f32 1.0, %v11586_v63  ;;  %11591 = vrcp.f32 %v5905_v20  ;;  %v13642_v34 = vpop.eup %11587 }
0x1d34   :  { %v13646_v33 = vpop.eup %11589  ;;  %v5928_v27 = vmul.f32 0.0, %v13642_v34 }
0x1d35   :  { %11593 = vrcp.f32 %v5907_v22  ;;  %v5930_v28 = vmul.f32 0.0, %v13646_v33 }
0x1d3d   :  { %v11592_v25 = vpop.eup %11591 }
0x1d3e   :  { %v5929_v31 = vmul.f32 0.0, %v11592_v25 }
0x1d3f   :  { %v11594_v8 = vpop.eup %11593 }
0x1d40   :  { %v5931_v6 = vmul.f32 0.0, %v11594_v8 }
0x1d84   :  { %v5939_v43 = vpop.permute.xlu0 %5938 }
0x1d85   :  { %v5956_v54 = vmul.f32 %v13634_v57, %v5939_v43 }
0x1d86   :  { %v5941_v59 = vpop.permute.xlu1 %5940 }
0x1d87   :  { %5968 = vrot.lane.b32.xlu0 %v5956_v54, %s11972_s9  ;;  %v5957_v30 = vmul.f32 %v13637_v39, %v5941_v59 }
0x1d89   :  { %5970 = vrot.lane.b32.xlu1 %v5957_v30, %s11972_s9 }
0x1d91   :  { %v5943_v40 = vpop.permute.xlu0 %5942 }
0x1d92   :  { %v5958_v42 = vmul.f32 %v13642_v34, %v5943_v40 }
0x1d93   :  { %v5945_v19 = vpop.permute.xlu1 %5944 }
0x1d94   :  { %5972 = vrot.lane.b32.xlu0 %v5958_v42, %s11972_s9  ;;  %v5959_v32 = vmul.f32 %v11592_v25, %v5945_v19 }
0x1d95   :  { %v5947_v24 = vpop.permute.xlu0 %5946 }
0x1d96   :  { %v5960_v5 = vmul.f32 %v13646_v33, %v5947_v24  ;;  %5974 = vrot.lane.b32.xlu1 %v5959_v32, %s11972_s9 }
0x1d97   :  { %v5949_v55 = vpop.permute.xlu1 %5948 }
0x1d98   :  { %5976 = vrot.lane.b32.xlu0 %v5960_v5, %s11972_s9  ;;  %v5961_v9 = vmul.f32 %v11594_v8, %v5949_v55 }
0x1d9a   :  { %5978 = vrot.lane.b32.xlu1 %v5961_v9, %s11972_s9 }
0x1df9   :  { %v5969_v49 = vpop.permute.xlu0 %5968 }
0x1dfa   :  { %v13653_v44 = vadd.f32 %v5969_v49, %v5926_v7 }
0x1dfb   :  { %v5971_v52 = vpop.permute.xlu1 %5970 }
0x1dfc   :  { %11595 = vtanh.f32 %v13653_v44  ;;  %v13657_v51 = vadd.f32 %v5971_v52, %v5927_v58 }
0x1dfe   :  { %11597 = vtanh.f32 %v13657_v51 }
0x1e06   :  { %v11596_v17 = vpop.eup %11595  ;;  %v5973_v15 = vpop.permute.xlu0 %5972 }
0x1e07   :  { %v13661_v60 = vadd.f32 %v5973_v15, %v5928_v27  ;;  %6004 = vrot.lane.b32.xlu0 %v11596_v17, %s11971_s25 }
0x1e08   :  { %v11598_v11 = vpop.eup %11597  ;;  %v5975_v0 = vpop.permute.xlu1 %5974 }
0x1e09   :  { %11599 = vtanh.f32 %v13661_v60  ;;  %6006 = vrot.lane.b32.xlu1 %v11598_v11, %s11971_s25  ;;  %v13669_v50 = vadd.f32 %v5975_v0, %v5929_v31 }
0x1e0a   :  { %v5977_v16 = vpop.permute.xlu0 %5976 }
0x1e0b   :  { %v13667_v41 = vadd.f32 %v5977_v16, %v5930_v28 }
0x1e0c   :  { %v5979_v38 = vpop.permute.xlu1 %5978 }
0x1e0d   :  { %11601 = vtanh.f32 %v13667_v41  ;;  %v13673_v2 = vadd.f32 %v5979_v38, %v5931_v6 }
0x1e0e   :  { %11603 = vtanh.f32 %v13669_v50 }
0x1e0f   :  { %11605 = vtanh.f32 %v13673_v2 }
0x1e13   :  { %v11600_v26 = vpop.eup %11599 }
0x1e14   :  { %6008 = vrot.lane.b32.xlu0 %v11600_v26, %s11971_s25 }
0x1e17   :  { %v11602_v56 = vpop.eup %11601 }
0x1e18   :  { %6012 = vrot.lane.b32.xlu0 %v11602_v56, %s11971_s25  ;;  %v11604_v3 = vpop.eup %11603 }
0x1e19   :  { %6010 = vrot.lane.b32.xlu1 %v11604_v3, %s11971_s25  ;;  %v11606_v48 = vpop.eup %11605 }
0x1e1d   :  { %6014 = vrot.lane.b32.xlu1 %v11606_v48, %s11971_s25 }
0x1e79   :  { %v6005_v13 = vpop.permute.xlu0 %6004 }
0x1e7a   :  { %v13684_v43 = vmul.f32 %v13634_v57, %v6005_v13 }
0x1e7b   :  { %v6007_v46 = vpop.permute.xlu1 %6006 }
0x1e7c   :  { %v13681_v18 = vmul.f32 %v13637_v39, %v6007_v46 }
0x1e7e   :  { %v6058_v54 = vrot.slane %v13681_v18, 7 }
0x1e80   :  { %v6059_v62 = vsel %vm1293_vm4, %v6058_v54, %v13684_v43 }
0x1e81   :  { %6060 = vrot.lane.b32.xlu1 %v6059_v62, %s11972_s9 }
0x1e86   :  { %v6009_v45 = vpop.permute.xlu0 %6008 }
0x1e87   :  { %v13693_v20 = vmul.f32 %v13642_v34, %v6009_v45 }
0x1e8a   :  { %v6013_v63 = vpop.permute.xlu0 %6012 }
0x1e8b   :  { %v6011_v59 = vpop.permute.xlu1 %6010  ;;  %v13702_v42 = vmul.f32 %v13646_v33, %v6013_v63 }
0x1e8c   :  { %v13690_v30 = vmul.f32 %v11592_v25, %v6011_v59 }
0x1e8d   :  { %14919 = vst [vmem:[#allocation11_spill] sm:$0xff] %v13702_v42 }
0x1e8e   :  { %v6134_v39 = vrot.slane %v13690_v30, 7 }
0x1e8f   :  { %v6015_v22 = vpop.permute.xlu1 %6014 }
0x1e90   :  { %v13696_v57 = vmul.f32 %v11594_v8, %v6015_v22  ;;  %v6135_v40 = vsel %vm1293_vm4, %v6134_v39, %v13693_v20 }
0x1e91   :  { %6136 = vrot.lane.b32.xlu0 %v6135_v40, %s11972_s9 }
0x1e92   :  { %v6210_v24 = vrot.slane %v13696_v57, 7 }
0x1e94   :  { %v6211_v34 = vsel %vm1293_vm4, %v6210_v24, %v13702_v42 }
0x1e95   :  { %6212 = vrot.lane.b32.xlu1 %v6211_v34, %s11972_s9 }
0x1ef3   :  { %v6061_v5 = vpop.permute.xlu1 %6060 }
0x1ef4   :  { %10501 = vmatmul.mubr.msk.f32.vlgmr.msra.gmra.mrb[48].mxu0 %vm1843_vm11, %v6061_v5 }
0x1ef5   :  { %10958 = vmatpush3.bf16.msra.mxu0 %v13546_v61  ;;  %10522 = vmatprep.mubr.msk.f32.mxu0 %vm11968_vm1, %v14911_v4 }
0x1ef6   :  { %10959 = vmatprep.subr.bf16.mxu0 %v14912_v10 }
0x1ef9   :  { %10961 = vmatpush3.bf16.msra.mxu0 %v13563_v47 }
0x1efa   :  { %10968 = vmatprep.subr.bf16.mxu0 %v14912_v10 }
0x1f03   :  { %v6137_v33 = vpop.permute.xlu0 %6136 }
0x1f04   :  { %10512 = vmatmul.mubr.msk.f32.vlgmr.msra.gmra.mrb[44].mxu1 %vm1843_vm11, %v6137_v33 }
0x1f05   :  { %10964 = vmatpush3.bf16.msra.mxu1 %v13522_v1  ;;  %10533 = vmatprep.mubr.msk.f32.mxu1 %vm11968_vm1, %v14911_v4 }
0x1f06   :  { %10965 = vmatprep.subr.bf16.mxu1 %v14912_v10 }
0x1f07   :  { %v6213_v25 = vpop.permute.xlu1 %6212 }
0x1f08   :  { %10523 = vmatmul.mubr.msk.f32.vlgmr.msra.gmra.mrb[50].mxu0 %vm1843_vm11, %v6213_v25 }
0x1f09   :  { %10967 = vmatpush3.bf16.msra.mxu1 %v13532_v53  ;;  %10970 = vmatpush3.bf16.msra.mxu0 %v13568_v23 }
0x1f0a   :  { %10971 = vmatprep.subr.bf16.mxu0 %v14912_v10  ;;  %10974 = vmatprep.subr.bf16.mxu1 %v14912_v10 }
0x1f0b   :  { %10544 = vmatprep.mubr.msk.f32.mxu0 %vm11968_vm1, %v14911_v4 }
0x1f0d   :  { %10973 = vmatpush3.bf16.msra.mxu0 %v13579_v36 }
0x1f0e   :  { %10980 = vmatprep.subr.bf16.mxu0 %v14912_v10 }
0x1fc7   :  { %v6130_v19 = vpop.f32.mrb[48].mxu0 }
0x1fc8   :  { %v6289_v32 = vrot.slane %v6130_v19, 7  ;;  %v6299_v8 = vadd.f32 %v6130_v19, %v13606_v37  ;;  %v10502_v55 = vpop.f32.mrb[49].mxu0 }
0x1fca   :  { %v6298_v9 = vadd.f32 %v6289_v32, %v13604_v12  ;;  %11607 = vtanh.f32 %v6299_v8  ;;  %v9663_v3 = vmul.f32 -1.442695, %v6299_v8 }
0x1fcc   :  { %11609 = vtanh.f32 %v6298_v9  ;;  %v9662_v48 = vmul.f32 -1.442695, %v6298_v9 }
0x1fd4   :  { %v11608_v7 = vpop.eup %11607 }
0x1fd5   :  { %6378 = vrot.lane.b32.xlu1 %v11608_v7, %s11971_s25 }
0x1fd6   :  { %v11610_v49 = vpop.eup %11609 }
0x1fd7   :  { %v6206_v58 = vpop.f32.mrb[44].mxu1  ;;  %6376 = vrot.lane.b32.xlu0 %v11610_v49, %s11971_s25 }
0x1fd8   :  { %v6290_v52 = vrot.slane %v6206_v58, 7  ;;  %v6301_v27 = vadd.f32 %v6206_v58, %v13622_v35  ;;  %v10513_v17 = vpop.f32.mrb[45].mxu1 }
0x1fda   :  { %v6300_v15 = vadd.f32 %v6290_v52, %v13616_v29  ;;  %11611 = vtanh.f32 %v6301_v27  ;;  %v9665_v46 = vmul.f32 -1.442695, %v6301_v27 }
0x1fdb   :  { %v6282_v11 = vpop.f32.mrb[50].mxu0 }
0x1fdc   :  { %v6291_v28 = vrot.slane %v6282_v11, 7  ;;  %v6303_v16 = vadd.f32 %v6282_v11, %v13627_v14  ;;  %v10524_v31 = vpop.f32.mrb[51].mxu0  ;;  %11613 = vtanh.f32 %v6300_v15  ;;  %v9664_v45 = vmul.f32 -1.442695, %v6300_v15 }
0x1fde   :  { %v6302_v0 = vadd.f32 %v6291_v28, %v13618_v21  ;;  %11615 = vtanh.f32 %v6303_v16  ;;  %v9667_v39 = vmul.f32 -1.442695, %v6303_v16 }
0x1fe0   :  { %11617 = vtanh.f32 %v6302_v0  ;;  %v9666_v63 = vmul.f32 -1.442695, %v6302_v0 }
0x1fe1   :  { %11619 = vpow2.f32 %v9663_v3  ;;  %v6352_v3 = vrot.slane %v13653_v44, 7 }
0x1fe2   :  { %11621 = vpow2.f32 %v9662_v48 }
0x1fe3   :  { %11623 = vpow2.f32 %v9665_v46 }
0x1fe4   :  { %v11612_v6 = vpop.eup %11611 }
0x1fe5   :  { %6382 = vrot.lane.b32.xlu1 %v11612_v6, %s11971_s25 }
0x1fe6   :  { %v11614_v38 = vpop.eup %11613 }
0x1fe7   :  { %6380 = vrot.lane.b32.xlu0 %v11614_v38, %s11971_s25 }
0x1fe8   :  { %v11616_v26 = vpop.eup %11615 }
0x1fe9   :  { %6386 = vrot.lane.b32.xlu1 %v11616_v26, %s11971_s25  ;;  %v6353_v26 = vrot.slane %v13657_v51, 7 }
0x1fea   :  { %v11618_v56 = vpop.eup %11617 }
0x1feb   :  { %6384 = vrot.lane.b32.xlu0 %v11618_v56, %s11971_s25  ;;  %v11620_v13 = vpop.eup %11619 }
0x1fec   :  { %v11622_v54 = vpop.eup %11621  ;;  %v6323_v62 = vadd.f32 1.0, %v11620_v13 }
0x1fed   :  { %v6322_v59 = vadd.f32 1.0, %v11622_v54  ;;  %v11624_v22 = vpop.eup %11623 }
0x1fee   :  { %11625 = vrcp.f32 %v6323_v62  ;;  %v6325_v33 = vadd.f32 1.0, %v11624_v22 }
0x1fef   :  { %11627 = vpow2.f32 %v9664_v45 }
0x1ff0   :  { %11629 = vrcp.f32 %v6322_v59  ;;  %v6355_v59 = vrot.slane %v13669_v50, 7  ;;  %v6356_v50 = vrot.slane %v13667_v41, 7 }
0x1ff1   :  { %11631 = vpow2.f32 %v9667_v39  ;;  %v6354_v39 = vrot.slane %v13661_v60, 7 }
0x1ff2   :  { %11633 = vpow2.f32 %v9666_v63 }
0x1ff3   :  { %11635 = vrcp.f32 %v6325_v33 }
0x1ff8   :  { %v13741_v40 = vpop.eup %11625 }
0x1ff9   :  { %v11628_v5 = vpop.eup %11627  ;;  %v6365_v56 = vmul.f32 %v13741_v40, %v6353_v26 }
0x1ffa   :  { %v13744_v25 = vpop.eup %11629  ;;  %v6324_v55 = vadd.f32 1.0, %v11628_v5 }
0x1ffb   :  { %v11632_v32 = vpop.eup %11631  ;;  %v6364_v46 = vmul.f32 %v13744_v25, %v6352_v3 }
0x1ffc   :  { %v11634_v9 = vpop.eup %11633  ;;  %v6327_v7 = vadd.f32 1.0, %v11632_v32  ;;  %11637 = vrcp.f32 %v6324_v55 }
0x1ffd   :  { %v6326_v49 = vadd.f32 1.0, %v11634_v9  ;;  %v13749_v58 = vpop.eup %11635 }
0x1ffe   :  { %11639 = vrcp.f32 %v6327_v7  ;;  %v6367_v51 = vmul.f32 %v13749_v58, %v6355_v59 }
0x1fff   :  { %11641 = vrcp.f32 %v6326_v49 }
0x2006   :  { %v13752_v17 = vpop.eup %11637 }
0x2008   :  { %v13756_v28 = vpop.eup %11639 }
0x2009   :  { %v11642_v0 = vpop.eup %11641 }
0x2047   :  { %v6379_v24 = vpop.permute.xlu1 %6378 }
0x2048   :  { %v6395_v34 = vmul.f32 %v13741_v40, %v6379_v24  ;;  %v6357_v24 = vrot.slane %v13673_v2, 7 }
0x2049   :  { %v6377_v19 = vpop.permute.xlu0 %6376 }
0x204a   :  { %6408 = vrot.lane.b32.xlu1 %v6395_v34, %s11972_s9  ;;  %v6394_v8 = vmul.f32 %v13744_v25, %v6377_v19  ;;  %v6366_v34 = vmul.f32 %v13752_v17, %v6354_v39  ;;  %v6369_v19 = vmul.f32 %v13756_v28, %v6357_v24 }
0x204c   :  { %6406 = vrot.lane.b32.xlu0 %v6394_v8, %s11972_s9  ;;  %v6368_v8 = vmul.f32 %v11642_v0, %v6356_v50 }
0x2057   :  { %v6383_v52 = vpop.permute.xlu1 %6382 }
0x2058   :  { %v6397_v27 = vmul.f32 %v13749_v58, %v6383_v52 }
0x2059   :  { %v6381_v15 = vpop.permute.xlu0 %6380 }
0x205a   :  { %6412 = vrot.lane.b32.xlu1 %v6397_v27, %s11972_s9  ;;  %v6396_v11 = vmul.f32 %v13752_v17, %v6381_v15 }
0x205b   :  { %v6387_v16 = vpop.permute.xlu1 %6386 }
0x205c   :  { %v6399_v31 = vmul.f32 %v13756_v28, %v6387_v16  ;;  %6410 = vrot.lane.b32.xlu0 %v6396_v11, %s11972_s9 }
0x205d   :  { %v6385_v6 = vpop.permute.xlu0 %6384 }
0x205e   :  { %v6398_v38 = vmul.f32 %v11642_v0, %v6385_v6  ;;  %6416 = vrot.lane.b32.xlu1 %v6399_v31, %s11972_s9 }
0x2060   :  { %6414 = vrot.lane.b32.xlu0 %v6398_v38, %s11972_s9 }
0x20bc   :  { %v6409_v48 = vpop.permute.xlu1 %6408 }
0x20bd   :  { %v13765_v13 = vadd.f32 %v6409_v48, %v6365_v56 }
0x20be   :  { %v6407_v54 = vpop.permute.xlu0 %6406 }
0x20bf   :  { %11643 = vtanh.f32 %v13765_v13  ;;  %v13769_v62 = vadd.f32 %v6407_v54, %v6364_v46 }
0x20c1   :  { %11645 = vtanh.f32 %v13769_v62 }
0x20c9   :  { %v11644_v45 = vpop.eup %11643 }
0x20ca   :  { %6444 = vrot.lane.b32.xlu1 %v11644_v45, %s11971_s25 }
0x20cb   :  { %v11646_v44 = vpop.eup %11645 }
0x20cc   :  { %v6413_v63 = vpop.permute.xlu1 %6412  ;;  %6442 = vrot.lane.b32.xlu0 %v11646_v44, %s11971_s25 }
0x20cd   :  { %v13776_v22 = vadd.f32 %v6413_v63, %v6367_v51 }
0x20ce   :  { %v6411_v5 = vpop.permute.xlu0 %6410 }
0x20cf   :  { %11647 = vtanh.f32 %v13776_v22  ;;  %v13783_v33 = vadd.f32 %v6411_v5, %v6366_v34 }
0x20d0   :  { %v6417_v32 = vpop.permute.xlu1 %6416 }
0x20d1   :  { %11649 = vtanh.f32 %v13783_v33  ;;  %v13787_v60 = vadd.f32 %v6417_v32, %v6369_v19 }
0x20d2   :  { %v6415_v55 = vpop.permute.xlu0 %6414 }
0x20d3   :  { %11651 = vtanh.f32 %v13787_v60  ;;  %v13790_v2 = vadd.f32 %v6415_v55, %v6368_v8 }
0x20d5   :  { %11653 = vtanh.f32 %v13790_v2 }
0x20d9   :  { %v11648_v9 = vpop.eup %11647 }
0x20da   :  { %6448 = vrot.lane.b32.xlu1 %v11648_v9, %s11971_s25 }
0x20db   :  { %v11650_v41 = vpop.eup %11649 }
0x20dc   :  { %6446 = vrot.lane.b32.xlu0 %v11650_v41, %s11971_s25 }
0x20dd   :  { %v11652_v7 = vpop.eup %11651 }
0x20de   :  { %6452 = vrot.lane.b32.xlu1 %v11652_v7, %s11971_s25 }
0x20df   :  { %v11654_v49 = vpop.eup %11653 }
0x20e0   :  { %6450 = vrot.lane.b32.xlu0 %v11654_v49, %s11971_s25 }
0x213c   :  { %v6445_v52 = vpop.permute.xlu1 %6444 }
0x213d   :  { %v13801_v11 = vmul.f32 %v13741_v40, %v6445_v52 }
0x213e   :  { %v6443_v27 = vpop.permute.xlu0 %6442 }
0x213f   :  { %v13798_v15 = vmul.f32 %v13744_v25, %v6443_v27 }
0x2141   :  { %v6496_v16 = vrot.slane %v13798_v15, 1 }
0x2143   :  { %v6497_v31 = vsel %vm1293_vm4, %v13801_v11, %v6496_v16 }
0x2144   :  { %6498 = vrot.lane.b32.xlu0 %v6497_v31, %s11972_s9 }
0x214c   :  { %v6449_v6 = vpop.permute.xlu1 %6448 }
0x214d   :  { %v13811_v56 = vmul.f32 %v13749_v58, %v6449_v6 }
0x214e   :  { %v6447_v38 = vpop.permute.xlu0 %6446 }
0x214f   :  { %v13808_v26 = vmul.f32 %v13752_v17, %v6447_v38 }
0x2150   :  { %v6453_v3 = vpop.permute.xlu1 %6452 }
0x2151   :  { %v6572_v25 = vrot.slane %v13808_v26, 1  ;;  %v13820_v54 = vmul.f32 %v13756_v28, %v6453_v3 }
0x2152   :  { %v6451_v40 = vpop.permute.xlu0 %6450 }
0x2153   :  { %v13814_v48 = vmul.f32 %v11642_v0, %v6451_v40  ;;  %v6573_v46 = vsel %vm1293_vm4, %v13811_v56, %v6572_v25 }
0x2154   :  { %6574 = vrot.lane.b32.xlu1 %v6573_v46, %s11972_s9 }
0x2155   :  { %14920 = vst [vmem:[#allocation12_spill] sm:$0xff] %v13814_v48  ;;  %v6648_v17 = vrot.slane %v13814_v48, 1 }
0x2157   :  { %v6649_v58 = vsel %vm1293_vm4, %v13820_v54, %v6648_v17 }
0x2158   :  { %6650 = vrot.lane.b32.xlu0 %v6649_v58, %s11972_s9 }
0x21b6   :  { %v6499_v45 = vpop.permute.xlu0 %6498 }
0x21b7   :  { %10534 = vmatmul.mubr.msk.f32.vlgmr.msra.gmra.mrb[46].mxu1 %vm1843_vm11, %v6499_v45 }
0x21b8   :  { %10976 = vmatpush3.bf16.msra.mxu1 %v13546_v61  ;;  %10555 = vmatprep.mubr.msk.f32.mxu1 %vm11968_vm1, %v14911_v4 }
0x21b9   :  { %10977 = vmatprep.subr.bf16.mxu1 %v14912_v10 }
0x21bc   :  { %10979 = vmatpush3.bf16.msra.mxu1 %v13563_v47 }
0x21bd   :  { %10986 = vmatprep.subr.bf16.mxu1 %v14912_v10 }
0x21c6   :  { %v6575_v28 = vpop.permute.xlu1 %6574 }
0x21c7   :  { %10545 = vmatmul.mubr.msk.f32.vlgmr.msra.gmra.mrb[52].mxu0 %vm1843_vm11, %v6575_v28 }
0x21c8   :  { %10982 = vmatpush3.bf16.msra.mxu0 %v13522_v1  ;;  %10566 = vmatprep.mubr.msk.f32.mxu0 %vm11968_vm1, %v14911_v4 }
0x21c9   :  { %10983 = vmatprep.subr.bf16.mxu0 %v14912_v10 }
0x21ca   :  { %v6651_v0 = vpop.permute.xlu0 %6650 }
0x21cb   :  { %10556 = vmatmul.mubr.msk.f32.vlgmr.msra.gmra.mrb[48].mxu1 %vm1843_vm11, %v6651_v0 }
0x21cc   :  { %10985 = vmatpush3.bf16.msra.mxu0 %v13532_v53  ;;  %10988 = vmatpush3.bf16.msra.mxu1 %v13568_v23 }
0x21cd   :  { %10989 = vmatprep.subr.bf16.mxu1 %v14912_v10  ;;  %10992 = vmatprep.subr.bf16.mxu0 %v14912_v10 }
0x21ce   :  { %10577 = vmatprep.mubr.msk.f32.mxu1 %vm11968_vm1, %v14911_v4 }
0x21d0   :  { %10991 = vmatpush3.bf16.msra.mxu1 %v13579_v36 }
0x21d1   :  { %10998 = vmatprep.subr.bf16.mxu1 %v14912_v10 }
0x228a   :  { %v6568_v59 = vpop.f32.mrb[46].mxu1 }
0x228b   :  { %v6727_v51 = vrot.slane %v6568_v59, 6  ;;  %v6728_v44 = vrot.slane %v6568_v59, 7  ;;  %v10535_v39 = vpop.f32.mrb[47].mxu1 }
0x228d   :  { %v6739_v63 = vadd.f32 %v6727_v51, %v13604_v12  ;;  %v6740_v24 = vadd.f32 %v6728_v44, %v13606_v37 }
0x228f   :  { %11655 = vtanh.f32 %v6739_v63  ;;  %v9671_v3 = vmul.f32 -1.442695, %v6739_v63  ;;  %v9672_v40 = vmul.f32 -1.442695, %v6740_v24 }
0x2290   :  { %11657 = vtanh.f32 %v6740_v24 }
0x2299   :  { %v11656_v34 = vpop.eup %11655 }
0x229a   :  { %v11658_v5 = vpop.eup %11657  ;;  %v6644_v50 = vpop.f32.mrb[52].mxu0  ;;  %6817 = vrot.lane.b32.xlu1 %v11656_v34, %s11971_s25 }
0x229b   :  { %v6729_v19 = vrot.slane %v6644_v50, 6  ;;  %v6730_v32 = vrot.slane %v6644_v50, 7  ;;  %v10546_v8 = vpop.f32.mrb[53].mxu0  ;;  %6819 = vrot.lane.b32.xlu0 %v11658_v5, %s11971_s25 }
0x229d   :  { %v6741_v55 = vadd.f32 %v6729_v19, %v13616_v29  ;;  %v6742_v41 = vadd.f32 %v6730_v32, %v13622_v35 }
0x229e   :  { %v6720_v9 = vpop.f32.mrb[48].mxu1 }
0x229f   :  { %v6731_v7 = vrot.slane %v6720_v9, 6  ;;  %v10557_v49 = vpop.f32.mrb[49].mxu1  ;;  %11659 = vtanh.f32 %v6741_v55  ;;  %v6732_v52 = vrot.slane %v6720_v9, 7  ;;  %v9673_v45 = vmul.f32 -1.442695, %v6741_v55 }
0x22a0   :  { %11661 = vtanh.f32 %v6742_v41  ;;  %v9674_v0 = vmul.f32 -1.442695, %v6742_v41 }
0x22a1   :  { %v6743_v27 = vadd.f32 %v6731_v7, %v13618_v21  ;;  %v6744_v16 = vadd.f32 %v6732_v52, %v13627_v14 }
0x22a3   :  { %11663 = vtanh.f32 %v6743_v27  ;;  %v9675_v59 = vmul.f32 -1.442695, %v6743_v27  ;;  %v9676_v51 = vmul.f32 -1.442695, %v6744_v16 }
0x22a4   :  { %11665 = vtanh.f32 %v6744_v16 }
0x22a5   :  { %11667 = vpow2.f32 %v9671_v3 }
0x22a6   :  { %11669 = vpow2.f32 %v9672_v40 }
0x22a9   :  { %v11660_v31 = vpop.eup %11659 }
0x22aa   :  { %6821 = vrot.lane.b32.xlu1 %v11660_v31, %s11971_s25  ;;  %v11662_v6 = vpop.eup %11661 }
0x22ab   :  { %6823 = vrot.lane.b32.xlu0 %v11662_v6, %s11971_s25 }
0x22ad   :  { %v11664_v38 = vpop.eup %11663 }
0x22ae   :  { %6825 = vrot.lane.b32.xlu1 %v11664_v38, %s11971_s25  ;;  %v11666_v25 = vpop.eup %11665 }
0x22af   :  { %6827 = vrot.lane.b32.xlu0 %v11666_v25, %s11971_s25  ;;  %v11668_v46 = vpop.eup %11667 }
0x22b0   :  { %v11670_v17 = vpop.eup %11669  ;;  %v6763_v58 = vadd.f32 1.0, %v11668_v46 }
0x22b1   :  { %v6764_v28 = vadd.f32 1.0, %v11670_v17 }
0x22b2   :  { %11671 = vrcp.f32 %v6763_v58  ;;  %v6793_v58 = vrot.slane %v13769_v62, 7  ;;  %v6795_v62 = vrot.slane %v13783_v33, 7 }
0x22b3   :  { %11673 = vpow2.f32 %v9673_v45  ;;  %v6794_v45 = vrot.slane %v13765_v13, 7 }
0x22b4   :  { %11675 = vrcp.f32 %v6764_v28 }
0x22b5   :  { %11677 = vpow2.f32 %v9674_v0 }
0x22b6   :  { %11679 = vpow2.f32 %v9675_v59 }
0x22b7   :  { %11681 = vpow2.f32 %v9676_v51 }
0x22bc   :  { %v13859_v44 = vpop.eup %11671 }
0x22bd   :  { %v11674_v39 = vpop.eup %11673  ;;  %v6805_v28 = vmul.f32 %v13859_v44, %v6793_v58 }
0x22be   :  { %v13861_v24 = vpop.eup %11675  ;;  %v6765_v32 = vadd.f32 1.0, %v11674_v39 }
0x22bf   :  { %v11678_v19 = vpop.eup %11677  ;;  %v6806_v0 = vmul.f32 %v13861_v24, %v6794_v45 }
0x22c0   :  { %v11680_v8 = vpop.eup %11679  ;;  %v6766_v55 = vadd.f32 1.0, %v11678_v19  ;;  %11683 = vrcp.f32 %v6765_v32  ;;  %v6797_v32 = vrot.slane %v13790_v2, 7 }
0x22c1   :  { %v11682_v9 = vpop.eup %11681  ;;  %v6767_v41 = vadd.f32 1.0, %v11680_v8 }
0x22c2   :  { %11685 = vrcp.f32 %v6766_v55  ;;  %v6768_v7 = vadd.f32 1.0, %v11682_v9 }
0x22c3   :  { %11687 = vrcp.f32 %v6767_v41  ;;  %v6798_v41 = vrot.slane %v13787_v60, 7 }
0x22c4   :  { %11689 = vrcp.f32 %v6768_v7 }
0x22ca   :  { %v13867_v49 = vpop.eup %11683 }
0x22cb   :  { %v6807_v13 = vmul.f32 %v13867_v49, %v6795_v62 }
0x22cc   :  { %v13870_v16 = vpop.eup %11685 }
0x22cd   :  { %v13873_v6 = vpop.eup %11687 }
0x22ce   :  { %v13878_v40 = vpop.eup %11689  ;;  %v6809_v33 = vmul.f32 %v13873_v6, %v6797_v32 }
0x230c   :  { %v6818_v63 = vpop.permute.xlu1 %6817 }
0x230d   :  { %v6820_v34 = vpop.permute.xlu0 %6819  ;;  %v6835_v5 = vmul.f32 %v13859_v44, %v6818_v63 }
0x230e   :  { %v6836_v50 = vmul.f32 %v13861_v24, %v6820_v34 }
0x230f   :  { %6847 = vrot.lane.b32.xlu1 %v6835_v5, %s11972_s9 }
0x2310   :  { %6849 = vrot.lane.b32.xlu0 %v6836_v50, %s11972_s9  ;;  %v6796_v50 = vrot.slane %v13776_v22, 7  ;;  %v6810_v22 = vmul.f32 %v13878_v40, %v6798_v41 }
0x2312   :  { %v6808_v55 = vmul.f32 %v13870_v16, %v6796_v50 }
0x231c   :  { %v6822_v52 = vpop.permute.xlu1 %6821 }
0x231d   :  { %v6837_v27 = vmul.f32 %v13867_v49, %v6822_v52  ;;  %v6824_v31 = vpop.permute.xlu0 %6823 }
0x231e   :  { %v6838_v38 = vmul.f32 %v13870_v16, %v6824_v31 }
0x231f   :  { %6851 = vrot.lane.b32.xlu1 %v6837_v27, %s11972_s9 }
0x2320   :  { %v6826_v25 = vpop.permute.xlu1 %6825  ;;  %6853 = vrot.lane.b32.xlu0 %v6838_v38, %s11972_s9 }
0x2321   :  { %v6839_v3 = vmul.f32 %v13873_v6, %v6826_v25  ;;  %v6828_v46 = vpop.permute.xlu0 %6827 }
0x2322   :  { %v6840_v17 = vmul.f32 %v13878_v40, %v6828_v46 }
0x2323   :  { %6855 = vrot.lane.b32.xlu1 %v6839_v3, %s11972_s9 }
0x2324   :  { %6857 = vrot.lane.b32.xlu0 %v6840_v17, %s11972_s9 }
0x2381   :  { %v6848_v59 = vpop.permute.xlu1 %6847 }
0x2382   :  { %v6850_v51 = vpop.permute.xlu0 %6849  ;;  %v13887_v39 = vadd.f32 %v6848_v59, %v6805_v28 }
0x2383   :  { %v13889_v63 = vadd.f32 %v6850_v51, %v6806_v0 }
0x2384   :  { %11691 = vtanh.f32 %v13887_v39 }
0x2385   :  { %11693 = vtanh.f32 %v13889_v63 }
0x238e   :  { %v11692_v34 = vpop.eup %11691 }
0x238f   :  { %v11694_v5 = vpop.eup %11693  ;;  %6883 = vrot.lane.b32.xlu1 %v11692_v34, %s11971_s25 }
0x2390   :  { %6885 = vrot.lane.b32.xlu0 %v11694_v5, %s11971_s25 }
0x2391   :  { %v6852_v19 = vpop.permute.xlu1 %6851 }
0x2392   :  { %v13899_v8 = vadd.f32 %v6852_v19, %v6807_v13  ;;  %v6854_v9 = vpop.permute.xlu0 %6853 }
0x2393   :  { %v13905_v7 = vadd.f32 %v6854_v9, %v6808_v55 }
0x2394   :  { %11695 = vtanh.f32 %v13899_v8 }
0x2395   :  { %v6856_v52 = vpop.permute.xlu1 %6855  ;;  %11697 = vtanh.f32 %v13905_v7 }
0x2396   :  { %v13907_v27 = vadd.f32 %v6856_v52, %v6809_v33  ;;  %v6858_v2 = vpop.permute.xlu0 %6857 }
0x2397   :  { %v13912_v31 = vadd.f32 %v6858_v2, %v6810_v22 }
0x2398   :  { %11699 = vtanh.f32 %v13907_v27 }
0x2399   :  { %11701 = vtanh.f32 %v13912_v31 }
0x239e   :  { %v11696_v38 = vpop.eup %11695 }
0x239f   :  { %6887 = vrot.lane.b32.xlu1 %v11696_v38, %s11971_s25  ;;  %v11698_v60 = vpop.eup %11697 }
0x23a0   :  { %6889 = vrot.lane.b32.xlu0 %v11698_v60, %s11971_s25 }
0x23a2   :  { %v11700_v25 = vpop.eup %11699 }
0x23a3   :  { %6891 = vrot.lane.b32.xlu1 %v11700_v25, %s11971_s25  ;;  %v11702_v3 = vpop.eup %11701 }
0x23a4   :  { %6893 = vrot.lane.b32.xlu0 %v11702_v3, %s11971_s25 }
0x2401   :  { %v6884_v46 = vpop.permute.xlu1 %6883 }
0x2402   :  { %v6886_v17 = vpop.permute.xlu0 %6885  ;;  %v13920_v58 = vmul.f32 %v13859_v44, %v6884_v46 }
0x2403   :  { %v13923_v45 = vmul.f32 %v13861_v24, %v6886_v17 }
0x2404   :  { %v6937_v28 = vrot.slane %v13920_v58, 2 }
0x2405   :  { %v6938_v0 = vrot.slane %v13923_v45, 1 }
0x2407   :  { %v6939_v59 = vsel %vm1293_vm4, %v6938_v0, %v6937_v28 }
0x2408   :  { %6940 = vrot.lane.b32.xlu1 %v6939_v59, %s11972_s9 }
0x2411   :  { %v6888_v51 = vpop.permute.xlu1 %6887 }
0x2412   :  { %v13930_v34 = vmul.f32 %v13867_v49, %v6888_v51  ;;  %v6890_v5 = vpop.permute.xlu0 %6889 }
0x2413   :  { %v13933_v62 = vmul.f32 %v13870_v16, %v6890_v5 }
0x2414   :  { %v7014_v44 = vrot.slane %v13930_v34, 2 }
0x2415   :  { %v6892_v24 = vpop.permute.xlu1 %6891  ;;  %v7015_v50 = vrot.slane %v13933_v62, 1 }
0x2416   :  { %v13937_v13 = vmul.f32 %v13873_v6, %v6892_v24  ;;  %v6894_v19 = vpop.permute.xlu0 %6893 }
0x2417   :  { %v13941_v32 = vmul.f32 %v13878_v40, %v6894_v19  ;;  %v7016_v49 = vsel %vm1293_vm4, %v7015_v50, %v7014_v44 }
0x2418   :  { %14921 = vst [vmem:[#allocation14_spill] sm:$0xff] %v13937_v13  ;;  %v7091_v55 = vrot.slane %v13937_v13, 2  ;;  %7017 = vrot.lane.b32.xlu0 %v7016_v49, %s11972_s9 }
0x2419   :  { %v7092_v16 = vrot.slane %v13941_v32, 1 }
0x241b   :  { %v7093_v9 = vsel %vm1293_vm4, %v7092_v16, %v7091_v55 }
0x241c   :  { %7094 = vrot.lane.b32.xlu1 %v7093_v9, %s11972_s9 }
0x247a   :  { %v6941_v6 = vpop.permute.xlu1 %6940 }
0x247b   :  { %10567 = vmatmul.mubr.msk.f32.vlgmr.msra.gmra.mrb[54].mxu0 %vm1843_vm11, %v6941_v6 }
0x247c   :  { %10994 = vmatpush3.bf16.msra.mxu0 %v13546_v61  ;;  %10588 = vmatprep.mubr.msk.f32.mxu0 %vm11968_vm1, %v14911_v4 }
0x247d   :  { %10995 = vmatprep.subr.bf16.mxu0 %v14912_v10 }
0x2480   :  { %10997 = vmatpush3.bf16.msra.mxu0 %v13563_v47 }
0x2481   :  { %11004 = vmatprep.subr.bf16.mxu0 %v14912_v10 }
0x248a   :  { %v7018_v40 = vpop.permute.xlu0 %7017 }
0x248b   :  { %10578 = vmatmul.mubr.msk.f32.vlgmr.msra.gmra.mrb[50].mxu1 %vm1843_vm11, %v7018_v40 }
0x248c   :  { %11000 = vmatpush3.bf16.msra.mxu1 %v13522_v1  ;;  %10599 = vmatprep.mubr.msk.f32.mxu1 %vm11968_vm1, %v14911_v4 }
0x248d   :  { %11001 = vmatprep.subr.bf16.mxu1 %v14912_v10 }
0x248e   :  { %v7095_v33 = vpop.permute.xlu1 %7094 }
0x248f   :  { %10589 = vmatmul.mubr.msk.f32.vlgmr.msra.gmra.mrb[56].mxu0 %vm1843_vm11, %v7095_v33 }
0x2490   :  { %11003 = vmatpush3.bf16.msra.mxu1 %v13532_v53  ;;  %11006 = vmatpush3.bf16.msra.mxu0 %v13568_v23 }
0x2491   :  { %11007 = vmatprep.subr.bf16.mxu0 %v14912_v10  ;;  %11010 = vmatprep.subr.bf16.mxu1 %v14912_v10 }
0x2492   :  { %10610 = vmatprep.mubr.msk.f32.mxu0 %vm11968_vm1, %v14911_v4 }
0x2494   :  { %11009 = vmatpush3.bf16.msra.mxu0 %v13579_v36 }
0x2495   :  { %11016 = vmatprep.subr.bf16.mxu0 %v14912_v10 }
0x254e   :  { %v7010_v41 = vpop.f32.mrb[54].mxu0 }
0x254f   :  { %v7171_v52 = vrot.slane %v7010_v41, 5  ;;  %v7172_v22 = vrot.slane %v7010_v41, 6  ;;  %v10568_v2 = vpop.f32.mrb[55].mxu0 }
0x2551   :  { %v7183_v38 = vadd.f32 %v7171_v52, %v13604_v12  ;;  %v7184_v60 = vadd.f32 %v7172_v22, %v13606_v37 }
0x2553   :  { %11703 = vtanh.f32 %v7183_v38  ;;  %v9680_v40 = vmul.f32 -1.442695, %v7183_v38  ;;  %v9681_v33 = vmul.f32 -1.442695, %v7184_v60 }
0x2554   :  { %11705 = vtanh.f32 %v7184_v60 }
0x255d   :  { %v11704_v25 = vpop.eup %11703 }
0x255e   :  { %v11706_v3 = vpop.eup %11705  ;;  %7261 = vrot.lane.b32.xlu0 %v11704_v25, %s11971_s25  ;;  %v7087_v46 = vpop.f32.mrb[50].mxu1 }
0x255f   :  { %7263 = vrot.lane.b32.xlu1 %v11706_v3, %s11971_s25  ;;  %v7173_v17 = vrot.slane %v7087_v46, 5  ;;  %v7174_v28 = vrot.slane %v7087_v46, 6  ;;  %v10579_v0 = vpop.f32.mrb[51].mxu1 }
0x2561   :  { %v7185_v59 = vadd.f32 %v7173_v17, %v13616_v29  ;;  %v7186_v51 = vadd.f32 %v7174_v28, %v13622_v35 }
0x2562   :  { %v7164_v5 = vpop.f32.mrb[56].mxu0 }
0x2563   :  { %11707 = vtanh.f32 %v7185_v59  ;;  %v7175_v44 = vrot.slane %v7164_v5, 5  ;;  %v10590_v24 = vpop.f32.mrb[57].mxu0  ;;  %v7176_v50 = vrot.slane %v7164_v5, 6  ;;  %v9682_v25 = vmul.f32 -1.442695, %v7185_v59 }
0x2564   :  { %11709 = vtanh.f32 %v7186_v51  ;;  %v9683_v3 = vmul.f32 -1.442695, %v7186_v51 }
0x2565   :  { %v7187_v19 = vadd.f32 %v7175_v44, %v13618_v21  ;;  %v7188_v55 = vadd.f32 %v7176_v50, %v13627_v14 }
0x2567   :  { %11711 = vtanh.f32 %v7187_v19  ;;  %v9684_v46 = vmul.f32 -1.442695, %v7187_v19  ;;  %v9685_v17 = vmul.f32 -1.442695, %v7188_v55 }
0x2568   :  { %11713 = vtanh.f32 %v7188_v55 }
0x2569   :  { %11715 = vpow2.f32 %v9680_v40 }
0x256a   :  { %11717 = vpow2.f32 %v9681_v33 }
0x256d   :  { %v11708_v49 = vpop.eup %11707 }
0x256e   :  { %v11710_v16 = vpop.eup %11709  ;;  %7265 = vrot.lane.b32.xlu0 %v11708_v49, %s11971_s25 }
0x256f   :  { %7267 = vrot.lane.b32.xlu1 %v11710_v16, %s11971_s25 }
0x2571   :  { %v11712_v9 = vpop.eup %11711 }
0x2572   :  { %v11714_v6 = vpop.eup %11713  ;;  %7269 = vrot.lane.b32.xlu0 %v11712_v9, %s11971_s25 }
0x2573   :  { %7271 = vrot.lane.b32.xlu1 %v11714_v6, %s11971_s25  ;;  %v11716_v41 = vpop.eup %11715 }
0x2574   :  { %v11718_v52 = vpop.eup %11717  ;;  %v7207_v22 = vadd.f32 1.0, %v11716_v41 }
0x2575   :  { %v7208_v2 = vadd.f32 1.0, %v11718_v52 }
0x2576   :  { %11719 = vrcp.f32 %v7207_v22 }
0x2577   :  { %11721 = vrcp.f32 %v7208_v2 }
0x2578   :  { %11723 = vpow2.f32 %v9682_v25 }
0x2579   :  { %11725 = vpow2.f32 %v9683_v3 }
0x257a   :  { %11727 = vpow2.f32 %v9684_v46 }
0x257b   :  { %11729 = vpow2.f32 %v9685_v17 }
0x2580   :  { %v13982_v28 = vpop.eup %11719 }
0x2581   :  { %v13984_v60 = vpop.eup %11721 }
0x2582   :  { %v11724_v44 = vpop.eup %11723 }
0x2583   :  { %v11726_v51 = vpop.eup %11725  ;;  %v7209_v24 = vadd.f32 1.0, %v11724_v44 }
0x2584   :  { %v11728_v50 = vpop.eup %11727  ;;  %v7210_v19 = vadd.f32 1.0, %v11726_v51 }
0x2585   :  { %v11730_v55 = vpop.eup %11729  ;;  %11731 = vrcp.f32 %v7209_v24  ;;  %v7211_v49 = vadd.f32 1.0, %v11728_v50 }
0x2586   :  { %11733 = vrcp.f32 %v7210_v19  ;;  %v7212_v16 = vadd.f32 1.0, %v11730_v55 }
0x2587   :  { %11735 = vrcp.f32 %v7211_v49 }
0x2588   :  { %11737 = vrcp.f32 %v7212_v16 }
0x258f   :  { %v13990_v9 = vpop.eup %11731 }
0x2590   :  { %v13992_v40 = vpop.eup %11733 }
0x2591   :  { %v13997_v22 = vpop.eup %11735 }
0x2592   :  { %v14000_v25 = vpop.eup %11737 }
0x25d0   :  { %v7262_v38 = vpop.permute.xlu0 %7261 }
0x25d1   :  { %v7279_v0 = vmul.f32 %v13982_v28, %v7262_v38  ;;  %v7264_v5 = vpop.permute.xlu1 %7263  ;;  %v7237_v38 = vrot.slane %v13887_v39, 7  ;;  %v7239_v39 = vrot.slane %v13899_v8, 7 }
0x25d2   :  { %v7280_v59 = vmul.f32 %v13984_v60, %v7264_v5 }
0x25d3   :  { %7291 = vrot.lane.b32.xlu0 %v7279_v0, %s11972_s9  ;;  %v7238_v0 = vrot.slane %v13889_v63, 7  ;;  %v7249_v5 = vmul.f32 %v13982_v28, %v7237_v38  ;;  %v7240_v63 = vrot.slane %v13905_v7, 7  ;;  %v7251_v49 = vmul.f32 %v13990_v9, %v7239_v39 }
0x25d4   :  { %7293 = vrot.lane.b32.xlu1 %v7280_v59, %s11972_s9 }
0x25d5   :  { %v7250_v59 = vmul.f32 %v13984_v60, %v7238_v0 }
0x25e0   :  { %v7266_v6 = vpop.permute.xlu0 %7265 }
0x25e1   :  { %v7281_v33 = vmul.f32 %v13990_v9, %v7266_v6  ;;  %v7268_v41 = vpop.permute.xlu1 %7267  ;;  %v7252_v6 = vmul.f32 %v13992_v40, %v7240_v63 }
0x25e2   :  { %v7282_v52 = vmul.f32 %v13992_v40, %v7268_v41 }
0x25e3   :  { %7295 = vrot.lane.b32.xlu0 %v7281_v33, %s11972_s9  ;;  %v7241_v33 = vrot.slane %v13907_v27, 7 }
0x25e4   :  { %7297 = vrot.lane.b32.xlu1 %v7282_v52, %s11972_s9  ;;  %v7270_v2 = vpop.permute.xlu0 %7269 }
0x25e5   :  { %v7283_v3 = vmul.f32 %v13997_v22, %v7270_v2  ;;  %v7272_v46 = vpop.permute.xlu1 %7271  ;;  %v7242_v2 = vrot.slane %v13912_v31, 7  ;;  %v7253_v8 = vmul.f32 %v13997_v22, %v7241_v33 }
0x25e6   :  { %v7284_v17 = vmul.f32 %v14000_v25, %v7272_v46 }
0x25e7   :  { %7299 = vrot.lane.b32.xlu0 %v7283_v3, %s11972_s9  ;;  %v7254_v46 = vmul.f32 %v14000_v25, %v7242_v2 }
0x25e8   :  { %7301 = vrot.lane.b32.xlu1 %v7284_v17, %s11972_s9 }
0x2645   :  { %v7292_v44 = vpop.permute.xlu0 %7291 }
0x2646   :  { %v14010_v51 = vadd.f32 %v7292_v44, %v7249_v5  ;;  %v7294_v24 = vpop.permute.xlu1 %7293 }
0x2647   :  { %v14012_v50 = vadd.f32 %v7294_v24, %v7250_v59 }
0x2648   :  { %11739 = vtanh.f32 %v14010_v51 }
0x2649   :  { %11741 = vtanh.f32 %v14012_v50 }
0x2652   :  { %v11740_v19 = vpop.eup %11739 }
0x2653   :  { %v11742_v55 = vpop.eup %11741  ;;  %7327 = vrot.lane.b32.xlu0 %v11740_v19, %s11971_s25 }
0x2654   :  { %7329 = vrot.lane.b32.xlu1 %v11742_v55, %s11971_s25 }
0x2655   :  { %v7296_v16 = vpop.permute.xlu0 %7295 }
0x2656   :  { %v14023_v41 = vadd.f32 %v7296_v16, %v7251_v49  ;;  %v7298_v52 = vpop.permute.xlu1 %7297 }
0x2657   :  { %v14026_v3 = vadd.f32 %v7298_v52, %v7252_v6 }
0x2658   :  { %11743 = vtanh.f32 %v14023_v41 }
0x2659   :  { %11745 = vtanh.f32 %v14026_v3  ;;  %v7300_v7 = vpop.permute.xlu0 %7299 }
0x265a   :  { %v14032_v17 = vadd.f32 %v7300_v7, %v7253_v8  ;;  %v7302_v38 = vpop.permute.xlu1 %7301 }
0x265b   :  { %v14034_v27 = vadd.f32 %v7302_v38, %v7254_v46 }
0x265c   :  { %11747 = vtanh.f32 %v14032_v17 }
0x265d   :  { %11749 = vtanh.f32 %v14034_v27 }
0x2662   :  { %v11744_v31 = vpop.eup %11743 }
0x2663   :  { %v11746_v0 = vpop.eup %11745  ;;  %7331 = vrot.lane.b32.xlu0 %v11744_v31, %s11971_s25 }
0x2664   :  { %7333 = vrot.lane.b32.xlu1 %v11746_v0, %s11971_s25 }
0x2666   :  { %v11748_v5 = vpop.eup %11747 }
0x2667   :  { %v11750_v44 = vpop.eup %11749  ;;  %7335 = vrot.lane.b32.xlu0 %v11748_v5, %s11971_s25 }
0x2668   :  { %7337 = vrot.lane.b32.xlu1 %v11750_v44, %s11971_s25 }
0x26c5   :  { %v7328_v59 = vpop.permute.xlu0 %7327 }
0x26c6   :  { %v14043_v24 = vmul.f32 %v13982_v28, %v7328_v59  ;;  %v7330_v19 = vpop.permute.xlu1 %7329 }
0x26c7   :  { %v14046_v55 = vmul.f32 %v13984_v60, %v7330_v19 }
0x26c8   :  { %v7381_v39 = vrot.slane %v14043_v24, 3 }
0x26c9   :  { %v7382_v63 = vrot.slane %v14046_v55, 2 }
0x26cb   :  { %v7383_v49 = vsel %vm1293_vm4, %v7382_v63, %v7381_v39 }
0x26cc   :  { %7384 = vrot.lane.b32.xlu0 %v7383_v49, %s11972_s9 }
0x26d5   :  { %v7332_v16 = vpop.permute.xlu0 %7331 }
0x26d6   :  { %v14053_v6 = vmul.f32 %v13990_v9, %v7332_v16  ;;  %v7334_v33 = vpop.permute.xlu1 %7333 }
0x26d7   :  { %v14056_v28 = vmul.f32 %v13992_v40, %v7334_v33 }
0x26d8   :  { %v7458_v52 = vrot.slane %v14053_v6, 3 }
0x26d9   :  { %v7459_v60 = vrot.slane %v14056_v28, 2  ;;  %v7336_v2 = vpop.permute.xlu0 %7335 }
0x26da   :  { %v14061_v8 = vmul.f32 %v13997_v22, %v7336_v2  ;;  %v7338_v7 = vpop.permute.xlu1 %7337 }
0x26db   :  { %v14064_v46 = vmul.f32 %v14000_v25, %v7338_v7  ;;  %v7460_v38 = vsel %vm1293_vm4, %v7459_v60, %v7458_v52 }
0x26dc   :  { %14922 = vst [vmem:[#allocation9_spill] sm:$0xff] %v14061_v8  ;;  %v7535_v9 = vrot.slane %v14061_v8, 3  ;;  %7461 = vrot.lane.b32.xlu1 %v7460_v38, %s11972_s9 }
0x26dd   :  { %v7536_v40 = vrot.slane %v14064_v46, 2 }
0x26df   :  { %v7537_v31 = vsel %vm1293_vm4, %v7536_v40, %v7535_v9 }
0x26e0   :  { %7538 = vrot.lane.b32.xlu0 %v7537_v31, %s11972_s9 }
0x273e   :  { %v7385_v0 = vpop.permute.xlu0 %7384 }
0x273f   :  { %10600 = vmatmul.mubr.msk.f32.vlgmr.msra.gmra.mrb[52].mxu1 %vm1843_vm11, %v7385_v0 }
0x2740   :  { %11012 = vmatpush3.bf16.msra.mxu1 %v13546_v61  ;;  %10621 = vmatprep.mubr.msk.f32.mxu1 %vm11968_vm1, %v14911_v4 }
0x2741   :  { %11013 = vmatprep.subr.bf16.mxu1 %v14912_v10 }
0x2744   :  { %11015 = vmatpush3.bf16.msra.mxu1 %v13563_v47 }
0x2745   :  { %11022 = vmatprep.subr.bf16.mxu1 %v14912_v10 }
0x274e   :  { %v7462_v22 = vpop.permute.xlu1 %7461 }
0x274f   :  { %10611 = vmatmul.mubr.msk.f32.vlgmr.msra.gmra.mrb[58].mxu0 %vm1843_vm11, %v7462_v22 }
0x2750   :  { %11018 = vmatpush3.bf16.msra.mxu0 %v13522_v1  ;;  %10632 = vmatprep.mubr.msk.f32.mxu0 %vm11968_vm1, %v14911_v4 }
0x2751   :  { %11019 = vmatprep.subr.bf16.mxu0 %v14912_v10 }
0x2752   :  { %v7539_v25 = vpop.permute.xlu0 %7538 }
0x2753   :  { %10622 = vmatmul.mubr.msk.f32.vlgmr.msra.gmra.mrb[54].mxu1 %vm1843_vm11, %v7539_v25 }
0x2754   :  { %11021 = vmatpush3.bf16.msra.mxu0 %v13532_v53  ;;  %11024 = vmatpush3.bf16.msra.mxu1 %v13568_v23 }
0x2755   :  { %11025 = vmatprep.subr.bf16.mxu1 %v14912_v10  ;;  %11028 = vmatprep.subr.bf16.mxu0 %v14912_v10 }
0x2756   :  { %10643 = vmatprep.mubr.msk.f32.mxu1 %vm11968_vm1, %v14911_v4 }
0x2758   :  { %11027 = vmatpush3.bf16.msra.mxu1 %v13579_v36 }
0x2759   :  { %11034 = vmatprep.subr.bf16.mxu1 %v14912_v10 }
0x2812   :  { %v7454_v5 = vpop.f32.mrb[52].mxu1 }
0x2813   :  { %v7615_v44 = vrot.slane %v7454_v5, 4  ;;  %v7616_v59 = vrot.slane %v7454_v5, 5  ;;  %v10601_v19 = vpop.f32.mrb[53].mxu1 }
0x2815   :  { %v7627_v39 = vadd.f32 %v7615_v44, %v13604_v12  ;;  %v7628_v63 = vadd.f32 %v7616_v59, %v13606_v37 }
0x2817   :  { %11751 = vtanh.f32 %v7627_v39 }
0x2818   :  { %11753 = vtanh.f32 %v7628_v63 }
0x2821   :  { %v11752_v49 = vpop.eup %11751 }
0x2822   :  { %v11754_v16 = vpop.eup %11753  ;;  %7705 = vrot.lane.b32.xlu1 %v11752_v49, %s11971_s25  ;;  %v7531_v33 = vpop.f32.mrb[58].mxu0  ;;  %v9689_v49 = vmul.f32 -1.442695, %v7627_v39 }
0x2823   :  { %7707 = vrot.lane.b32.xlu0 %v11754_v16, %s11971_s25  ;;  %v7617_v52 = vrot.slane %v7531_v33, 4  ;;  %v7618_v60 = vrot.slane %v7531_v33, 5  ;;  %v10612_v2 = vpop.f32.mrb[59].mxu0  ;;  %v9690_v16 = vmul.f32 -1.442695, %v7628_v63 }
0x2825   :  { %v7629_v7 = vadd.f32 %v7617_v52, %v13616_v29  ;;  %v7630_v38 = vadd.f32 %v7618_v60, %v13622_v35 }
0x2826   :  { %v7608_v9 = vpop.f32.mrb[54].mxu1 }
0x2827   :  { %11755 = vtanh.f32 %v7629_v7  ;;  %v7619_v40 = vrot.slane %v7608_v9, 4  ;;  %v10623_v31 = vpop.f32.mrb[55].mxu1  ;;  %v7620_v0 = vrot.slane %v7608_v9, 5  ;;  %v9691_v9 = vmul.f32 -1.442695, %v7629_v7 }
0x2828   :  { %11757 = vtanh.f32 %v7630_v38 }
0x2829   :  { %v7631_v22 = vadd.f32 %v7619_v40, %v13618_v21  ;;  %v7632_v25 = vadd.f32 %v7620_v0, %v13627_v14  ;;  %v9692_v40 = vmul.f32 -1.442695, %v7630_v38 }
0x282b   :  { %11759 = vtanh.f32 %v7631_v22  ;;  %v9693_v31 = vmul.f32 -1.442695, %v7631_v22  ;;  %v9694_v0 = vmul.f32 -1.442695, %v7632_v25 }
0x282c   :  { %11761 = vtanh.f32 %v7632_v25 }
0x282d   :  { %11763 = vpow2.f32 %v9689_v49 }
0x282e   :  { %11765 = vpow2.f32 %v9690_v16 }
0x2831   :  { %v11756_v5 = vpop.eup %11755 }
0x2832   :  { %v11758_v44 = vpop.eup %11757  ;;  %7709 = vrot.lane.b32.xlu1 %v11756_v5, %s11971_s25 }
0x2833   :  { %7711 = vrot.lane.b32.xlu0 %v11758_v44, %s11971_s25 }
0x2835   :  { %v11760_v59 = vpop.eup %11759 }
0x2836   :  { %v11762_v19 = vpop.eup %11761  ;;  %7713 = vrot.lane.b32.xlu1 %v11760_v59, %s11971_s25 }
0x2837   :  { %7715 = vrot.lane.b32.xlu0 %v11762_v19, %s11971_s25  ;;  %v11764_v33 = vpop.eup %11763 }
0x2838   :  { %v11766_v52 = vpop.eup %11765  ;;  %v7651_v60 = vadd.f32 1.0, %v11764_v33 }
0x2839   :  { %v7652_v2 = vadd.f32 1.0, %v11766_v52 }
0x283a   :  { %11767 = vrcp.f32 %v7651_v60 }
0x283b   :  { %11769 = vrcp.f32 %v7652_v2 }
0x283c   :  { %11771 = vpow2.f32 %v9691_v9 }
0x283d   :  { %11773 = vpow2.f32 %v9692_v40 }
0x283e   :  { %11775 = vpow2.f32 %v9693_v31 }
0x283f   :  { %11777 = vpow2.f32 %v9694_v0 }
0x2844   :  { %v14105_v5 = vpop.eup %11767 }
0x2845   :  { %v14107_v63 = vpop.eup %11769 }
0x2846   :  { %v11772_v19 = vpop.eup %11771 }
0x2847   :  { %v11774_v38 = vpop.eup %11773  ;;  %v7653_v22 = vadd.f32 1.0, %v11772_v19 }
0x2848   :  { %v11776_v25 = vpop.eup %11775  ;;  %v7654_v49 = vadd.f32 1.0, %v11774_v38 }
0x2849   :  { %v11778_v16 = vpop.eup %11777  ;;  %11779 = vrcp.f32 %v7653_v22  ;;  %v7655_v33 = vadd.f32 1.0, %v11776_v25  ;;  %v7681_v22 = vrot.slane %v14010_v51, 7  ;;  %v7682_v25 = vrot.slane %v14012_v50, 7 }
0x284a   :  { %11781 = vrcp.f32 %v7654_v49  ;;  %v7656_v52 = vadd.f32 1.0, %v11778_v16  ;;  %v7683_v51 = vrot.slane %v14023_v41, 7  ;;  %v7684_v50 = vrot.slane %v14026_v3, 7 }
0x284b   :  { %11783 = vrcp.f32 %v7655_v33  ;;  %v7693_v49 = vmul.f32 %v14105_v5, %v7681_v22  ;;  %v7694_v16 = vmul.f32 %v14107_v63, %v7682_v25 }
0x284c   :  { %11785 = vrcp.f32 %v7656_v52 }
0x2853   :  { %v14113_v60 = vpop.eup %11779 }
0x2854   :  { %v14115_v9 = vpop.eup %11781 }
0x2894   :  { %v7706_v39 = vpop.permute.xlu1 %7705 }
0x2895   :  { %v7708_v44 = vpop.permute.xlu0 %7707  ;;  %v7723_v59 = vmul.f32 %v14105_v5, %v7706_v39  ;;  %v14120_v39 = vpop.eup %11783 }
0x2896   :  { %v7724_v7 = vmul.f32 %v14107_v63, %v7708_v44 }
0x2897   :  { %7735 = vrot.lane.b32.xlu1 %v7723_v59, %s11972_s9  ;;  %v14123_v59 = vpop.eup %11785 }
0x2898   :  { %7737 = vrot.lane.b32.xlu0 %v7724_v7, %s11972_s9 }
0x28a4   :  { %v7710_v2 = vpop.permute.xlu1 %7709 }
0x28a5   :  { %v7712_v40 = vpop.permute.xlu0 %7711  ;;  %v7725_v31 = vmul.f32 %v14113_v60, %v7710_v2 }
0x28a6   :  { %v7726_v0 = vmul.f32 %v14115_v9, %v7712_v40 }
0x28a7   :  { %7739 = vrot.lane.b32.xlu1 %v7725_v31, %s11972_s9 }
0x28a8   :  { %7741 = vrot.lane.b32.xlu0 %v7726_v0, %s11972_s9  ;;  %v7714_v44 = vpop.permute.xlu1 %7713 }
0x28a9   :  { %v7716_v19 = vpop.permute.xlu0 %7715  ;;  %v7727_v7 = vmul.f32 %v14120_v39, %v7714_v44  ;;  %v7695_v44 = vmul.f32 %v14113_v60, %v7683_v51 }
0x28aa   :  { %v7728_v38 = vmul.f32 %v14123_v59, %v7716_v19  ;;  %v7696_v19 = vmul.f32 %v14115_v9, %v7684_v50 }
0x28ab   :  { %7743 = vrot.lane.b32.xlu1 %v7727_v7, %s11972_s9 }
0x28ac   :  { %7745 = vrot.lane.b32.xlu0 %v7728_v38, %s11972_s9  ;;  %v7685_v38 = vrot.slane %v14032_v17, 7 }
0x28ae   :  { %v7697_v41 = vmul.f32 %v14120_v39, %v7685_v38 }
0x2909   :  { %v7736_v33 = vpop.permute.xlu1 %7735 }
0x290a   :  { %v7738_v52 = vpop.permute.xlu0 %7737  ;;  %v14133_v2 = vadd.f32 %v7736_v33, %v7693_v49  ;;  %v7686_v49 = vrot.slane %v14034_v27, 7 }
0x290b   :  { %v14135_v40 = vadd.f32 %v7738_v52, %v7694_v16 }
0x290c   :  { %11787 = vtanh.f32 %v14133_v2  ;;  %v7698_v3 = vmul.f32 %v14123_v59, %v7686_v49 }
0x290d   :  { %11789 = vtanh.f32 %v14135_v40 }
0x2916   :  { %v11788_v31 = vpop.eup %11787 }
0x2917   :  { %v11790_v0 = vpop.eup %11789  ;;  %7771 = vrot.lane.b32.xlu1 %v11788_v31, %s11971_s25 }
0x2918   :  { %7773 = vrot.lane.b32.xlu0 %v11790_v0, %s11971_s25 }
0x2919   :  { %v7740_v7 = vpop.permute.xlu1 %7739 }
0x291a   :  { %v7742_v22 = vpop.permute.xlu0 %7741  ;;  %v14146_v25 = vadd.f32 %v7740_v7, %v7695_v44 }
0x291b   :  { %v14149_v16 = vadd.f32 %v7742_v22, %v7696_v19 }
0x291c   :  { %11791 = vtanh.f32 %v14146_v25 }
0x291d   :  { %11793 = vtanh.f32 %v14149_v16  ;;  %v7744_v33 = vpop.permute.xlu1 %7743 }
0x291e   :  { %v7746_v52 = vpop.permute.xlu0 %7745  ;;  %v14155_v31 = vadd.f32 %v7744_v33, %v7697_v41 }
0x291f   :  { %v14157_v17 = vadd.f32 %v7746_v52, %v7698_v3 }
0x2920   :  { %11795 = vtanh.f32 %v14155_v31 }
0x2921   :  { %11797 = vtanh.f32 %v14157_v17 }
0x2926   :  { %v11792_v27 = vpop.eup %11791 }
0x2927   :  { %v11794_v0 = vpop.eup %11793  ;;  %7775 = vrot.lane.b32.xlu1 %v11792_v27, %s11971_s25 }
0x2928   :  { %7777 = vrot.lane.b32.xlu0 %v11794_v0, %s11971_s25 }
0x292a   :  { %v11796_v51 = vpop.eup %11795 }
0x292b   :  { %v11798_v50 = vpop.eup %11797  ;;  %7779 = vrot.lane.b32.xlu1 %v11796_v51, %s11971_s25 }
0x292c   :  { %7781 = vrot.lane.b32.xlu0 %v11798_v50, %s11971_s25 }
0x2989   :  { %v7772_v44 = vpop.permute.xlu1 %7771 }
0x298a   :  { %v7774_v19 = vpop.permute.xlu0 %7773  ;;  %v14166_v7 = vmul.f32 %v14105_v5, %v7772_v44 }
0x298b   :  { %v14169_v38 = vmul.f32 %v14107_v63, %v7774_v19 }
0x298c   :  { %v7825_v22 = vrot.slane %v14166_v7, 4 }
0x298d   :  { %v7826_v49 = vrot.slane %v14169_v38, 3 }
0x298f   :  { %v7827_v41 = vsel %vm1293_vm4, %v7826_v49, %v7825_v22 }
0x2990   :  { %7828 = vrot.lane.b32.xlu1 %v7827_v41, %s11972_s9 }
0x2999   :  { %v7776_v3 = vpop.permute.xlu1 %7775 }
0x299a   :  { %v7778_v33 = vpop.permute.xlu0 %7777  ;;  %v14176_v52 = vmul.f32 %v14113_v60, %v7776_v3 }
0x299b   :  { %v14179_v27 = vmul.f32 %v14115_v9, %v7778_v33 }
0x299c   :  { %v7902_v5 = vrot.slane %v14176_v52, 4 }
0x299d   :  { %v7903_v63 = vrot.slane %v14179_v27, 3  ;;  %v7780_v0 = vpop.permute.xlu1 %7779 }
0x299e   :  { %v7782_v51 = vpop.permute.xlu0 %7781  ;;  %v14184_v50 = vmul.f32 %v14120_v39, %v7780_v0 }
0x299f   :  { %v14187_v44 = vmul.f32 %v14123_v59, %v7782_v51  ;;  %v7904_v19 = vsel %vm1293_vm4, %v7903_v63, %v7902_v5 }
0x29a0   :  { %14923 = vst [vmem:[#allocation10_spill] sm:$0xff] %v14184_v50  ;;  %v7979_v60 = vrot.slane %v14184_v50, 4  ;;  %7905 = vrot.lane.b32.xlu0 %v7904_v19, %s11972_s9 }
0x29a1   :  { %v7980_v9 = vrot.slane %v14187_v44, 3 }
0x29a3   :  { %v7981_v22 = vsel %vm1293_vm4, %v7980_v9, %v7979_v60 }
0x29a4   :  { %7982 = vrot.lane.b32.xlu1 %v7981_v22, %s11972_s9 }
0x2a02   :  { %v7829_v49 = vpop.permute.xlu1 %7828 }
0x2a03   :  { %10633 = vmatmul.mubr.msk.f32.vlgmr.msra.gmra.mrb[60].mxu0 %vm1843_vm11, %v7829_v49 }
0x2a04   :  { %11030 = vmatpush3.bf16.msra.mxu0 %v13546_v61  ;;  %10654 = vmatprep.mubr.msk.f32.mxu0 %vm11968_vm1, %v14911_v4 }
0x2a05   :  { %11031 = vmatprep.subr.bf16.mxu0 %v14912_v10 }
0x2a08   :  { %11033 = vmatpush3.bf16.msra.mxu0 %v13563_v47 }
0x2a09   :  { %11040 = vmatprep.subr.bf16.mxu0 %v14912_v10 }
0x2a12   :  { %v7906_v39 = vpop.permute.xlu0 %7905 }
0x2a13   :  { %10644 = vmatmul.mubr.msk.f32.vlgmr.msra.gmra.mrb[56].mxu1 %vm1843_vm11, %v7906_v39 }
0x2a14   :  { %11036 = vmatpush3.bf16.msra.mxu1 %v13522_v1  ;;  %10665 = vmatprep.mubr.msk.f32.mxu1 %vm11968_vm1, %v14911_v4 }
0x2a15   :  { %11037 = vmatprep.subr.bf16.mxu1 %v14912_v10 }
0x2a16   :  { %v7983_v59 = vpop.permute.xlu1 %7982 }
0x2a17   :  { %10655 = vmatmul.mubr.msk.f32.vlgmr.msra.gmra.mrb[62].mxu0 %vm1843_vm11, %v7983_v59 }
0x2a18   :  { %11039 = vmatpush3.bf16.msra.mxu1 %v13532_v53  ;;  %11042 = vmatpush3.bf16.msra.mxu0 %v13568_v23 }
0x2a19   :  { %11043 = vmatprep.subr.bf16.mxu0 %v14912_v10  ;;  %11046 = vmatprep.subr.bf16.mxu1 %v14912_v10 }
0x2a1a   :  { %10676 = vmatprep.mubr.msk.f32.mxu0 %vm11968_vm1, %v14911_v4 }
0x2a1c   :  { %11045 = vmatpush3.bf16.msra.mxu0 %v13579_v36 }
0x2a1d   :  { %11052 = vmatprep.subr.bf16.mxu0 %v14912_v10 }
0x2ad6   :  { %v7898_v41 = vpop.f32.mrb[60].mxu0 }
0x2ad7   :  { %v8059_v3 = vrot.slane %v7898_v41, 3  ;;  %v8060_v33 = vrot.slane %v7898_v41, 4  ;;  %v10634_v5 = vpop.f32.mrb[61].mxu0 }
0x2ad9   :  { %v8071_v63 = vadd.f32 %v8059_v3, %v13604_v12  ;;  %v8072_v0 = vadd.f32 %v8060_v33, %v13606_v37 }
0x2adb   :  { %11799 = vtanh.f32 %v8071_v63 }
0x2adc   :  { %11801 = vtanh.f32 %v8072_v0 }
0x2ae5   :  { %v11800_v51 = vpop.eup %11799 }
0x2ae6   :  { %v11802_v19 = vpop.eup %11801  ;;  %8149 = vrot.lane.b32.xlu0 %v11800_v51, %s11971_s25  ;;  %v7975_v60 = vpop.f32.mrb[56].mxu1 }
0x2ae7   :  { %8151 = vrot.lane.b32.xlu1 %v11802_v19, %s11971_s25  ;;  %v8061_v9 = vrot.slane %v7975_v60, 3  ;;  %v8062_v22 = vrot.slane %v7975_v60, 4  ;;  %v10645_v49 = vpop.f32.mrb[57].mxu1 }
0x2ae8   :  { %v9699_v49 = vmul.f32 -1.442695, %v8072_v0 }
0x2ae9   :  { %v8073_v39 = vadd.f32 %v8061_v9, %v13616_v29  ;;  %v8074_v59 = vadd.f32 %v8062_v22, %v13622_v35  ;;  %v9698_v22 = vmul.f32 -1.442695, %v8071_v63 }
0x2aea   :  { %v8052_v41 = vpop.f32.mrb[62].mxu0 }
0x2aeb   :  { %11803 = vtanh.f32 %v8073_v39  ;;  %v8063_v3 = vrot.slane %v8052_v41, 3  ;;  %v10656_v33 = vpop.f32.mrb[63].mxu0  ;;  %v8064_v5 = vrot.slane %v8052_v41, 4  ;;  %v9700_v13 = vmul.f32 -1.442695, %v8073_v39 }
0x2aec   :  { %11805 = vtanh.f32 %v8074_v59  ;;  %v9701_v48 = vmul.f32 -1.442695, %v8074_v59 }
0x2aed   :  { %v8075_v50 = vadd.f32 %v8063_v3, %v13618_v21  ;;  %v8076_v51 = vadd.f32 %v8064_v5, %v13627_v14 }
0x2aef   :  { %11807 = vtanh.f32 %v8075_v50 }
0x2af0   :  { %11809 = vtanh.f32 %v8076_v51 }
0x2af1   :  { %11811 = vpow2.f32 %v9698_v22 }
0x2af2   :  { %11813 = vpow2.f32 %v9699_v49 }
0x2af5   :  { %v11804_v19 = vpop.eup %11803 }
0x2af6   :  { %v11806_v8 = vpop.eup %11805  ;;  %8153 = vrot.lane.b32.xlu0 %v11804_v19, %s11971_s25  ;;  %v9703_v19 = vmul.f32 -1.442695, %v8076_v51 }
0x2af7   :  { %8155 = vrot.lane.b32.xlu1 %v11806_v8, %s11971_s25  ;;  %v9702_v8 = vmul.f32 -1.442695, %v8075_v50 }
0x2af9   :  { %v11808_v60 = vpop.eup %11807 }
0x2afa   :  { %v11810_v9 = vpop.eup %11809  ;;  %8157 = vrot.lane.b32.xlu0 %v11808_v60, %s11971_s25 }
0x2afb   :  { %8159 = vrot.lane.b32.xlu1 %v11810_v9, %s11971_s25  ;;  %v11812_v41 = vpop.eup %11811 }
0x2afc   :  { %v11814_v3 = vpop.eup %11813  ;;  %v8095_v33 = vadd.f32 1.0, %v11812_v41 }
0x2afd   :  { %v8096_v5 = vadd.f32 1.0, %v11814_v3 }
0x2afe   :  { %11815 = vrcp.f32 %v8095_v33 }
0x2aff   :  { %11817 = vrcp.f32 %v8096_v5 }
0x2b00   :  { %11819 = vpow2.f32 %v9700_v13 }
0x2b01   :  { %11821 = vpow2.f32 %v9701_v48 }
0x2b02   :  { %11823 = vpow2.f32 %v9702_v8 }
0x2b03   :  { %11825 = vpow2.f32 %v9703_v19 }
0x2b08   :  { %v14228_v60 = vpop.eup %11815 }
0x2b09   :  { %v14230_v0 = vpop.eup %11817 }
0x2b0a   :  { %v11820_v49 = vpop.eup %11819 }
0x2b0b   :  { %v11822_v59 = vpop.eup %11821  ;;  %v8097_v48 = vadd.f32 1.0, %v11820_v49 }
0x2b0c   :  { %v11824_v13 = vpop.eup %11823  ;;  %v8098_v50 = vadd.f32 1.0, %v11822_v59 }
0x2b0d   :  { %v11826_v51 = vpop.eup %11825  ;;  %11827 = vrcp.f32 %v8097_v48  ;;  %v8099_v41 = vadd.f32 1.0, %v11824_v13 }
0x2b0e   :  { %11829 = vrcp.f32 %v8098_v50  ;;  %v8100_v3 = vadd.f32 1.0, %v11826_v51  ;;  %v8125_v50 = vrot.slane %v14133_v2, 7  ;;  %v8126_v51 = vrot.slane %v14135_v40, 7 }
0x2b0f   :  { %11831 = vrcp.f32 %v8099_v41  ;;  %v8127_v2 = vrot.slane %v14146_v25, 7  ;;  %v8128_v40 = vrot.slane %v14149_v16, 7 }
0x2b10   :  { %11833 = vrcp.f32 %v8100_v3  ;;  %v8137_v41 = vmul.f32 %v14228_v60, %v8125_v50 }
0x2b17   :  { %v14236_v33 = vpop.eup %11827 }
0x2b18   :  { %v14238_v8 = vpop.eup %11829 }
0x2b19   :  { %v8140_v50 = vmul.f32 %v14238_v8, %v8128_v40 }
0x2b58   :  { %v8150_v63 = vpop.permute.xlu0 %8149 }
0x2b59   :  { %v8167_v9 = vmul.f32 %v14228_v60, %v8150_v63  ;;  %v8152_v22 = vpop.permute.xlu1 %8151 }
0x2b5a   :  { %v8168_v39 = vmul.f32 %v14230_v0, %v8152_v22  ;;  %v14243_v22 = vpop.eup %11831 }
0x2b5b   :  { %8179 = vrot.lane.b32.xlu0 %v8167_v9, %s11972_s9 }
0x2b5c   :  { %8181 = vrot.lane.b32.xlu1 %v8168_v39, %s11972_s9  ;;  %v14246_v39 = vpop.eup %11833 }
0x2b68   :  { %v8154_v5 = vpop.permute.xlu0 %8153 }
0x2b69   :  { %v8169_v19 = vmul.f32 %v14236_v33, %v8154_v5  ;;  %v8156_v63 = vpop.permute.xlu1 %8155  ;;  %v8138_v5 = vmul.f32 %v14230_v0, %v8126_v51  ;;  %v8129_v51 = vrot.slane %v14155_v31, 7 }
0x2b6a   :  { %v8170_v9 = vmul.f32 %v14238_v8, %v8156_v63 }
0x2b6b   :  { %8183 = vrot.lane.b32.xlu0 %v8169_v19, %s11972_s9  ;;  %v8141_v25 = vmul.f32 %v14243_v22, %v8129_v51 }
0x2b6c   :  { %8185 = vrot.lane.b32.xlu1 %v8170_v9, %s11972_s9  ;;  %v8158_v49 = vpop.permute.xlu0 %8157 }
0x2b6d   :  { %v8171_v59 = vmul.f32 %v14243_v22, %v8158_v49  ;;  %v8160_v48 = vpop.permute.xlu1 %8159 }
0x2b6e   :  { %v8172_v13 = vmul.f32 %v14246_v39, %v8160_v48  ;;  %v8139_v48 = vmul.f32 %v14236_v33, %v8127_v2 }
0x2b6f   :  { %8187 = vrot.lane.b32.xlu0 %v8171_v59, %s11972_s9 }
0x2b70   :  { %8189 = vrot.lane.b32.xlu1 %v8172_v13, %s11972_s9 }
0x2bcd   :  { %v8180_v3 = vpop.permute.xlu0 %8179 }
0x2bce   :  { %v14256_v19 = vadd.f32 %v8180_v3, %v8137_v41  ;;  %v8182_v63 = vpop.permute.xlu1 %8181 }
0x2bcf   :  { %v14258_v9 = vadd.f32 %v8182_v63, %v8138_v5  ;;  %v8130_v5 = vrot.slane %v14157_v17, 7 }
0x2bd0   :  { %11835 = vtanh.f32 %v14256_v19 }
0x2bd1   :  { %11837 = vtanh.f32 %v14258_v9 }
0x2bda   :  { %v11836_v49 = vpop.eup %11835 }
0x2bdb   :  { %v11838_v59 = vpop.eup %11837  ;;  %8215 = vrot.lane.b32.xlu0 %v11836_v49, %s11971_s25  ;;  %v8142_v49 = vmul.f32 %v14246_v39, %v8130_v5 }
0x2bdc   :  { %8217 = vrot.lane.b32.xlu1 %v11838_v59, %s11971_s25 }
0x2bdd   :  { %v8184_v13 = vpop.permute.xlu0 %8183 }
0x2bde   :  { %v14269_v41 = vadd.f32 %v8184_v13, %v8139_v48  ;;  %v8186_v3 = vpop.permute.xlu1 %8185 }
0x2bdf   :  { %v14272_v63 = vadd.f32 %v8186_v3, %v8140_v50 }
0x2be0   :  { %11839 = vtanh.f32 %v14269_v41 }
0x2be1   :  { %11841 = vtanh.f32 %v14272_v63  ;;  %v8188_v16 = vpop.permute.xlu0 %8187 }
0x2be2   :  { %v14278_v59 = vadd.f32 %v8188_v16, %v8141_v25  ;;  %v8190_v2 = vpop.permute.xlu1 %8189 }
0x2be3   :  { %v14280_v31 = vadd.f32 %v8190_v2, %v8142_v49 }
0x2be4   :  { %11843 = vtanh.f32 %v14278_v59 }
0x2be5   :  { %11845 = vtanh.f32 %v14280_v31 }
0x2bea   :  { %v11840_v17 = vpop.eup %11839 }
0x2beb   :  { %v11842_v40 = vpop.eup %11841  ;;  %8219 = vrot.lane.b32.xlu0 %v11840_v17, %s11971_s25 }
0x2bec   :  { %8221 = vrot.lane.b32.xlu1 %v11842_v40, %s11971_s25 }
0x2bee   :  { %v11844_v48 = vpop.eup %11843 }
0x2bef   :  { %v11846_v13 = vpop.eup %11845  ;;  %8223 = vrot.lane.b32.xlu0 %v11844_v48, %s11971_s25 }
0x2bf0   :  { %8225 = vrot.lane.b32.xlu1 %v11846_v13, %s11971_s25 }
0x2c4d   :  { %v8216_v50 = vpop.permute.xlu0 %8215 }
0x2c4e   :  { %v14289_v51 = vmul.f32 %v14228_v60, %v8216_v50  ;;  %v8218_v3 = vpop.permute.xlu1 %8217 }
0x2c4f   :  { %v14292_v5 = vmul.f32 %v14230_v0, %v8218_v3 }
0x2c50   :  { %v8269_v25 = vrot.slane %v14289_v51, 5 }
0x2c51   :  { %v8270_v16 = vrot.slane %v14292_v5, 4 }
0x2c53   :  { %v8271_v49 = vsel %vm1293_vm4, %v8270_v16, %v8269_v25 }
0x2c54   :  { %8272 = vrot.lane.b32.xlu0 %v8271_v49, %s11972_s9 }
0x2c5d   :  { %v8220_v2 = vpop.permute.xlu0 %8219 }
0x2c5e   :  { %v14299_v17 = vmul.f32 %v14236_v33, %v8220_v2  ;;  %v8222_v40 = vpop.permute.xlu1 %8221 }
0x2c5f   :  { %v14302_v60 = vmul.f32 %v14238_v8, %v8222_v40 }
0x2c60   :  { %v8346_v48 = vrot.slane %v14299_v17, 5 }
0x2c61   :  { %v8347_v0 = vrot.slane %v14302_v60, 4  ;;  %v8224_v13 = vpop.permute.xlu0 %8223 }
0x2c62   :  { %v14307_v50 = vmul.f32 %v14243_v22, %v8224_v13  ;;  %v8226_v3 = vpop.permute.xlu1 %8225 }
0x2c63   :  { %v14310_v25 = vmul.f32 %v14246_v39, %v8226_v3  ;;  %v8348_v16 = vsel %vm1293_vm4, %v8347_v0, %v8346_v48 }
0x2c64   :  { %14924 = vst [vmem:[#allocation13_spill] sm:$0xff] %v14307_v50  ;;  %v8423_v33 = vrot.slane %v14307_v50, 5  ;;  %8349 = vrot.lane.b32.xlu1 %v8348_v16, %s11972_s9 }
0x2c65   :  { %v8424_v8 = vrot.slane %v14310_v25, 4 }
0x2c67   :  { %v8425_v49 = vsel %vm1293_vm4, %v8424_v8, %v8423_v33 }
0x2c68   :  { %8426 = vrot.lane.b32.xlu0 %v8425_v49, %s11972_s9 }
0x2cc6   :  { %v8273_v2 = vpop.permute.xlu0 %8272 }
0x2cc7   :  { %10666 = vmatmul.mubr.msk.f32.vlgmr.msra.gmra.mrb[58].mxu1 %vm1843_vm11, %v8273_v2 }
0x2cc8   :  { %11048 = vmatpush3.bf16.msra.mxu1 %v13546_v61  ;;  %10687 = vmatprep.mubr.msk.f32.mxu1 %vm11968_vm1, %v14911_v4 }
0x2cc9   :  { %11049 = vmatprep.subr.bf16.mxu1 %v14912_v10 }
0x2ccc   :  { %11051 = vmatpush3.bf16.msra.mxu1 %v13563_v47 }
0x2ccd   :  { %11058 = vmatprep.subr.bf16.mxu1 %v14912_v10 }
0x2cd6   :  { %v8350_v22 = vpop.permute.xlu1 %8349 }
0x2cd7   :  { %10677 = vmatmul.mubr.msk.f32.vlgmr.msra.gmra.mrb[64].mxu0 %vm1843_vm11, %v8350_v22 }
0x2cd8   :  { %11054 = vmatpush3.bf16.msra.mxu0 %v13522_v1  ;;  %10698 = vmatprep.mubr.msk.f32.mxu0 %vm11968_vm1, %v14911_v4 }
0x2cd9   :  { %11055 = vmatprep.subr.bf16.mxu0 %v14912_v10 }
0x2cda   :  { %v8427_v39 = vpop.permute.xlu0 %8426 }
0x2cdb   :  { %10688 = vmatmul.mubr.msk.f32.vlgmr.msra.gmra.mrb[60].mxu1 %vm1843_vm11, %v8427_v39 }
0x2cdc   :  { %11057 = vmatpush3.bf16.msra.mxu0 %v13532_v53  ;;  %11060 = vmatpush3.bf16.msra.mxu1 %v13568_v23 }
0x2cdd   :  { %11061 = vmatprep.subr.bf16.mxu1 %v14912_v10  ;;  %11064 = vmatprep.subr.bf16.mxu0 %v14912_v10 }
0x2cde   :  { %10709 = vmatprep.mubr.msk.f32.mxu1 %vm11968_vm1, %v14911_v4 }
0x2ce0   :  { %11063 = vmatpush3.bf16.msra.mxu1 %v13579_v36 }
0x2d9a   :  { %v8342_v1 = vpop.f32.mrb[58].mxu1 }
0x2d9b   :  { %v8503_v40 = vrot.slane %v8342_v1, 2  ;;  %v8504_v48 = vrot.slane %v8342_v1, 3  ;;  %v10667_v0 = vpop.f32.mrb[59].mxu1 }
0x2d9d   :  { %v8515_v13 = vadd.f32 %v8503_v40, %v13604_v12  ;;  %v8516_v3 = vadd.f32 %v8504_v48, %v13606_v37 }
0x2d9f   :  { %11847 = vtanh.f32 %v8515_v13 }
0x2da0   :  { %11849 = vtanh.f32 %v8516_v3 }
0x2da9   :  { %v11848_v53 = vpop.eup %11847 }
0x2daa   :  { %v11850_v23 = vpop.eup %11849  ;;  %8593 = vrot.lane.b32.xlu1 %v11848_v53, %s11971_s25  ;;  %v8419_v16 = vpop.f32.mrb[64].mxu0 }
0x2dab   :  { %8595 = vrot.lane.b32.xlu0 %v11850_v23, %s11971_s25  ;;  %v8505_v33 = vrot.slane %v8419_v16, 2  ;;  %v8506_v8 = vrot.slane %v8419_v16, 3  ;;  %v10678_v36 = vpop.f32.mrb[65].mxu0 }
0x2dac   :  { %v9708_v36 = vmul.f32 -1.442695, %v8516_v3 }
0x2dad   :  { %v8517_v49 = vadd.f32 %v8505_v33, %v13616_v29  ;;  %v8518_v2 = vadd.f32 %v8506_v8, %v13622_v35  ;;  %v9707_v8 = vmul.f32 -1.442695, %v8515_v13 }
0x2dae   :  { %v8496_v22 = vpop.f32.mrb[60].mxu1 }
0x2daf   :  { %11851 = vtanh.f32 %v8517_v49  ;;  %v8507_v39 = vrot.slane %v8496_v22, 2  ;;  %v10689_v1 = vpop.f32.mrb[61].mxu1  ;;  %v8508_v40 = vrot.slane %v8496_v22, 3  ;;  %v9709_v50 = vmul.f32 -1.442695, %v8517_v49 }
0x2db0   :  { %11853 = vtanh.f32 %v8518_v2  ;;  %v9710_v42 = vmul.f32 -1.442695, %v8518_v2 }
0x2db1   :  { %v8519_v48 = vadd.f32 %v8507_v39, %v13618_v21  ;;  %v8520_v0 = vadd.f32 %v8508_v40, %v13627_v14 }
0x2db3   :  { %11855 = vtanh.f32 %v8519_v48 }
0x2db4   :  { %11857 = vtanh.f32 %v8520_v0 }
0x2db5   :  { %11859 = vpow2.f32 %v9707_v8 }
0x2db6   :  { %11861 = vpow2.f32 %v9708_v36 }
0x2db9   :  { %v11852_v53 = vpop.eup %11851 }
0x2dba   :  { %v11854_v23 = vpop.eup %11853  ;;  %8597 = vrot.lane.b32.xlu1 %v11852_v53, %s11971_s25  ;;  %v9711_v53 = vmul.f32 -1.442695, %v8519_v48 }
0x2dbb   :  { %8599 = vrot.lane.b32.xlu0 %v11854_v23, %s11971_s25  ;;  %v9712_v23 = vmul.f32 -1.442695, %v8520_v0 }
0x2dbd   :  { %v11856_v16 = vpop.eup %11855 }
0x2dbe   :  { %v11858_v33 = vpop.eup %11857  ;;  %8601 = vrot.lane.b32.xlu1 %v11856_v16, %s11971_s25 }
0x2dbf   :  { %8603 = vrot.lane.b32.xlu0 %v11858_v33, %s11971_s25  ;;  %v11860_v22 = vpop.eup %11859 }
0x2dc0   :  { %v11862_v39 = vpop.eup %11861  ;;  %v8539_v1 = vadd.f32 1.0, %v11860_v22 }
0x2dc1   :  { %v8540_v40 = vadd.f32 1.0, %v11862_v39 }
0x2dc2   :  { %11863 = vrcp.f32 %v8539_v1 }
0x2dc3   :  { %11865 = vrcp.f32 %v8540_v40 }
0x2dc4   :  { %11867 = vpow2.f32 %v9709_v50 }
0x2dc5   :  { %11869 = vpow2.f32 %v9710_v42 }
0x2dc6   :  { %11871 = vpow2.f32 %v9711_v53 }
0x2dc7   :  { %11873 = vpow2.f32 %v9712_v23 }
0x2dcc   :  { %v14350_v16 = vpop.eup %11863 }
0x2dcd   :  { %v14352_v3 = vpop.eup %11865 }
0x2dce   :  { %v11868_v36 = vpop.eup %11867 }
0x2dcf   :  { %v11870_v2 = vpop.eup %11869  ;;  %v8541_v42 = vadd.f32 1.0, %v11868_v36 }
0x2dd0   :  { %v11872_v50 = vpop.eup %11871  ;;  %v8542_v48 = vadd.f32 1.0, %v11870_v2 }
0x2dd1   :  { %v11874_v0 = vpop.eup %11873  ;;  %11875 = vrcp.f32 %v8541_v42  ;;  %v8543_v22 = vadd.f32 1.0, %v11872_v50 }
0x2dd2   :  { %11877 = vrcp.f32 %v8542_v48  ;;  %v8544_v39 = vadd.f32 1.0, %v11874_v0  ;;  %v8569_v48 = vrot.slane %v14256_v19, 7  ;;  %v8570_v0 = vrot.slane %v14258_v9, 7 }
0x2dd3   :  { %11879 = vrcp.f32 %v8543_v22  ;;  %v8571_v19 = vrot.slane %v14269_v41, 7  ;;  %v8572_v9 = vrot.slane %v14272_v63, 7 }
0x2dd4   :  { %11881 = vrcp.f32 %v8544_v39  ;;  %v8581_v22 = vmul.f32 %v14350_v16, %v8569_v48  ;;  %v8582_v39 = vmul.f32 %v14352_v3, %v8570_v0  ;;  %v8573_v0 = vrot.slane %v14278_v59, 7 }
0x2ddb   :  { %v14358_v1 = vpop.eup %11875 }
0x2ddc   :  { %v14360_v53 = vpop.eup %11877 }
0x2e1c   :  { %v8594_v13 = vpop.permute.xlu1 %8593 }
0x2e1d   :  { %v8596_v33 = vpop.permute.xlu0 %8595  ;;  %v8611_v8 = vmul.f32 %v14350_v16, %v8594_v13 }
0x2e1e   :  { %v8612_v49 = vmul.f32 %v14352_v3, %v8596_v33 }
0x2e1f   :  { %8623 = vrot.lane.b32.xlu1 %v8611_v8, %s11972_s9  ;;  %v14365_v8 = vpop.eup %11879 }
0x2e20   :  { %8625 = vrot.lane.b32.xlu0 %v8612_v49, %s11972_s9  ;;  %v14368_v49 = vpop.eup %11881  ;;  %v8585_v41 = vmul.f32 %v14365_v8, %v8573_v0 }
0x2e2c   :  { %v8598_v40 = vpop.permute.xlu1 %8597 }
0x2e2d   :  { %v8600_v23 = vpop.permute.xlu0 %8599  ;;  %v8613_v13 = vmul.f32 %v14358_v1, %v8598_v40 }
0x2e2e   :  { %v8614_v33 = vmul.f32 %v14360_v53, %v8600_v23 }
0x2e2f   :  { %8627 = vrot.lane.b32.xlu1 %v8613_v13, %s11972_s9 }
0x2e30   :  { %8629 = vrot.lane.b32.xlu0 %v8614_v33, %s11972_s9  ;;  %v8602_v36 = vpop.permute.xlu1 %8601 }
0x2e31   :  { %v8604_v2 = vpop.permute.xlu0 %8603  ;;  %v8615_v42 = vmul.f32 %v14365_v8, %v8602_v36 }
0x2e32   :  { %v8616_v50 = vmul.f32 %v14368_v49, %v8604_v2 }
0x2e33   :  { %8631 = vrot.lane.b32.xlu1 %v8615_v42, %s11972_s9  ;;  %v8583_v42 = vmul.f32 %v14358_v1, %v8571_v19 }
0x2e34   :  { %8633 = vrot.lane.b32.xlu0 %v8616_v50, %s11972_s9  ;;  %v8584_v50 = vmul.f32 %v14360_v53, %v8572_v9 }
0x2e91   :  { %v8624_v40 = vpop.permute.xlu1 %8623 }
0x2e92   :  { %v8626_v23 = vpop.permute.xlu0 %8625  ;;  %v14378_v13 = vadd.f32 %v8624_v40, %v8581_v22  ;;  %v8574_v40 = vrot.slane %v14280_v31, 7 }
0x2e93   :  { %v14380_v33 = vadd.f32 %v8626_v23, %v8582_v39 }
0x2e94   :  { %11883 = vtanh.f32 %v14378_v13  ;;  %v8586_v63 = vmul.f32 %v14368_v49, %v8574_v40 }
0x2e95   :  { %11885 = vtanh.f32 %v14380_v33 }
0x2e9e   :  { %v11884_v36 = vpop.eup %11883 }
0x2e9f   :  { %v11886_v2 = vpop.eup %11885  ;;  %8659 = vrot.lane.b32.xlu1 %v11884_v36, %s11971_s25 }
0x2ea0   :  { %8661 = vrot.lane.b32.xlu0 %v11886_v2, %s11971_s25 }
0x2ea1   :  { %v8628_v48 = vpop.permute.xlu1 %8627 }
0x2ea2   :  { %v8630_v22 = vpop.permute.xlu0 %8629  ;;  %v14391_v39 = vadd.f32 %v8628_v48, %v8583_v42 }
0x2ea3   :  { %v14394_v23 = vadd.f32 %v8630_v22, %v8584_v50 }
0x2ea4   :  { %11887 = vtanh.f32 %v14391_v39 }
0x2ea5   :  { %11889 = vtanh.f32 %v14394_v23  ;;  %v8632_v36 = vpop.permute.xlu1 %8631 }
0x2ea6   :  { %v8634_v2 = vpop.permute.xlu0 %8633  ;;  %v14400_v19 = vadd.f32 %v8632_v36, %v8585_v41 }
0x2ea7   :  { %v14402_v59 = vadd.f32 %v8634_v2, %v8586_v63 }
0x2ea8   :  { %11891 = vtanh.f32 %v14400_v19 }
0x2ea9   :  { %11893 = vtanh.f32 %v14402_v59 }
0x2eae   :  { %v11888_v31 = vpop.eup %11887 }
0x2eaf   :  { %v11890_v9 = vpop.eup %11889  ;;  %8663 = vrot.lane.b32.xlu1 %v11888_v31, %s11971_s25 }
0x2eb0   :  { %8665 = vrot.lane.b32.xlu0 %v11890_v9, %s11971_s25 }
0x2eb2   :  { %v11892_v42 = vpop.eup %11891 }
0x2eb3   :  { %v11894_v50 = vpop.eup %11893  ;;  %8667 = vrot.lane.b32.xlu1 %v11892_v42, %s11971_s25 }
0x2eb4   :  { %8669 = vrot.lane.b32.xlu0 %v11894_v50, %s11971_s25 }
0x2f11   :  { %v8660_v48 = vpop.permute.xlu1 %8659 }
0x2f12   :  { %v8662_v0 = vpop.permute.xlu0 %8661  ;;  %v14411_v22 = vmul.f32 %v14350_v16, %v8660_v48 }
0x2f13   :  { %v14414_v40 = vmul.f32 %v14352_v3, %v8662_v0 }
0x2f14   :  { %v8713_v41 = vrot.slane %v14411_v22, 6 }
0x2f15   :  { %v8714_v63 = vrot.slane %v14414_v40, 5 }
0x2f17   :  { %v8715_v36 = vsel %vm1293_vm4, %v8714_v63, %v8713_v41 }
0x2f18   :  { %8716 = vrot.lane.b32.xlu1 %v8715_v36, %s11972_s9 }
0x2f21   :  { %v8664_v2 = vpop.permute.xlu1 %8663 }
0x2f22   :  { %v8666_v31 = vpop.permute.xlu0 %8665  ;;  %v14421_v9 = vmul.f32 %v14358_v1, %v8664_v2 }
0x2f23   :  { %v14424_v42 = vmul.f32 %v14360_v53, %v8666_v31 }
0x2f24   :  { %v8790_v16 = vrot.slane %v14421_v9, 6 }
0x2f25   :  { %v8791_v3 = vrot.slane %v14424_v42, 5  ;;  %v8668_v50 = vpop.permute.xlu1 %8667 }
0x2f26   :  { %v8670_v48 = vpop.permute.xlu0 %8669  ;;  %v14429_v0 = vmul.f32 %v14365_v8, %v8668_v50 }
0x2f27   :  { %v14432_v41 = vmul.f32 %v14368_v49, %v8670_v48  ;;  %v8792_v63 = vsel %vm1293_vm4, %v8791_v3, %v8790_v16 }
0x2f28   :  { %v8867_v1 = vrot.slane %v14429_v0, 6  ;;  %8793 = vrot.lane.b32.xlu0 %v8792_v63, %s11972_s9 }
0x2f29   :  { %v8868_v53 = vrot.slane %v14432_v41, 5 }
0x2f2b   :  { %v8869_v36 = vsel %vm1293_vm4, %v8868_v53, %v8867_v1 }
0x2f2c   :  { %8870 = vrot.lane.b32.xlu1 %v8869_v36, %s11972_s9 }
0x2f8a   :  { %v8717_v2 = vpop.permute.xlu1 %8716 }
0x2f8b   :  { %10699 = vmatmul.mubr.msk.f32.vlgmr.msra.gmra.mrb[66].mxu0 %vm1843_vm11, %v8717_v2 }
0x2f8c   :  { %11066 = vmatpush3.bf16.msra.mxu0 %v13546_v61  ;;  %10720 = vmatprep.mubr.msk.f32.mxu0 %vm11968_vm1, %v14911_v4 }
0x2f8d   :  { %11067 = vmatprep.subr.bf16.mxu0 %v14912_v10 }
0x2f90   :  { %11069 = vmatpush3.bf16.msra.mxu0 %v13563_v47 }
0x2f91   :  { %11102 = vmatprep.subr.bf16.mxu0 %v14912_v10 }
0x2f9a   :  { %v8794_v8 = vpop.permute.xlu0 %8793 }
0x2f9b   :  { %10710 = vmatmul.mubr.msk.f32.vlgmr.msra.gmra.mrb[62].mxu1 %vm1843_vm11, %v8794_v8 }
0x2f9e   :  { %v8871_v49 = vpop.permute.xlu1 %8870 }
0x2f9f   :  { %10721 = vmatmul.mubr.msk.f32.vlgmr.msra.gmra.mrb[68].mxu0 %vm1843_vm11, %v8871_v49 }
0x2fa0   :  { %10731 = vmatprep.mubr.msk.f32.mxu0 %vm11968_vm1, %v14911_v4  ;;  %vm9218_vm1 = vcmask 254976  }
0x305e   :  { %v8786_v31 = vpop.f32.mrb[66].mxu0 }
0x305f   :  { %v8948_v61 = vrot.slane %v8786_v31, 2  ;;  %v10700_v16 = vpop.f32.mrb[67].mxu0  ;;  %v8947_v3 = vrot.slane %v8786_v31, 1 }
0x3061   :  { %v8960_v50 = vadd.f32 %v8948_v61, %v13606_v37  ;;  %v8959_v48 = vadd.f32 %v8947_v3, %v13604_v12 }
0x3063   :  { %11895 = vtanh.f32 %v8960_v50 }
0x3064   :  { %11897 = vtanh.f32 %v8959_v48 }
0x306d   :  { %v11896_v47 = vpop.eup %11895 }
0x306e   :  { %9039 = vrot.lane.b32.xlu0 %v11896_v47, %s11971_s25  ;;  %v8863_v63 = vpop.f32.mrb[62].mxu1  ;;  %v11898_v1 = vpop.eup %11897 }
0x306f   :  { %v8949_v53 = vrot.slane %v8863_v63, 1  ;;  %v8950_v36 = vrot.slane %v8863_v63, 2  ;;  %v10711_v2 = vpop.f32.mrb[63].mxu1 }
0x3071   :  { %v8962_v4 = vadd.f32 %v8950_v36, %v13622_v35  ;;  %v8961_v49 = vadd.f32 %v8949_v53, %v13616_v29  ;;  %v9717_v35 = vmul.f32 -1.442695, %v8960_v50 }
0x3072   :  { %9037 = vrot.lane.b32.xlu0 %v11898_v1, %s11971_s25  ;;  %v8940_v8 = vpop.f32.mrb[68].mxu0  ;;  %v9716_v1 = vmul.f32 -1.442695, %v8959_v48 }
0x3073   :  { %v10722_v37 = vpop.f32.mrb[69].mxu0  ;;  %11899 = vtanh.f32 %v8962_v4  ;;  %v8951_v12 = vrot.slane %v8940_v8, 1  ;;  %v8952_v31 = vrot.slane %v8940_v8, 2  ;;  %v9719_v36 = vmul.f32 -1.442695, %v8962_v4 }
0x3074   :  { %11901 = vtanh.f32 %v8961_v49  ;;  %v9718_v8 = vmul.f32 -1.442695, %v8961_v49 }
0x3075   :  { %v8964_v61 = vadd.f32 %v8952_v31, %v13627_v14  ;;  %v8963_v16 = vadd.f32 %v8951_v12, %v13618_v21 }
0x3077   :  { %11903 = vtanh.f32 %v8964_v61  ;;  %v9721_v37 = vmul.f32 -1.442695, %v8964_v61  ;;  %v9720_v12 = vmul.f32 -1.442695, %v8963_v16 }
0x3078   :  { %11905 = vtanh.f32 %v8963_v16 }
0x3079   :  { %11907 = vpow2.f32 %v9717_v35 }
0x307a   :  { %11909 = vpow2.f32 %v9716_v1 }
0x307d   :  { %v11900_v3 = vpop.eup %11899 }
0x307e   :  { %9043 = vrot.lane.b32.xlu1 %v11900_v3, %s11971_s25  ;;  %v11902_v47 = vpop.eup %11901 }
0x3081   :  { %v11904_v63 = vpop.eup %11903 }
0x3082   :  { %9041 = vrot.lane.b32.xlu1 %v11902_v47, %s11971_s25  ;;  %9047 = vrot.lane.b32.xlu0 %v11904_v63, %s11971_s25  ;;  %v11906_v29 = vpop.eup %11905 }
0x3083   :  { %v11908_v14 = vpop.eup %11907 }
0x3084   :  { %v8984_v21 = vadd.f32 1.0, %v11908_v14  ;;  %v11910_v53 = vpop.eup %11909 }
0x3085   :  { %v8983_v2 = vadd.f32 1.0, %v11910_v53 }
0x3086   :  { %9045 = vrot.lane.b32.xlu1 %v11906_v29, %s11971_s25  ;;  %11911 = vrcp.f32 %v8984_v21 }
0x3087   :  { %11913 = vpow2.f32 %v9719_v36 }
0x3088   :  { %11915 = vrcp.f32 %v8983_v2 }
0x3089   :  { %11917 = vpow2.f32 %v9718_v8 }
0x308a   :  { %11919 = vpow2.f32 %v9721_v37 }
0x308b   :  { %11921 = vpow2.f32 %v9720_v12 }
0x3090   :  { %v14463_v31 = vpop.eup %11911 }
0x3091   :  { %v11914_v3 = vpop.eup %11913 }
0x3092   :  { %v14467_v47 = vpop.eup %11915  ;;  %v8986_v49 = vadd.f32 1.0, %v11914_v3 }
0x3093   :  { %v11918_v63 = vpop.eup %11917 }
0x3094   :  { %v11920_v29 = vpop.eup %11919  ;;  %v8985_v16 = vadd.f32 1.0, %v11918_v63  ;;  %11923 = vrcp.f32 %v8986_v49 }
0x3095   :  { %v8988_v35 = vadd.f32 1.0, %v11920_v29  ;;  %v11922_v1 = vpop.eup %11921 }
0x3096   :  { %11925 = vrcp.f32 %v8985_v16  ;;  %v8987_v14 = vadd.f32 1.0, %v11922_v1  ;;  %v9017_v16 = vrot.slane %v14400_v19, 7 }
0x3097   :  { %11927 = vrcp.f32 %v8988_v35 }
0x3098   :  { %11929 = vrcp.f32 %v8987_v14 }
0x309e   :  { %v14471_v21 = vpop.eup %11923 }
0x30a0   :  { %v14474_v2 = vpop.eup %11925 }
0x30a1   :  { %v14477_v8 = vpop.eup %11927 }
0x30a2   :  { %v14483_v3 = vpop.eup %11929 }
0x30e0   :  { %v9040_v50 = vpop.permute.xlu0 %9039 }
0x30e1   :  { %v9056_v48 = vmul.f32 %v14463_v31, %v9040_v50 }
0x30e3   :  { %9069 = vrot.lane.b32.xlu0 %v9056_v48, %s11972_s9 }
0x30e4   :  { %v9038_v4 = vpop.permute.xlu0 %9037 }
0x30e5   :  { %v9055_v61 = vmul.f32 %v14467_v47, %v9038_v4 }
0x30e7   :  { %9067 = vrot.lane.b32.xlu0 %v9055_v61, %s11972_s9 }
0x30f0   :  { %v9044_v53 = vpop.permute.xlu1 %9043 }
0x30f1   :  { %v9058_v36 = vmul.f32 %v14471_v21, %v9044_v53 }
0x30f3   :  { %9073 = vrot.lane.b32.xlu1 %v9058_v36, %s11972_s9 }
0x30f4   :  { %v9048_v37 = vpop.permute.xlu0 %9047  ;;  %v9042_v12 = vpop.permute.xlu1 %9041 }
0x30f5   :  { %v9060_v50 = vmul.f32 %v14477_v8, %v9048_v37  ;;  %v9057_v48 = vmul.f32 %v14474_v2, %v9042_v12 }
0x30f7   :  { %9077 = vrot.lane.b32.xlu0 %v9060_v50, %s11972_s9  ;;  %9071 = vrot.lane.b32.xlu1 %v9057_v48, %s11972_s9 }
0x30f8   :  { %v9046_v4 = vpop.permute.xlu1 %9045 }
0x30f9   :  { %v9059_v63 = vmul.f32 %v14483_v3, %v9046_v4 }
0x30fb   :  { %6036 = vrot.lane.b32.xlu0 %v13681_v18, %s11972_s9  ;;  %9075 = vrot.lane.b32.xlu1 %v9059_v63, %s11972_s9  ;;  %v9014_v18 = vrot.slane %v14380_v33, 7 }
0x30ff   :  { %6474 = vrot.lane.b32.xlu0 %v13801_v11, %s11972_s9  ;;  %6040 = vrot.lane.b32.xlu1 %v13690_v30, %s11972_s9  ;;  %v9026_v30 = vmul.f32 %v14463_v31, %v9014_v18 }
0x3103   :  { %6915 = vrot.lane.b32.xlu0 %v13923_v45, %s11972_s9  ;;  %6478 = vrot.lane.b32.xlu1 %v13811_v56, %s11972_s9  ;;  %v9013_v56 = vrot.slane %v14378_v13, 7  ;;  %v9018_v13 = vrot.slane %v14402_v59, 7 }
0x3107   :  { %7359 = vrot.lane.b32.xlu0 %v14046_v55, %s11972_s9  ;;  %6919 = vrot.lane.b32.xlu1 %v13933_v62, %s11972_s9  ;;  %v9025_v62 = vmul.f32 %v14467_v47, %v9013_v56 }
0x310b   :  { %7803 = vrot.lane.b32.xlu0 %v14169_v38, %s11972_s9  ;;  %7363 = vrot.lane.b32.xlu1 %v14056_v28, %s11972_s9  ;;  %v9016_v38 = vrot.slane %v14394_v23, 7 }
0x310f   :  { %8247 = vrot.lane.b32.xlu0 %v14292_v5, %s11972_s9  ;;  %7807 = vrot.lane.b32.xlu1 %v14179_v27, %s11972_s9  ;;  %v9028_v27 = vmul.f32 %v14471_v21, %v9016_v38 }
0x3113   :  { %8691 = vrot.lane.b32.xlu0 %v14414_v40, %s11972_s9  ;;  %8251 = vrot.lane.b32.xlu1 %v14302_v60, %s11972_s9  ;;  %v9015_v60 = vrot.slane %v14391_v39, 7  ;;  %v9030_v40 = vmul.f32 %v14477_v8, %v9018_v13  ;;  %v9029_v39 = vmul.f32 %v14483_v3, %v9017_v16  ;;  %v9338_v16 = vld [vmem:[%s14861_s16 + $0x98] sm:$0xff] }
0x3117   :  { %6034 = vrot.lane.b32.xlu0 %v13684_v43, %s11972_s9  ;;  %8695 = vrot.lane.b32.xlu1 %v14424_v42, %s11972_s9  ;;  %v9027_v42 = vmul.f32 %v14474_v2, %v9015_v60 }
0x311b   :  { %6038 = vrot.lane.b32.xlu1 %v13693_v20, %s11972_s9 }
0x3155   :  { %v9070_v11 = vpop.permute.xlu0 %9069 }
0x3156   :  { %v9086_v45 = vadd.f32 %v9070_v11, %v9026_v30 }
0x3158   :  { %11931 = vtanh.f32 %v9086_v45 }
0x3159   :  { %v9068_v55 = vpop.permute.xlu0 %9067 }
0x315a   :  { %v9085_v28 = vadd.f32 %v9068_v55, %v9025_v62 }
0x315c   :  { %11933 = vtanh.f32 %v9085_v28 }
0x3162   :  { %v11932_v43 = vpop.eup %11931 }
0x3163   :  { %9105 = vrot.lane.b32.xlu0 %v11932_v43, %s11971_s25 }
0x3165   :  { %v9074_v5 = vpop.permute.xlu1 %9073 }
0x3166   :  { %v11934_v20 = vpop.eup %11933  ;;  %v9088_v33 = vadd.f32 %v9074_v5, %v9028_v27 }
0x3167   :  { %9103 = vrot.lane.b32.xlu0 %v11934_v20, %s11971_s25 }
0x3168   :  { %11935 = vtanh.f32 %v9088_v33 }
0x3169   :  { %v9078_v49 = vpop.permute.xlu0 %9077  ;;  %v9072_v61 = vpop.permute.xlu1 %9071 }
0x316a   :  { %v9090_v29 = vadd.f32 %v9078_v49, %v9030_v40  ;;  %v9087_v23 = vadd.f32 %v9072_v61, %v9027_v42  ;;  %v9335_v40 = vld [vmem:[%s14861_s16 + $0x80] sm:$0xff]  ;;  %v9336_v42 = vld [vmem:[%s14861_s16 + $0x88] sm:$0xff] }
0x316b   :  { %v9319_v49 = vld [vmem:[%s14861_s16] sm:$0xff]  ;;  %v11070_v61 = vpack.c.bf16 %v9336_v42, %v9335_v40  ;;  %v9341_v40 = vld [vmem:[%s14861_s16 + $0xb0] sm:$0xff]  ;;  %v9342_v42 = vld [vmem:[%s14861_s16 + $0xb8] sm:$0xff] }
0x316c   :  { %11937 = vtanh.f32 %v9090_v29  ;;  %v9320_v29 = vld [vmem:[%s14861_s16 + $0x8] sm:$0xff] }
0x316d   :  { %11939 = vtanh.f32 %v9087_v23  ;;  %v6037_v35 = vpop.permute.xlu0 %6036  ;;  %v9076_v1 = vpop.permute.xlu1 %9075  ;;  %v9337_v23 = vld [vmem:[%s14861_s16 + $0x90] sm:$0xff]  ;;  %11071 = vmatprep.subr.bf16.mxu1 %v11070_v61 }
0x316e   :  { %6053 = vst.msk [vmem:[#allocation2 + $0x8] sm:$0x1] %vm2243_vm12, %v6037_v35  ;;  %v9089_v59 = vadd.f32 %v9076_v1, %v9029_v39  ;;  %v11072_v35 = vpack.c.bf16 %v9320_v29, %v9319_v49  ;;  %v11074_v1 = vpack.c.bf16 %v9338_v16, %v9337_v23  ;;  %v9321_v39 = vld [vmem:[%s14861_s16 + $0x10] sm:$0xff]  ;;  %v11082_v23 = vpack.c.bf16 %v9342_v42, %v9341_v40  ;;  %v9331_v42 = vld [vmem:[%s14861_s16 + $0x60] sm:$0xff] }
0x316f   :  { %v9325_v16 = vld [vmem:[%s14861_s16 + $0x30] sm:$0xff] }
0x3170   :  { %11941 = vtanh.f32 %v9089_v59  ;;  %v9322_v59 = vld [vmem:[%s14861_s16 + $0x18] sm:$0xff]  ;;  %11073 = vmatpush3.bf16.msra.mxu1 %v11072_v35 }
0x3171   :  { %v6475_v14 = vpop.permute.xlu0 %6474  ;;  %v6041_v53 = vpop.permute.xlu1 %6040  ;;  %11075 = vmatprep.subr.bf16.mxu1 %v11074_v1  ;;  %v9326_v35 = vld [vmem:[%s14861_s16 + $0x38] sm:$0xff] }
0x3172   :  { %v11936_v36 = vpop.eup %11935  ;;  %6491 = vst.msk [vmem:[#allocation2 + $0x8] sm:$0x2] %vm2682_vm13, %v6475_v14  ;;  %v9339_v14 = vld [vmem:[%s14861_s16 + $0xa0] sm:$0xff] }
0x3173   :  { %6055 = vst.msk [vmem:[#allocation2 + $0x18] sm:$0x1] %vm2243_vm12, %v6041_v53  ;;  %9109 = vrot.lane.b32.xlu1 %v11936_v36, %s11971_s25  ;;  %v9340_v36 = vld [vmem:[%s14861_s16 + $0xa8] sm:$0xff] }
0x3175   :  { %v6916_v37 = vpop.permute.xlu0 %6915  ;;  %v6479_v19 = vpop.permute.xlu1 %6478 }
0x3176   :  { %v11938_v12 = vpop.eup %11937  ;;  %6932 = vst.msk [vmem:[#allocation2 + $0x8] sm:$0x4] %vm3124_vm14, %v6916_v37 }
0x3177   :  { %6493 = vst.msk [vmem:[#allocation2 + $0x18] sm:$0x2] %vm2682_vm13, %v6479_v19  ;;  %v11940_v50 = vpop.eup %11939  ;;  %9113 = vrot.lane.b32.xlu0 %v11938_v12, %s11971_s25  ;;  %v11076_v19 = vpack.c.bf16 %v9322_v59, %v9321_v39  ;;  %v11078_v12 = vpack.c.bf16 %v9340_v36, %v9339_v14  ;;  %v11084_v14 = vpack.c.bf16 %v9326_v35, %v9325_v16  ;;  %v9344_v36 = vld [vmem:[%s14861_s16 + $0xc8] sm:$0xff]  ;;  %v9349_v35 = vld [vmem:[%s14861_s16 + $0xf0] sm:$0xff] }
0x3178   :  { %9107 = vrot.lane.b32.xlu1 %v11940_v50, %s11971_s25  ;;  %v9323_v50 = vld [vmem:[%s14861_s16 + $0x20] sm:$0xff] }
0x3179   :  { %v7360_v48 = vpop.permute.xlu0 %7359  ;;  %v6920_v4 = vpop.permute.xlu1 %6919  ;;  %11077 = vmatpush3.bf16.msra.mxu1 %v11076_v19 }
0x317a   :  { %7376 = vst.msk [vmem:[#allocation2 + $0x8] sm:$0x8] %vm3569_vm15, %v7360_v48  ;;  %v11942_v30 = vpop.eup %11941  ;;  %v9324_v48 = vld [vmem:[%s14861_s16 + $0x28] sm:$0xff]  ;;  %11079 = vmatprep.subr.bf16.mxu1 %v11078_v12 }
0x317b   :  { %6934 = vst.msk [vmem:[#allocation2 + $0x18] sm:$0x4] %vm3124_vm14, %v6920_v4  ;;  %6472 = vrot.lane.b32.xlu0 %v13798_v15, %s11972_s9 }
0x317c   :  { %6476 = vrot.lane.b32.xlu1 %v13808_v26, %s11972_s9 }
0x317d   :  { %v7804_v63 = vpop.permute.xlu0 %7803  ;;  %v7364_v18 = vpop.permute.xlu1 %7363 }
0x317e   :  { %7820 = vst.msk [vmem:[#allocation2 + $0x8] sm:$0x10] %vm4014_vm0, %v7804_v63 }
0x317f   :  { %7378 = vst.msk [vmem:[#allocation2 + $0x18] sm:$0x8] %vm3569_vm15, %v7364_v18  ;;  %6913 = vrot.lane.b32.xlu0 %v13920_v58, %s11972_s9  ;;  %v11080_v18 = vpack.c.bf16 %v9324_v48, %v9323_v50 }
0x3180   :  { %9111 = vrot.lane.b32.xlu1 %v11942_v30, %s11971_s25 }
0x3181   :  { %v8248_v11 = vpop.permute.xlu0 %8247  ;;  %v7808_v56 = vpop.permute.xlu1 %7807  ;;  %11081 = vmatpush3.bf16.msra.mxu1 %v11080_v18 }
0x3182   :  { %8264 = vst.msk [vmem:[#allocation2 + $0x8] sm:$0x20] %vm4459_vm2, %v8248_v11  ;;  %11083 = vmatprep.subr.bf16.mxu1 %v11082_v23 }
0x3183   :  { %7822 = vst.msk [vmem:[#allocation2 + $0x18] sm:$0x10] %vm4014_vm0, %v7808_v56  ;;  %7357 = vrot.lane.b32.xlu0 %v14043_v24, %s11972_s9  ;;  %v14928_v24 = vld [vmem:[#allocation9_spill] sm:$0xff] }
0x3184   :  { %6917 = vrot.lane.b32.xlu1 %v13930_v34, %s11972_s9 }
0x3185   :  { %v8692_v15 = vpop.permute.xlu0 %8691  ;;  %v8252_v26 = vpop.permute.xlu1 %8251  ;;  %11085 = vmatpush3.bf16.msra.mxu1 %v11084_v14 }
0x3186   :  { %8708 = vst.msk [vmem:[#allocation2 + $0x8] sm:$0x40] %vm4904_vm3, %v8692_v15 }
0x3187   :  { %8266 = vst.msk [vmem:[#allocation2 + $0x18] sm:$0x20] %vm4459_vm2, %v8252_v26  ;;  %7801 = vrot.lane.b32.xlu0 %v14166_v7, %s11972_s9 }
0x3188   :  { %7361 = vrot.lane.b32.xlu1 %v14053_v6, %s11972_s9  ;;  %v14929_v6 = vld [vmem:[#allocation10_spill] sm:$0xff] }
0x3189   :  { %v6035_v58 = vpop.permute.xlu0 %6034  ;;  %v8696_v45 = vpop.permute.xlu1 %8695 }
0x318a   :  { %6052 = vst.msk [vmem:[#allocation2] sm:$0x1] %vm2243_vm12, %v6035_v58 }
0x318b   :  { %8710 = vst.msk [vmem:[#allocation2 + $0x18] sm:$0x40] %vm4904_vm3, %v8696_v45  ;;  %8245 = vrot.lane.b32.xlu0 %v14289_v51, %s11972_s9 }
0x318c   :  { %7805 = vrot.lane.b32.xlu1 %v14176_v52, %s11972_s9 }
0x318d   :  { %v6039_v34 = vpop.permute.xlu1 %6038 }
0x318e   :  { %6054 = vst.msk [vmem:[#allocation2 + $0x10] sm:$0x1] %vm2243_vm12, %v6039_v34 }
0x318f   :  { %8689 = vrot.lane.b32.xlu0 %v14411_v22, %s11972_s9 }
0x3190   :  { %8249 = vrot.lane.b32.xlu1 %v14299_v17, %s11972_s9 }
0x3193   :  { %6044 = vrot.lane.b32.xlu0 %v13696_v57, %s11972_s9  ;;  %v14925_v57 = vld [vmem:[#allocation11_spill] sm:$0xff] }
0x3194   :  { %8693 = vrot.lane.b32.xlu1 %v14421_v9, %s11972_s9 }
0x3197   :  { %6923 = vrot.lane.b32.xlu0 %v13941_v32, %s11972_s9  ;;  %v14926_v32 = vld [vmem:[#allocation12_spill] sm:$0xff] }
0x3198   :  { %6482 = vrot.lane.b32.xlu1 %v13820_v54, %s11972_s9  ;;  %v14927_v54 = vld [vmem:[#allocation14_spill] sm:$0xff] }
0x319b   :  { %7811 = vrot.lane.b32.xlu0 %v14187_v44, %s11972_s9 }
0x319c   :  { %7367 = vrot.lane.b32.xlu1 %v14064_v46, %s11972_s9  ;;  %v14930_v46 = vld [vmem:[#allocation13_spill] sm:$0xff] }
0x319f   :  { %8699 = vrot.lane.b32.xlu0 %v14432_v41, %s11972_s9 }
0x31a0   :  { %8255 = vrot.lane.b32.xlu1 %v14310_v25, %s11972_s9 }
0x31a3   :  { %6042 = vrot.lane.b32.xlu0 %v14925_v57, %s11972_s9 }
0x31a4   :  { %6480 = vrot.lane.b32.xlu1 %v14926_v32, %s11972_s9 }
0x31a7   :  { %6921 = vrot.lane.b32.xlu0 %v14927_v54, %s11972_s9 }
0x31a8   :  { %7365 = vrot.lane.b32.xlu1 %v14928_v24, %s11972_s9 }
0x31ab   :  { %7809 = vrot.lane.b32.xlu0 %v14929_v6, %s11972_s9 }
0x31ac   :  { %8253 = vrot.lane.b32.xlu1 %v14930_v46, %s11972_s9  ;;  %v9164_v46 = vld [vmem:[%s14858_s13 + $0x8] sm:$0xff] }
0x31d5   :  { %v9106_v7 = vpop.permute.xlu0 %9105 }
0x31d6   :  { %v9122_v52 = vmul.f32 %v14463_v31, %v9106_v7 }
0x31d8   :  { %9135 = vrot.lane.b32.xlu0 %v9122_v52, %s11972_s9 }
0x31d9   :  { %v9104_v44 = vpop.permute.xlu0 %9103 }
0x31da   :  { %v9121_v51 = vmul.f32 %v14467_v47, %v9104_v44  ;;  %v9163_v44 = vld [vmem:[%s14858_s13] sm:$0xff] }
0x31dc   :  { %9133 = vrot.lane.b32.xlu0 %v9121_v51, %s11972_s9 }
0x31e0   :  { %8697 = vrot.lane.b32.xlu0 %v14429_v0, %s11972_s9 }
0x31e5   :  { %v9110_v17 = vpop.permute.xlu1 %9109 }
0x31e6   :  { %v9124_v25 = vmul.f32 %v14471_v21, %v9110_v17  ;;  %v11973_v17 = vmov 1983009808  }
0x31e8   :  { %9139 = vrot.lane.b32.xlu1 %v9124_v25, %s11972_s9  ;;  %v9197_v25 = vunpack.c.l.s4 %v11973_v17 }
0x31e9   :  { %v9114_v22 = vpop.permute.xlu0 %9113 }
0x31ea   :  { %v9108_v9 = vpop.permute.xlu1 %9107  ;;  %v9126_v62 = vmul.f32 %v14477_v8, %v9114_v22 }
0x31eb   :  { %v9123_v41 = vmul.f32 %v14474_v2, %v9108_v9  ;;  %v9165_v9 = vld [vmem:[%s14858_s13 + $0x10] sm:$0xff] }
0x31ed   :  { %9137 = vrot.lane.b32.xlu1 %v9123_v41, %s11972_s9  ;;  %v6473_v31 = vpop.permute.xlu0 %6472 }
0x31ee   :  { %6490 = vst.msk [vmem:[#allocation2] sm:$0x2] %vm2682_vm13, %v6473_v31  ;;  %v6477_v47 = vpop.permute.xlu1 %6476 }
0x31ef   :  { %6492 = vst.msk [vmem:[#allocation2 + $0x10] sm:$0x2] %vm2682_vm13, %v6477_v47 }
0x31f1   :  { %9143 = vrot.lane.b32.xlu1 %v9126_v62, %s11972_s9  ;;  %v6914_v0 = vpop.permute.xlu0 %6913 }
0x31f2   :  { %6931 = vst.msk [vmem:[#allocation2] sm:$0x4] %vm3124_vm14, %v6914_v0  ;;  %v9112_v21 = vpop.permute.xlu1 %9111 }
0x31f3   :  { %v9125_v55 = vmul.f32 %v14483_v3, %v9112_v21 }
0x31f5   :  { %9141 = vrot.lane.b32.xlu1 %v9125_v55, %s11972_s9  ;;  %v7358_v2 = vpop.permute.xlu0 %7357  ;;  %v9198_v55 = vunpack.c.0.s8 %v9197_v25 }
0x31f6   :  { %7375 = vst.msk [vmem:[#allocation2] sm:$0x8] %vm3569_vm15, %v7358_v2  ;;  %v6918_v28 = vpop.permute.xlu1 %6917  ;;  %v9722_v2 = vld [vmem:[%s14859_s14] ss:$0 sm:$0xff] }
0x31f7   :  { %6933 = vst.msk [vmem:[#allocation2 + $0x10] sm:$0x4] %vm3124_vm14, %v6918_v28 }
0x31f9   :  { %v7802_v43 = vpop.permute.xlu0 %7801 }
0x31fa   :  { %7819 = vst.msk [vmem:[#allocation2] sm:$0x10] %vm4014_vm0, %v7802_v43  ;;  %v7362_v8 = vpop.permute.xlu1 %7361 }
0x31fb   :  { %7377 = vst.msk [vmem:[#allocation2 + $0x10] sm:$0x8] %vm3569_vm15, %v7362_v8 }
0x31fd   :  { %v8246_v38 = vpop.permute.xlu0 %8245 }
0x31fe   :  { %8263 = vst.msk [vmem:[#allocation2] sm:$0x20] %vm4459_vm2, %v8246_v38  ;;  %v7806_v20 = vpop.permute.xlu1 %7805  ;;  %v9723_v38 = vld [vmem:[%s14860_s15] ss:$0 sm:$0xff] }
0x31ff   :  { %7821 = vst.msk [vmem:[#allocation2 + $0x10] sm:$0x10] %vm4014_vm0, %v7806_v20 }
0x3201   :  { %v8690_v3 = vpop.permute.xlu0 %8689 }
0x3202   :  { %8707 = vst.msk [vmem:[#allocation2] sm:$0x40] %vm4904_vm3, %v8690_v3  ;;  %v8250_v27 = vpop.permute.xlu1 %8249 }
0x3203   :  { %8265 = vst.msk [vmem:[#allocation2 + $0x10] sm:$0x20] %vm4459_vm2, %v8250_v27 }
0x3205   :  { %v6045_v5 = vpop.permute.xlu0 %6044 }
0x3206   :  { %6057 = vst.msk [vmem:[#allocation2 + $0x28] sm:$0x1] %vm2243_vm12, %v6045_v5  ;;  %v8694_v60 = vpop.permute.xlu1 %8693  ;;  %v14931_v5 = vld [vmem:[#allocation8_spill] sm:$0xff] }
0x3207   :  { %8709 = vst.msk [vmem:[#allocation2 + $0x10] sm:$0x40] %vm4904_vm3, %v8694_v60  ;;  %v9201_v60 = vsub.s32 %v9198_v55, %v14931_v5 }
0x3209   :  { %v6924_v13 = vpop.permute.xlu0 %6923 }
0x320a   :  { %6936 = vst.msk [vmem:[#allocation2 + $0x28] sm:$0x4] %vm3124_vm14, %v6924_v13  ;;  %v6483_v33 = vpop.permute.xlu1 %6482 }
0x320b   :  { %6495 = vst.msk [vmem:[#allocation2 + $0x28] sm:$0x2] %vm2682_vm13, %v6483_v33 }
0x320d   :  { %v7812_v53 = vpop.permute.xlu0 %7811 }
0x320e   :  { %7824 = vst.msk [vmem:[#allocation2 + $0x28] sm:$0x10] %vm4014_vm0, %v7812_v53  ;;  %v7368_v37 = vpop.permute.xlu1 %7367  ;;  %v9343_v53 = vld [vmem:[%s14861_s16 + $0xc0] sm:$0xff] }
0x320f   :  { %7380 = vst.msk [vmem:[#allocation2 + $0x28] sm:$0x8] %vm3569_vm15, %v7368_v37  ;;  %v11086_v48 = vpack.c.bf16 %v9344_v36, %v9343_v53 }
0x3211   :  { %v8700_v4 = vpop.permute.xlu0 %8699  ;;  %11087 = vmatprep.subr.bf16.mxu1 %v11086_v48  ;;  %v9334_v48 = vld [vmem:[%s14861_s16 + $0x78] sm:$0xff] }
0x3212   :  { %8712 = vst.msk [vmem:[#allocation2 + $0x28] sm:$0x40] %vm4904_vm3, %v8700_v4  ;;  %v8256_v63 = vpop.permute.xlu1 %8255  ;;  %v9327_v4 = vld [vmem:[%s14861_s16 + $0x40] sm:$0xff] }
0x3213   :  { %8268 = vst.msk [vmem:[#allocation2 + $0x28] sm:$0x20] %vm4459_vm2, %v8256_v63  ;;  %v9328_v63 = vld [vmem:[%s14861_s16 + $0x48] sm:$0xff] }
0x3215   :  { %v6043_v30 = vpop.permute.xlu0 %6042 }
0x3216   :  { %6056 = vst.msk [vmem:[#allocation2 + $0x20] sm:$0x1] %vm2243_vm12, %v6043_v30  ;;  %v6481_v11 = vpop.permute.xlu1 %6480 }
0x3217   :  { %6494 = vst.msk [vmem:[#allocation2 + $0x20] sm:$0x2] %vm2682_vm13, %v6481_v11 }
0x3219   :  { %v6922_v56 = vpop.permute.xlu0 %6921 }
0x321a   :  { %6935 = vst.msk [vmem:[#allocation2 + $0x20] sm:$0x4] %vm3124_vm14, %v6922_v56  ;;  %v7366_v15 = vpop.permute.xlu1 %7365 }
0x321b   :  { %7379 = vst.msk [vmem:[#allocation2 + $0x20] sm:$0x8] %vm3569_vm15, %v7366_v15 }
0x321d   :  { %v7810_v26 = vpop.permute.xlu0 %7809 }
0x321e   :  { %7823 = vst.msk [vmem:[#allocation2 + $0x20] sm:$0x10] %vm4014_vm0, %v7810_v26  ;;  %v8254_v58 = vpop.permute.xlu1 %8253 }
0x321f   :  { %8267 = vst.msk [vmem:[#allocation2 + $0x20] sm:$0x20] %vm4459_vm2, %v8254_v58  ;;  %v11088_v58 = vpack.c.bf16 %v9328_v63, %v9327_v4 }
0x3221   :  { %11089 = vmatpush3.bf16.msra.mxu1 %v11088_v58  ;;  %v9440_v58 = vld [vmem:[%s14863_s18] sm:$0xff] }
0x324a   :  { %v9136_v45 = vpop.permute.xlu0 %9135 }
0x324b   :  { %9152 = vst.msk [vmem:[#allocation2 + $0x8] sm:$0x80] %vm5349_vm5, %v9136_v45 }
0x324e   :  { %v9134_v34 = vpop.permute.xlu0 %9133 }
0x324f   :  { %9151 = vst.msk [vmem:[#allocation2] sm:$0x80] %vm5349_vm5, %v9134_v34 }
0x3252   :  { %v8698_v57 = vpop.permute.xlu0 %8697  ;;  %v9158_v52 = vld [vmem:[#allocation2 + $0x8] sm:$0xff] }
0x3253   :  { %8711 = vst.msk [vmem:[#allocation2 + $0x20] sm:$0x40] %vm4904_vm3, %v8698_v57  ;;  %v9167_v41 = vmul.f32 %v9163_v44, %v9158_v52 }
0x3256   :  { %v9157_v31 = vld [vmem:[#allocation2] sm:$0xff] }
0x3257   :  { %v9166_v28 = vmul.f32 %v9163_v44, %v9157_v31 }
0x325a   :  { %v9140_v32 = vpop.permute.xlu1 %9139 }
0x325b   :  { %9154 = vst.msk [vmem:[#allocation2 + $0x18] sm:$0x80] %vm5349_vm5, %v9140_v32 }
0x325f   :  { %v9138_v54 = vpop.permute.xlu1 %9137 }
0x3260   :  { %9153 = vst.msk [vmem:[#allocation2 + $0x10] sm:$0x80] %vm5349_vm5, %v9138_v54 }
0x3262   :  { %v9160_v6 = vld [vmem:[#allocation2 + $0x18] sm:$0xff] }
0x3263   :  { %v9144_v24 = vpop.permute.xlu1 %9143  ;;  %v9169_v51 = vmul.f32 %v9164_v46, %v9160_v6 }
0x3264   :  { %9156 = vst.msk [vmem:[#allocation2 + $0x28] sm:$0x80] %vm5349_vm5, %v9144_v24 }
0x3265   :  { %v9171_v0 = vadd.f32 %v9169_v51, %v9167_v41 }
0x3267   :  { %v9142_v7 = vpop.permute.xlu1 %9141  ;;  %v9159_v22 = vld [vmem:[#allocation2 + $0x10] sm:$0xff] }
0x3268   :  { %9155 = vst.msk [vmem:[#allocation2 + $0x20] sm:$0x80] %vm5349_vm5, %v9142_v7  ;;  %v9168_v62 = vmul.f32 %v9164_v46, %v9159_v22 }
0x326a   :  { %v9170_v20 = vadd.f32 %v9168_v62, %v9166_v28  ;;  %v9345_v62 = vld [vmem:[%s14861_s16 + $0xd0] sm:$0xff] }
0x326b   :  { %v9162_v47 = vld [vmem:[#allocation2 + $0x28] sm:$0xff] }
0x326c   :  { %v9173_v21 = vmul.f32 %v9165_v9, %v9162_v47 }
0x326e   :  { %v9175_v43 = vadd.f32 %v9173_v21, %v9171_v0  ;;  %v9346_v0 = vld [vmem:[%s14861_s16 + $0xd8] sm:$0xff]  ;;  %v9329_v21 = vld [vmem:[%s14861_s16 + $0x50] sm:$0xff] }
0x326f   :  { %v9161_v8 = vld [vmem:[#allocation2 + $0x20] sm:$0xff]  ;;  %v11090_v40 = vpack.c.bf16 %v9346_v0, %v9345_v62 }
0x3270   :  { %v9172_v3 = vmul.f32 %v9165_v9, %v9161_v8  ;;  %v9184_v27 = vmul.f32 %v9722_v2, %v9175_v43  ;;  %v9330_v43 = vld [vmem:[%s14861_s16 + $0x58] sm:$0xff]  ;;  %v9347_v8 = vld [vmem:[%s14861_s16 + $0xe0] sm:$0xff] }
0x3271   :  { %v11092_v23 = vpack.c.bf16 %v9330_v43, %v9329_v21  ;;  %11091 = vmatprep.subr.bf16.mxu1 %v11090_v40 }
0x3272   :  { %v9174_v13 = vadd.f32 %v9172_v3, %v9170_v20  ;;  %v9193_v33 = vadd.f32 %v9723_v38, %v9184_v27 }
0x3273   :  { %11093 = vmatpush3.bf16.msra.mxu1 %v11092_v23 }
0x3274   :  { %v9183_v49 = vmul.f32 %v9722_v2, %v9174_v13  ;;  %v9209_v61 = vrot.slane %v9193_v33, %v9201_v60  ;;  %v9266_v29 = vcombine.high %v9193_v33, %v9193_v33 }
0x3276   :  { %v9192_v1 = vadd.f32 %v9723_v38, %v9183_v49  ;;  %v9273_v39 = vrot.slane %v9266_v29, %v9201_v60  ;;  %v14713_v59 = vcombine.high %v9209_v61, %v9209_v61  ;;  %v9212_v50 = vrot.slane %v9209_v61, 7  ;;  %v9348_v38 = vld [vmem:[%s14861_s16 + $0xe8] sm:$0xff] }
0x3277   :  { %v9332_v49 = vld [vmem:[%s14861_s16 + $0x68] sm:$0xff]  ;;  %v11094_v16 = vpack.c.bf16 %v9348_v38, %v9347_v8 }
0x3278   :  { %v9202_v37 = vrot.slane %v9192_v1, %v9201_v60  ;;  %v9258_v19 = vcombine.high %v9192_v1, %v9192_v1  ;;  %v14721_v12 = vcombine.high %v9273_v39, %v9273_v39  ;;  %v9236_v56 = vrot.slane %v14713_v59, 7  ;;  %v9350_v1 = vld [vmem:[%s14861_s16 + $0xf8] sm:$0xff] }
0x3279   :  { %v9276_v22 = vrot.slane %v9273_v39, 7  ;;  %v11096_v36 = vpack.c.bf16 %v9332_v49, %v9331_v42  ;;  %11095 = vmatprep.subr.bf16.mxu1 %v11094_v16 }
0x327a   :  { %v9220_v18 = vrot.slane %v9202_v37, 1  ;;  %v9265_v30 = vrot.slane %v9258_v19, %v9201_v60  ;;  %v9232_v11 = vcombine.high %v9202_v37, %v9202_v37  ;;  %v9298_v15 = vrot.slane %v14721_v12, 7 }
0x327b   :  { %v9213_v26 = vsel %vm1293_vm4, %v9212_v50, %v9202_v37  ;;  %v11098_v19 = vpack.c.bf16 %v9350_v1, %v9349_v35  ;;  %11097 = vmatpush3.bf16.msra.mxu1 %v11096_v36 }
0x327c   :  { %v9223_v45 = vsel %vm1293_vm4, %v9209_v61, %v9220_v18  ;;  %v9283_v34 = vrot.slane %v9265_v30, 1  ;;  %v9237_v57 = vsel %vm1293_vm4, %v9236_v56, %v9232_v11  ;;  %v9294_v32 = vcombine.high %v9265_v30, %v9265_v30 }
0x327d   :  { %v9224_v54 = vsel %vm1297_vm6, %v9209_v61, %v9223_v45  ;;  %v9238_v24 = vsel %vm1297_vm6, %v9236_v56, %v9237_v57  ;;  %v9246_v6 = vrot.slane %v9232_v11, 1  ;;  %v9214_v44 = vsel %vm1297_vm6, %v9212_v50, %v9213_v26  ;;  %11099 = vmatprep.subr.bf16.mxu1 %v11098_v19  ;;  %v9441_v45 = vld [vmem:[%s14863_s18 + $0x8] sm:$0xff]  ;;  %v9442_v57 = vld [vmem:[%s14863_s18 + $0x10] sm:$0xff] }
0x327e   :  { %v9225_v46 = vsel %vm1301_vm8, %v9209_v61, %v9224_v54  ;;  %v9286_v7 = vsel %vm1293_vm4, %v9273_v39, %v9283_v34  ;;  %v9299_v52 = vsel %vm1293_vm4, %v9298_v15, %v9294_v32  ;;  %v9239_v41 = vsel %vm1301_vm8, %v9236_v56, %v9238_v24 }
0x327f   :  { %v9226_v51 = vsel %vm1305_vm10, %v9209_v61, %v9225_v46  ;;  %v9287_v17 = vsel %vm1297_vm6, %v9273_v39, %v9286_v7  ;;  %v9300_v25 = vsel %vm1297_vm6, %v9298_v15, %v9299_v52  ;;  %v9249_v31 = vsel %vm1293_vm4, %v14713_v59, %v9246_v6  ;;  %v9724_v6 = vld [vmem:[%s14862_s17] ss:$0 sm:$0xff] }
0x3280   :  { %9227 = vrot.lane.b32.xlu0 %v9226_v51, %s11972_s9  ;;  %v9288_v9 = vsel %vm1301_vm8, %v9273_v39, %v9287_v17  ;;  %v9307_v47 = vrot.slane %v9294_v32, 1  ;;  %v9250_v2 = vsel %vm1297_vm6, %v14713_v59, %v9249_v31  ;;  %v9215_v28 = vsel %vm1301_vm8, %v9212_v50, %v9214_v44  ;;  %v9443_v32 = vld [vmem:[%s14863_s18 + $0x18] sm:$0xff]  ;;  %v9726_v51 = vld [vmem:[%s14864_s19] ss:$0 sm:$0xff]  ;;  %s11975_s18 = smov [#allocation5]  }
0x3281   :  { %v9289_v55 = vsel %vm1305_vm10, %v9273_v39, %v9288_v9  ;;  %v9301_v20 = vsel %vm1301_vm8, %v9298_v15, %v9300_v25  ;;  %v9216_v27 = vsel %vm1305_vm10, %v9212_v50, %v9215_v28  ;;  %v9277_v5 = vsel %vm1293_vm4, %v9276_v22, %v9265_v30  ;;  %v9333_v50 = vld [vmem:[%s14861_s16 + $0x70] sm:$0xff]  ;;  %s9532_s30 = sshll.u32 %s11975_s18, 4  ;;  %s9533_s30 = int_to_ptr.vmem [resolvable:$true] %s9532_s30 }
0x3282   :  { %9290 = vrot.lane.b32.xlu1 %v9289_v55, %s11972_s9  ;;  %v9310_v3 = vsel %vm1293_vm4, %v14721_v12, %v9307_v47  ;;  %v9240_v60 = vsel %vm1305_vm10, %v9236_v56, %v9239_v41  ;;  %9219 = vst.msk [vmem:[#allocation3] sm:$0x3] %vm9218_vm1, %v9216_v27  ;;  %v9278_v33 = vsel %vm1297_vm6, %v9276_v22, %v9277_v5  ;;  %vm9230_vm4 = vcmask 517376   ;;  %s11943_s14 = scalar_lea.vmem %s9533_s30, 32  ;;  %p11948_p1 = scmp.lt.s32.totalorder %s9533_s30, %s9533_s30 }
0x3283   :  { %v9311_v13 = vsel %vm1297_vm6, %v14721_v12, %v9310_v3  ;;  %v9251_v61 = vsel %vm1301_vm8, %v14713_v59, %v9250_v2  ;;  %v9279_v29 = vsel %vm1301_vm8, %v9276_v22, %v9278_v33  ;;  %v9302_v39 = vsel %vm1305_vm10, %v9298_v15, %v9301_v20  ;;  %p11944_p0 = scmp.ne.s32.totalorder %s9533_s30, %s11943_s14  ;;  %p11949_p2 = scmp.lt.s32.totalorder %s11943_s14, %s11943_s14 }
0x3284   :  { %9241 = vrot.lane.b32.xlu0 %v9240_v60, %s11971_s25  ;;  %v9280_v14 = vsel %vm1305_vm10, %v9276_v22, %v9279_v29  ;;  %v9312_v53 = vsel %vm1301_vm8, %v14721_v12, %v9311_v13  ;;  %v9252_v37 = vsel %vm1305_vm10, %v14713_v59, %v9251_v61  ;;  %v11100_v63 = vpack.c.bf16 %v9334_v48, %v9333_v50 }
0x3285   :  { %9282 = vst.msk [vmem:[#allocation3 + $0x2] sm:$0x3] %vm9218_vm1, %v9280_v14  ;;  %v9313_v4 = vsel %vm1305_vm10, %v14721_v12, %v9312_v53  ;;  %vm9244_vm6 = vcmask 779776   ;;  %v11103_v34 = vpack.c.bf16 %v9441_v45, %v9440_v58  ;;  %v11106_v54 = vpack.c.bf16 %v9443_v32, %v9442_v57  ;;  %p11950_p3 = por %p11949_p2, %p11948_p1 }
0x3286   :  { %9303 = vrot.lane.b32.xlu1 %v9302_v39, %s11971_s25  ;;  %s11974_s25 = smov 96   ;;  %11101 = vmatpush3.bf16.msra.mxu1 %v11100_v63  ;;  %vm9524_vm8 = vcmask 33792  }
0x3287   :  { %11104 = vmatpush3.bf16.msra.mxu0 %v11103_v34  ;;  %p11951_p4 = pnand %p11950_p3, %p11944_p0 }
0x3288   :  { %9253 = vrot.lane.b32.xlu0 %v9252_v37, %s11974_s25  ;;  %11105 = vmatprep.subr.bf16.mxu0 %v14912_v10 }
0x328a   :  { %9314 = vrot.lane.b32.xlu1 %v9313_v4, %s11974_s25 }
0x328b   :  { %11107 = vmatpush3.bf16.msra.mxu0 %v11106_v54 }
0x32f2   :  { %v9228_v59 = vpop.permute.xlu0 %9227 }
0x32f3   :  { %9231 = vst.msk [vmem:[#allocation3] sm:$0x3] %vm9230_vm4, %v9228_v59 }
0x32f4   :  { %v9291_v18 = vpop.permute.xlu1 %9290 }
0x32f5   :  { %9293 = vst.msk [vmem:[#allocation3 + $0x2] sm:$0x3] %vm9230_vm4, %v9291_v18 }
0x32f6   :  { %v9242_v30 = vpop.permute.xlu0 %9241 }
0x32f7   :  { %9245 = vst.msk [vmem:[#allocation3] sm:$0x3] %vm9244_vm6, %v9242_v30 }
0x32f8   :  { %v9304_v11 = vpop.permute.xlu1 %9303 }
0x32f9   :  { %9306 = vst.msk [vmem:[#allocation3 + $0x2] sm:$0x3] %vm9244_vm6, %v9304_v11 }
0x32fa   :  { %v9254_v56 = vpop.permute.xlu0 %9253 }
0x32fb   :  { %9257 = vst.msk [vmem:[#allocation3] sm:$0x3] %vm9256_vm7, %v9254_v56 }
0x32fc   :  { %v9315_v15 = vpop.permute.xlu1 %9314 }
0x32fd   :  { %9317 = vst.msk [vmem:[#allocation3 + $0x2] sm:$0x3] %vm9256_vm7, %v9315_v15 }
0x3304   :  { %v9725_v12 = vld.sshfl [vmem:[#allocation3] sm:$0x33 pattern:$0x76325410] }
0x3305   :  { %v9366_v26 = vcombine.high %v9725_v12, %v9725_v12 }
0x3307   :  { %9433 = vmatprep.mubr.f32.mxu1 %v9366_v26 }
0x3308   :  { %9434 = vmatmul.mubr.f32.vlgmr.msra.gmra.mrb[64].mxu1 %v9725_v12 }
0x33db   :  { %v10062_v24 = vpop.f32.mrb[64].mxu1 }
0x33dc   :  { %v10063_v46 = vpop.f32.mrb[65].mxu1 }
0x33dd   :  { %v10064_v7 = vadd.f32 %v10063_v46, %v10062_v24 }
0x33df   :  { %v9436_v52 = vadd.f32 %v10064_v7, %v9724_v6 }
0x33e1   :  { %v9439_v44 = vmax.f32 %v9436_v52, 0.0 }
0x33e3   :  { %10732 = vmatmul.mubr.msk.f32.vlgmr.msra.gmra.mrb[70].mxu0 %vm1843_vm11, %v9439_v44 }
0x34b6   :  { %v9520_v17 = vpop.f32.mrb[70].mxu0 }
0x34b7   :  { %v9521_v10 = vadd.f32 %v9726_v51, %v9520_v17  ;;  %v10733_v25 = vpop.f32.mrb[71].mxu0 }
0x34b9   :  { %9525 = vst.msk [vmem:[#allocation5] sm:$0x3] %vm9524_vm8, %v9521_v10 }
0x34ba   :  { %11954 = shalt.err (!%p11951_p4)
}
0x34bb   :  { %s11955_s15 = scalar_lea.hbm %s14866_s21, 32 }
0x34bc   :  { %p11956_p5 = scmp.ne.s32.totalorder %s14866_s21, %s11955_s15  ;;  %p11959_p6 = scmp.lt.u32.totalorder %s11955_s15, %s14866_s21 }
0x34be   :  { %p11961_p7 = pnand %p11959_p6, %p11956_p5 }
0x34c0   :  { %11964 = shalt.err (!%p11961_p7)
}
0x34c1   :  { %9535 = dma.vmem_to_hbm [thread:$0]  %s9533_s30, 32, %s14866_s21, [#allocation6]  }
0x34c2   :  { %11965 = dma.done.wait [#allocation6], 32  }
0x34c3   :  { %11966 = vsyncadd [#allocation6], 4294967264 }
0x34c4   :  { %9539 = vsyncpa [#allocation6], 1 }

</bundles_post_ra>
